<compile_context>
chip_gen: v5e
topology: v5e:2x2
jax: 0.10.0
libtpu: 0.0.40
codegen_flags: <defaults>
</compile_context>

<pallas_src>
import numpy as np

import jax
import jax.numpy as jnp
from jax.experimental import pallas as pl
from jax.experimental.pallas import tpu as pltpu

# ----------------------------- hyperparameters ------------------------------
B = 2
SEQ_LEN = 32
PRED_LEN = 16
N_VARS = 7                 # Normalize(7) hardcoded in the module
N_HEADS = 4
D_MODEL = 32               # PatchEmbedding(32, ...) hardcoded
D_FF = 128                 # hardcoded
PATCH_LEN = 16             # hardcoded
STRIDE = 8                 # hardcoded
D_KEYS = D_FF              # ReprogrammingLayer(d_model, n_heads, d_keys=d_ff, d_llm)
HD = N_HEADS * D_KEYS      # 512
D_LLM = 512                # reduced from 4096 for the small synthetic run
VOCAB = 256                # reduced from 32000
NUM_TOKENS = 64            # mapping-layer output tokens (1000 in Time-LLM)
EPS = 1e-5
NUM_PATCHES = (SEQ_LEN + STRIDE - PATCH_LEN) // STRIDE + 1   # = 4


def _build_col_gather_idx():
    """Static gather indices building the circular-k3 im2col slab in one take."""
    idx = np.empty((NUM_PATCHES, 3 * PATCH_LEN), dtype=np.int32)
    offs = np.arange(PATCH_LEN, dtype=np.int32)
    for l in range(NUM_PATCHES):
        prv = (l - 1) % NUM_PATCHES
        nxt = (l + 1) % NUM_PATCHES
        idx[l, 0:PATCH_LEN] = prv * STRIDE + offs
        idx[l, PATCH_LEN:2 * PATCH_LEN] = l * STRIDE + offs
        idx[l, 2 * PATCH_LEN:3 * PATCH_LEN] = nxt * STRIDE + offs
    return idx


COL_GATHER_IDX = _build_col_gather_idx()          # [NUM_PATCHES, 3*PATCH_LEN]


def _full_spec(a):
    """Whole-array block for a grid=(1,) pallas_call."""
    n = a.ndim
    return pl.BlockSpec(a.shape, lambda i, n=n: (0,) * n)


# ----- fused kernel: RevIN norm -> conv/Q -> attention -> LLM -> head -> denorm
def _timellm_fused_kernel(xp_ref, col_ref,
                          wconv_ref, wq_ref, bq_ref,
                          wmap_ref, bmap_ref, wemb_ref,
                          wkv_ref, bkv_ref,
                          wo_ref, bo_ref,
                          wll_ref, bll_ref,
                          whead_ref, bhead_ref,
                          out_ref):
    f32 = jnp.float32
    bf16 = jnp.bfloat16
    bnp = out_ref.shape[0]                              # padded B*C rows (Rp)

    # --- Normalize(..., 'norm') statistics (RevIN, affine=False) ------------
    x = xp_ref[...]                                     # [Rp, T] f32, reduce over lanes
    mean = jnp.mean(x, axis=-1, keepdims=True)          # [Rp, 1]
    xc = x - mean
    var = jnp.mean(xc * xc, axis=-1, keepdims=True)     # unbiased=False
    std = jnp.sqrt(var + EPS)
    inv_std = 1.0 / std

    # --- normalize the raw im2col slab (rows are l-major: l*Rp + bc) --------
    mean_col = jnp.concatenate([mean] * NUM_PATCHES, axis=0)      # [NP*Rp, 1]
    inv_col = jnp.concatenate([inv_std] * NUM_PATCHES, axis=0)    # [NP*Rp, 1]
    col = ((col_ref[...] - mean_col) * inv_col).astype(bf16)      # [NP*Rp, 3*patch_len]

    # --- TokenEmbedding conv (im2col matmul), kept in VMEM, feeding Q -------
    patch_emb = jnp.dot(col, wconv_ref[...], preferred_element_type=f32)    # [RP, d_model]
    q = jnp.dot(patch_emb.astype(bf16), wq_ref[...],
                preferred_element_type=f32) + bq_ref[...]                   # [RP, HD]

    # --- source embeddings: mapping_layer(word_emb.T).T == map_w @ word_emb + b
    src = jnp.dot(wmap_ref[...], wemb_ref[...],
                  preferred_element_type=f32) + bmap_ref[...]               # [S, d_llm]

    # --- fused K,V projections (single matmul) ------------------------------
    kv = jnp.dot(src.astype(bf16), wkv_ref[...],
                 preferred_element_type=f32) + bkv_ref[...]                 # [S, 2*HD]
    k = kv[:, :HD]
    v = kv[:, HD:]

    # --- multi-head reprogramming cross-attention (softmax over S) ----------
    scale = 1.0 / (D_KEYS ** 0.5)
    heads = []
    for h in range(N_HEADS):
        sl = slice(h * D_KEYS, (h + 1) * D_KEYS)
        qh = q[:, sl].astype(bf16)                                          # [RP, E]
        kh = k[:, sl].astype(bf16)                                          # [S, E]
        vh = v[:, sl].astype(bf16)                                          # [S, E]
        s = jax.lax.dot_general(qh, kh, (((1,), (1,)), ((), ())),
                                preferred_element_type=f32) * scale         # [RP, S]
        m = jnp.max(s, axis=-1, keepdims=True)
        p = jnp.exp(s - m)
        a = p * pl.reciprocal(jnp.sum(p, axis=-1, keepdims=True), approx=True)
        heads.append(jnp.dot(a.astype(bf16), vh, preferred_element_type=f32))
    o = jnp.concatenate(heads, axis=-1)                                     # [RP, HD]

    # --- reprogramming out-projection + synthetic LLaMA (pre-sliced to d_ff) -
    enc = jnp.dot(o.astype(bf16), wo_ref[...],
                  preferred_element_type=f32) + bo_ref[...]                 # [RP, d_llm]
    dec = jnp.dot(enc.astype(bf16), wll_ref[...],
                  preferred_element_type=f32) + bll_ref[...]                # [RP, d_ff]

    # --- FlattenHead over (d_ff, num_patches) + RevIN 'denorm' epilogue -----
    acc = jnp.zeros((bnp, PRED_LEN), f32)
    for l in range(NUM_PATCHES):
        dec_l = dec[l * bnp:(l + 1) * bnp, :].astype(bf16)                  # [bnp, d_ff]
        acc = acc + jnp.dot(dec_l, whead_ref[l], preferred_element_type=f32)
    out = acc + bhead_ref[...]
    out_ref[...] = out * std + mean


def timellm_fused(xp, col, p):
    Rp = xp.shape[0]
    args = (xp, col,
            p['w_conv'], p['w_q'], p['b_q'],
            p['w_map'], p['b_map'], p['word_emb'],
            p['w_kv'], p['b_kv'],
            p['w_o'], p['b_o'],
            p['w_llm'], p['b_llm'],
            p['w_head'], p['b_head'])
    return pl.pallas_call(
        _timellm_fused_kernel,
        out_shape=jax.ShapeDtypeStruct((Rp, PRED_LEN), jnp.float32),
        grid=(1,),
        in_specs=[_full_spec(a) for a in args],
        out_specs=pl.BlockSpec((Rp, PRED_LEN), lambda i: (0, 0)),
        compiler_params=pltpu.CompilerParams(dimension_semantics=("arbitrary",)),
    )(*args)


# ------------------------------ parameter init ------------------------------
def init_params(key):
    ks = jax.random.split(key, 9)

    def nrm(k, shape, scale=0.02):
        return (scale * jax.random.normal(k, shape)).astype(jnp.float32)

    # Masters in PyTorch [out, in] layout --------------------------------------
    word_emb = nrm(ks[0], (VOCAB, D_LLM))            # llama input embeddings
    map_w = nrm(ks[1], (NUM_TOKENS, VOCAB))          # MappingLayer Linear
    conv_w = nrm(ks[2], (D_MODEL, PATCH_LEN, 3))     # TokenEmbedding Conv1d (no bias)
    q_w = nrm(ks[3], (HD, D_MODEL))
    k_w = nrm(ks[4], (HD, D_LLM))
    v_w = nrm(ks[5], (HD, D_LLM))
    o_w = nrm(ks[6], (D_LLM, HD))
    llama_w = nrm(ks[7], (D_LLM, D_LLM))
    head_w = nrm(ks[8], (PRED_LEN, D_FF * NUM_PATCHES))   # FlattenHead Linear

    bf = jnp.bfloat16
    return dict(
        # MXU operands: pre-transposed to [K, N] and cast to bf16 once, here.
        w_conv=conv_w.transpose(2, 1, 0).reshape(3 * PATCH_LEN, D_MODEL).astype(bf),
        w_q=q_w.T.astype(bf),
        b_q=jnp.zeros((1, HD), jnp.float32),
        w_map=map_w.astype(bf),
        b_map=jnp.zeros((NUM_TOKENS, 1), jnp.float32),
        word_emb=word_emb.astype(bf),
        w_kv=jnp.concatenate([k_w.T, v_w.T], axis=1).astype(bf),     # [D_LLM, 2*HD]
        b_kv=jnp.zeros((1, 2 * HD), jnp.float32),
        w_o=o_w.T.astype(bf),                                        # [HD, D_LLM]
        b_o=jnp.zeros((1, D_LLM), jnp.float32),
        # synthetic LLaMA linear, sliced at init to the d_ff outputs the head uses
        w_llm=llama_w[:D_FF, :].T.astype(bf),                        # [D_LLM, D_FF]
        b_llm=jnp.zeros((1, D_FF), jnp.float32),
        # FlattenHead weight rearranged so w_head[l, d, n] == head_w[n, d*NP + l]
        w_head=head_w.reshape(PRED_LEN, D_FF, NUM_PATCHES).transpose(2, 1, 0).astype(bf),
        b_head=jnp.zeros((1, PRED_LEN), jnp.float32),
    )


# --------------------------------- forward ----------------------------------
def timellm_forward(params, x_enc, x_mark_enc, x_dec, x_mark_dec):
    Bx, T, C = x_enc.shape
    R = Bx * C
    Rp = R + ((-R) % 8)                                 # pad rows to a sublane multiple

    # [B, T, C] -> [B*C, T] slab for the in-kernel RevIN reduction over lanes.
    xp = jnp.transpose(x_enc, (0, 2, 1)).reshape(R, T).astype(jnp.float32)
    xp = jnp.pad(xp, ((0, Rp - R), (0, 0)))

    # PatchEmbedding prep on the RAW series: ReplicationPad1d((0, stride)) +
    # unfold + circular k=3 window, built as one static gather into a
    # contiguous l-major slab.  Normalization is applied inside the kernel
    # (RevIN is per-(b,c) affine, so norm-then-pad == pad-then-norm).
    xpad = jnp.concatenate([xp, jnp.repeat(xp[:, -1:], STRIDE, axis=1)], axis=1)  # [Rp, T+stride]
    col = jnp.take(xpad, jnp.asarray(COL_GATHER_IDX), axis=1)                     # [Rp, L, 3*pl]
    col = jnp.transpose(col, (1, 0, 2)).reshape(NUM_PATCHES * Rp, 3 * PATCH_LEN)  # rows: l*Rp + bc

    # Single fused kernel: RevIN norm, conv->Q, source embeddings, K/V,
    # reprogramming attention, out-projection, synthetic LLaMA (d_ff slice),
    # FlattenHead, RevIN denorm.
    out_bc = timellm_fused(xp, col, params)             # [Rp, pred_len]

    out = out_bc[:R].reshape(Bx, C, PRED_LEN)
    out = jnp.transpose(out, (0, 2, 1))                 # [B, pred_len, C]
    return out[:, -PRED_LEN:, :]


# ----------------------------------- main ------------------------------------
if __name__ == "__main__":
    key = jax.random.PRNGKey(0)
    kp, kx, kd = jax.random.split(key, 3)
    params = init_params(kp)

    x_enc = jax.random.normal(kx, (B, SEQ_LEN, N_VARS), dtype=jnp.float32)
    x_mark_enc = jnp.zeros((B, SEQ_LEN, 4), jnp.float32)
    x_dec = jax.random.normal(kd, (B, PRED_LEN, N_VARS), dtype=jnp.float32)
    x_mark_dec = jnp.zeros((B, PRED_LEN, 4), jnp.float32)

    out = jax.jit(timellm_forward)(params, x_enc, x_mark_enc, x_dec, x_mark_dec)
    out = jax.block_until_ready(out)
    assert out.shape == (B, PRED_LEN, N_VARS), out.shape
    assert bool(jnp.all(jnp.isfinite(out)))
    print("KERNEL_OK")
</pallas_src>

<mosaic_0001>
module attributes {stable_mosaic.version = 11 : i64} {
  func.func @_timellm_fused_kernel(%arg0: i32, %arg1: memref<16x32xf32, #tpu.memory_space<vmem>>, %arg2: memref<64x48xf32, #tpu.memory_space<vmem>>, %arg3: memref<48x32xbf16, #tpu.memory_space<vmem>>, %arg4: memref<32x512xbf16, #tpu.memory_space<vmem>>, %arg5: memref<1x512xf32, #tpu.memory_space<vmem>>, %arg6: memref<64x256xbf16, #tpu.memory_space<vmem>>, %arg7: memref<64x1xf32, #tpu.memory_space<vmem>>, %arg8: memref<256x512xbf16, #tpu.memory_space<vmem>>, %arg9: memref<512x1024xbf16, #tpu.memory_space<vmem>>, %arg10: memref<1x1024xf32, #tpu.memory_space<vmem>>, %arg11: memref<512x512xbf16, #tpu.memory_space<vmem>>, %arg12: memref<1x512xf32, #tpu.memory_space<vmem>>, %arg13: memref<512x128xbf16, #tpu.memory_space<vmem>>, %arg14: memref<1x128xf32, #tpu.memory_space<vmem>>, %arg15: memref<4x128x16xbf16, #tpu.memory_space<vmem>>, %arg16: memref<1x16xf32, #tpu.memory_space<vmem>>, %arg17: memref<16x16xf32, #tpu.memory_space<vmem>>) attributes {dimension_semantics = [#tpu.dimension_semantics<arbitrary>], iteration_bounds = array<i64: 1>, scalar_prefetch = 0 : i64, scratch_operands = 0 : i64, tpu.core_type = #tpu.core_type<tc>, window_params = [{pipeline_mode = #tpu.pipeline_mode<synchronous>, transform_indices = @transform_0, window_bounds = array<i64: 16, 32>}, {pipeline_mode = #tpu.pipeline_mode<synchronous>, transform_indices = @transform_1, window_bounds = array<i64: 64, 48>}, {pipeline_mode = #tpu.pipeline_mode<synchronous>, transform_indices = @transform_2, window_bounds = array<i64: 48, 32>}, {pipeline_mode = #tpu.pipeline_mode<synchronous>, transform_indices = @transform_3, window_bounds = array<i64: 32, 512>}, {pipeline_mode = #tpu.pipeline_mode<synchronous>, transform_indices = @transform_4, window_bounds = array<i64: 1, 512>}, {pipeline_mode = #tpu.pipeline_mode<synchronous>, transform_indices = @transform_5, window_bounds = array<i64: 64, 256>}, {pipeline_mode = #tpu.pipeline_mode<synchronous>, transform_indices = @transform_6, window_bounds = array<i64: 64, 1>}, {pipeline_mode = #tpu.pipeline_mode<synchronous>, transform_indices = @transform_7, window_bounds = array<i64: 256, 512>}, {pipeline_mode = #tpu.pipeline_mode<synchronous>, transform_indices = @transform_8, window_bounds = array<i64: 512, 1024>}, {pipeline_mode = #tpu.pipeline_mode<synchronous>, transform_indices = @transform_9, window_bounds = array<i64: 1, 1024>}, {pipeline_mode = #tpu.pipeline_mode<synchronous>, transform_indices = @transform_10, window_bounds = array<i64: 512, 512>}, {pipeline_mode = #tpu.pipeline_mode<synchronous>, transform_indices = @transform_11, window_bounds = array<i64: 1, 512>}, {pipeline_mode = #tpu.pipeline_mode<synchronous>, transform_indices = @transform_12, window_bounds = array<i64: 512, 128>}, {pipeline_mode = #tpu.pipeline_mode<synchronous>, transform_indices = @transform_13, window_bounds = array<i64: 1, 128>}, {pipeline_mode = #tpu.pipeline_mode<synchronous>, transform_indices = @transform_14, window_bounds = array<i64: 4, 128, 16>}, {pipeline_mode = #tpu.pipeline_mode<synchronous>, transform_indices = @transform_15, window_bounds = array<i64: 1, 16>}, {pipeline_mode = #tpu.pipeline_mode<synchronous>, transform_indices = @transform_16, window_bounds = array<i64: 16, 16>}]} {
    %c0 = arith.constant 0 : index
    %c0_0 = arith.constant 0 : index
    %0 = vector.load %arg1[%c0, %c0_0] : memref<16x32xf32, #tpu.memory_space<vmem>>, vector<16x32xf32>
    %cst = arith.constant dense<0.000000e+00> : vector<16xf32>
    %1 = vector.multi_reduction <add>, %0, %cst [1] : vector<16x32xf32> to vector<16xf32>
    %2 = vector.shape_cast %1 : vector<16xf32> to vector<16x1xf32>
    %cst_1 = arith.constant 3.200000e+01 : f32
    %3 = vector.broadcast %cst_1 : f32 to vector<16x1xf32>
    %4 = arith.divf %2, %3 : vector<16x1xf32>
    %5 = vector.broadcast %4 : vector<16x1xf32> to vector<16x32xf32>
    %6 = arith.subf %0, %5 : vector<16x32xf32>
    %7 = arith.mulf %6, %6 : vector<16x32xf32>
    %cst_2 = arith.constant dense<0.000000e+00> : vector<16xf32>
    %8 = vector.multi_reduction <add>, %7, %cst_2 [1] : vector<16x32xf32> to vector<16xf32>
    %9 = vector.shape_cast %8 : vector<16xf32> to vector<16x1xf32>
    %cst_3 = arith.constant 3.200000e+01 : f32
    %10 = vector.broadcast %cst_3 : f32 to vector<16x1xf32>
    %11 = arith.divf %9, %10 : vector<16x1xf32>
    %cst_4 = arith.constant 9.99999974E-6 : f32
    %12 = vector.broadcast %cst_4 : f32 to vector<16x1xf32>
    %13 = arith.addf %11, %12 : vector<16x1xf32>
    %14 = math.sqrt %13 : vector<16x1xf32>
    %cst_5 = arith.constant 1.000000e+00 : f32
    %15 = vector.broadcast %cst_5 : f32 to vector<16x1xf32>
    %16 = arith.divf %15, %14 : vector<16x1xf32>
    %17 = tpu.concatenate %4, %4, %4, %4 in 0 : vector<16x1xf32>, vector<16x1xf32>, vector<16x1xf32>, vector<16x1xf32> -> vector<64x1xf32>
    %18 = tpu.concatenate %16, %16, %16, %16 in 0 : vector<16x1xf32>, vector<16x1xf32>, vector<16x1xf32>, vector<16x1xf32> -> vector<64x1xf32>
    %c0_6 = arith.constant 0 : index
    %c0_7 = arith.constant 0 : index
    %19 = vector.load %arg2[%c0_6, %c0_7] : memref<64x48xf32, #tpu.memory_space<vmem>>, vector<64x48xf32>
    %20 = vector.broadcast %17 : vector<64x1xf32> to vector<64x48xf32>
    %21 = arith.subf %19, %20 : vector<64x48xf32>
    %22 = vector.broadcast %18 : vector<64x1xf32> to vector<64x48xf32>
    %23 = arith.mulf %21, %22 : vector<64x48xf32>
    %24 = arith.truncf %23 : vector<64x48xf32> to vector<64x48xbf16>
    %c0_8 = arith.constant 0 : index
    %c0_9 = arith.constant 0 : index
    %25 = vector.load %arg3[%c0_8, %c0_9] : memref<48x32xbf16, #tpu.memory_space<vmem>>, vector<48x32xbf16>
    %cst_10 = arith.constant dense<0.000000e+00> : vector<64x32xf32>
    %26 = tpu.matmul %24, %25, %cst_10 {dimension_numbers = #tpu.dot_dimension_numbers<[1], [0], [0], [1], [0, 0, 1, 1], [], []>} : vector<64x48xbf16>, vector<48x32xbf16>, vector<64x32xf32> -> vector<64x32xf32>
    %27 = arith.truncf %26 : vector<64x32xf32> to vector<64x32xbf16>
    %c0_11 = arith.constant 0 : index
    %c0_12 = arith.constant 0 : index
    %28 = vector.load %arg4[%c0_11, %c0_12] : memref<32x512xbf16, #tpu.memory_space<vmem>>, vector<32x512xbf16>
    %cst_13 = arith.constant dense<0.000000e+00> : vector<64x512xf32>
    %29 = tpu.matmul %27, %28, %cst_13 {dimension_numbers = #tpu.dot_dimension_numbers<[1], [0], [0], [1], [0, 0, 1, 1], [], []>} : vector<64x32xbf16>, vector<32x512xbf16>, vector<64x512xf32> -> vector<64x512xf32>
    %c0_14 = arith.constant 0 : index
    %c0_15 = arith.constant 0 : index
    %30 = vector.load %arg5[%c0_14, %c0_15] : memref<1x512xf32, #tpu.memory_space<vmem>>, vector<1x512xf32>
    %31 = vector.broadcast %30 : vector<1x512xf32> to vector<64x512xf32>
    %32 = arith.addf %29, %31 : vector<64x512xf32>
    %c0_16 = arith.constant 0 : index
    %c0_17 = arith.constant 0 : index
    %33 = vector.load %arg6[%c0_16, %c0_17] : memref<64x256xbf16, #tpu.memory_space<vmem>>, vector<64x256xbf16>
    %c0_18 = arith.constant 0 : index
    %c0_19 = arith.constant 0 : index
    %34 = vector.load %arg8[%c0_18, %c0_19] : memref<256x512xbf16, #tpu.memory_space<vmem>>, vector<256x512xbf16>
    %cst_20 = arith.constant dense<0.000000e+00> : vector<64x512xf32>
    %35 = tpu.matmul %33, %34, %cst_20 {dimension_numbers = #tpu.dot_dimension_numbers<[1], [0], [0], [1], [0, 0, 1, 1], [], []>} : vector<64x256xbf16>, vector<256x512xbf16>, vector<64x512xf32> -> vector<64x512xf32>
    %c0_21 = arith.constant 0 : index
    %c0_22 = arith.constant 0 : index
    %36 = vector.load %arg7[%c0_21, %c0_22] : memref<64x1xf32, #tpu.memory_space<vmem>>, vector<64x1xf32>
    %37 = vector.broadcast %36 : vector<64x1xf32> to vector<64x512xf32>
    %38 = arith.addf %35, %37 : vector<64x512xf32>
    %39 = arith.truncf %38 : vector<64x512xf32> to vector<64x512xbf16>
    %c0_23 = arith.constant 0 : index
    %c0_24 = arith.constant 0 : index
    %40 = vector.load %arg9[%c0_23, %c0_24] : memref<512x1024xbf16, #tpu.memory_space<vmem>>, vector<512x1024xbf16>
    %cst_25 = arith.constant dense<0.000000e+00> : vector<64x1024xf32>
    %41 = tpu.matmul %39, %40, %cst_25 {dimension_numbers = #tpu.dot_dimension_numbers<[1], [0], [0], [1], [0, 0, 1, 1], [], []>} : vector<64x512xbf16>, vector<512x1024xbf16>, vector<64x1024xf32> -> vector<64x1024xf32>
    %c0_26 = arith.constant 0 : index
    %c0_27 = arith.constant 0 : index
    %42 = vector.load %arg10[%c0_26, %c0_27] : memref<1x1024xf32, #tpu.memory_space<vmem>>, vector<1x1024xf32>
    %43 = vector.broadcast %42 : vector<1x1024xf32> to vector<64x1024xf32>
    %44 = arith.addf %41, %43 : vector<64x1024xf32>
    %45 = vector.extract_strided_slice %44 {offsets = [0, 0], sizes = [64, 512], strides = [1, 1]} : vector<64x1024xf32> to vector<64x512xf32>
    %46 = vector.extract_strided_slice %44 {offsets = [0, 512], sizes = [64, 512], strides = [1, 1]} : vector<64x1024xf32> to vector<64x512xf32>
    %47 = vector.extract_strided_slice %32 {offsets = [0, 0], sizes = [64, 128], strides = [1, 1]} : vector<64x512xf32> to vector<64x128xf32>
    %48 = arith.truncf %47 : vector<64x128xf32> to vector<64x128xbf16>
    %49 = vector.extract_strided_slice %45 {offsets = [0, 0], sizes = [64, 128], strides = [1, 1]} : vector<64x512xf32> to vector<64x128xf32>
    %50 = arith.truncf %49 : vector<64x128xf32> to vector<64x128xbf16>
    %51 = vector.extract_strided_slice %46 {offsets = [0, 0], sizes = [64, 128], strides = [1, 1]} : vector<64x512xf32> to vector<64x128xf32>
    %52 = arith.truncf %51 : vector<64x128xf32> to vector<64x128xbf16>
    %cst_28 = arith.constant dense<0.000000e+00> : vector<64x64xf32>
    %53 = tpu.matmul %48, %50, %cst_28 {dimension_numbers = #tpu.dot_dimension_numbers<[1], [1], [0], [0], [0, 0, 1, 0], [], []>} : vector<64x128xbf16>, vector<64x128xbf16>, vector<64x64xf32> -> vector<64x64xf32>
    %cst_29 = arith.constant 0.0883883461 : f32
    %54 = vector.broadcast %cst_29 : f32 to vector<64x64xf32>
    %55 = arith.mulf %53, %54 : vector<64x64xf32>
    %cst_30 = arith.constant dense<0xFF800000> : vector<64xf32>
    %56 = vector.multi_reduction <maximumf>, %55, %cst_30 [1] : vector<64x64xf32> to vector<64xf32>
    %57 = vector.shape_cast %56 : vector<64xf32> to vector<64x1xf32>
    %58 = vector.broadcast %57 : vector<64x1xf32> to vector<64x64xf32>
    %59 = arith.subf %55, %58 : vector<64x64xf32>
    %60 = math.exp %59 : vector<64x64xf32>
    %cst_31 = arith.constant dense<0.000000e+00> : vector<64xf32>
    %61 = vector.multi_reduction <add>, %60, %cst_31 [1] : vector<64x64xf32> to vector<64xf32>
    %62 = vector.shape_cast %61 : vector<64xf32> to vector<64x1xf32>
    %63 = tpu.reciprocal %62 {approx = true} : vector<64x1xf32> -> vector<64x1xf32>
    %64 = vector.broadcast %63 : vector<64x1xf32> to vector<64x64xf32>
    %65 = arith.mulf %60, %64 : vector<64x64xf32>
    %66 = arith.truncf %65 : vector<64x64xf32> to vector<64x64xbf16>
    %cst_32 = arith.constant dense<0.000000e+00> : vector<64x128xf32>
    %67 = tpu.matmul %66, %52, %cst_32 {dimension_numbers = #tpu.dot_dimension_numbers<[1], [0], [0], [1], [0, 0, 1, 1], [], []>} : vector<64x64xbf16>, vector<64x128xbf16>, vector<64x128xf32> -> vector<64x128xf32>
    %68 = vector.extract_strided_slice %32 {offsets = [0, 128], sizes = [64, 128], strides = [1, 1]} : vector<64x512xf32> to vector<64x128xf32>
    %69 = arith.truncf %68 : vector<64x128xf32> to vector<64x128xbf16>
    %70 = vector.extract_strided_slice %45 {offsets = [0, 128], sizes = [64, 128], strides = [1, 1]} : vector<64x512xf32> to vector<64x128xf32>
    %71 = arith.truncf %70 : vector<64x128xf32> to vector<64x128xbf16>
    %72 = vector.extract_strided_slice %46 {offsets = [0, 128], sizes = [64, 128], strides = [1, 1]} : vector<64x512xf32> to vector<64x128xf32>
    %73 = arith.truncf %72 : vector<64x128xf32> to vector<64x128xbf16>
    %cst_33 = arith.constant dense<0.000000e+00> : vector<64x64xf32>
    %74 = tpu.matmul %69, %71, %cst_33 {dimension_numbers = #tpu.dot_dimension_numbers<[1], [1], [0], [0], [0, 0, 1, 0], [], []>} : vector<64x128xbf16>, vector<64x128xbf16>, vector<64x64xf32> -> vector<64x64xf32>
    %cst_34 = arith.constant 0.0883883461 : f32
    %75 = vector.broadcast %cst_34 : f32 to vector<64x64xf32>
    %76 = arith.mulf %74, %75 : vector<64x64xf32>
    %cst_35 = arith.constant dense<0xFF800000> : vector<64xf32>
    %77 = vector.multi_reduction <maximumf>, %76, %cst_35 [1] : vector<64x64xf32> to vector<64xf32>
    %78 = vector.shape_cast %77 : vector<64xf32> to vector<64x1xf32>
    %79 = vector.broadcast %78 : vector<64x1xf32> to vector<64x64xf32>
    %80 = arith.subf %76, %79 : vector<64x64xf32>
    %81 = math.exp %80 : vector<64x64xf32>
    %cst_36 = arith.constant dense<0.000000e+00> : vector<64xf32>
    %82 = vector.multi_reduction <add>, %81, %cst_36 [1] : vector<64x64xf32> to vector<64xf32>
    %83 = vector.shape_cast %82 : vector<64xf32> to vector<64x1xf32>
    %84 = tpu.reciprocal %83 {approx = true} : vector<64x1xf32> -> vector<64x1xf32>
    %85 = vector.broadcast %84 : vector<64x1xf32> to vector<64x64xf32>
    %86 = arith.mulf %81, %85 : vector<64x64xf32>
    %87 = arith.truncf %86 : vector<64x64xf32> to vector<64x64xbf16>
    %cst_37 = arith.constant dense<0.000000e+00> : vector<64x128xf32>
    %88 = tpu.matmul %87, %73, %cst_37 {dimension_numbers = #tpu.dot_dimension_numbers<[1], [0], [0], [1], [0, 0, 1, 1], [], []>} : vector<64x64xbf16>, vector<64x128xbf16>, vector<64x128xf32> -> vector<64x128xf32>
    %89 = vector.extract_strided_slice %32 {offsets = [0, 256], sizes = [64, 128], strides = [1, 1]} : vector<64x512xf32> to vector<64x128xf32>
    %90 = arith.truncf %89 : vector<64x128xf32> to vector<64x128xbf16>
    %91 = vector.extract_strided_slice %45 {offsets = [0, 256], sizes = [64, 128], strides = [1, 1]} : vector<64x512xf32> to vector<64x128xf32>
    %92 = arith.truncf %91 : vector<64x128xf32> to vector<64x128xbf16>
    %93 = vector.extract_strided_slice %46 {offsets = [0, 256], sizes = [64, 128], strides = [1, 1]} : vector<64x512xf32> to vector<64x128xf32>
    %94 = arith.truncf %93 : vector<64x128xf32> to vector<64x128xbf16>
    %cst_38 = arith.constant dense<0.000000e+00> : vector<64x64xf32>
    %95 = tpu.matmul %90, %92, %cst_38 {dimension_numbers = #tpu.dot_dimension_numbers<[1], [1], [0], [0], [0, 0, 1, 0], [], []>} : vector<64x128xbf16>, vector<64x128xbf16>, vector<64x64xf32> -> vector<64x64xf32>
    %cst_39 = arith.constant 0.0883883461 : f32
    %96 = vector.broadcast %cst_39 : f32 to vector<64x64xf32>
    %97 = arith.mulf %95, %96 : vector<64x64xf32>
    %cst_40 = arith.constant dense<0xFF800000> : vector<64xf32>
    %98 = vector.multi_reduction <maximumf>, %97, %cst_40 [1] : vector<64x64xf32> to vector<64xf32>
    %99 = vector.shape_cast %98 : vector<64xf32> to vector<64x1xf32>
    %100 = vector.broadcast %99 : vector<64x1xf32> to vector<64x64xf32>
    %101 = arith.subf %97, %100 : vector<64x64xf32>
    %102 = math.exp %101 : vector<64x64xf32>
    %cst_41 = arith.constant dense<0.000000e+00> : vector<64xf32>
    %103 = vector.multi_reduction <add>, %102, %cst_41 [1] : vector<64x64xf32> to vector<64xf32>
    %104 = vector.shape_cast %103 : vector<64xf32> to vector<64x1xf32>
    %105 = tpu.reciprocal %104 {approx = true} : vector<64x1xf32> -> vector<64x1xf32>
    %106 = vector.broadcast %105 : vector<64x1xf32> to vector<64x64xf32>
    %107 = arith.mulf %102, %106 : vector<64x64xf32>
    %108 = arith.truncf %107 : vector<64x64xf32> to vector<64x64xbf16>
    %cst_42 = arith.constant dense<0.000000e+00> : vector<64x128xf32>
    %109 = tpu.matmul %108, %94, %cst_42 {dimension_numbers = #tpu.dot_dimension_numbers<[1], [0], [0], [1], [0, 0, 1, 1], [], []>} : vector<64x64xbf16>, vector<64x128xbf16>, vector<64x128xf32> -> vector<64x128xf32>
    %110 = vector.extract_strided_slice %32 {offsets = [0, 384], sizes = [64, 128], strides = [1, 1]} : vector<64x512xf32> to vector<64x128xf32>
    %111 = arith.truncf %110 : vector<64x128xf32> to vector<64x128xbf16>
    %112 = vector.extract_strided_slice %45 {offsets = [0, 384], sizes = [64, 128], strides = [1, 1]} : vector<64x512xf32> to vector<64x128xf32>
    %113 = arith.truncf %112 : vector<64x128xf32> to vector<64x128xbf16>
    %114 = vector.extract_strided_slice %46 {offsets = [0, 384], sizes = [64, 128], strides = [1, 1]} : vector<64x512xf32> to vector<64x128xf32>
    %115 = arith.truncf %114 : vector<64x128xf32> to vector<64x128xbf16>
    %cst_43 = arith.constant dense<0.000000e+00> : vector<64x64xf32>
    %116 = tpu.matmul %111, %113, %cst_43 {dimension_numbers = #tpu.dot_dimension_numbers<[1], [1], [0], [0], [0, 0, 1, 0], [], []>} : vector<64x128xbf16>, vector<64x128xbf16>, vector<64x64xf32> -> vector<64x64xf32>
    %cst_44 = arith.constant 0.0883883461 : f32
    %117 = vector.broadcast %cst_44 : f32 to vector<64x64xf32>
    %118 = arith.mulf %116, %117 : vector<64x64xf32>
    %cst_45 = arith.constant dense<0xFF800000> : vector<64xf32>
    %119 = vector.multi_reduction <maximumf>, %118, %cst_45 [1] : vector<64x64xf32> to vector<64xf32>
    %120 = vector.shape_cast %119 : vector<64xf32> to vector<64x1xf32>
    %121 = vector.broadcast %120 : vector<64x1xf32> to vector<64x64xf32>
    %122 = arith.subf %118, %121 : vector<64x64xf32>
    %123 = math.exp %122 : vector<64x64xf32>
    %cst_46 = arith.constant dense<0.000000e+00> : vector<64xf32>
    %124 = vector.multi_reduction <add>, %123, %cst_46 [1] : vector<64x64xf32> to vector<64xf32>
    %125 = vector.shape_cast %124 : vector<64xf32> to vector<64x1xf32>
    %126 = tpu.reciprocal %125 {approx = true} : vector<64x1xf32> -> vector<64x1xf32>
    %127 = vector.broadcast %126 : vector<64x1xf32> to vector<64x64xf32>
    %128 = arith.mulf %123, %127 : vector<64x64xf32>
    %129 = arith.truncf %128 : vector<64x64xf32> to vector<64x64xbf16>
    %cst_47 = arith.constant dense<0.000000e+00> : vector<64x128xf32>
    %130 = tpu.matmul %129, %115, %cst_47 {dimension_numbers = #tpu.dot_dimension_numbers<[1], [0], [0], [1], [0, 0, 1, 1], [], []>} : vector<64x64xbf16>, vector<64x128xbf16>, vector<64x128xf32> -> vector<64x128xf32>
    %131 = tpu.concatenate %67, %88, %109, %130 in 1 : vector<64x128xf32>, vector<64x128xf32>, vector<64x128xf32>, vector<64x128xf32> -> vector<64x512xf32>
    %132 = arith.truncf %131 : vector<64x512xf32> to vector<64x512xbf16>
    %c0_48 = arith.constant 0 : index
    %c0_49 = arith.constant 0 : index
    %133 = vector.load %arg11[%c0_48, %c0_49] : memref<512x512xbf16, #tpu.memory_space<vmem>>, vector<512x512xbf16>
    %cst_50 = arith.constant dense<0.000000e+00> : vector<64x512xf32>
    %134 = tpu.matmul %132, %133, %cst_50 {dimension_numbers = #tpu.dot_dimension_numbers<[1], [0], [0], [1], [0, 0, 1, 1], [], []>} : vector<64x512xbf16>, vector<512x512xbf16>, vector<64x512xf32> -> vector<64x512xf32>
    %c0_51 = arith.constant 0 : index
    %c0_52 = arith.constant 0 : index
    %135 = vector.load %arg12[%c0_51, %c0_52] : memref<1x512xf32, #tpu.memory_space<vmem>>, vector<1x512xf32>
    %136 = vector.broadcast %135 : vector<1x512xf32> to vector<64x512xf32>
    %137 = arith.addf %134, %136 : vector<64x512xf32>
    %138 = arith.truncf %137 : vector<64x512xf32> to vector<64x512xbf16>
    %c0_53 = arith.constant 0 : index
    %c0_54 = arith.constant 0 : index
    %139 = vector.load %arg13[%c0_53, %c0_54] : memref<512x128xbf16, #tpu.memory_space<vmem>>, vector<512x128xbf16>
    %cst_55 = arith.constant dense<0.000000e+00> : vector<64x128xf32>
    %140 = tpu.matmul %138, %139, %cst_55 {dimension_numbers = #tpu.dot_dimension_numbers<[1], [0], [0], [1], [0, 0, 1, 1], [], []>} : vector<64x512xbf16>, vector<512x128xbf16>, vector<64x128xf32> -> vector<64x128xf32>
    %c0_56 = arith.constant 0 : index
    %c0_57 = arith.constant 0 : index
    %141 = vector.load %arg14[%c0_56, %c0_57] : memref<1x128xf32, #tpu.memory_space<vmem>>, vector<1x128xf32>
    %142 = vector.broadcast %141 : vector<1x128xf32> to vector<64x128xf32>
    %143 = arith.addf %140, %142 : vector<64x128xf32>
    %cst_58 = arith.constant 0.000000e+00 : f32
    %144 = vector.broadcast %cst_58 : f32 to vector<16x16xf32>
    %145 = vector.extract_strided_slice %143 {offsets = [0, 0], sizes = [16, 128], strides = [1, 1]} : vector<64x128xf32> to vector<16x128xf32>
    %146 = arith.truncf %145 : vector<16x128xf32> to vector<16x128xbf16>
    %c0_59 = arith.constant 0 : index
    %c0_60 = arith.constant 0 : index
    %c0_61 = arith.constant 0 : index
    %147 = vector.load %arg15[%c0_59, %c0_60, %c0_61] : memref<4x128x16xbf16, #tpu.memory_space<vmem>>, vector<1x128x16xbf16>
    %148 = vector.shape_cast %147 : vector<1x128x16xbf16> to vector<128x16xbf16>
    %cst_62 = arith.constant dense<0.000000e+00> : vector<16x16xf32>
    %149 = tpu.matmul %146, %148, %cst_62 {dimension_numbers = #tpu.dot_dimension_numbers<[1], [0], [0], [1], [0, 0, 1, 1], [], []>} : vector<16x128xbf16>, vector<128x16xbf16>, vector<16x16xf32> -> vector<16x16xf32>
    %150 = arith.addf %144, %149 : vector<16x16xf32>
    %151 = vector.extract_strided_slice %143 {offsets = [16, 0], sizes = [16, 128], strides = [1, 1]} : vector<64x128xf32> to vector<16x128xf32>
    %152 = arith.truncf %151 : vector<16x128xf32> to vector<16x128xbf16>
    %c1 = arith.constant 1 : index
    %c0_63 = arith.constant 0 : index
    %c0_64 = arith.constant 0 : index
    %153 = vector.load %arg15[%c1, %c0_63, %c0_64] : memref<4x128x16xbf16, #tpu.memory_space<vmem>>, vector<1x128x16xbf16>
    %154 = vector.shape_cast %153 : vector<1x128x16xbf16> to vector<128x16xbf16>
    %cst_65 = arith.constant dense<0.000000e+00> : vector<16x16xf32>
    %155 = tpu.matmul %152, %154, %cst_65 {dimension_numbers = #tpu.dot_dimension_numbers<[1], [0], [0], [1], [0, 0, 1, 1], [], []>} : vector<16x128xbf16>, vector<128x16xbf16>, vector<16x16xf32> -> vector<16x16xf32>
    %156 = arith.addf %150, %155 : vector<16x16xf32>
    %157 = vector.extract_strided_slice %143 {offsets = [32, 0], sizes = [16, 128], strides = [1, 1]} : vector<64x128xf32> to vector<16x128xf32>
    %158 = arith.truncf %157 : vector<16x128xf32> to vector<16x128xbf16>
    %c2 = arith.constant 2 : index
    %c0_66 = arith.constant 0 : index
    %c0_67 = arith.constant 0 : index
    %159 = vector.load %arg15[%c2, %c0_66, %c0_67] : memref<4x128x16xbf16, #tpu.memory_space<vmem>>, vector<1x128x16xbf16>
    %160 = vector.shape_cast %159 : vector<1x128x16xbf16> to vector<128x16xbf16>
    %cst_68 = arith.constant dense<0.000000e+00> : vector<16x16xf32>
    %161 = tpu.matmul %158, %160, %cst_68 {dimension_numbers = #tpu.dot_dimension_numbers<[1], [0], [0], [1], [0, 0, 1, 1], [], []>} : vector<16x128xbf16>, vector<128x16xbf16>, vector<16x16xf32> -> vector<16x16xf32>
    %162 = arith.addf %156, %161 : vector<16x16xf32>
    %163 = vector.extract_strided_slice %143 {offsets = [48, 0], sizes = [16, 128], strides = [1, 1]} : vector<64x128xf32> to vector<16x128xf32>
    %164 = arith.truncf %163 : vector<16x128xf32> to vector<16x128xbf16>
    %c3 = arith.constant 3 : index
    %c0_69 = arith.constant 0 : index
    %c0_70 = arith.constant 0 : index
    %165 = vector.load %arg15[%c3, %c0_69, %c0_70] : memref<4x128x16xbf16, #tpu.memory_space<vmem>>, vector<1x128x16xbf16>
    %166 = vector.shape_cast %165 : vector<1x128x16xbf16> to vector<128x16xbf16>
    %cst_71 = arith.constant dense<0.000000e+00> : vector<16x16xf32>
    %167 = tpu.matmul %164, %166, %cst_71 {dimension_numbers = #tpu.dot_dimension_numbers<[1], [0], [0], [1], [0, 0, 1, 1], [], []>} : vector<16x128xbf16>, vector<128x16xbf16>, vector<16x16xf32> -> vector<16x16xf32>
    %168 = arith.addf %162, %167 : vector<16x16xf32>
    %c0_72 = arith.constant 0 : index
    %c0_73 = arith.constant 0 : index
    %169 = vector.load %arg16[%c0_72, %c0_73] : memref<1x16xf32, #tpu.memory_space<vmem>>, vector<1x16xf32>
    %170 = vector.broadcast %169 : vector<1x16xf32> to vector<16x16xf32>
    %171 = arith.addf %168, %170 : vector<16x16xf32>
    %172 = vector.broadcast %14 : vector<16x1xf32> to vector<16x16xf32>
    %173 = arith.mulf %171, %172 : vector<16x16xf32>
    %174 = vector.broadcast %4 : vector<16x1xf32> to vector<16x16xf32>
    %175 = arith.addf %173, %174 : vector<16x16xf32>
    %c0_74 = arith.constant 0 : index
    %c0_75 = arith.constant 0 : index
    %176 = vector.load %arg17[%c0_74, %c0_75] : memref<16x16xf32, #tpu.memory_space<vmem>>, vector<16x16xf32>
    tpu.vector_store %arg17[%c0_74, %c0_75], %175 {strides = array<i32>} : memref<16x16xf32, #tpu.memory_space<vmem>>, vector<16x16xf32>,
    return
  }
  func.func @transform_0(%arg0: i32) -> (i32, i32) {
    %c0_i32 = arith.constant 0 : i32
    %c0_i32_0 = arith.constant 0 : i32
    %c0_i32_1 = arith.constant 0 : i32
    return %c0_i32, %c0_i32_0 : i32, i32
  }
  func.func @transform_1(%arg0: i32) -> (i32, i32) {
    %c0_i32 = arith.constant 0 : i32
    %c0_i32_0 = arith.constant 0 : i32
    %c0_i32_1 = arith.constant 0 : i32
    return %c0_i32, %c0_i32_0 : i32, i32
  }
  func.func @transform_2(%arg0: i32) -> (i32, i32) {
    %c0_i32 = arith.constant 0 : i32
    %c0_i32_0 = arith.constant 0 : i32
    %c0_i32_1 = arith.constant 0 : i32
    return %c0_i32, %c0_i32_0 : i32, i32
  }
  func.func @transform_3(%arg0: i32) -> (i32, i32) {
    %c0_i32 = arith.constant 0 : i32
    %c0_i32_0 = arith.constant 0 : i32
    %c0_i32_1 = arith.constant 0 : i32
    return %c0_i32, %c0_i32_0 : i32, i32
  }
  func.func @transform_4(%arg0: i32) -> (i32, i32) {
    %c0_i32 = arith.constant 0 : i32
    %c0_i32_0 = arith.constant 0 : i32
    %c0_i32_1 = arith.constant 0 : i32
    return %c0_i32, %c0_i32_0 : i32, i32
  }
  func.func @transform_5(%arg0: i32) -> (i32, i32) {
    %c0_i32 = arith.constant 0 : i32
    %c0_i32_0 = arith.constant 0 : i32
    %c0_i32_1 = arith.constant 0 : i32
    return %c0_i32, %c0_i32_0 : i32, i32
  }
  func.func @transform_6(%arg0: i32) -> (i32, i32) {
    %c0_i32 = arith.constant 0 : i32
    %c0_i32_0 = arith.constant 0 : i32
    %c0_i32_1 = arith.constant 0 : i32
    return %c0_i32, %c0_i32_0 : i32, i32
  }
  func.func @transform_7(%arg0: i32) -> (i32, i32) {
    %c0_i32 = arith.constant 0 : i32
    %c0_i32_0 = arith.constant 0 : i32
    %c0_i32_1 = arith.constant 0 : i32
    return %c0_i32, %c0_i32_0 : i32, i32
  }
  func.func @transform_8(%arg0: i32) -> (i32, i32) {
    %c0_i32 = arith.constant 0 : i32
    %c0_i32_0 = arith.constant 0 : i32
    %c0_i32_1 = arith.constant 0 : i32
    return %c0_i32, %c0_i32_0 : i32, i32
  }
  func.func @transform_9(%arg0: i32) -> (i32, i32) {
    %c0_i32 = arith.constant 0 : i32
    %c0_i32_0 = arith.constant 0 : i32
    %c0_i32_1 = arith.constant 0 : i32
    return %c0_i32, %c0_i32_0 : i32, i32
  }
  func.func @transform_10(%arg0: i32) -> (i32, i32) {
    %c0_i32 = arith.constant 0 : i32
    %c0_i32_0 = arith.constant 0 : i32
    %c0_i32_1 = arith.constant 0 : i32
    return %c0_i32, %c0_i32_0 : i32, i32
  }
  func.func @transform_11(%arg0: i32) -> (i32, i32) {
    %c0_i32 = arith.constant 0 : i32
    %c0_i32_0 = arith.constant 0 : i32
    %c0_i32_1 = arith.constant 0 : i32
    return %c0_i32, %c0_i32_0 : i32, i32
  }
  func.func @transform_12(%arg0: i32) -> (i32, i32) {
    %c0_i32 = arith.constant 0 : i32
    %c0_i32_0 = arith.constant 0 : i32
    %c0_i32_1 = arith.constant 0 : i32
    return %c0_i32, %c0_i32_0 : i32, i32
  }
  func.func @transform_13(%arg0: i32) -> (i32, i32) {
    %c0_i32 = arith.constant 0 : i32
    %c0_i32_0 = arith.constant 0 : i32
    %c0_i32_1 = arith.constant 0 : i32
    return %c0_i32, %c0_i32_0 : i32, i32
  }
  func.func @transform_14(%arg0: i32) -> (i32, i32, i32) {
    %c0_i32 = arith.constant 0 : i32
    %c0_i32_0 = arith.constant 0 : i32
    %c0_i32_1 = arith.constant 0 : i32
    %c0_i32_2 = arith.constant 0 : i32
    return %c0_i32, %c0_i32_0, %c0_i32_1 : i32, i32, i32
  }
  func.func @transform_15(%arg0: i32) -> (i32, i32) {
    %c0_i32 = arith.constant 0 : i32
    %c0_i32_0 = arith.constant 0 : i32
    %c0_i32_1 = arith.constant 0 : i32
    return %c0_i32, %c0_i32_0 : i32, i32
  }
  func.func @transform_16(%arg0: i32) -> (i32, i32) {
    %c0_i32 = arith.constant 0 : i32
    %c0_i32_0 = arith.constant 0 : i32
    %c0_i32_1 = arith.constant 0 : i32
    return %c0_i32, %c0_i32_0 : i32, i32
  }
}

</mosaic_0001>

<bundles_post_ra>
// kernel: timellm_forward.1
= control target key start
LH: loop header
LB: loop body
LE: loop exit
PB: predicated region body
PF: predicated region fallthrough
CT: control target
= control target key end

     0   :  { %s12034_s0 = inlined_call_operand.vmem [shape: f32[16,32], index: 0, kind: input, shape index: {}]   ;;  %s12035_s1 = inlined_call_operand.vmem [shape: f32[64,48], index: 1, kind: input, shape index: {}]   ;;  %s12036_s2 = inlined_call_operand.vmem [shape: bf16[48,32], index: 2, kind: input, shape index: {}]   ;;  %s12037_s3 = inlined_call_operand.vmem [shape: bf16[32,512], index: 3, kind: input, shape index: {}]   ;;  %s12038_s4 = inlined_call_operand.vmem [shape: f32[1,512], index: 4, kind: input, shape index: {}]   ;;  %s12039_s5 = inlined_call_operand.vmem [shape: bf16[64,256], index: 5, kind: input, shape index: {}]   ;;  %s12040_s6 = inlined_call_operand.vmem [shape: f32[64,1], index: 6, kind: input, shape index: {}]   ;;  %s12041_s7 = inlined_call_operand.vmem [shape: bf16[256,512], index: 7, kind: input, shape index: {}]   ;;  %s12042_s8 = inlined_call_operand.hbm [shape: bf16[512,1024], index: 8, kind: input, shape index: {}]   ;;  %s12043_s9 = inlined_call_operand.vmem [shape: f32[1,1024], index: 9, kind: input, shape index: {}]   ;;  %s12044_s10 = inlined_call_operand.hbm [shape: bf16[512,512], index: 10, kind: input, shape index: {}]   ;;  %s12045_s11 = inlined_call_operand.vmem [shape: f32[1,512], index: 11, kind: input, shape index: {}]   ;;  %s12046_s12 = inlined_call_operand.vmem [shape: bf16[512,128], index: 12, kind: input, shape index: {}]   ;;  %s12047_s13 = inlined_call_operand.vmem [shape: f32[1,128], index: 13, kind: input, shape index: {}]   ;;  %s12048_s14 = inlined_call_operand.vmem [shape: bf16[4,128,16], index: 14, kind: input, shape index: {}]   ;;  %s12049_s15 = inlined_call_operand.vmem [shape: f32[1,16], index: 15, kind: input, shape index: {}]   ;;  %s12050_s16 = inlined_call_operand.vmem [shape: f32[16,16], index: 16, kind: output, shape index: {}]  }
   0x1   :  { %12082 = sst [smem:[#allocation54_spill]] %s12034_s0 }
   0x2   :  { %21 = vsyncpa [#allocation3], 0  ;;  %s43_s23 = sshll.u32 %s12042_s8, 4  ;;  %s44_s23 = int_to_ptr.hbm [resolvable:$true] %s43_s23 }
   0x3   :  { %22 = vsyncpa [#allocation5], 0  ;;  %s9354_s24 = smov [#allocation2]   ;;  %s58_s28 = sshll.u32 %s12044_s10, 4  ;;  %s59_s28 = int_to_ptr.hbm [resolvable:$true] %s58_s28 }
   0x4   :  { %s45_s25 = sshll.u32 %s9354_s24, 4  ;;  %s9355_s29 = smov 512   ;;  %s46_s25 = int_to_ptr.vmem [resolvable:$true] %s45_s25 }
   0x5   :  { %s9356_s30 = smov 32   ;;  %s9357_s0 = smov [#allocation4]  }
   0x6   :  { %51 = dma.hbm_to_vmem [thread:$0]  %s44_s23, 32768, %s46_s25, [#allocation3], %s9355_s29, %s9355_s29, %s9356_s30  }
   0x7   :  { %s60_s17 = sshll.u32 %s9357_s0, 4  ;;  %s9358_s18 = smov 256   ;;  %s61_s17 = int_to_ptr.vmem [resolvable:$true] %s60_s17 }
   0x8   :  { %s9359_s19 = smov 16  }
   0x9   :  { %66 = dma.hbm_to_vmem [thread:$0]  %s59_s28, 16384, %s61_s17, [#allocation5], %s9358_s18, %s9358_s18, %s9359_s19  }
   0xa   :  { %9350 = dma.done.wait [#allocation3], 32768  }
   0xb   :  { %9351 = vsyncadd [#allocation3], 4294934528 }
   0xc   :  { %9352 = dma.done.wait [#allocation5], 16384  }
   0xd   :  { %9353 = vsyncadd [#allocation5], 4294950912  ;;  %vm88_vm0 = vcmask 261120   ;;  %s12083_s21 = sld [smem:[#allocation54_spill]]  ;;  %v9360_v4 = vmov 0   ;;  %v9361_v5 = vmov 32.0  }
   0xe   :  { %9156 = vset.pattern.permute.xlu2 %v9360_v4  ;;  %9157 = vset.pattern.permute.xlu0 %v9360_v4  ;;  %9161 = vrcp.f32 %v9361_v5  ;;  %v548_v22 = vld [vmem:[%s12040_s6] sm:$0xff]  ;;  %v549_v23 = vld [vmem:[%s12040_s6 + $0x8] sm:$0xff]  ;;  %v550_v31 = vld [vmem:[%s12040_s6 + $0x10] sm:$0xff]  ;;  %vm244_vm14 = vcmask 392192   ;;  %vm3735_vm15 = vcmask 523264  }
   0xf   :  { %9158 = vset.pattern.permute.xlu1 %v9360_v4  ;;  %v551_v39 = vld [vmem:[%s12040_s6 + $0x18] sm:$0xff]  ;;  %v553_v47 = vld [vmem:[%s12040_s6 + $0x28] sm:$0xff] }
  0x10   :  { %v555_v5 = vld [vmem:[%s12040_s6 + $0x38] sm:$0xff] }
  0x13   :  { %v86_v0 = vld [vmem:[%s12083_s21] sm:$0xff]  ;;  %v87_v2 = vld [vmem:[%s12083_s21 + $0x8] sm:$0xff] }
  0x14   :  { %v89_v1 = vsel %vm88_vm0, %v86_v0, 0.0  ;;  %v92_v3 = vsel %vm88_vm0, %v87_v2, 0.0  ;;  %v9162_v6 = vpop.eup %9161 }
  0x15   :  { %90 = vadd.xlane.f32.xlu0 %v89_v1  ;;  %v96_v7 = vmul.f32 32.0, %v9162_v6  ;;  %vm100_vm1 = vweird.f32 %v9162_v6 }
  0x17   :  { %v97_v8 = vsub.f32 1.0, %v96_v7 }
  0x19   :  { %v98_v9 = vmul.f32 %v9162_v6, %v97_v8 }
  0x1b   :  { %v99_v10 = vadd.f32 %v9162_v6, %v98_v9 }
  0x1d   :  { %93 = vadd.xlane.f32.xlu0 %v92_v3  ;;  %v101_v11 = vsel %vm100_vm1, %v9162_v6, %v99_v10  ;;  %v552_v10 = vld [vmem:[%s12040_s6 + $0x20] sm:$0xff] }
  0x88   :  { %v91_v12 = vpop.xlane.xlu0 %90 }
  0x89   :  { %v9461_v13 = vmul.f32 %v101_v11, %v91_v12  ;;  %v8617_v12 = vld [vmem:[%s12036_s2 + $0x10] sm:$0xff] }
  0x8a   :  { %262 = vmatpush.bf16.msra.mxu0 %v8617_v12  ;;  %v8627_v12 = vld [vmem:[%s12039_s5 + $0x4] sm:$0xf0] }
  0x8b   :  { %12084 = vst [vmem:[#allocation8_spill] sm:$0xff] %v9461_v13  ;;  %182 = vperm.xlu2 %9156, %v9461_v13   ;;  %v104_v14 = vsub.f32 %v86_v0, %v9461_v13 }
  0x8d   :  { %v106_v15 = vmul.f32 %v104_v14, %v104_v14  ;;  %v8616_v14 = vld [vmem:[%s12036_s2 + $0x8] sm:$0xff] }
  0x8e   :  { %263 = vmatpush.bf16.msra.mxu0 %v8616_v14 }
  0x8f   :  { %v108_v16 = vsel %vm88_vm0, %v106_v15, 0.0  ;;  %v8615_v15 = vld [vmem:[%s12036_s2] sm:$0xff] }
  0x90   :  { %109 = vadd.xlane.f32.xlu1 %v108_v16  ;;  %v94_v17 = vpop.xlane.xlu0 %93 }
  0x91   :  { %v9466_v18 = vmul.f32 %v101_v11, %v94_v17  ;;  %v172_v17 = vld [vmem:[%s12035_s1] sm:$0xff] }
  0x92   :  { %264 = vmatpush.bf16.msra.mxu0 %v8615_v15  ;;  %v8663_v15 = vld [vmem:[%s12041_s7 + $0xec] sm:$0xf] }
  0x93   :  { %12085 = vst [vmem:[#allocation9_spill] sm:$0xff] %v9466_v18  ;;  %187 = vperm.xlu2 %9156, %v9466_v18   ;;  %v105_v19 = vsub.f32 %v87_v2, %v9466_v18  ;;  %v8926_v18 = vld [vmem:[#allocation2 + $0x71c] sm:$0xf0] }
  0x95   :  { %v107_v20 = vmul.f32 %v105_v19, %v105_v19  ;;  %v173_v19 = vld [vmem:[%s12035_s1 + $0x8] sm:$0xff] }
  0x97   :  { %v111_v21 = vsel %vm88_vm0, %v107_v20, 0.0 }
  0x98   :  { %112 = vadd.xlane.f32.xlu1 %v111_v21 }
  0x9b   :  { %558 = vperm.xlu2 %9156, %v548_v22  }
  0xa3   :  { %563 = vperm.xlu2 %9156, %v549_v23  }
  0xab   :  { %568 = vperm.xlu2 %9156, %v550_v31   ;;  %v8658_v31 = vld [vmem:[%s12041_s7 + $0xc4] sm:$0xf] }
  0xb3   :  { %573 = vperm.xlu2 %9156, %v551_v39   ;;  %v8650_v39 = vld [vmem:[%s12041_s7 + $0x84] sm:$0xf] }
  0xbb   :  { %583 = vperm.xlu2 %9156, %v553_v47  }
  0xe5   :  { %v9518_v16 = vpop.permute.xlu2 %182 }
  0xe6   :  { %v190_v22 = vsub.f32 %v172_v17, %v9518_v16 }
  0xed   :  { %v9526_v20 = vpop.permute.xlu2 %187 }
  0xee   :  { %v191_v23 = vsub.f32 %v173_v19, %v9526_v20  ;;  %v8659_v19 = vld [vmem:[%s12041_s7 + $0xcc] sm:$0xf] }
 0x103   :  { %v110_v24 = vpop.xlane.xlu1 %109 }
 0x104   :  { %v114_v25 = vmul.f32 %v110_v24, %v101_v11 }
 0x106   :  { %v116_v26 = vadd.f32 1e-05, %v114_v25 }
 0x108   :  { %9163 = vrsqrt.f32 %v116_v26  ;;  %vm125_vm2 = vcmp.eq.f32.partialorder %v116_v26, inf  ;;  %v128_v42 = vand.u32 2147483648, %v116_v26  ;;  %vm127_vm3 = vcmp.eq.f32.partialorder %v116_v26, 0.0 }
 0x10b   :  { %v113_v27 = vpop.xlane.xlu1 %112 }
 0x10c   :  { %v115_v28 = vmul.f32 %v113_v27, %v101_v11  ;;  %v554_v11 = vld [vmem:[%s12040_s6 + $0x30] sm:$0xff] }
 0x10e   :  { %v9164_v29 = vpop.eup %9163  ;;  %v117_v30 = vadd.f32 1e-05, %v115_v28  ;;  %v8662_v28 = vld [vmem:[%s12041_s7 + $0xe4] sm:$0xf] }
 0x10f   :  { %v119_v32 = vmul.f32 %v9164_v29, %v116_v26 }
 0x110   :  { %9165 = vrsqrt.f32 %v117_v30  ;;  %vm137_vm4 = vcmp.eq.f32.partialorder %v117_v30, inf  ;;  %v140_v51 = vand.u32 2147483648, %v117_v30  ;;  %vm139_vm5 = vcmp.eq.f32.partialorder %v117_v30, 0.0 }
 0x111   :  { %v120_v33 = vmul.f32 %v9164_v29, %v119_v32  ;;  %v6603_v32 = vld [vmem:[%s12041_s7 + $0xd0] sm:$0xf0] }
 0x113   :  { %v121_v34 = vmul.f32 0.5, %v120_v33  ;;  %v6606_v33 = vor.u32 %v8658_v31, %v6603_v32  ;;  %v8647_v31 = vld [vmem:[%s12041_s7 + $0x6c] sm:$0xf]  ;;  %v6563_v32 = vld [vmem:[%s12041_s7 + $0x78] sm:$0xf0] }
 0x115   :  { %v122_v35 = vsub.f32 1.5, %v121_v34  ;;  %v8654_v34 = vld [vmem:[%s12041_s7 + $0xa4] sm:$0xf] }
 0x116   :  { %v9166_v36 = vpop.eup %9165 }
 0x117   :  { %v131_v37 = vmul.f32 %v9166_v36, %v117_v30  ;;  %v123_v38 = vmul.f32 %v9164_v29, %v122_v35  ;;  %v6619_v29 = vld [vmem:[%s12041_s7 + $0xf0] sm:$0xf0] }
 0x118   :  { %v6587_v35 = vld [vmem:[%s12041_s7 + $0xb0] sm:$0xf0] }
 0x119   :  { %v124_v40 = vmul.f32 %v123_v38, %v116_v26  ;;  %v132_v41 = vmul.f32 %v9166_v36, %v131_v37  ;;  %v6590_v37 = vor.u32 %v8654_v34, %v6587_v35  ;;  %v174_v38 = vld [vmem:[%s12035_s1 + $0x10] sm:$0xff]  ;;  %v8643_v34 = vld [vmem:[%s12041_s7 + $0x4c] sm:$0xf]  ;;  %v6547_v35 = vld [vmem:[%s12041_s7 + $0x58] sm:$0xf0] }
 0x11b   :  { %v126_v43 = vsel %vm125_vm2, %v116_v26, %v124_v40  ;;  %v133_v44 = vmul.f32 0.5, %v132_v41  ;;  %v6571_v40 = vld [vmem:[%s12041_s7 + $0x90] sm:$0xf0] }
 0x11c   :  { %v9483_v45 = vsel %vm127_vm3, %v128_v42, %v126_v43  ;;  %v192_v42 = vsub.f32 %v174_v38, %v9518_v16  ;;  %v6531_v38 = vld [vmem:[%s12041_s7 + $0x38] sm:$0xf0] }
 0x11d   :  { %12086 = vst [vmem:[#allocation10_spill] sm:$0xff] %v9483_v45  ;;  %9167 = vrcp.f32 %v9483_v45  ;;  %v134_v46 = vsub.f32 1.5, %v133_v44  ;;  %v153_v56 = vand.u32 2147483648, %v9483_v45  ;;  %v151_v58 = vand.u32 2147483647, %v9483_v45 }
 0x11e   :  { %vm147_vm7 = vweird.f32 %v9483_v45  ;;  %v6574_v44 = vor.u32 %v8650_v39, %v6571_v40  ;;  %v6489_v40 = vld [vmem:[%s12039_s5 + $0x20] sm:$0xf] }
 0x11f   :  { %v135_v48 = vmul.f32 %v9166_v36, %v134_v46  ;;  %v154_v60 = vor.u32 1.1754944e-38, %v153_v56  ;;  %vm152_vm9 = vcmp.eq.f32.partialorder %v151_v58, 8.507059e+37  ;;  %v175_v36 = vld [vmem:[%s12035_s1 + $0x18] sm:$0xff]  ;;  %v6523_v56 = vld [vmem:[%s12041_s7 + $0x30] sm:$0xf0] }
 0x120   :  { %v193_v41 = vsub.f32 %v175_v36, %v9526_v20  ;;  %v6550_v36 = vor.u32 %v8643_v34, %v6547_v35  ;;  %v8644_v34 = vld [vmem:[%s12041_s7 + $0x4c] sm:$0xf0] }
 0x121   :  { %v136_v49 = vmul.f32 %v135_v48, %v117_v30  ;;  %v8646_v48 = vld [vmem:[%s12041_s7 + $0x64] sm:$0xf] }
 0x123   :  { %v9168_v50 = vpop.eup %9167  ;;  %v138_v53 = vsel %vm137_vm4, %v117_v30, %v136_v49  ;;  %v6622_v30 = vor.u32 %v8662_v28, %v6619_v29  ;;  %v6555_v49 = vld [vmem:[%s12041_s7 + $0x70] sm:$0xf0]  ;;  %v8629_v28 = vld [vmem:[%s12039_s5 + $0x14] sm:$0xf0] }
 0x124   :  { %v143_v52 = vmul.f32 %v9168_v50, %v9483_v45  ;;  %v9490_v54 = vsel %vm139_vm5, %v140_v51, %v138_v53  ;;  %vm148_vm6 = vweird.f32 %v9168_v50  ;;  %v8642_v51 = vld [vmem:[%s12041_s7 + $0x44] sm:$0xf] }
 0x125   :  { %12087 = vst [vmem:[#allocation11_spill] sm:$0xff] %v9490_v54  ;;  %9169 = vrcp.f32 %v9490_v54  ;;  %vm149_vm8 = vmor %vm147_vm7, %vm148_vm6  ;;  %v168_v2 = vand.u32 2147483648, %v9490_v54  ;;  %v166_v4 = vand.u32 2147483647, %v9490_v54  ;;  %vm162_vm11 = vweird.f32 %v9490_v54  ;;  %1014 = vmatpush.bf16.msrb.mxu0 %v6622_v30 }
 0x126   :  { %v144_v55 = vsub.f32 1.0, %v143_v52  ;;  %v6539_v52 = vld [vmem:[%s12041_s7 + $0x50] sm:$0xf0] }
 0x127   :  { %v169_v7 = vor.u32 1.1754944e-38, %v168_v2  ;;  %vm167_vm13 = vcmp.eq.f32.partialorder %v166_v4, 8.507059e+37  ;;  %v6542_v53 = vor.u32 %v8642_v51, %v6539_v52  ;;  %v179_v4 = vld [vmem:[%s12035_s1 + $0x38] sm:$0xff]  ;;  %v6443_v51 = vld [vmem:[%s12037_s3 + $0x30] sm:$0xf0] }
 0x128   :  { %v145_v57 = vmul.f32 %v9168_v50, %v144_v55  ;;  %v8638_v55 = vld [vmem:[%s12041_s7 + $0x24] sm:$0xf] }
 0x129   :  { %1015 = vmatpush.bf16.msrb.mxu0 %v6606_v33  ;;  %v6526_v58 = vor.u32 %v8638_v55, %v6523_v56  ;;  %v6566_v33 = vor.u32 %v8647_v31, %v6563_v32  ;;  %v8620_v55 = vld [vmem:[%s12037_s3 + $0xc] sm:$0xf0]  ;;  %v8618_v56 = vld [vmem:[%s12037_s3 + $0x4] sm:$0xf] }
 0x12a   :  { %v146_v59 = vadd.f32 %v9168_v50, %v145_v57  ;;  %v177_v57 = vld [vmem:[%s12035_s1 + $0x28] sm:$0xff] }
 0x12b   :  { %v9170_v61 = vpop.eup %9169 }
 0x12c   :  { %v150_v62 = vsel %vm149_vm8, %v9168_v50, %v146_v59  ;;  %v158_v0 = vmul.f32 %v9170_v61, %v9490_v54  ;;  %vm163_vm10 = vweird.f32 %v9170_v61  ;;  %v6558_v50 = vor.u32 %v8646_v48, %v6555_v49  ;;  %v176_v59 = vld [vmem:[%s12035_s1 + $0x20] sm:$0xff]  ;;  %v8624_v48 = vld [vmem:[%s12037_s3 + $0x2c] sm:$0xf0] }
 0x12d   :  { %v155_v63 = vsel %vm152_vm9, %v154_v60, %v150_v62  ;;  %vm164_vm12 = vmor %vm162_vm11, %vm163_vm10  ;;  %1016 = vmatpush.bf16.msrb.mxu0 %v6590_v37  ;;  %v8634_v60 = vld [vmem:[%s12041_s7 + $0x4] sm:$0xf]  ;;  %v195_v62 = vsub.f32 %v177_v57, %v9526_v20  ;;  %v8639_v37 = vld [vmem:[%s12041_s7 + $0x2c] sm:$0xf] }
 0x12e   :  { %200 = vperm.xlu0 %9157, %v155_v63   ;;  %v159_v1 = vsub.f32 1.0, %v158_v0  ;;  %v194_v63 = vsub.f32 %v176_v59, %v9518_v16  ;;  %v6534_v39 = vor.u32 %v8639_v37, %v6531_v38  ;;  %v8622_v49 = vld [vmem:[%s12037_s3 + $0x24] sm:$0xf]  ;;  %v6433_v37 = vld [vmem:[%s12037_s3 + $0x8] sm:$0xf] }
 0x12f   :  { %v6446_v52 = vor.u32 %v8622_v49, %v6443_v51  ;;  %v8621_v38 = vld [vmem:[%s12037_s3 + $0x14] sm:$0xf0]  ;;  %v6745_v51 = vld [vmem:[%s12041_s7 + $0x1e0] sm:$0xf] }
 0x130   :  { %v160_v3 = vmul.f32 %v9170_v61, %v159_v1 }
 0x131   :  { %1017 = vmatpush.bf16.msrb.mxu0 %v6574_v44  ;;  %395 = vmatpush.bf16.msra.mxu2 %v6446_v52  ;;  %v8696_v52 = vld [vmem:[%s12041_s7 + $0x1ec] sm:$0xf0] }
 0x132   :  { %v161_v6 = vadd.f32 %v9170_v61, %v160_v3 }
 0x134   :  { %v165_v8 = vsel %vm164_vm12, %v9170_v61, %v161_v6  ;;  %v6507_v61 = vld [vmem:[%s12041_s7 + $0x10] sm:$0xf0]  ;;  %v197_v6 = vsub.f32 %v179_v4, %v9526_v20  ;;  %v6611_v20 = vld [vmem:[%s12041_s7 + $0xd8] sm:$0xf0] }
 0x135   :  { %v170_v9 = vsel %vm167_vm13, %v169_v7, %v165_v8  ;;  %1018 = vmatpush.bf16.msrb.mxu0 %v6558_v50  ;;  %v6510_v1 = vor.u32 %v8634_v60, %v6507_v61  ;;  %v6497_v60 = vld [vmem:[%s12039_s5 + $0x30] sm:$0xf]  ;;  %v8633_v61 = vld [vmem:[%s12039_s5 + $0x34] sm:$0xf0] }
 0x136   :  { %593 = vperm.xlu0 %9157, %v555_v5   ;;  %205 = vperm.xlu1 %9158, %v170_v9   ;;  %v178_v5 = vld [vmem:[%s12035_s1 + $0x30] sm:$0xff] }
 0x137   :  { %v196_v7 = vsub.f32 %v178_v5, %v9518_v16  ;;  %v6627_v16 = vld [vmem:[%s12041_s7 + $0xf8] sm:$0xf0]  ;;  %v6601_v5 = vld [vmem:[%s12041_s7 + $0xc0] sm:$0xf] }
 0x138   :  { %v6630_v17 = vor.u32 %v8663_v15, %v6627_v16  ;;  %v8656_v15 = vld [vmem:[%s12041_s7 + $0xac] sm:$0xf0] }
 0x139   :  { %1019 = vmatpush.bf16.msrb.mxu0 %v6542_v53  ;;  %v6425_v53 = vld [vmem:[%s12037_s3] sm:$0xf] }
 0x13a   :  { %v6426_v57 = vor.u32 %v8620_v55, %v6425_v53  ;;  %v6746_v55 = vor.u32 %v8696_v52, %v6745_v51  ;;  %v8653_v51 = vld [vmem:[%s12041_s7 + $0x94] sm:$0xf0] }
 0x13d   :  { %1020 = vmatpush.bf16.msrb.mxu0 %v6526_v58  ;;  %v6427_v58 = vld [vmem:[%s12037_s3 + $0x10] sm:$0xf0] }
 0x13e   :  { %578 = vperm.xlu1 %9158, %v552_v10   ;;  %v6430_v59 = vor.u32 %v8618_v56, %v6427_v58  ;;  %v8692_v58 = vld [vmem:[%s12041_s7 + $0x1cc] sm:$0xf0] }
 0x140   :  { %396 = vmatpush.bf16.msra.mxu2 %v6430_v59  ;;  %v8694_v59 = vld [vmem:[%s12041_s7 + $0x1e4] sm:$0xf] }
 0x141   :  { %1021 = vmatpush.bf16.msrb.mxu0 %v6510_v1 }
 0x146   :  { %588 = vperm.xlu1 %9158, %v554_v11   ;;  %v6473_v11 = vld [vmem:[%s12039_s5] sm:$0xf] }
 0x147   :  { %v9612_v14 = vor.u32 %v8627_v12, %v6473_v11  ;;  %v6585_v11 = vld [vmem:[%s12041_s7 + $0xa0] sm:$0xf] }
 0x148   :  { %v6586_v16 = vor.u32 %v8656_v15, %v6585_v11  ;;  %v8682_v15 = vld [vmem:[%s12041_s7 + $0x184] sm:$0xf] }
 0x1a0   :  { %v201_v21 = vpop.permute.xlu0 %200 }
 0x1a1   :  { %v208_v25 = vmul.f32 %v201_v21, %v190_v22  ;;  %v210_v46 = vmul.f32 %v201_v21, %v192_v42  ;;  %v212_v2 = vmul.f32 %v201_v21, %v194_v63  ;;  %v214_v9 = vmul.f32 %v201_v21, %v196_v7  ;;  %v8655_v22 = vld [vmem:[%s12041_s7 + $0xac] sm:$0xf] }
 0x1a2   :  { %v6614_v21 = vor.u32 %v8659_v19, %v6611_v20  ;;  %v8635_v42 = vld [vmem:[%s12041_s7 + $0xc] sm:$0xf]  ;;  %v6435_v19 = vld [vmem:[%s12037_s3 + $0x18] sm:$0xf0]  ;;  %v6569_v20 = vld [vmem:[%s12041_s7 + $0x80] sm:$0xf] }
 0x1a8   :  { %v206_v24 = vpop.permute.xlu1 %205 }
 0x1a9   :  { %v209_v26 = vmul.f32 %v206_v24, %v191_v23  ;;  %v211_v43 = vmul.f32 %v206_v24, %v193_v41  ;;  %v213_v0 = vmul.f32 %v206_v24, %v195_v62  ;;  %v215_v8 = vmul.f32 %v206_v24, %v197_v6  ;;  %v6595_v23 = vld [vmem:[%s12041_s7 + $0xb8] sm:$0xf0]  ;;  %v8631_v41 = vld [vmem:[%s12039_s5 + $0x24] sm:$0xf0]  ;;  %v8660_v6 = vld [vmem:[%s12041_s7 + $0xcc] sm:$0xf0] }
 0x1aa   :  { %v6598_v24 = vor.u32 %v8655_v22, %v6595_v23  ;;  %v9678_v44 = vor.u32 %v8631_v41, %v6489_v40  ;;  %v9711_v62 = vor.u32 %v8633_v61, %v6497_v60  ;;  %v6602_v7 = vor.u32 %v8660_v6, %v6601_v5  ;;  %v8652_v22 = vld [vmem:[%s12041_s7 + $0x8c] sm:$0xf0]  ;;  %v6747_v60 = vld [vmem:[%s12041_s7 + $0x1f0] sm:$0xf0] }
 0x1ab   :  { %v216_v27 = vpack.c.bf16 %v209_v26, %v208_v25  ;;  %v217_v47 = vpack.c.bf16 %v211_v43, %v210_v46  ;;  %v218_v3 = vpack.c.bf16 %v213_v0, %v212_v2  ;;  %v219_v10 = vpack.c.bf16 %v215_v8, %v214_v9  ;;  %v8651_v25 = vld [vmem:[%s12041_s7 + $0x8c] sm:$0xf]  ;;  %v6579_v26 = vld [vmem:[%s12041_s7 + $0x98] sm:$0xf0]  ;;  %v6617_v2 = vld [vmem:[%s12041_s7 + $0xe0] sm:$0xf] }
 0x1ac   :  { %v6582_v29 = vor.u32 %v8651_v25, %v6579_v26  ;;  %v6515_v43 = vld [vmem:[%s12041_s7 + $0x18] sm:$0xf0]  ;;  %v8623_v9 = vld [vmem:[%s12037_s3 + $0x2c] sm:$0xf]  ;;  %v6553_v26 = vld [vmem:[%s12041_s7 + $0x60] sm:$0xf]  ;;  %v6434_v40 = vor.u32 %v8621_v38, %v6433_v37  ;;  %v6750_v61 = vor.u32 %v8694_v59, %v6747_v60 }
 0x1ad   :  { %6419 = vmatmul.msk.bf16.vlgmr.msra.gmra.mxu0 %vm244_vm14, %v216_v27  ;;  %v6481_v27 = vld [vmem:[%s12039_s5 + $0x10] sm:$0xf]  ;;  %v6518_v46 = vor.u32 %v8635_v42, %v6515_v43  ;;  %v6505_v43 = vld [vmem:[%s12041_s7] sm:$0xf]  ;;  %v8670_v37 = vld [vmem:[%s12041_s7 + $0x124] sm:$0xf] }
 0x1ae   :  { %1130 = vmatpush.bf16.msra.mxu0 %v6630_v17  ;;  %v9645_v30 = vor.u32 %v8629_v28, %v6481_v27  ;;  %v8619_v17 = vld [vmem:[%s12037_s3 + $0xc] sm:$0xf]  ;;  %v8648_v27 = vld [vmem:[%s12041_s7 + $0x6c] sm:$0xf0]  ;;  %v6449_v28 = vld [vmem:[%s12037_s3 + $0x28] sm:$0xf] }
 0x1af   :  { %v6554_v31 = vor.u32 %v8648_v27, %v6553_v26  ;;  %v8640_v41 = vld [vmem:[%s12041_s7 + $0x2c] sm:$0xf0] }
 0x1b0   :  { %v8680_v26 = vld [vmem:[%s12041_s7 + $0x16c] sm:$0xf0] }
 0x1b2   :  { %1131 = vmatpush.bf16.msra.mxu0 %v6614_v21  ;;  %v6438_v21 = vor.u32 %v8619_v17, %v6435_v19  ;;  %v8678_v19 = vld [vmem:[%s12041_s7 + $0x164] sm:$0xf] }
 0x1b6   :  { %1132 = vmatpush.bf16.msra.mxu0 %v6598_v24  ;;  %v6570_v24 = vor.u32 %v8652_v22, %v6569_v20  ;;  %v6683_v20 = vld [vmem:[%s12041_s7 + $0x170] sm:$0xf0] }
 0x1b7   :  { %v6686_v22 = vor.u32 %v8678_v19, %v6683_v20  ;;  %v6475_v19 = vld [vmem:[%s12039_s5 + $0x8] sm:$0xf0] }
 0x1ba   :  { %1133 = vmatpush.bf16.msra.mxu0 %v6582_v29  ;;  %v8625_v29 = vld [vmem:[%s12037_s3 + $0x34] sm:$0xf0] }
 0x1bb   :  { %v6450_v32 = vor.u32 %v8625_v29, %v6449_v28  ;;  %v8674_v28 = vld [vmem:[%s12041_s7 + $0x144] sm:$0xf]  ;;  %v6667_v29 = vld [vmem:[%s12041_s7 + $0x150] sm:$0xf0] }
 0x1bd   :  { %6420 = vmatmul.msk.bf16.gmra.mxu0 %vm244_vm14, %v217_v47  ;;  %v6441_v47 = vld [vmem:[%s12037_s3 + $0x20] sm:$0xf] }
 0x1be   :  { %1134 = vmatpush.bf16.msra.mxu0 %v6566_v33  ;;  %v6442_v50 = vor.u32 %v8624_v48, %v6441_v47  ;;  %v6537_v33 = vld [vmem:[%s12041_s7 + $0x40] sm:$0xf] }
 0x1bf   :  { %v6538_v35 = vor.u32 %v8644_v34, %v6537_v33  ;;  %v8661_v33 = vld [vmem:[%s12041_s7 + $0xd4] sm:$0xf0] }
 0x1c0   :  { %366 = vmatpush.bf16.msra.mxu1 %v6442_v50  ;;  %9146 = vmatpush.bf16.msra.mxu3 %v6442_v50 }
 0x1c2   :  { %1135 = vmatpush.bf16.msra.mxu0 %v6550_v36 }
 0x1c4   :  { %367 = vmatpush.bf16.msra.mxu1 %v6426_v57  ;;  %9147 = vmatpush.bf16.msra.mxu3 %v6426_v57  ;;  %v6729_v57 = vld [vmem:[%s12041_s7 + $0x1c0] sm:$0xf] }
 0x1c6   :  { %1136 = vmatpush.bf16.msra.mxu0 %v6534_v39  ;;  %v6521_v39 = vld [vmem:[%s12041_s7 + $0x20] sm:$0xf] }
 0x1c7   :  { %v6522_v42 = vor.u32 %v8640_v41, %v6521_v39  ;;  %v6651_v39 = vld [vmem:[%s12041_s7 + $0x130] sm:$0xf0]  ;;  %v8657_v41 = vld [vmem:[%s12041_s7 + $0xb4] sm:$0xf0] }
 0x1c8   :  { %424 = vmatpush.bf16.msrb.mxu3 %v6450_v32  ;;  %v6670_v32 = vor.u32 %v8674_v28, %v6667_v29  ;;  %v8687_v29 = vld [vmem:[%s12041_s7 + $0x1ac] sm:$0xf] }
 0x1ca   :  { %1137 = vmatpush.bf16.msra.mxu0 %v6518_v46  ;;  %v8636_v46 = vld [vmem:[%s12041_s7 + $0xc] sm:$0xf0] }
 0x1cb   :  { %v6506_v47 = vor.u32 %v8636_v46, %v6505_v43  ;;  %v8666_v46 = vld [vmem:[%s12041_s7 + $0x104] sm:$0xf] }
 0x1cc   :  { %425 = vmatpush.bf16.msrb.mxu3 %v6434_v40  ;;  %v6593_v40 = vld [vmem:[%s12041_s7 + $0xa8] sm:$0xf] }
 0x1cd   :  { %6421 = vmatmul.msk.bf16.gmra.mxu0 %vm244_vm14, %v218_v3  ;;  %v8664_v3 = vld [vmem:[%s12041_s7 + $0xec] sm:$0xf0]  ;;  %v6594_v43 = vor.u32 %v8657_v41, %v6593_v40 }
 0x1ce   :  { %v6618_v4 = vor.u32 %v8664_v3, %v6617_v2  ;;  %v8688_v2 = vld [vmem:[%s12041_s7 + $0x1ac] sm:$0xf0]  ;;  %v8690_v3 = vld [vmem:[%s12041_s7 + $0x1c4] sm:$0xf] }
 0x1d0   :  { %956 = vmatpush.bf16.msrb.mxu2 %v6618_v4  ;;  %v6731_v4 = vld [vmem:[%s12041_s7 + $0x1d0] sm:$0xf0] }
 0x1d1   :  { %v6734_v5 = vor.u32 %v8690_v3, %v6731_v4  ;;  %v6529_v3 = vld [vmem:[%s12041_s7 + $0x28] sm:$0xf] }
 0x1d4   :  { %957 = vmatpush.bf16.msrb.mxu2 %v6602_v7  ;;  %v6697_v7 = vld [vmem:[%s12041_s7 + $0x180] sm:$0xf] }
 0x1d8   :  { %958 = vmatpush.bf16.msrb.mxu2 %v6586_v16  ;;  %v6699_v16 = vld [vmem:[%s12041_s7 + $0x190] sm:$0xf0] }
 0x1d9   :  { %v6702_v17 = vor.u32 %v8682_v15, %v6699_v16  ;;  %v6737_v15 = vld [vmem:[%s12041_s7 + $0x1c8] sm:$0xf] }
 0x1dc   :  { %959 = vmatpush.bf16.msrb.mxu2 %v6570_v24  ;;  %v6681_v24 = vld [vmem:[%s12041_s7 + $0x160] sm:$0xf] }
 0x1dd   :  { %6422 = vmatmul.msk.bf16.gmra.mxu0 %vm244_vm14, %v219_v10  ;;  %v6451_v10 = vld [vmem:[%s12037_s3 + $0x38] sm:$0xf0] }
 0x1de   :  { %v6454_v12 = vor.u32 %v8623_v9, %v6451_v10  ;;  %v8686_v9 = vld [vmem:[%s12041_s7 + $0x1a4] sm:$0xf]  ;;  %v6715_v10 = vld [vmem:[%s12041_s7 + $0x1b0] sm:$0xf0] }
 0x1df   :  { %v6718_v11 = vor.u32 %v8686_v9, %v6715_v10  ;;  %v6753_v10 = vld [vmem:[%s12041_s7 + $0x1e8] sm:$0xf] }
 0x1e0   :  { %453 = vmatpush.bf16.msrb.mxu1 %v6454_v12  ;;  %960 = vmatpush.bf16.msrb.mxu2 %v6554_v31  ;;  %v6609_v31 = vld [vmem:[%s12041_s7 + $0xc8] sm:$0xf] }
 0x1e1   :  { %v6610_v34 = vor.u32 %v8661_v33, %v6609_v31  ;;  %v6723_v31 = vld [vmem:[%s12041_s7 + $0x1b8] sm:$0xf0]  ;;  %v8685_v33 = vld [vmem:[%s12041_s7 + $0x194] sm:$0xf0] }
 0x1e4   :  { %454 = vmatpush.bf16.msrb.mxu1 %v6438_v21  ;;  %961 = vmatpush.bf16.msrb.mxu2 %v6538_v35  ;;  %v6625_v21 = vld [vmem:[%s12041_s7 + $0xe8] sm:$0xf]  ;;  %v6665_v35 = vld [vmem:[%s12041_s7 + $0x140] sm:$0xf] }
 0x1e8   :  { %962 = vmatpush.bf16.msrb.mxu2 %v6522_v42  ;;  %v6654_v42 = vor.u32 %v8670_v37, %v6651_v39  ;;  %v6483_v37 = vld [vmem:[%s12039_s5 + $0x18] sm:$0xf0] }
 0x1e9   :  { %v6707_v39 = vld [vmem:[%s12041_s7 + $0x198] sm:$0xf0] }
 0x1ec   :  { %963 = vmatpush.bf16.msrb.mxu2 %v6506_v47  ;;  %v6635_v47 = vld [vmem:[%s12041_s7 + $0x110] sm:$0xf0] }
 0x1ed   :  { %1022 = vmatmul.bf16.vlgmr.msrb.gmra.mxu0 %v9612_v14 }
 0x1fd   :  { %1027 = vmatmul.bf16.gmra.mxu0 %v9645_v30 }
 0x20d   :  { %1032 = vmatmul.bf16.gmra.mxu0 %v9678_v44 }
 0x21d   :  { %1037 = vmatmul.bf16.gmra.mxu0 %v9711_v62 }
 0x22a   :  { %v266_v63 = vpop.f32.mrf.mxu0 }
 0x22d   :  { %1138 = vmatmul.bf16.vlgmr.msra.gmra.mxu0 %v9612_v14 }
 0x232   :  { %v268_v0 = vpop.f32.mrf.mxu0 }
 0x233   :  { %v9715_v1 = vpack.c.bf16 %v268_v0, %v266_v63  ;;  %v6730_v63 = vor.u32 %v8692_v58, %v6729_v57  ;;  %v6713_v0 = vld [vmem:[%s12041_s7 + $0x1a0] sm:$0xf]  ;;  %v8672_v58 = vld [vmem:[%s12041_s7 + $0x12c] sm:$0xf0] }
 0x234   :  { %v6714_v6 = vor.u32 %v8688_v2, %v6713_v0  ;;  %v6649_v57 = vld [vmem:[%s12041_s7 + $0x120] sm:$0xf]  ;;  %v8668_v2 = vld [vmem:[%s12041_s7 + $0x10c] sm:$0xf0] }
 0x235   :  { %6455 = vmatmul.msk.bf16.vlgmr.msra.gmra.mxu1 %vm88_vm0, %v9715_v1  ;;  %6459 = vmatmul.msk.bf16.vlgmr.msra.gmra.mxu2 %vm88_vm0, %v9715_v1  ;;  %v6650_v60 = vor.u32 %v8672_v58, %v6649_v57  ;;  %v6633_v0 = vld [vmem:[%s12041_s7 + $0x100] sm:$0xf] }
 0x236   :  { %1043 = vmatpush.bf16.msra.mxu1 %v6750_v61  ;;  %v6545_v61 = vld [vmem:[%s12041_s7 + $0x48] sm:$0xf]  ;;  %v6634_v4 = vor.u32 %v8668_v2, %v6633_v0  ;;  %v8677_v2 = vld [vmem:[%s12041_s7 + $0x154] sm:$0xf0] }
 0x237   :  { %v6673_v0 = vld [vmem:[%s12041_s7 + $0x148] sm:$0xf] }
 0x23a   :  { %v271_v8 = vpop.f32.mrf.mxu0  ;;  %1044 = vmatpush.bf16.msra.mxu1 %v6734_v5  ;;  %v8641_v5 = vld [vmem:[%s12041_s7 + $0x34] sm:$0xf0] }
 0x23d   :  { %1143 = vmatmul.bf16.gmra.mxu0 %v9645_v30 }
 0x23e   :  { %1045 = vmatpush.bf16.msra.mxu1 %v6718_v11  ;;  %v8697_v11 = vld [vmem:[%s12041_s7 + $0x1f4] sm:$0xf0] }
 0x242   :  { %v273_v23 = vpop.f32.mrf.mxu0  ;;  %1046 = vmatpush.bf16.msra.mxu1 %v6702_v17  ;;  %v8626_v17 = vld [vmem:[%s12039_s5 + $0x4] sm:$0xf] }
 0x243   :  { %v9758_v25 = vpack.c.bf16 %v273_v23, %v271_v8  ;;  %v8684_v8 = vld [vmem:[%s12041_s7 + $0x18c] sm:$0xf0]  ;;  %v8665_v23 = vld [vmem:[%s12041_s7 + $0xf4] sm:$0xf0]  ;;  %v9993_v20 = vor.u32 %v8626_v17, %v6475_v19 }
 0x244   :  { %v6698_v12 = vor.u32 %v8684_v8, %v6697_v7  ;;  %v6626_v27 = vor.u32 %v8665_v23, %v6625_v21  ;;  %v6513_v7 = vld [vmem:[%s12041_s7 + $0x8] sm:$0xf]  ;;  %v8637_v8 = vld [vmem:[%s12041_s7 + $0x14] sm:$0xf0]  ;;  %v8695_v21 = vld [vmem:[%s12041_s7 + $0x1ec] sm:$0xf] }
 0x245   :  { %6456 = vmatmul.msk.bf16.gmra.mxu1 %vm88_vm0, %v9758_v25  ;;  %6460 = vmatmul.msk.bf16.gmra.mxu2 %vm88_vm0, %v9758_v25  ;;  %v6514_v9 = vor.u32 %v8637_v8, %v6513_v7  ;;  %v8667_v7 = vld [vmem:[%s12041_s7 + $0x10c] sm:$0xf]  ;;  %v6643_v8 = vld [vmem:[%s12041_s7 + $0x118] sm:$0xf0] }
 0x246   :  { %1047 = vmatpush.bf16.msra.mxu1 %v6686_v22  ;;  %1072 = vmatpush.bf16.msra.mxu2 %v6626_v27  ;;  %v6755_v22 = vld [vmem:[%s12041_s7 + $0x1f8] sm:$0xf0] }
 0x247   :  { %v6758_v23 = vor.u32 %v8695_v21, %v6755_v22  ;;  %v6641_v22 = vld [vmem:[%s12041_s7 + $0x108] sm:$0xf]  ;;  %v8942_v21 = vld [vmem:[#allocation2 + $0x79c] sm:$0xf0] }
 0x24a   :  { %v276_v36 = vpop.f32.mrf.mxu0  ;;  %1048 = vmatpush.bf16.msra.mxu1 %v6670_v32  ;;  %1073 = vmatpush.bf16.msra.mxu2 %v6610_v34  ;;  %v6705_v32 = vld [vmem:[%s12041_s7 + $0x188] sm:$0xf]  ;;  %v6726_v34 = vor.u32 %v8687_v29, %v6723_v31 }
 0x24d   :  { %1148 = vmatmul.bf16.gmra.mxu0 %v9678_v44 }
 0x24e   :  { %1049 = vmatpush.bf16.msra.mxu1 %v6654_v42  ;;  %1074 = vmatpush.bf16.msra.mxu2 %v6594_v43  ;;  %v10046_v43 = vld [vmem:[%s12038_s4] sm:$0xf] }
 0x252   :  { %v278_v48 = vpop.f32.mrf.mxu0 }
 0x253   :  { %v9801_v49 = vpack.c.bf16 %v278_v48, %v276_v36  ;;  %v8676_v36 = vld [vmem:[%s12041_s7 + $0x14c] sm:$0xf0]  ;;  %v6577_v48 = vld [vmem:[%s12041_s7 + $0x88] sm:$0xf] }
 0x254   :  { %v6666_v38 = vor.u32 %v8676_v36, %v6665_v35  ;;  %v6578_v52 = vor.u32 %v8653_v51, %v6577_v48  ;;  %v6706_v35 = vor.u32 %v8685_v33, %v6705_v32  ;;  %v8628_v36 = vld [vmem:[%s12039_s5 + $0x14] sm:$0xf]  ;;  %v8681_v51 = vld [vmem:[%s12041_s7 + $0x174] sm:$0xf0] }
 0x255   :  { %6457 = vmatmul.msk.bf16.gmra.mxu1 %vm88_vm0, %v9801_v49  ;;  %6461 = vmatmul.msk.bf16.gmra.mxu2 %vm88_vm0, %v9801_v49  ;;  %v10041_v42 = vor.u32 %v8628_v36, %v6483_v37 }
 0x256   :  { %1075 = vmatpush.bf16.msra.mxu2 %v6578_v52  ;;  %v10064_v52 = vperm.slane %v10046_v43, 0 }
 0x25a   :  { %v281_v50 = vpop.f32.mrf.mxu0 }
 0x25d   :  { %1153 = vmatmul.bf16.gmra.mxu0 %v9711_v62 }
 0x262   :  { %v283_v53 = vpop.f32.mrf.mxu0 }
 0x263   :  { %v9814_v56 = vpack.c.bf16 %v283_v53, %v281_v50  ;;  %v6638_v50 = vor.u32 %v8666_v46, %v6635_v47  ;;  %v6561_v53 = vld [vmem:[%s12041_s7 + $0x68] sm:$0xf]  ;;  %v8679_v46 = vld [vmem:[%s12041_s7 + $0x16c] sm:$0xf]  ;;  %v6691_v47 = vld [vmem:[%s12041_s7 + $0x178] sm:$0xf0] }
 0x264   :  { %v6694_v48 = vor.u32 %v8679_v46, %v6691_v47 }
 0x265   :  { %6458 = vmatmul.msk.bf16.vlgmr.msra.gmra.mxu3 %vm88_vm0, %v9814_v56  ;;  %6462 = vmatmul.msk.bf16.gmra.mxu2 %vm88_vm0, %v9814_v56 }
 0x266   :  { %6467 = vmatmul.msk.bf16.vlgmr.msrb.gmra.mxu1 %vm88_vm0, %v9715_v1  ;;  %985 = vmatpush.bf16.msra.mxu3 %v6746_v55  ;;  %v8649_v55 = vld [vmem:[%s12041_s7 + $0x74] sm:$0xf0] }
 0x267   :  { %1050 = vmatpush.bf16.msra.mxu1 %v6638_v50  ;;  %v6562_v59 = vor.u32 %v8649_v55, %v6561_v53  ;;  %v6689_v50 = vld [vmem:[%s12041_s7 + $0x168] sm:$0xf]  ;;  %v6675_v55 = vld [vmem:[%s12041_s7 + $0x158] sm:$0xf0] }
 0x268   :  { %v6690_v53 = vor.u32 %v8681_v51, %v6689_v50 }
 0x269   :  { %1076 = vmatpush.bf16.msra.mxu2 %v6562_v59 }
 0x26a   :  { %986 = vmatpush.bf16.msra.mxu3 %v6730_v63 }
 0x26b   :  { %1159 = vmatpush.bf16.msrb.mxu1 %v6758_v23  ;;  %v8669_v23 = vld [vmem:[%s12041_s7 + $0x114] sm:$0xf0] }
 0x26e   :  { %987 = vmatpush.bf16.msra.mxu3 %v6714_v6  ;;  %v6530_v6 = vor.u32 %v8641_v5, %v6529_v3  ;;  %v8630_v5 = vld [vmem:[%s12039_s5 + $0x24] sm:$0xf] }
 0x272   :  { %988 = vmatpush.bf16.msra.mxu3 %v6698_v12  ;;  %v6754_v12 = vor.u32 %v8697_v11, %v6753_v10 }
 0x275   :  { %6463 = vmatmul.msk.bf16.vlgmr.msrb.gmra.mxu3 %vm88_vm0, %v9715_v1  ;;  %964 = vmatmul.bf16.vlgmr.msrb.gmra.mxu2 %v9612_v14  ;;  %v6682_v1 = vor.u32 %v8680_v26, %v6681_v24  ;;  %v6721_v24 = vld [vmem:[%s12041_s7 + $0x1a8] sm:$0xf]  ;;  %v8689_v26 = vld [vmem:[%s12041_s7 + $0x1b4] sm:$0xf0] }
 0x276   :  { %6468 = vmatmul.msk.bf16.gmra.mxu1 %vm88_vm0, %v9758_v25  ;;  %v6722_v27 = vor.u32 %v8689_v26, %v6721_v24  ;;  %v8632_v24 = vld [vmem:[%s12039_s5 + $0x34] sm:$0xf]  ;;  %v6499_v26 = vld [vmem:[%s12039_s5 + $0x38] sm:$0xf0] }
 0x277   :  { %989 = vmatpush.bf16.msra.mxu3 %v6682_v1  ;;  %v8691_v1 = vld [vmem:[%s12041_s7 + $0x1cc] sm:$0xf] }
 0x27b   :  { %990 = vmatpush.bf16.msra.mxu3 %v6666_v38  ;;  %v8683_v38 = vld [vmem:[%s12041_s7 + $0x18c] sm:$0xf] }
 0x27c   :  { %v6710_v40 = vor.u32 %v8683_v38, %v6707_v39 }
 0x27f   :  { %991 = vmatpush.bf16.msra.mxu3 %v6650_v60 }
 0x283   :  { %992 = vmatpush.bf16.msra.mxu3 %v6634_v4  ;;  %v6674_v4 = vor.u32 %v8677_v2, %v6673_v0  ;;  %v8758_v2 = vld [vmem:[#allocation2 + $0x1dc] sm:$0xf0] }
 0x285   :  { %6464 = vmatmul.msk.bf16.gmra.mxu3 %vm88_vm0, %v9758_v25  ;;  %969 = vmatmul.bf16.gmra.mxu2 %v9645_v30  ;;  %v8645_v25 = vld [vmem:[%s12041_s7 + $0x54] sm:$0xf0] }
 0x286   :  { %6469 = vmatmul.msk.bf16.gmra.mxu1 %vm88_vm0, %v9801_v49  ;;  %v6546_v63 = vor.u32 %v8645_v25, %v6545_v61  ;;  %v8671_v61 = vld [vmem:[%s12041_s7 + $0x12c] sm:$0xf]  ;;  %v6659_v25 = vld [vmem:[%s12041_s7 + $0x138] sm:$0xf0] }
 0x287   :  { %1101 = vmatpush.bf16.msrb.mxu3 %v6754_v12  ;;  %v6662_v3 = vor.u32 %v8671_v61, %v6659_v25  ;;  %v6657_v12 = vld [vmem:[%s12041_s7 + $0x128] sm:$0xf]  ;;  %v8806_v61 = vld [vmem:[#allocation2 + $0x35c] sm:$0xf0]  ;;  %v10182_v25 = vperm.slane %v10046_v43, 2 }
 0x288   :  { %1077 = vmatpush.bf16.msra.mxu2 %v6546_v63 }
 0x28c   :  { %1078 = vmatpush.bf16.msra.mxu2 %v6530_v6  ;;  %v6491_v6 = vld [vmem:[%s12039_s5 + $0x28] sm:$0xf0] }
 0x28d   :  { %v10104_v11 = vor.u32 %v8630_v5, %v6491_v6  ;;  %v7145_v5 = vld [vmem:[#allocation2 + $0x300] sm:$0xf] }
 0x28e   :  { %v8798_v6 = vld [vmem:[#allocation2 + $0x31c] sm:$0xf0] }
 0x290   :  { %1079 = vmatpush.bf16.msra.mxu2 %v6514_v9  ;;  %v6646_v9 = vor.u32 %v8667_v7, %v6643_v8  ;;  %v10184_v7 = vpop.f32.mrf.mxu0 }
 0x295   :  { %6465 = vmatmul.msk.bf16.gmra.mxu3 %vm88_vm0, %v9801_v49  ;;  %974 = vmatmul.bf16.gmra.mxu2 %v9678_v44  ;;  %v8693_v49 = vld [vmem:[%s12041_s7 + $0x1d4] sm:$0xf0] }
 0x296   :  { %6470 = vmatmul.msk.bf16.gmra.mxu1 %vm88_vm0, %v9814_v56  ;;  %v6738_v16 = vor.u32 %v8693_v49, %v6737_v15  ;;  %v8673_v15 = vld [vmem:[%s12041_s7 + $0x134] sm:$0xf0] }
 0x298   :  { %1102 = vmatpush.bf16.msrb.mxu3 %v6738_v16  ;;  %v6658_v16 = vor.u32 %v8673_v15, %v6657_v12 }
 0x29c   :  { %1103 = vmatpush.bf16.msrb.mxu3 %v6722_v27  ;;  %v6642_v27 = vor.u32 %v8669_v23, %v6641_v22  ;;  %v6953_v23 = vld [vmem:[#allocation2 + $0x180] sm:$0xf] }
 0x2a0   :  { %1104 = vmatpush.bf16.msrb.mxu3 %v6706_v35 }
 0x2a4   :  { %1105 = vmatpush.bf16.msrb.mxu3 %v6690_v53 }
 0x2a5   :  { %6466 = vmatmul.msk.bf16.gmra.mxu3 %vm88_vm0, %v9814_v56  ;;  %979 = vmatmul.bf16.gmra.mxu2 %v9711_v62  ;;  %v6739_v56 = vld [vmem:[%s12041_s7 + $0x1d8] sm:$0xf0]  ;;  %vm6398_vm0 = vcmask 130048  }
 0x2a6   :  { %1051 = vmatmul.bf16.vlgmr.msra.gmra.mxu1 %v9993_v20  ;;  %v6742_v28 = vor.u32 %v8691_v1, %v6739_v56 }
 0x2a8   :  { %1160 = vmatpush.bf16.msrb.mxu1 %v6742_v28  ;;  %1106 = vmatpush.bf16.msrb.mxu3 %v6674_v4  ;;  %v10139_v28 = vor.u32 %v8632_v24, %v6499_v26  ;;  %v8750_v24 = vld [vmem:[#allocation2 + $0x19c] sm:$0xf0] }
 0x2a9   :  { %v6954_v26 = vor.u32 %v8750_v24, %v6953_v23 }
 0x2ac   :  { %1161 = vmatpush.bf16.msrb.mxu1 %v6726_v34  ;;  %1107 = vmatpush.bf16.msrb.mxu3 %v6658_v16  ;;  %v7113_v16 = vld [vmem:[#allocation2 + $0x2c0] sm:$0xf] }
 0x2ad   :  { %v7721_v34 = vld [vmem:[#allocation2 + $0x780] sm:$0xf] }
 0x2b0   :  { %1162 = vmatpush.bf16.msrb.mxu1 %v6710_v40  ;;  %1108 = vmatpush.bf16.msrb.mxu3 %v6642_v27 }
 0x2b2   :  { %v369_v41 = vpop.f32.mrf.mxu1 }
 0x2b3   :  { %v10073_v59 = vadd.f32 %v369_v41, %v10064_v52 }
 0x2b4   :  { %1163 = vmatpush.bf16.msrb.mxu1 %v6694_v48  ;;  %v8822_v48 = vld [vmem:[#allocation2 + $0x3dc] sm:$0xf0] }
 0x2b5   :  { %993 = vmatmul.bf16.vlgmr.msra.gmra.mxu3 %v9993_v20  ;;  %1080 = vmatmul.bf16.vlgmr.msra.gmra.mxu2 %v9612_v14  ;;  %v8675_v14 = vld [vmem:[%s12041_s7 + $0x14c] sm:$0xf]  ;;  %12088 = vst [vmem:[#allocation12_spill] sm:$0xff] %v10073_v59  ;;  %v6881_v59 = vld [vmem:[#allocation2 + $0xd8] sm:$0xf] }
 0x2b6   :  { %1056 = vmatmul.bf16.gmra.mxu1 %v10041_v42  ;;  %v6678_v57 = vor.u32 %v8675_v14, %v6675_v55  ;;  %v7209_v14 = vld [vmem:[#allocation2 + $0x380] sm:$0xf] }
 0x2b7   :  { %v8814_v55 = vld [vmem:[#allocation2 + $0x39c] sm:$0xf0] }
 0x2b8   :  { %1164 = vmatpush.bf16.msrb.mxu1 %v6678_v57  ;;  %v10114_v49 = vpop.f32.mrf.mxu2 }
 0x2b9   :  { %12090 = vst [vmem:[#allocation14_spill] sm:$0xff] %v10114_v49  ;;  %v7417_v49 = vld [vmem:[#allocation2 + $0x510] sm:$0xf] }
 0x2ba   :  { %v371_v58 = vpop.f32.mrf.mxu1 }
 0x2bb   :  { %v10076_v60 = vadd.f32 %v371_v58, %v10064_v52  ;;  %v7177_v58 = vld [vmem:[#allocation2 + $0x340] sm:$0xf] }
 0x2bc   :  { %1165 = vmatpush.bf16.msrb.mxu1 %v6662_v3  ;;  %v7178_v0 = vor.u32 %v8806_v61, %v7177_v58  ;;  %v6889_v61 = vld [vmem:[#allocation2 + $0x100] sm:$0xf] }
 0x2bd   :  { %12089 = vst [vmem:[#allocation13_spill] sm:$0xff] %v10076_v60 }
 0x2c0   :  { %1166 = vmatpush.bf16.msrb.mxu1 %v6646_v9  ;;  %v10137_v1 = vpop.f32.mrf.mxu2 }
 0x2c1   :  { %12093 = vst [vmem:[#allocation17_spill] sm:$0xff] %v10137_v1  ;;  %v8920_v1 = vld [vmem:[#allocation2 + $0x6ec] sm:$0xf0] }
 0x2c2   :  { %v374_v10 = vpop.f32.mrf.mxu1 }
 0x2c3   :  { %v10118_v19 = vadd.f32 %v374_v10, %v10064_v52  ;;  %v7146_v10 = vor.u32 %v8798_v6, %v7145_v5  ;;  %v8766_v5 = vld [vmem:[#allocation2 + $0x21c] sm:$0xf0] }
 0x2c5   :  { %998 = vmatmul.bf16.gmra.mxu3 %v10041_v42  ;;  %1085 = vmatmul.bf16.gmra.mxu2 %v9645_v30  ;;  %12091 = vst [vmem:[#allocation15_spill] sm:$0xff] %v10118_v19 }
 0x2c6   :  { %1061 = vmatmul.bf16.gmra.mxu1 %v10104_v11 }
 0x2c8   :  { %v10144_v29 = vpop.f32.mrf.mxu2 }
 0x2c9   :  { %12094 = vst [vmem:[#allocation18_spill] sm:$0xff] %v10144_v29  ;;  %v8952_v29 = vld [vmem:[#allocation2 + $0x7ec] sm:$0xf0] }
 0x2ca   :  { %v376_v17 = vpop.f32.mrf.mxu1 }
 0x2cb   :  { %v10121_v30 = vadd.f32 %v376_v17, %v10064_v52  ;;  %v8790_v17 = vld [vmem:[#allocation2 + $0x2dc] sm:$0xf0] }
 0x2cc   :  { %v7114_v22 = vor.u32 %v8790_v17, %v7113_v16  ;;  %v6857_v17 = vld [vmem:[#allocation2 + $0xc0] sm:$0xf] }
 0x2cd   :  { %12092 = vst [vmem:[#allocation16_spill] sm:$0xff] %v10121_v30 }
 0x2d0   :  { %v10156_v36 = vpop.f32.mrf.mxu2 }
 0x2d1   :  { %12098 = vst [vmem:[#allocation22_spill] sm:$0xff] %v10156_v36 }
 0x2d2   :  { %v379_v56 = vpop.f32.mrf.mxu1 }
 0x2d3   :  { %v10147_v32 = vadd.f32 %v379_v56, %v10064_v52  ;;  %v7081_v56 = vld [vmem:[#allocation2 + $0x280] sm:$0xf] }
 0x2d5   :  { %1003 = vmatmul.bf16.gmra.mxu3 %v10104_v11  ;;  %1090 = vmatmul.bf16.gmra.mxu2 %v9678_v44  ;;  %12095 = vst [vmem:[#allocation19_spill] sm:$0xff] %v10147_v32  ;;  %v8948_v32 = vld [vmem:[#allocation2 + $0x7d4] sm:$0xf] }
 0x2d6   :  { %1066 = vmatmul.bf16.gmra.mxu1 %v10139_v28 }
 0x2d8   :  { %v10163_v38 = vpop.f32.mrf.mxu2 }
 0x2d9   :  { %12100 = vst [vmem:[#allocation24_spill] sm:$0xff] %v10163_v38  ;;  %v7411_v38 = vld [vmem:[#allocation2 + $0x528] sm:$0xf0] }
 0x2da   :  { %v381_v31 = vpop.f32.mrf.mxu1 }
 0x2db   :  { %v10150_v33 = vadd.f32 %v381_v31, %v10064_v52  ;;  %v8782_v31 = vld [vmem:[#allocation2 + $0x29c] sm:$0xf0] }
 0x2dd   :  { %12096 = vst [vmem:[#allocation20_spill] sm:$0xff] %v10150_v33 }
 0x2e0   :  { %v10177_v51 = vpop.f32.mrf.mxu2 }
 0x2e1   :  { %12104 = vst [vmem:[#allocation28_spill] sm:$0xff] %v10177_v51  ;;  %v8915_v51 = vld [vmem:[#allocation2 + $0x6cc] sm:$0xf] }
 0x2e3   :  { %v10154_v35 = vpop.f32.mrf.mxu1 }
 0x2e4   :  { %12097 = vst [vmem:[#allocation21_spill] sm:$0xff] %v10154_v35 }
 0x2e5   :  { %1008 = vmatmul.bf16.gmra.mxu3 %v10139_v28  ;;  %1095 = vmatmul.bf16.gmra.mxu2 %v9711_v62  ;;  %v7241_v62 = vld [vmem:[#allocation2 + $0x3c0] sm:$0xf] }
 0x2e6   :  { %1167 = vmatmul.bf16.vlgmr.msrb.gmra.mxu1 %v9993_v20  ;;  %v7242_v50 = vor.u32 %v8822_v48, %v7241_v62 }
 0x2e8   :  { %v384_v44 = vpop.f32.mrf.mxu3  ;;  %2787 = vmatpush.bf16.msra.mxu3 %v7242_v50  ;;  %v10192_v43 = vpop.f32.mrf.mxu2  ;;  %v8742_v50 = vld [vmem:[#allocation2 + $0x15c] sm:$0xf0] }
 0x2e9   :  { %v10166_v40 = vadd.f32 %v384_v44, %v10064_v52  ;;  %12108 = vst [vmem:[#allocation32_spill] sm:$0xff] %v10192_v43  ;;  %v7082_v44 = vor.u32 %v8782_v31, %v7081_v56  ;;  %v6825_v56 = vld [vmem:[#allocation2 + $0x80] sm:$0xf] }
 0x2ea   :  { %v8718_v31 = vld [vmem:[#allocation2 + $0x9c] sm:$0xf0] }
 0x2eb   :  { %v10161_v37 = vpop.f32.mrf.mxu1  ;;  %12101 = vst [vmem:[#allocation25_spill] sm:$0xff] %v10166_v40 }
 0x2ec   :  { %12099 = vst [vmem:[#allocation23_spill] sm:$0xff] %v10161_v37 }
 0x2f0   :  { %v386_v39 = vpop.f32.mrf.mxu3  ;;  %v10204_v48 = vpop.f32.mrf.mxu2 }
 0x2f1   :  { %v10169_v41 = vadd.f32 %v386_v39, %v10064_v52  ;;  %v7210_v52 = vor.u32 %v8814_v55, %v7209_v14  ;;  %v10200_v39 = vpop.f32.mrf.mxu0  ;;  %12111 = vst [vmem:[#allocation35_spill] sm:$0xff] %v10204_v48  ;;  %v8774_v55 = vld [vmem:[#allocation2 + $0x25c] sm:$0xf0] }
 0x2f3   :  { %12102 = vst [vmem:[#allocation26_spill] sm:$0xff] %v10169_v41  ;;  %v10173_v47 = vpop.f32.mrf.mxu1  ;;  %2788 = vmatpush.bf16.msra.mxu3 %v7210_v52  ;;  %v8753_v41 = vld [vmem:[#allocation2 + $0x1b4] sm:$0xf0] }
 0x2f4   :  { %12103 = vst [vmem:[#allocation27_spill] sm:$0xff] %v10173_v47 }
 0x2f5   :  { %1109 = vmatmul.bf16.vlgmr.msrb.gmra.mxu3 %v9993_v20  ;;  %v6985_v20 = vld [vmem:[#allocation2 + $0x1c0] sm:$0xf] }
 0x2f6   :  { %1172 = vmatmul.bf16.gmra.mxu1 %v10041_v42  ;;  %v6986_v3 = vor.u32 %v8758_v2, %v6985_v20  ;;  %v7017_v20 = vld [vmem:[#allocation2 + $0x200] sm:$0xf] }
 0x2f7   :  { %2789 = vmatpush.bf16.msra.mxu3 %v7178_v0  ;;  %v8734_v0 = vld [vmem:[#allocation2 + $0x11c] sm:$0xf0]  ;;  %v7018_v6 = vor.u32 %v8766_v5, %v7017_v20 }
 0x2f8   :  { %v427_v53 = vpop.f32.mrf.mxu3  ;;  %2758 = vmatpush.bf16.msrb.mxu2 %v6986_v3 }
 0x2f9   :  { %v10187_v8 = vadd.f32 %v427_v53, %v10182_v25  ;;  %v7049_v53 = vld [vmem:[#allocation2 + $0x240] sm:$0xf]  ;;  %v10216_v23 = vpop.f32.mrf.mxu0 }
 0x2fa   :  { %v7050_v52 = vor.u32 %v8774_v55, %v7049_v53  ;;  %v8710_v53 = vld [vmem:[#allocation2 + $0x5c] sm:$0xf0]  ;;  %v10224_v55 = vpop.permute.xlu2 %558 }
 0x2fb   :  { %v10179_v57 = vpop.f32.mrf.mxu1  ;;  %12106 = vst [vmem:[#allocation30_spill] sm:$0xff] %v10187_v8  ;;  %2790 = vmatpush.bf16.msra.mxu3 %v7146_v10 }
 0x2fc   :  { %12105 = vst [vmem:[#allocation29_spill] sm:$0xff] %v10179_v57  ;;  %2759 = vmatpush.bf16.msrb.mxu2 %v6954_v26  ;;  %v10219_v26 = vpop.f32.mrf.mxu2 }
 0x2ff   :  { %2791 = vmatpush.bf16.msra.mxu3 %v7114_v22  ;;  %v8726_v22 = vld [vmem:[#allocation2 + $0xdc] sm:$0xf0] }
 0x300   :  { %v429_v4 = vpop.f32.mrf.mxu3  ;;  %v6858_v24 = vor.u32 %v8726_v22, %v6857_v17  ;;  %v7497_v22 = vld [vmem:[#allocation2 + $0x5c0] sm:$0xf] }
 0x301   :  { %v10190_v9 = vadd.f32 %v429_v4, %v10182_v25  ;;  %v6890_v4 = vor.u32 %v8734_v0, %v6889_v61  ;;  %v6761_v61 = vld [vmem:[#allocation2] sm:$0xf] }
 0x302   :  { %v8702_v0 = vld [vmem:[#allocation2 + $0x1c] sm:$0xf0] }
 0x303   :  { %12107 = vst [vmem:[#allocation31_spill] sm:$0xff] %v10190_v9  ;;  %v10196_v15 = vpop.f32.mrf.mxu1  ;;  %2792 = vmatpush.bf16.msra.mxu3 %v7082_v44  ;;  %v6826_v44 = vor.u32 %v8718_v31, %v6825_v56  ;;  %v6762_v5 = vor.u32 %v8702_v0, %v6761_v61  ;;  %v10239_v31 = vpop.permute.xlu2 %563  ;;  %v8878_v61 = vld [vmem:[#allocation2 + $0x59c] sm:$0xf0] }
 0x304   :  { %12109 = vst [vmem:[#allocation33_spill] sm:$0xff] %v10196_v15  ;;  %v7753_v0 = vld [vmem:[#allocation2 + $0x7c0] sm:$0xf] }
 0x305   :  { %1114 = vmatmul.bf16.gmra.mxu3 %v10041_v42  ;;  %v6921_v42 = vld [vmem:[#allocation2 + $0x140] sm:$0xf] }
 0x306   :  { %1177 = vmatmul.bf16.gmra.mxu1 %v10104_v11  ;;  %v6922_v14 = vor.u32 %v8742_v50, %v6921_v42  ;;  %v6793_v50 = vld [vmem:[#allocation2 + $0x40] sm:$0xf] }
 0x307   :  { %2793 = vmatpush.bf16.msra.mxu3 %v7050_v52  ;;  %v10226_v52 = vpop.f32.mrf.mxu0 }
 0x308   :  { %v432_v27 = vpop.f32.mrf.mxu3  ;;  %2760 = vmatpush.bf16.msrb.mxu2 %v6922_v14  ;;  %v6794_v14 = vor.u32 %v8710_v53, %v6793_v50 }
 0x309   :  { %v10207_v2 = vadd.f32 %v432_v27, %v10182_v25 }
 0x30b   :  { %v10202_v62 = vpop.f32.mrf.mxu1  ;;  %12112 = vst [vmem:[#allocation36_spill] sm:$0xff] %v10207_v2  ;;  %2794 = vmatpush.bf16.msra.mxu3 %v7018_v6 }
 0x30c   :  { %12110 = vst [vmem:[#allocation34_spill] sm:$0xff] %v10202_v62  ;;  %2761 = vmatpush.bf16.msrb.mxu2 %v6890_v4 }
 0x310   :  { %v434_v58 = vpop.f32.mrf.mxu3  ;;  %2762 = vmatpush.bf16.msrb.mxu2 %v6858_v24  ;;  %v8886_v24 = vld [vmem:[#allocation2 + $0x5dc] sm:$0xf0] }
 0x311   :  { %v10210_v3 = vadd.f32 %v434_v58, %v10182_v25  ;;  %v7498_v56 = vor.u32 %v8886_v24, %v7497_v22  ;;  %v8950_v24 = vld [vmem:[#allocation2 + $0x7dc] sm:$0xf0] }
 0x312   :  { %v7754_v10 = vor.u32 %v8950_v24, %v7753_v0 }
 0x313   :  { %12113 = vst [vmem:[#allocation37_spill] sm:$0xff] %v10210_v3  ;;  %v10214_v16 = vpop.f32.mrf.mxu1  ;;  %2816 = vmatpush.bf16.msrb.mxu0 %v7498_v56 }
 0x314   :  { %12114 = vst [vmem:[#allocation38_spill] sm:$0xff] %v10214_v16  ;;  %2763 = vmatpush.bf16.msrb.mxu2 %v6826_v44  ;;  %2845 = vmatpush.bf16.msra.mxu1 %v7754_v10 }
 0x315   :  { %1119 = vmatmul.bf16.gmra.mxu3 %v10104_v11  ;;  %v10228_v11 = vpop.f32.mrf.mxu2 }
 0x316   :  { %1182 = vmatmul.bf16.gmra.mxu1 %v10139_v28 }
 0x318   :  { %v437_v27 = vpop.f32.mrf.mxu3  ;;  %2764 = vmatpush.bf16.msrb.mxu2 %v6794_v14  ;;  %v1026_v14 = vadd.f32 %v10200_v39, %v10239_v31  ;;  %v10255_v39 = vpop.permute.xlu2 %568 }
 0x319   :  { %v10231_v20 = vadd.f32 %v437_v27, %v10182_v25  ;;  %v10241_v27 = vpop.f32.mrf.mxu0 }
 0x31b   :  { %v10222_v42 = vpop.f32.mrf.mxu1  ;;  %12116 = vst [vmem:[#allocation40_spill] sm:$0xff] %v10231_v20 }
 0x31c   :  { %12115 = vst [vmem:[#allocation39_spill] sm:$0xff] %v10222_v42  ;;  %2765 = vmatpush.bf16.msrb.mxu2 %v6762_v5  ;;  %v8794_v42 = vld [vmem:[#allocation2 + $0x304] sm:$0xf] }
 0x31d   :  { %v10243_v50 = vpop.f32.mrf.mxu2 }
 0x320   :  { %v439_v58 = vpop.f32.mrf.mxu3  ;;  %v10266_v45 = vpop.permute.xlu2 %573 }
 0x321   :  { %v10234_v4 = vadd.f32 %v439_v58, %v10182_v25  ;;  %v7465_v58 = vld [vmem:[#allocation2 + $0x580] sm:$0xf]  ;;  %v10257_v63 = vpop.f32.mrf.mxu0 }
 0x322   :  { %v7466_v22 = vor.u32 %v8878_v61, %v7465_v58  ;;  %v8818_v58 = vld [vmem:[#allocation2 + $0x3c4] sm:$0xf]  ;;  %v8870_v61 = vld [vmem:[#allocation2 + $0x55c] sm:$0xf0] }
 0x323   :  { %12117 = vst [vmem:[#allocation41_spill] sm:$0xff] %v10234_v4  ;;  %v1052_v17 = vpop.f32.mrf.mxu1  ;;  %v8859_v4 = vld [vmem:[#allocation2 + $0x50c] sm:$0xf] }
 0x324   :  { %2817 = vmatpush.bf16.msrb.mxu0 %v7466_v22  ;;  %v8934_v22 = vld [vmem:[#allocation2 + $0x75c] sm:$0xf0] }
 0x325   :  { %1124 = vmatmul.bf16.gmra.mxu3 %v10139_v28  ;;  %v1024_v28 = vadd.f32 %v10184_v7, %v10224_v55 }
 0x327   :  { %v1053_v56 = vadd.f32 %v1052_v17, %v1024_v28  ;;  %v7689_v28 = vld [vmem:[#allocation2 + $0x740] sm:$0xf] }
 0x328   :  { %v442_v44 = vpop.f32.mrf.mxu3 }
 0x329   :  { %v10250_v12 = vadd.f32 %v442_v44, %v10182_v25  ;;  %v10263_v44 = vpop.f32.mrf.mxu2 }
 0x32b   :  { %v1054_v53 = vpop.f32.mrf.mxu1  ;;  %12118 = vst [vmem:[#allocation42_spill] sm:$0xff] %v10250_v12 }
 0x32c   :  { %v1055_v5 = vadd.f32 %v1054_v53, %v1026_v14  ;;  %v7722_v14 = vor.u32 %v8942_v21, %v7721_v34  ;;  %v7211_v53 = vld [vmem:[#allocation2 + $0x3a0] sm:$0xf0]  ;;  %v7657_v34 = vld [vmem:[#allocation2 + $0x700] sm:$0xf] }
 0x32d   :  { %v7658_v13 = vor.u32 %v8926_v18, %v7657_v34  ;;  %v966_v18 = vadd.f32 %v10219_v26, %v10224_v55  ;;  %v7625_v34 = vld [vmem:[#allocation2 + $0x6c0] sm:$0xf] }
 0x32e   :  { %v10259_v7 = vpack.c.bf16 %v1055_v5, %v1053_v56  ;;  %2846 = vmatpush.bf16.msra.mxu1 %v7722_v14  ;;  %v7690_v5 = vor.u32 %v8934_v22, %v7689_v28  ;;  %v8810_v56 = vld [vmem:[#allocation2 + $0x384] sm:$0xf]  ;;  %v8862_v28 = vld [vmem:[#allocation2 + $0x51c] sm:$0xf0] }
 0x32f   :  { %v7214_v21 = vor.u32 %v8810_v56, %v7211_v53  ;;  %v7179_v14 = vld [vmem:[#allocation2 + $0x360] sm:$0xf0]  ;;  %v7593_v26 = vld [vmem:[#allocation2 + $0x680] sm:$0xf] }
 0x330   :  { %v444_v6 = vpop.f32.mrf.mxu3  ;;  %v8754_v22 = vld [vmem:[#allocation2 + $0x1c4] sm:$0xf] }
 0x331   :  { %v10253_v46 = vadd.f32 %v444_v6, %v10182_v25  ;;  %v7243_v25 = vld [vmem:[#allocation2 + $0x3e0] sm:$0xf0]  ;;  %v7433_v6 = vld [vmem:[#allocation2 + $0x540] sm:$0xf]  ;;  %v10274_v53 = vpop.f32.mrf.mxu2 }
 0x332   :  { %v7246_v10 = vor.u32 %v8818_v58, %v7243_v25  ;;  %v7434_v0 = vor.u32 %v8870_v61, %v7433_v6  ;;  %2847 = vmatpush.bf16.msra.mxu1 %v7690_v5  ;;  %v8802_v58 = vld [vmem:[#allocation2 + $0x344] sm:$0xf]  ;;  %v1031_v25 = vadd.f32 %v10226_v52, %v10266_v45  ;;  %v10270_v6 = vpop.f32.mrf.mxu0  ;;  %v968_v5 = vadd.f32 %v10228_v11, %v10239_v31  ;;  %v8910_v11 = vld [vmem:[#allocation2 + $0x69c] sm:$0xf0] }
 0x333   :  { %12119 = vst [vmem:[#allocation43_spill] sm:$0xff] %v10253_v46  ;;  %v1057_v17 = vpop.f32.mrf.mxu1  ;;  %v7182_v61 = vor.u32 %v8802_v58, %v7179_v14  ;;  %v8918_v58 = vld [vmem:[#allocation2 + $0x6dc] sm:$0xf0] }
 0x334   :  { %2903 = vmatpush.bf16.msrb.mxu3 %v7246_v10  ;;  %2818 = vmatpush.bf16.msrb.mxu0 %v7434_v0  ;;  %v1029_v10 = vadd.f32 %v10216_v23, %v10255_v39  ;;  %v7401_v0 = vld [vmem:[#allocation2 + $0x500] sm:$0xf]  ;;  %v7626_v16 = vor.u32 %v8918_v58, %v7625_v34  ;;  %v7083_v34 = vld [vmem:[#allocation2 + $0x2a0] sm:$0xf0] }
 0x335   :  { %2795 = vmatmul.bf16.vlgmr.msra.gmra.mxu3 %v10259_v7  ;;  %v7402_v52 = vor.u32 %v8862_v28, %v7401_v0  ;;  %v7594_v0 = vor.u32 %v8910_v11, %v7593_v26  ;;  %v8786_v28 = vld [vmem:[#allocation2 + $0x2c4] sm:$0xf]  ;;  %v10290_v11 = vpop.permute.xlu2 %583 }
 0x336   :  { %2848 = vmatpush.bf16.msra.mxu1 %v7658_v13  ;;  %v7147_v13 = vld [vmem:[#allocation2 + $0x320] sm:$0xf0]  ;;  %v1058_v15 = vadd.f32 %v1057_v17, %v1029_v10  ;;  %v7369_v17 = vld [vmem:[#allocation2 + $0x4c0] sm:$0xf] }
 0x337   :  { %v7150_v57 = vor.u32 %v8794_v42, %v7147_v13  ;;  %v8746_v10 = vld [vmem:[#allocation2 + $0x184] sm:$0xf] }
 0x338   :  { %v994_v24 = vpop.f32.mrf.mxu3  ;;  %2904 = vmatpush.bf16.msrb.mxu3 %v7214_v21  ;;  %v6987_v21 = vld [vmem:[#allocation2 + $0x1e0] sm:$0xf0]  ;;  %2819 = vmatpush.bf16.msrb.mxu0 %v7402_v52 }
 0x339   :  { %v6990_v23 = vor.u32 %v8754_v22, %v6987_v21  ;;  %v995_v62 = vadd.f32 %v994_v24, %v966_v18  ;;  %v7115_v22 = vld [vmem:[#allocation2 + $0x2e0] sm:$0xf0]  ;;  %v8854_v24 = vld [vmem:[#allocation2 + $0x4dc] sm:$0xf0] }
 0x33a   :  { %2849 = vmatpush.bf16.msra.mxu1 %v7626_v16  ;;  %v7118_v42 = vor.u32 %v8786_v28, %v7115_v22  ;;  %v7370_v16 = vor.u32 %v8854_v24, %v7369_v17  ;;  %v6955_v18 = vld [vmem:[#allocation2 + $0x1a0] sm:$0xf0]  ;;  %v10292_v17 = vpop.permute.xlu1 %578  ;;  %v1036_v24 = vadd.f32 %v10257_v63, %v10290_v11 }
 0x33b   :  { %v1059_v54 = vpop.f32.mrf.mxu1  ;;  %2874 = vmatpush.bf16.msra.mxu2 %v6990_v23  ;;  %v8778_v21 = vld [vmem:[#allocation2 + $0x284] sm:$0xf]  ;;  %v8894_v23 = vld [vmem:[#allocation2 + $0x61c] sm:$0xf0] }
 0x33c   :  { %v1060_v56 = vadd.f32 %v1059_v54, %v1031_v25  ;;  %2905 = vmatpush.bf16.msrb.mxu3 %v7182_v61  ;;  %2820 = vmatpush.bf16.msrb.mxu0 %v7370_v16  ;;  %v7086_v58 = vor.u32 %v8778_v21, %v7083_v34  ;;  %v6923_v28 = vld [vmem:[#allocation2 + $0x160] sm:$0xf0]  ;;  %v1034_v16 = vadd.f32 %v10241_v27, %v10292_v17 }
 0x33d   :  { %v8770_v22 = vld [vmem:[#allocation2 + $0x244] sm:$0xf] }
 0x33e   :  { %v10280_v54 = vpack.c.bf16 %v1060_v56, %v1058_v15  ;;  %2850 = vmatpush.bf16.msra.mxu1 %v7594_v0  ;;  %v7561_v15 = vld [vmem:[#allocation2 + $0x640] sm:$0xf]  ;;  %v10288_v56 = vpop.f32.mrf.mxu2  ;;  %v8738_v0 = vld [vmem:[#allocation2 + $0x144] sm:$0xf] }
 0x33f   :  { %v8730_v63 = vld [vmem:[#allocation2 + $0x104] sm:$0xf] }
 0x340   :  { %v996_v14 = vpop.f32.mrf.mxu3  ;;  %2906 = vmatpush.bf16.msrb.mxu3 %v7150_v57  ;;  %v6958_v57 = vor.u32 %v8746_v10, %v6955_v18  ;;  %v7051_v10 = vld [vmem:[#allocation2 + $0x260] sm:$0xf0]  ;;  %v7337_v18 = vld [vmem:[#allocation2 + $0x480] sm:$0xf] }
 0x341   :  { %v997_v47 = vadd.f32 %v996_v14, %v968_v5  ;;  %v8902_v5 = vld [vmem:[#allocation2 + $0x65c] sm:$0xf0] }
 0x342   :  { %2875 = vmatpush.bf16.msra.mxu2 %v6958_v57  ;;  %v7529_v14 = vld [vmem:[#allocation2 + $0x600] sm:$0xf]  ;;  %v971_v57 = vadd.f32 %v10243_v50, %v10255_v39 }
 0x343   :  { %v10282_v25 = vpack.c.bf16 %v997_v47, %v995_v62  ;;  %v1062_v61 = vpop.f32.mrf.mxu1  ;;  %v10286_v47 = vpop.f32.mrf.mxu0  ;;  %v7562_v62 = vor.u32 %v8902_v5, %v7561_v15  ;;  %v7530_v26 = vor.u32 %v8894_v23, %v7529_v14  ;;  %v8846_v15 = vld [vmem:[#allocation2 + $0x49c] sm:$0xf0]  ;;  %v7054_v5 = vor.u32 %v8770_v22, %v7051_v10  ;;  %v6891_v14 = vld [vmem:[#allocation2 + $0x120] sm:$0xf0] }
 0x344   :  { %2907 = vmatpush.bf16.msrb.mxu3 %v7118_v42  ;;  %v6926_v42 = vor.u32 %v8738_v0, %v6923_v28  ;;  %v7338_v34 = vor.u32 %v8846_v15, %v7337_v18  ;;  %v8762_v23 = vld [vmem:[#allocation2 + $0x204] sm:$0xf]  ;;  %v1063_v27 = vadd.f32 %v1062_v61, %v1034_v16  ;;  %v6894_v22 = vor.u32 %v8730_v63, %v6891_v14  ;;  %v7305_v61 = vld [vmem:[#allocation2 + $0x440] sm:$0xf] }
 0x345   :  { %2766 = vmatmul.bf16.vlgmr.msrb.gmra.mxu2 %v10282_v25  ;;  %2800 = vmatmul.bf16.gmra.mxu3 %v10280_v54  ;;  %v7019_v10 = vld [vmem:[#allocation2 + $0x220] sm:$0xf0] }
 0x346   :  { %2851 = vmatpush.bf16.msra.mxu1 %v7562_v62  ;;  %v973_v62 = vadd.f32 %v10263_v44, %v10266_v45  ;;  %2876 = vmatpush.bf16.msra.mxu2 %v6926_v42  ;;  %v10304_v50 = vpop.f32.mrf.mxu2  ;;  %v7022_v35 = vor.u32 %v8762_v23, %v7019_v10  ;;  %v8722_v42 = vld [vmem:[#allocation2 + $0xc4] sm:$0xf]  ;;  %v7273_v10 = vld [vmem:[#allocation2 + $0x400] sm:$0xf] }
 0x347   :  { %2821 = vmatpush.bf16.msrb.mxu0 %v7338_v34  ;;  %v6859_v18 = vld [vmem:[#allocation2 + $0xe0] sm:$0xf0] }
 0x348   :  { %v999_v52 = vpop.f32.mrf.mxu3  ;;  %2908 = vmatpush.bf16.msrb.mxu3 %v7086_v58  ;;  %v6862_v16 = vor.u32 %v8722_v42, %v6859_v18  ;;  %v8706_v14 = vld [vmem:[#allocation2 + $0x44] sm:$0xf]  ;;  %v8830_v42 = vld [vmem:[#allocation2 + $0x41c] sm:$0xf0]  ;;  %v976_v18 = vadd.f32 %v10274_v53, %v10292_v17 }
 0x349   :  { %v6795_v23 = vld [vmem:[#allocation2 + $0x60] sm:$0xf0] }
 0x34a   :  { %2852 = vmatpush.bf16.msra.mxu1 %v7530_v26  ;;  %v1000_v26 = vadd.f32 %v999_v52, %v971_v57  ;;  %2877 = vmatpush.bf16.msra.mxu2 %v6894_v22  ;;  %v8838_v52 = vld [vmem:[#allocation2 + $0x45c] sm:$0xf0]  ;;  %v8714_v57 = vld [vmem:[#allocation2 + $0x84] sm:$0xf] }
 0x34b   :  { %v1064_v13 = vpop.f32.mrf.mxu1  ;;  %v10302_v0 = vpop.f32.mrf.mxu0  ;;  %v7306_v15 = vor.u32 %v8838_v52, %v7305_v61  ;;  %v978_v61 = vadd.f32 %v10288_v56, %v10290_v11 }
 0x34c   :  { %v1065_v21 = vadd.f32 %v1064_v13, %v1036_v24  ;;  %2909 = vmatpush.bf16.msrb.mxu3 %v7054_v5 }
 0x34d   :  { %2822 = vmatpush.bf16.msrb.mxu0 %v7306_v15 }
 0x34e   :  { %v10306_v44 = vpack.c.bf16 %v1065_v21, %v1063_v27  ;;  %2878 = vmatpush.bf16.msra.mxu2 %v6862_v16  ;;  %v982_v63 = vpop.f32.mrf.mxu2  ;;  %v10314_v27 = vpop.permute.xlu1 %588  ;;  %v7274_v16 = vor.u32 %v8830_v42, %v7273_v10 }
 0x34f   :  { %v1039_v22 = vadd.f32 %v10270_v6, %v10314_v27 }
 0x350   :  { %v1001_v58 = vpop.f32.mrf.mxu3  ;;  %2910 = vmatpush.bf16.msrb.mxu3 %v7022_v35  ;;  %v10312_v35 = vpop.permute.xlu0 %593 }
 0x351   :  { %v1002_v28 = vadd.f32 %v1001_v58, %v973_v62  ;;  %v6827_v62 = vld [vmem:[#allocation2 + $0xa0] sm:$0xf0]  ;;  %2823 = vmatpush.bf16.msrb.mxu0 %v7274_v16 }
 0x352   :  { %v6830_v21 = vor.u32 %v8714_v57, %v6827_v62  ;;  %v8698_v57 = vld [vmem:[#allocation2 + $0x4] sm:$0xf] }
 0x353   :  { %v10308_v13 = vpack.c.bf16 %v1002_v28, %v1000_v26  ;;  %v1067_v24 = vpop.f32.mrf.mxu1  ;;  %v1141_v34 = vpop.f32.mrf.mxu0  ;;  %v1041_v26 = vadd.f32 %v10286_v47, %v10312_v35  ;;  %v6798_v28 = vor.u32 %v8706_v14, %v6795_v23  ;;  %v6763_v62 = vld [vmem:[#allocation2 + $0x20] sm:$0xf0] }
 0x354   :  { %2879 = vmatpush.bf16.msra.mxu2 %v6830_v21  ;;  %v1068_v21 = vadd.f32 %v1067_v24, %v1039_v22  ;;  %v6766_v23 = vor.u32 %v8698_v57, %v6763_v62  ;;  %v1142_v22 = vadd.f32 %v1141_v34, %v10239_v31  ;;  %v7467_v16 = vld [vmem:[#allocation2 + $0x5a0] sm:$0xf0]  ;;  %v981_v62 = vadd.f32 %v10304_v50, %v10314_v27  ;;  %v7249_v50 = vld [vmem:[#allocation2 + $0x3c8] sm:$0xf] }
 0x355   :  { %2771 = vmatmul.bf16.gmra.mxu2 %v10308_v13  ;;  %2805 = vmatmul.bf16.gmra.mxu3 %v10306_v44 }
 0x356   :  { %v10330_v56 = vpop.f32.mrf.mxu2 }
 0x358   :  { %v1004_v5 = vpop.f32.mrf.mxu3  ;;  %2880 = vmatpush.bf16.msra.mxu2 %v6798_v28  ;;  %v1140_v28 = vadd.f32 %v10302_v0, %v10224_v55 }
 0x359   :  { %v1005_v47 = vadd.f32 %v1004_v5, %v976_v18 }
 0x35b   :  { %v1069_v58 = vpop.f32.mrf.mxu1  ;;  %v1144_v53 = vpop.f32.mrf.mxu0 }
 0x35c   :  { %v1070_v52 = vadd.f32 %v1069_v58, %v1041_v26  ;;  %2881 = vmatpush.bf16.msra.mxu2 %v6766_v23  ;;  %v8882_v58 = vld [vmem:[#allocation2 + $0x5c4] sm:$0xf] }
 0x35d   :  { %v7499_v26 = vld [vmem:[#allocation2 + $0x5e0] sm:$0xf0] }
 0x35e   :  { %v10324_v6 = vpack.c.bf16 %v1070_v52, %v1068_v21  ;;  %v7502_v24 = vor.u32 %v8882_v58, %v7499_v26  ;;  %v8874_v52 = vld [vmem:[#allocation2 + $0x584] sm:$0xf]  ;;  %v983_v21 = vadd.f32 %v982_v63, %v10312_v35  ;;  %v1083_v23 = vpop.f32.mrf.mxu2 }
 0x35f   :  { %v8938_v26 = vld [vmem:[#allocation2 + $0x784] sm:$0xf] }
 0x360   :  { %v1006_v15 = vpop.f32.mrf.mxu3  ;;  %2932 = vmatpush.bf16.msra.mxu0 %v7502_v24  ;;  %v7723_v24 = vld [vmem:[#allocation2 + $0x7a0] sm:$0xf0] }
 0x361   :  { %v1007_v14 = vadd.f32 %v1006_v15, %v978_v61  ;;  %v8946_v15 = vld [vmem:[#allocation2 + $0x7c4] sm:$0xf] }
 0x363   :  { %v10326_v37 = vpack.c.bf16 %v1007_v14, %v1005_v47  ;;  %v1168_v12 = vpop.f32.mrf.mxu1  ;;  %v1146_v57 = vpop.f32.mrf.mxu0  ;;  %v7470_v47 = vor.u32 %v8874_v52, %v7467_v16  ;;  %v7755_v14 = vld [vmem:[#allocation2 + $0x7e0] sm:$0xf0] }
 0x364   :  { %v1169_v42 = vadd.f32 %v1168_v12, %v1140_v28  ;;  %v7758_v34 = vor.u32 %v8946_v15, %v7755_v14  ;;  %v7435_v52 = vld [vmem:[#allocation2 + $0x560] sm:$0xf0]  ;;  %v8815_v14 = vld [vmem:[#allocation2 + $0x3a4] sm:$0xf0] }
 0x365   :  { %2776 = vmatmul.bf16.gmra.mxu2 %v10326_v37  ;;  %2810 = vmatmul.bf16.gmra.mxu3 %v10324_v6  ;;  %v7691_v15 = vld [vmem:[#allocation2 + $0x760] sm:$0xf0] }
 0x366   :  { %2933 = vmatpush.bf16.msra.mxu0 %v7470_v47  ;;  %2961 = vmatpush.bf16.msrb.mxu1 %v7758_v34  ;;  %v7217_v47 = vld [vmem:[#allocation2 + $0x388] sm:$0xf] }
 0x367   :  { %v7218_v34 = vor.u32 %v8815_v14, %v7217_v47  ;;  %v8914_v47 = vld [vmem:[#allocation2 + $0x6c4] sm:$0xf] }
 0x368   :  { %v1009_v5 = vpop.f32.mrf.mxu3 }
 0x369   :  { %v1010_v12 = vadd.f32 %v1009_v5, %v981_v62  ;;  %v8930_v5 = vld [vmem:[#allocation2 + $0x744] sm:$0xf] }
 0x36b   :  { %v1170_v10 = vpop.f32.mrf.mxu1 }
 0x36c   :  { %v1171_v18 = vadd.f32 %v1170_v10, %v1142_v22  ;;  %v7726_v10 = vor.u32 %v8938_v26, %v7723_v24  ;;  %v10349_v26 = vpop.f32.mrf.mxu2  ;;  %v8922_v24 = vld [vmem:[#allocation2 + $0x704] sm:$0xf] }
 0x36e   :  { %v10335_v61 = vpack.c.bf16 %v1171_v18, %v1169_v42  ;;  %v8823_v42 = vld [vmem:[#allocation2 + $0x3e4] sm:$0xf0]  ;;  %2962 = vmatpush.bf16.msrb.mxu1 %v7726_v10  ;;  %v8866_v18 = vld [vmem:[#allocation2 + $0x544] sm:$0xf] }
 0x36f   :  { %v7250_v63 = vor.u32 %v8823_v42, %v7249_v50  ;;  %v7438_v16 = vor.u32 %v8866_v18, %v7435_v52  ;;  %v7659_v10 = vld [vmem:[#allocation2 + $0x720] sm:$0xf0]  ;;  %v7185_v52 = vld [vmem:[#allocation2 + $0x348] sm:$0xf] }
 0x370   :  { %2853 = vmatmul.bf16.vlgmr.msra.gmra.mxu1 %v10335_v61  ;;  %v1011_v0 = vpop.f32.mrf.mxu3  ;;  %v7662_v42 = vor.u32 %v8922_v24, %v7659_v10  ;;  %v7153_v10 = vld [vmem:[#allocation2 + $0x308] sm:$0xf] }
 0x371   :  { %v1012_v58 = vadd.f32 %v1011_v0, %v983_v21  ;;  %3019 = vmatpush.bf16.msra.mxu3 %v7250_v63  ;;  %v7694_v21 = vor.u32 %v8930_v5, %v7691_v15  ;;  %v10345_v0 = vpop.f32.mrf.mxu0  ;;  %2934 = vmatpush.bf16.msra.mxu0 %v7438_v16  ;;  %v8807_v5 = vld [vmem:[#allocation2 + $0x364] sm:$0xf0]  ;;  %v8858_v16 = vld [vmem:[#allocation2 + $0x504] sm:$0xf] }
 0x372   :  { %v7186_v15 = vor.u32 %v8807_v5, %v7185_v52 }
 0x373   :  { %v10341_v28 = vpack.c.bf16 %v1012_v58, %v1010_v12  ;;  %v1173_v22 = vpop.f32.mrf.mxu1  ;;  %v1145_v12 = vadd.f32 %v1144_v53, %v10255_v39  ;;  %v1147_v58 = vadd.f32 %v1146_v57, %v10266_v45  ;;  %2963 = vmatpush.bf16.msrb.mxu1 %v7694_v21  ;;  %v7403_v53 = vld [vmem:[#allocation2 + $0x520] sm:$0xf0]  ;;  %v1082_v57 = vadd.f32 %v10330_v56, %v10224_v55 }
 0x374   :  { %v1084_v21 = vadd.f32 %v1083_v23, %v10239_v31  ;;  %v7406_v14 = vor.u32 %v8858_v16, %v7403_v53  ;;  %v8906_v55 = vld [vmem:[#allocation2 + $0x684] sm:$0xf]  ;;  %v1088_v16 = vpop.f32.mrf.mxu2  ;;  %v7121_v53 = vld [vmem:[#allocation2 + $0x2c8] sm:$0xf] }
 0x375   :  { %2781 = vmatmul.bf16.gmra.mxu2 %v10341_v28  ;;  %2911 = vmatmul.bf16.vlgmr.msrb.gmra.mxu3 %v10259_v7  ;;  %v1174_v63 = vadd.f32 %v1173_v22, %v1145_v12  ;;  %v6993_v12 = vld [vmem:[#allocation2 + $0x1c8] sm:$0xf]  ;;  %v7595_v56 = vld [vmem:[#allocation2 + $0x6a0] sm:$0xf0] }
 0x376   :  { %3020 = vmatpush.bf16.msra.mxu3 %v7218_v34  ;;  %v7627_v34 = vld [vmem:[#allocation2 + $0x6e0] sm:$0xf0]  ;;  %2935 = vmatpush.bf16.msra.mxu0 %v7406_v14  ;;  %v6961_v14 = vld [vmem:[#allocation2 + $0x188] sm:$0xf] }
 0x377   :  { %2964 = vmatpush.bf16.msrb.mxu1 %v7662_v42  ;;  %v7630_v24 = vor.u32 %v8914_v47, %v7627_v34  ;;  %v8791_v47 = vld [vmem:[#allocation2 + $0x2e4] sm:$0xf0] }
 0x378   :  { %v1110_v62 = vpop.f32.mrf.mxu3 }
 0x379   :  { %v1151_v31 = vpop.f32.mrf.mxu0 }
 0x37a   :  { %3021 = vmatpush.bf16.msra.mxu3 %v7186_v15  ;;  %v7598_v15 = vor.u32 %v8906_v55, %v7595_v56  ;;  %v7531_v55 = vld [vmem:[#allocation2 + $0x620] sm:$0xf0] }
 0x37b   :  { %v1175_v50 = vpop.f32.mrf.mxu1  ;;  %2965 = vmatpush.bf16.msrb.mxu1 %v7630_v24  ;;  %v8842_v56 = vld [vmem:[#allocation2 + $0x484] sm:$0xf] }
 0x37c   :  { %v1176_v18 = vadd.f32 %v1175_v50, %v1147_v58  ;;  %v8759_v58 = vld [vmem:[#allocation2 + $0x1e4] sm:$0xf0]  ;;  %v1111_v50 = vadd.f32 %v1110_v62, %v1082_v57  ;;  %v7122_v62 = vor.u32 %v8791_v47, %v7121_v53  ;;  %v8850_v57 = vld [vmem:[#allocation2 + $0x4c4] sm:$0xf]  ;;  %v1152_v53 = vadd.f32 %v1151_v31, %v10290_v11 }
 0x37d   :  { %v1087_v31 = vadd.f32 %v10349_v26, %v10255_v39  ;;  %v6865_v39 = vld [vmem:[#allocation2 + $0xc8] sm:$0xf] }
 0x37e   :  { %v10351_v46 = vpack.c.bf16 %v1176_v18, %v1174_v63  ;;  %v6994_v63 = vor.u32 %v8759_v58, %v6993_v12  ;;  %v8799_v18 = vld [vmem:[#allocation2 + $0x324] sm:$0xf0]  ;;  %v8898_v12 = vld [vmem:[#allocation2 + $0x644] sm:$0xf] }
 0x37f   :  { %v7154_v52 = vor.u32 %v8799_v18, %v7153_v10  ;;  %2966 = vmatpush.bf16.msrb.mxu1 %v7598_v15  ;;  %v7563_v58 = vld [vmem:[#allocation2 + $0x660] sm:$0xf0]  ;;  %v1150_v15 = vadd.f32 %v10345_v0, %v10292_v17  ;;  %v1091_v0 = vpop.f32.mrf.mxu2  ;;  %v8727_v26 = vld [vmem:[#allocation2 + $0xe4] sm:$0xf0] }
 0x380   :  { %2858 = vmatmul.bf16.gmra.mxu1 %v10351_v46  ;;  %v1112_v22 = vpop.f32.mrf.mxu3  ;;  %2990 = vmatpush.bf16.msrb.mxu2 %v6994_v63  ;;  %v8783_v63 = vld [vmem:[#allocation2 + $0x2a4] sm:$0xf0] }
 0x381   :  { %v1113_v42 = vadd.f32 %v1112_v22, %v1084_v21  ;;  %3022 = vmatpush.bf16.msra.mxu3 %v7154_v52  ;;  %v7371_v21 = vld [vmem:[#allocation2 + $0x4e0] sm:$0xf0]  ;;  %v8751_v22 = vld [vmem:[#allocation2 + $0x1a4] sm:$0xf0]  ;;  %v1154_v48 = vpop.f32.mrf.mxu0 }
 0x382   :  { %v7374_v34 = vor.u32 %v8850_v57, %v7371_v21  ;;  %v6962_v10 = vor.u32 %v8751_v22, %v6961_v14  ;;  %v8890_v52 = vld [vmem:[#allocation2 + $0x604] sm:$0xf]  ;;  %v6929_v21 = vld [vmem:[#allocation2 + $0x148] sm:$0xf] }
 0x383   :  { %v10357_v23 = vpack.c.bf16 %v1113_v42, %v1111_v50  ;;  %v1178_v5 = vpop.f32.mrf.mxu1  ;;  %v7566_v50 = vor.u32 %v8898_v12, %v7563_v58  ;;  %v7089_v42 = vld [vmem:[#allocation2 + $0x288] sm:$0xf]  ;;  %v7534_v47 = vor.u32 %v8890_v52, %v7531_v55  ;;  %v7339_v57 = vld [vmem:[#allocation2 + $0x4a0] sm:$0xf0] }
 0x384   :  { %2936 = vmatpush.bf16.msra.mxu0 %v7374_v34  ;;  %v7090_v18 = vor.u32 %v8783_v63, %v7089_v42  ;;  %2991 = vmatpush.bf16.msrb.mxu2 %v6962_v10  ;;  %v7342_v22 = vor.u32 %v8842_v56, %v7339_v57  ;;  %v7057_v58 = vld [vmem:[#allocation2 + $0x248] sm:$0xf]  ;;  %v1179_v42 = vadd.f32 %v1178_v5, %v1150_v15 }
 0x385   :  { %2824 = vmatmul.bf16.vlgmr.msrb.gmra.mxu0 %v10357_v23  ;;  %2882 = vmatmul.bf16.vlgmr.msra.gmra.mxu2 %v10282_v25  ;;  %v8775_v34 = vld [vmem:[#allocation2 + $0x264] sm:$0xf0]  ;;  %v1089_v10 = vadd.f32 %v1088_v16, %v10266_v45  ;;  %v8834_v45 = vld [vmem:[#allocation2 + $0x444] sm:$0xf]  ;;  %v6866_v16 = vor.u32 %v8727_v26, %v6865_v39 }
 0x386   :  { %2916 = vmatmul.bf16.gmra.mxu3 %v10280_v54  ;;  %2967 = vmatpush.bf16.msrb.mxu1 %v7566_v50  ;;  %v7058_v43 = vor.u32 %v8775_v34, %v7057_v58  ;;  %v6897_v5 = vld [vmem:[#allocation2 + $0x108] sm:$0xf]  ;;  %v8826_v34 = vld [vmem:[#allocation2 + $0x404] sm:$0xf] }
 0x387   :  { %3023 = vmatpush.bf16.msra.mxu3 %v7122_v62  ;;  %v8743_v62 = vld [vmem:[#allocation2 + $0x164] sm:$0xf0] }
 0x388   :  { %v1115_v24 = vpop.f32.mrf.mxu3  ;;  %v6930_v12 = vor.u32 %v8743_v62, %v6929_v21  ;;  %2937 = vmatpush.bf16.msra.mxu0 %v7342_v22  ;;  %v8735_v52 = vld [vmem:[#allocation2 + $0x124] sm:$0xf0] }
 0x389   :  { %v1116_v55 = vadd.f32 %v1115_v24, %v1087_v31  ;;  %v6898_v15 = vor.u32 %v8735_v52, %v6897_v5  ;;  %v1156_v62 = vpop.f32.mrf.mxu0  ;;  %v8719_v58 = vld [vmem:[#allocation2 + $0xa4] sm:$0xf0] }
 0x38a   :  { %2968 = vmatpush.bf16.msrb.mxu1 %v7534_v47  ;;  %2992 = vmatpush.bf16.msrb.mxu2 %v6930_v12  ;;  %v6833_v12 = vld [vmem:[#allocation2 + $0x88] sm:$0xf]  ;;  %v1157_v5 = vadd.f32 %v1156_v62, %v10312_v35 }
 0x38b   :  { %v1180_v14 = vpop.f32.mrf.mxu1  ;;  %3024 = vmatpush.bf16.msra.mxu3 %v7090_v18  ;;  %v7025_v18 = vld [vmem:[#allocation2 + $0x208] sm:$0xf] }
 0x38c   :  { %v1181_v63 = vadd.f32 %v1180_v14, %v1152_v53  ;;  %v8767_v53 = vld [vmem:[#allocation2 + $0x224] sm:$0xf0]  ;;  %v1093_v14 = vpop.f32.mrf.mxu2 }
 0x38d   :  { %v7026_v57 = vor.u32 %v8767_v53, %v7025_v18  ;;  %v6801_v31 = vld [vmem:[#allocation2 + $0x48] sm:$0xf]  ;;  %v1094_v39 = vadd.f32 %v1093_v14, %v10290_v11 }
 0x38e   :  { %v10365_v20 = vpack.c.bf16 %v1181_v63, %v1179_v42  ;;  %2993 = vmatpush.bf16.msrb.mxu2 %v6898_v15  ;;  %v6834_v42 = vor.u32 %v8719_v58, %v6833_v12  ;;  %v7275_v63 = vld [vmem:[#allocation2 + $0x420] sm:$0xf0]  ;;  %v7505_v11 = vld [vmem:[#allocation2 + $0x5c8] sm:$0xf] }
 0x38f   :  { %3025 = vmatpush.bf16.msra.mxu3 %v7058_v43  ;;  %v7307_v43 = vld [vmem:[#allocation2 + $0x460] sm:$0xf0]  ;;  %v7278_v52 = vor.u32 %v8826_v34, %v7275_v63  ;;  %v7473_v14 = vld [vmem:[#allocation2 + $0x588] sm:$0xf] }
 0x390   :  { %2863 = vmatmul.bf16.gmra.mxu1 %v10365_v20  ;;  %v1117_v50 = vpop.f32.mrf.mxu3  ;;  %v7310_v24 = vor.u32 %v8834_v45, %v7307_v43  ;;  %v8703_v45 = vld [vmem:[#allocation2 + $0x24] sm:$0xf0] }
 0x391   :  { %v1118_v56 = vadd.f32 %v1117_v50, %v1089_v10  ;;  %v8711_v10 = vld [vmem:[#allocation2 + $0x64] sm:$0xf0]  ;;  %v1155_v50 = vadd.f32 %v1154_v48, %v10314_v27 }
 0x392   :  { %2994 = vmatpush.bf16.msrb.mxu2 %v6866_v16  ;;  %2938 = vmatpush.bf16.msra.mxu0 %v7310_v24  ;;  %v6769_v48 = vld [vmem:[#allocation2 + $0x8] sm:$0xf] }
 0x393   :  { %v10371_v21 = vpack.c.bf16 %v1118_v56, %v1116_v55  ;;  %v1183_v47 = vpop.f32.mrf.mxu1  ;;  %3026 = vmatpush.bf16.msra.mxu3 %v7026_v57  ;;  %v6802_v55 = vor.u32 %v8711_v10, %v6801_v31  ;;  %v1092_v57 = vadd.f32 %v1091_v0, %v10292_v17  ;;  %v6770_v24 = vor.u32 %v8703_v45, %v6769_v48  ;;  %v8887_v17 = vld [vmem:[#allocation2 + $0x5e4] sm:$0xf0] }
 0x394   :  { %v1184_v56 = vadd.f32 %v1183_v47, %v1155_v50  ;;  %v1096_v62 = vpop.f32.mrf.mxu2  ;;  %v7506_v0 = vor.u32 %v8887_v17, %v7505_v11  ;;  %v8879_v58 = vld [vmem:[#allocation2 + $0x5a4] sm:$0xf0]  ;;  %v8811_v11 = vld [vmem:[#allocation2 + $0x38c] sm:$0xf] }
 0x395   :  { %2829 = vmatmul.bf16.gmra.mxu0 %v10371_v21  ;;  %2887 = vmatmul.bf16.gmra.mxu2 %v10308_v13  ;;  %v8951_v63 = vld [vmem:[#allocation2 + $0x7e4] sm:$0xf0]  ;;  %v1097_v31 = vadd.f32 %v1096_v62, %v10314_v27  ;;  %v7219_v17 = vld [vmem:[#allocation2 + $0x3a8] sm:$0xf0] }
 0x396   :  { %2921 = vmatmul.bf16.gmra.mxu3 %v10306_v44  ;;  %2995 = vmatpush.bf16.msrb.mxu2 %v6834_v42  ;;  %v7761_v42 = vld [vmem:[#allocation2 + $0x7c8] sm:$0xf] }
 0x397   :  { %2939 = vmatpush.bf16.msra.mxu0 %v7278_v52  ;;  %v7762_v50 = vor.u32 %v8951_v63, %v7761_v42  ;;  %v8871_v48 = vld [vmem:[#allocation2 + $0x564] sm:$0xf0]  ;;  %v8803_v42 = vld [vmem:[#allocation2 + $0x34c] sm:$0xf] }
 0x398   :  { %v1120_v22 = vpop.f32.mrf.mxu3  ;;  %v7697_v45 = vld [vmem:[#allocation2 + $0x748] sm:$0xf]  ;;  %v7187_v63 = vld [vmem:[#allocation2 + $0x368] sm:$0xf0] }
 0x399   :  { %v1121_v43 = vadd.f32 %v1120_v22, %v1092_v57  ;;  %v7474_v22 = vor.u32 %v8879_v58, %v7473_v14  ;;  %3077 = vmatpush.bf16.msra.mxu1 %v7762_v50  ;;  %v8927_v14 = vld [vmem:[#allocation2 + $0x724] sm:$0xf0] }
 0x39a   :  { %2996 = vmatpush.bf16.msrb.mxu2 %v6802_v55  ;;  %v7729_v55 = vld [vmem:[#allocation2 + $0x788] sm:$0xf] }
 0x39b   :  { %v1185_v18 = vpop.f32.mrf.mxu1  ;;  %3048 = vmatpush.bf16.msrb.mxu0 %v7506_v0  ;;  %v7222_v0 = vor.u32 %v8811_v11, %v7219_v17  ;;  %v7409_v58 = vld [vmem:[#allocation2 + $0x508] sm:$0xf] }
 0x39c   :  { %v1186_v15 = vadd.f32 %v1185_v18, %v1157_v5  ;;  %v1098_v34 = vpop.f32.mrf.mxu2  ;;  %v7633_v50 = vld [vmem:[#allocation2 + $0x6c8] sm:$0xf] }
 0x39d   :  { %v1099_v10 = vadd.f32 %v1098_v34, %v10312_v35  ;;  %v7441_v35 = vld [vmem:[#allocation2 + $0x548] sm:$0xf] }
 0x39e   :  { %v10378_v53 = vpack.c.bf16 %v1186_v15, %v1184_v56  ;;  %2997 = vmatpush.bf16.msrb.mxu2 %v6770_v24  ;;  %v8943_v56 = vld [vmem:[#allocation2 + $0x7a4] sm:$0xf0] }
 0x39f   :  { %3049 = vmatpush.bf16.msrb.mxu0 %v7474_v22  ;;  %v7730_v15 = vor.u32 %v8943_v56, %v7729_v55  ;;  %v8863_v34 = vld [vmem:[#allocation2 + $0x524] sm:$0xf0]  ;;  %v8755_v55 = vld [vmem:[#allocation2 + $0x1cc] sm:$0xf] }
 0x3a0   :  { %2868 = vmatmul.bf16.gmra.mxu1 %v10378_v53  ;;  %v1122_v26 = vpop.f32.mrf.mxu3  ;;  %v6995_v56 = vld [vmem:[#allocation2 + $0x1e8] sm:$0xf0] }
 0x3a1   :  { %v1123_v16 = vadd.f32 %v1122_v26, %v1094_v39  ;;  %v8819_v39 = vld [vmem:[#allocation2 + $0x3cc] sm:$0xf]  ;;  %3078 = vmatpush.bf16.msra.mxu1 %v7730_v15 }
 0x3a2   :  { %v7251_v26 = vld [vmem:[#allocation2 + $0x3e8] sm:$0xf0] }
 0x3a3   :  { %v10383_v12 = vpack.c.bf16 %v1123_v16, %v1121_v43  ;;  %v7254_v27 = vor.u32 %v8819_v39, %v7251_v26  ;;  %v7442_v43 = vor.u32 %v8871_v48, %v7441_v35  ;;  %v8935_v16 = vld [vmem:[#allocation2 + $0x764] sm:$0xf0]  ;;  %v8795_v15 = vld [vmem:[#allocation2 + $0x30c] sm:$0xf]  ;;  %v6998_v39 = vor.u32 %v8755_v55, %v6995_v56  ;;  %v10404_v48 = vld [vmem:[%s12043_s9] sm:$0xff] }
 0x3a4   :  { %v7698_v62 = vor.u32 %v8935_v16, %v7697_v45  ;;  %v7155_v26 = vld [vmem:[#allocation2 + $0x328] sm:$0xf0]  ;;  %v8911_v35 = vld [vmem:[#allocation2 + $0x6a4] sm:$0xf0]  ;;  %v10409_v11 = vperm.slane %v10404_v48, 0 }
 0x3a5   :  { %2834 = vmatmul.bf16.gmra.mxu0 %v10383_v12  ;;  %2892 = vmatmul.bf16.gmra.mxu2 %v10326_v37  ;;  %v7158_v45 = vor.u32 %v8795_v15, %v7155_v26  ;;  %v8787_v16 = vld [vmem:[#allocation2 + $0x2cc] sm:$0xf]  ;;  %v7537_v15 = vld [vmem:[#allocation2 + $0x608] sm:$0xf] }
 0x3a6   :  { %2926 = vmatmul.bf16.gmra.mxu3 %v10324_v6  ;;  %3050 = vmatpush.bf16.msrb.mxu0 %v7442_v43 }
 0x3a7   :  { %3135 = vmatpush.bf16.msrb.mxu3 %v7254_v27  ;;  %3079 = vmatpush.bf16.msra.mxu1 %v7698_v62  ;;  %v7601_v27 = vld [vmem:[#allocation2 + $0x688] sm:$0xf]  ;;  %v7123_v62 = vld [vmem:[#allocation2 + $0x2e8] sm:$0xf0] }
 0x3a8   :  { %v1125_v47 = vpop.f32.mrf.mxu3  ;;  %v7602_v43 = vor.u32 %v8911_v35, %v7601_v27  ;;  %3106 = vmatpush.bf16.msra.mxu2 %v6998_v39  ;;  %v7126_v17 = vor.u32 %v8787_v16, %v7123_v62  ;;  %v8895_v39 = vld [vmem:[#allocation2 + $0x624] sm:$0xf0]  ;;  %v8739_v35 = vld [vmem:[#allocation2 + $0x14c] sm:$0xf] }
 0x3a9   :  { %v1126_v52 = vadd.f32 %v1125_v47, %v1097_v31  ;;  %v7665_v47 = vld [vmem:[#allocation2 + $0x708] sm:$0xf]  ;;  %v7410_v31 = vor.u32 %v8863_v34, %v7409_v58  ;;  %v7538_v26 = vor.u32 %v8895_v39, %v7537_v15 }
 0x3aa   :  { %v7666_v22 = vor.u32 %v8927_v14, %v7665_v47  ;;  %v8855_v47 = vld [vmem:[#allocation2 + $0x4e4] sm:$0xf0]  ;;  %v8747_v14 = vld [vmem:[#allocation2 + $0x18c] sm:$0xf] }
 0x3ab   :  { %3136 = vmatpush.bf16.msrb.mxu3 %v7222_v0  ;;  %3051 = vmatpush.bf16.msrb.mxu0 %v7410_v31  ;;  %v7377_v0 = vld [vmem:[#allocation2 + $0x4c8] sm:$0xf] }
 0x3ac   :  { %3080 = vmatpush.bf16.msra.mxu1 %v7666_v22  ;;  %v7378_v58 = vor.u32 %v8855_v47, %v7377_v0  ;;  %v6963_v22 = vld [vmem:[#allocation2 + $0x1a8] sm:$0xf0]  ;;  %v7569_v34 = vld [vmem:[#allocation2 + $0x648] sm:$0xf] }
 0x3ad   :  { %v7345_v16 = vld [vmem:[#allocation2 + $0x488] sm:$0xf]  ;;  %v7059_v0 = vld [vmem:[#allocation2 + $0x268] sm:$0xf0] }
 0x3ae   :  { %v8847_v62 = vld [vmem:[#allocation2 + $0x4a4] sm:$0xf0] }
 0x3af   :  { %3052 = vmatpush.bf16.msrb.mxu0 %v7378_v58  ;;  %v7346_v47 = vor.u32 %v8847_v62, %v7345_v16  ;;  %v7313_v15 = vld [vmem:[#allocation2 + $0x448] sm:$0xf]  ;;  %v8715_v16 = vld [vmem:[#allocation2 + $0x8c] sm:$0xf] }
 0x3b0   :  { %2969 = vmatmul.bf16.vlgmr.msrb.gmra.mxu1 %v10335_v61  ;;  %v1127_v5 = vpop.f32.mrf.mxu3  ;;  %v8839_v39 = vld [vmem:[#allocation2 + $0x464] sm:$0xf0] }
 0x3b1   :  { %v1128_v18 = vadd.f32 %v1127_v5, %v1099_v10  ;;  %v7190_v10 = vor.u32 %v8803_v42, %v7187_v63  ;;  %v8919_v5 = vld [vmem:[#allocation2 + $0x6e4] sm:$0xf0] }
 0x3b2   :  { %v8903_v42 = vld [vmem:[#allocation2 + $0x664] sm:$0xf0] }
 0x3b3   :  { %v10391_v57 = vpack.c.bf16 %v1128_v18, %v1126_v52  ;;  %3137 = vmatpush.bf16.msrb.mxu3 %v7190_v10  ;;  %v7634_v52 = vor.u32 %v8919_v5, %v7633_v50  ;;  %v6966_v10 = vor.u32 %v8747_v14, %v6963_v22  ;;  %v7570_v50 = vor.u32 %v8903_v42, %v7569_v34  ;;  %v8779_v5 = vld [vmem:[#allocation2 + $0x28c] sm:$0xf] }
 0x3b4   :  { %3053 = vmatpush.bf16.msrb.mxu0 %v7346_v47  ;;  %v8731_v34 = vld [vmem:[#allocation2 + $0x10c] sm:$0xf] }
 0x3b5   :  { %2839 = vmatmul.bf16.gmra.mxu0 %v10391_v57  ;;  %2897 = vmatmul.bf16.gmra.mxu2 %v10341_v28  ;;  %v8763_v42 = vld [vmem:[#allocation2 + $0x20c] sm:$0xf] }
 0x3b6   :  { %3027 = vmatmul.bf16.vlgmr.msra.gmra.mxu3 %v10259_v7  ;;  %3081 = vmatpush.bf16.msra.mxu1 %v7634_v52  ;;  %v7091_v52 = vld [vmem:[#allocation2 + $0x2a8] sm:$0xf0] }
 0x3b7   :  { %3138 = vmatpush.bf16.msrb.mxu3 %v7158_v45  ;;  %v7094_v56 = vor.u32 %v8779_v5, %v7091_v52  ;;  %3107 = vmatpush.bf16.msra.mxu2 %v6966_v10  ;;  %v6931_v45 = vld [vmem:[#allocation2 + $0x168] sm:$0xf0] }
 0x3b8   :  { %v10396_v24 = vpop.f32.mrf.mxu3  ;;  %v8707_v47 = vld [vmem:[#allocation2 + $0x4c] sm:$0xf] }
 0x3ba   :  { %3082 = vmatpush.bf16.msra.mxu1 %v7602_v43  ;;  %v8771_v43 = vld [vmem:[#allocation2 + $0x24c] sm:$0xf] }
 0x3bb   :  { %3139 = vmatpush.bf16.msrb.mxu3 %v7126_v17  ;;  %v6934_v17 = vor.u32 %v8739_v35, %v6931_v45  ;;  %v7062_v14 = vor.u32 %v8771_v43, %v7059_v0  ;;  %v7314_v35 = vor.u32 %v8839_v39, %v7313_v15  ;;  %v8883_v15 = vld [vmem:[#allocation2 + $0x5cc] sm:$0xf] }
 0x3bc   :  { %v7507_v39 = vld [vmem:[#allocation2 + $0x5e8] sm:$0xf0] }
 0x3bd   :  { %3108 = vmatpush.bf16.msra.mxu2 %v6934_v17  ;;  %3054 = vmatpush.bf16.msrb.mxu0 %v7314_v35 }
 0x3be   :  { %3083 = vmatpush.bf16.msra.mxu1 %v7570_v50  ;;  %v7027_v50 = vld [vmem:[#allocation2 + $0x228] sm:$0xf0] }
 0x3bf   :  { %3140 = vmatpush.bf16.msrb.mxu3 %v7094_v56  ;;  %v7030_v5 = vor.u32 %v8763_v42, %v7027_v50  ;;  %v6867_v56 = vld [vmem:[#allocation2 + $0xe8] sm:$0xf0] }
 0x3c0   :  { %2974 = vmatmul.bf16.gmra.mxu1 %v10351_v46  ;;  %v10399_v18 = vpop.f32.mrf.mxu3  ;;  %v8699_v50 = vld [vmem:[#allocation2 + $0xc] sm:$0xf] }
 0x3c2   :  { %3084 = vmatpush.bf16.msra.mxu1 %v7538_v26 }
 0x3c3   :  { %3141 = vmatpush.bf16.msrb.mxu3 %v7062_v14  ;;  %v6803_v14 = vld [vmem:[#allocation2 + $0x68] sm:$0xf0] }
 0x3c5   :  { %2940 = vmatmul.bf16.vlgmr.msra.gmra.mxu0 %v10357_v23  ;;  %2998 = vmatmul.bf16.vlgmr.msrb.gmra.mxu2 %v10282_v25 }
 0x3c6   :  { %3032 = vmatmul.bf16.gmra.mxu3 %v10280_v54 }
 0x3c7   :  { %3142 = vmatpush.bf16.msrb.mxu3 %v7030_v5  ;;  %v6771_v5 = vld [vmem:[#allocation2 + $0x28] sm:$0xf0] }
 0x3c8   :  { %v2767_v63 = vpop.f32.mrf.mxu2  ;;  %v2801_v31 = vpop.f32.mrf.mxu3 }
 0x3c9   :  { %v2768_v55 = vadd.f32 %v2767_v63, %v10409_v11 }
 0x3cb   :  { %v10414_v27 = vadd.f32 %v10396_v24, %v2768_v55  ;;  %v6899_v24 = vld [vmem:[#allocation2 + $0x128] sm:$0xf0] }
 0x3cc   :  { %v6902_v10 = vor.u32 %v8731_v34, %v6899_v24  ;;  %v8723_v55 = vld [vmem:[#allocation2 + $0xcc] sm:$0xf]  ;;  %v8831_v34 = vld [vmem:[#allocation2 + $0x424] sm:$0xf0]  ;;  %v6806_v24 = vor.u32 %v8707_v47, %v6803_v14 }
 0x3cd   :  { %v6870_v26 = vor.u32 %v8723_v55, %v6867_v56  ;;  %v6774_v56 = vor.u32 %v8699_v50, %v6771_v5  ;;  %v8947_v14 = vld [vmem:[#allocation2 + $0x7cc] sm:$0xf] }
 0x3ce   :  { %3109 = vmatpush.bf16.msra.mxu2 %v6902_v10  ;;  %v8939_v50 = vld [vmem:[#allocation2 + $0x78c] sm:$0xf] }
 0x3d0   :  { %2979 = vmatmul.bf16.gmra.mxu1 %v10365_v20  ;;  %v2769_v58 = vpop.f32.mrf.mxu2  ;;  %v2803_v22 = vpop.f32.mrf.mxu3 }
 0x3d1   :  { %v2770_v63 = vadd.f32 %v2769_v58, %v10409_v11  ;;  %v7281_v58 = vld [vmem:[#allocation2 + $0x408] sm:$0xf] }
 0x3d2   :  { %3110 = vmatpush.bf16.msra.mxu2 %v6870_v26  ;;  %v7282_v42 = vor.u32 %v8831_v34, %v7281_v58  ;;  %v7510_v26 = vor.u32 %v8883_v15, %v7507_v39  ;;  %v7763_v58 = vld [vmem:[#allocation2 + $0x7e8] sm:$0xf0]  ;;  %v8824_v15 = vld [vmem:[#allocation2 + $0x3ec] sm:$0xf0] }
 0x3d3   :  { %v10419_v52 = vadd.f32 %v10399_v18, %v2770_v63  ;;  %v6835_v18 = vld [vmem:[#allocation2 + $0xa8] sm:$0xf0]  ;;  %v7766_v34 = vor.u32 %v8947_v14, %v7763_v58 }
 0x3d4   :  { %v6838_v17 = vor.u32 %v8715_v16, %v6835_v18  ;;  %3055 = vmatpush.bf16.msrb.mxu0 %v7282_v42 }
 0x3d5   :  { %2945 = vmatmul.bf16.gmra.mxu0 %v10371_v21  ;;  %3003 = vmatmul.bf16.gmra.mxu2 %v10308_v13 }
 0x3d6   :  { %3037 = vmatmul.bf16.gmra.mxu3 %v10306_v44  ;;  %3111 = vmatpush.bf16.msra.mxu2 %v6838_v17  ;;  %v7475_v17 = vld [vmem:[#allocation2 + $0x5a8] sm:$0xf0] }
 0x3d7   :  { %3193 = vmatpush.bf16.msrb.mxu1 %v7766_v34  ;;  %v7225_v34 = vld [vmem:[#allocation2 + $0x390] sm:$0xf] }
 0x3d8   :  { %v2772_v45 = vpop.f32.mrf.mxu2  ;;  %v2806_v43 = vpop.f32.mrf.mxu3  ;;  %3164 = vmatpush.bf16.msra.mxu0 %v7510_v26 }
 0x3d9   :  { %v2773_v62 = vadd.f32 %v2772_v45, %v10409_v11 }
 0x3da   :  { %3112 = vmatpush.bf16.msra.mxu2 %v6806_v24 }
 0x3db   :  { %v10425_v0 = vadd.f32 %v2801_v31, %v2773_v62 }
 0x3de   :  { %3113 = vmatpush.bf16.msra.mxu2 %v6774_v56  ;;  %v7257_v56 = vld [vmem:[#allocation2 + $0x3d0] sm:$0xf] }
 0x3df   :  { %v7258_v26 = vor.u32 %v8824_v15, %v7257_v56  ;;  %v7667_v56 = vld [vmem:[#allocation2 + $0x728] sm:$0xf0] }
 0x3e0   :  { %2984 = vmatmul.bf16.gmra.mxu1 %v10378_v53  ;;  %v2774_v63 = vpop.f32.mrf.mxu2  ;;  %v2808_v10 = vpop.f32.mrf.mxu3 }
 0x3e1   :  { %v2775_v55 = vadd.f32 %v2774_v63, %v10409_v11  ;;  %3251 = vmatpush.bf16.msra.mxu3 %v7258_v26  ;;  %v8808_v26 = vld [vmem:[#allocation2 + $0x36c] sm:$0xf0] }
 0x3e3   :  { %v10429_v31 = vadd.f32 %v2803_v22, %v2775_v55  ;;  %v8875_v22 = vld [vmem:[#allocation2 + $0x58c] sm:$0xf] }
 0x3e4   :  { %v7478_v47 = vor.u32 %v8875_v22, %v7475_v17  ;;  %v8931_v22 = vld [vmem:[#allocation2 + $0x74c] sm:$0xf] }
 0x3e5   :  { %2950 = vmatmul.bf16.gmra.mxu0 %v10383_v12  ;;  %3008 = vmatmul.bf16.gmra.mxu2 %v10326_v37 }
 0x3e6   :  { %3042 = vmatmul.bf16.gmra.mxu3 %v10324_v6  ;;  %3165 = vmatpush.bf16.msra.mxu0 %v7478_v47  ;;  %v7699_v47 = vld [vmem:[#allocation2 + $0x768] sm:$0xf0] }
 0x3e7   :  { %v7702_v58 = vor.u32 %v8931_v22, %v7699_v47  ;;  %v7414_v47 = vor.u32 %v8859_v4, %v7411_v38  ;;  %v8907_v4 = vld [vmem:[#allocation2 + $0x68c] sm:$0xf] }
 0x3e8   :  { %v2777_v35 = vpop.f32.mrf.mxu2  ;;  %v2811_v45 = vpop.f32.mrf.mxu3 }
 0x3e9   :  { %v2778_v16 = vadd.f32 %v2777_v35, %v10409_v11  ;;  %v8867_v35 = vld [vmem:[#allocation2 + $0x54c] sm:$0xf] }
 0x3eb   :  { %v10435_v18 = vadd.f32 %v2806_v43, %v2778_v16  ;;  %v7731_v43 = vld [vmem:[#allocation2 + $0x7a8] sm:$0xf0] }
 0x3ec   :  { %v7734_v5 = vor.u32 %v8939_v50, %v7731_v43  ;;  %v7443_v16 = vld [vmem:[#allocation2 + $0x568] sm:$0xf0] }
 0x3ed   :  { %v10437_v62 = vpop.f32.mrf.mxu1  ;;  %v7446_v17 = vor.u32 %v8867_v35, %v7443_v16  ;;  %v8923_v43 = vld [vmem:[#allocation2 + $0x70c] sm:$0xf]  ;;  %v7193_v35 = vld [vmem:[#allocation2 + $0x350] sm:$0xf] }
 0x3ee   :  { %3194 = vmatpush.bf16.msrb.mxu1 %v7734_v5  ;;  %v7670_v5 = vor.u32 %v8923_v43, %v7667_v56  ;;  %v7194_v22 = vor.u32 %v8808_v26, %v7193_v35  ;;  %v8800_v56 = vld [vmem:[#allocation2 + $0x32c] sm:$0xf0] }
 0x3ef   :  { %3166 = vmatpush.bf16.msra.mxu0 %v7446_v17 }
 0x3f0   :  { %3085 = vmatmul.bf16.vlgmr.msra.gmra.mxu1 %v10335_v61  ;;  %v2779_v24 = vpop.f32.mrf.mxu2  ;;  %v10440_v42 = vpop.f32.mrf.mxu3 }
 0x3f1   :  { %v2780_v63 = vadd.f32 %v2779_v24, %v10409_v11  ;;  %v8816_v24 = vld [vmem:[#allocation2 + $0x3ac] sm:$0xf0] }
 0x3f2   :  { %v7226_v50 = vor.u32 %v8816_v24, %v7225_v34  ;;  %3195 = vmatpush.bf16.msrb.mxu1 %v7702_v58  ;;  %v8760_v24 = vld [vmem:[#allocation2 + $0x1ec] sm:$0xf0] }
 0x3f3   :  { %v10443_v55 = vadd.f32 %v2808_v10, %v2780_v63  ;;  %3167 = vmatpush.bf16.msra.mxu0 %v7414_v47  ;;  %v7129_v47 = vld [vmem:[#allocation2 + $0x2d0] sm:$0xf] }
 0x3f4   :  { %3252 = vmatpush.bf16.msra.mxu3 %v7226_v50 }
 0x3f5   :  { %v10445_v39 = vpop.f32.mrf.mxu1  ;;  %2955 = vmatmul.bf16.gmra.mxu0 %v10391_v57  ;;  %3013 = vmatmul.bf16.gmra.mxu2 %v10341_v28 }
 0x3f6   :  { %3143 = vmatmul.bf16.vlgmr.msrb.gmra.mxu3 %v10259_v7  ;;  %3196 = vmatpush.bf16.msrb.mxu1 %v7670_v5  ;;  %v7603_v5 = vld [vmem:[#allocation2 + $0x6a8] sm:$0xf0] }
 0x3f7   :  { %v7606_v26 = vor.u32 %v8907_v4, %v7603_v5  ;;  %v8784_v4 = vld [vmem:[#allocation2 + $0x2ac] sm:$0xf0] }
 0x3f8   :  { %v2782_v10 = vpop.f32.mrf.mxu2  ;;  %v10450_v14 = vpop.f32.mrf.mxu3  ;;  %3253 = vmatpush.bf16.msra.mxu3 %v7194_v22 }
 0x3f9   :  { %v2783_v63 = vadd.f32 %v2782_v10, %v10409_v11  ;;  %v7635_v10 = vld [vmem:[#allocation2 + $0x6e8] sm:$0xf0] }
 0x3fa   :  { %v7638_v17 = vor.u32 %v8915_v51, %v7635_v10  ;;  %v8792_v10 = vld [vmem:[#allocation2 + $0x2ec] sm:$0xf0] }
 0x3fb   :  { %v10453_v15 = vadd.f32 %v2811_v45, %v2783_v63  ;;  %v7001_v45 = vld [vmem:[#allocation2 + $0x1d0] sm:$0xf] }
 0x3fc   :  { %v7161_v63 = vld [vmem:[#allocation2 + $0x310] sm:$0xf]  ;;  %v7002_v43 = vor.u32 %v8760_v24, %v7001_v45  ;;  %3197 = vmatpush.bf16.msrb.mxu1 %v7638_v17  ;;  %v10473_v17 = vperm.slane %v10404_v48, 1 }
 0x3fd   :  { %v10455_v16 = vpop.f32.mrf.mxu1  ;;  %v7162_v38 = vor.u32 %v8800_v56, %v7161_v63  ;;  %v6969_v45 = vld [vmem:[#allocation2 + $0x190] sm:$0xf] }
 0x3fe   :  { %3222 = vmatpush.bf16.msrb.mxu2 %v7002_v43  ;;  %v8752_v63 = vld [vmem:[#allocation2 + $0x1ac] sm:$0xf0] }
 0x3ff   :  { %3254 = vmatpush.bf16.msra.mxu3 %v7162_v38  ;;  %v6970_v56 = vor.u32 %v8752_v63, %v6969_v45  ;;  %v7097_v38 = vld [vmem:[#allocation2 + $0x290] sm:$0xf] }
 0x400   :  { %3090 = vmatmul.bf16.gmra.mxu1 %v10351_v46  ;;  %v2784_v58 = vpop.f32.mrf.mxu2  ;;  %v10458_v34 = vpop.f32.mrf.mxu3  ;;  %v6937_v45 = vld [vmem:[#allocation2 + $0x150] sm:$0xf] }
 0x401   :  { %v2785_v50 = vadd.f32 %v2784_v58, %v10409_v11  ;;  %3198 = vmatpush.bf16.msrb.mxu1 %v7606_v26  ;;  %v7379_v58 = vld [vmem:[#allocation2 + $0x4e8] sm:$0xf0]  ;;  %v8744_v63 = vld [vmem:[#allocation2 + $0x16c] sm:$0xf0] }
 0x402   :  { %v2825_v35 = vpop.f32.mrf.mxu0  ;;  %3223 = vmatpush.bf16.msrb.mxu2 %v6970_v56  ;;  %v7347_v56 = vld [vmem:[#allocation2 + $0x4a8] sm:$0xf0] }
 0x403   :  { %v2826_v51 = vadd.f32 %v2825_v35, %v10414_v27  ;;  %v10463_v22 = vadd.f32 %v10440_v42, %v2785_v50  ;;  %v7130_v27 = vor.u32 %v8792_v10, %v7129_v47  ;;  %v8851_v42 = vld [vmem:[#allocation2 + $0x4cc] sm:$0xf]  ;;  %v7098_v47 = vor.u32 %v8784_v4, %v7097_v38  ;;  %v8776_v38 = vld [vmem:[#allocation2 + $0x26c] sm:$0xf0] }
 0x404   :  { %v7382_v24 = vor.u32 %v8851_v42, %v7379_v58  ;;  %v7571_v50 = vld [vmem:[#allocation2 + $0x668] sm:$0xf0] }
 0x405   :  { %v10466_v2 = vadd.f32 %v10437_v62, %v2826_v51  ;;  %v10468_v11 = vpop.f32.mrf.mxu1  ;;  %3056 = vmatmul.bf16.vlgmr.msrb.gmra.mxu0 %v10357_v23  ;;  %3114 = vmatmul.bf16.vlgmr.msra.gmra.mxu2 %v10282_v25  ;;  %v8899_v62 = vld [vmem:[#allocation2 + $0x64c] sm:$0xf] }
 0x406   :  { %3148 = vmatmul.bf16.gmra.mxu3 %v10280_v54  ;;  %v7574_v35 = vor.u32 %v8899_v62, %v7571_v50  ;;  %3168 = vmatpush.bf16.msra.mxu0 %v7382_v24  ;;  %v8891_v10 = vld [vmem:[#allocation2 + $0x60c] sm:$0xf]  ;;  %v7065_v62 = vld [vmem:[#allocation2 + $0x250] sm:$0xf] }
 0x407   :  { %3255 = vmatpush.bf16.msra.mxu3 %v7130_v27  ;;  %v7539_v42 = vld [vmem:[#allocation2 + $0x628] sm:$0xf0] }
 0x408   :  { %v2883_v43 = vpop.f32.mrf.mxu2  ;;  %3199 = vmatpush.bf16.msrb.mxu1 %v7574_v35  ;;  %v7542_v3 = vor.u32 %v8891_v10, %v7539_v42  ;;  %v6938_v35 = vor.u32 %v8744_v63, %v6937_v45  ;;  %v8768_v45 = vld [vmem:[#allocation2 + $0x22c] sm:$0xf0] }
 0x409   :  { %v2884_v5 = vadd.f32 %v2883_v43, %v10473_v17  ;;  %v10477_v51 = vpop.f32.mrf.mxu3  ;;  %v8843_v43 = vld [vmem:[#allocation2 + $0x48c] sm:$0xf] }
 0x40a   :  { %v2827_v26 = vpop.f32.mrf.mxu0  ;;  %v7350_v4 = vor.u32 %v8843_v43, %v7347_v56  ;;  %3224 = vmatpush.bf16.msrb.mxu2 %v6938_v35  ;;  %v6873_v56 = vld [vmem:[#allocation2 + $0xd0] sm:$0xf] }
 0x40b   :  { %v2828_v58 = vadd.f32 %v2827_v26, %v10419_v52  ;;  %v10481_v27 = vadd.f32 %v10450_v14, %v2884_v5  ;;  %3256 = vmatpush.bf16.msra.mxu3 %v7098_v47  ;;  %v7066_v52 = vor.u32 %v8776_v38, %v7065_v62  ;;  %v6905_v47 = vld [vmem:[#allocation2 + $0x110] sm:$0xf] }
 0x40c   :  { %3200 = vmatpush.bf16.msrb.mxu1 %v7542_v3  ;;  %3169 = vmatpush.bf16.msra.mxu0 %v7350_v4  ;;  %v7033_v26 = vld [vmem:[#allocation2 + $0x210] sm:$0xf] }
 0x40d   :  { %v10484_v50 = vadd.f32 %v10445_v39, %v2828_v58  ;;  %v10486_v24 = vpop.f32.mrf.mxu1  ;;  %v8736_v39 = vld [vmem:[#allocation2 + $0x12c] sm:$0xf0]  ;;  %v7034_v62 = vor.u32 %v8768_v45, %v7033_v26 }
 0x40e   :  { %v6906_v58 = vor.u32 %v8736_v39, %v6905_v47  ;;  %v8728_v35 = vld [vmem:[#allocation2 + $0xec] sm:$0xf0] }
 0x40f   :  { %3257 = vmatpush.bf16.msra.mxu3 %v7066_v52  ;;  %v8835_v52 = vld [vmem:[#allocation2 + $0x44c] sm:$0xf]  ;;  %v6874_v47 = vor.u32 %v8728_v35, %v6873_v56  ;;  %v6841_v39 = vld [vmem:[#allocation2 + $0x90] sm:$0xf] }
 0x410   :  { %3095 = vmatmul.bf16.gmra.mxu1 %v10365_v20  ;;  %v2885_v5 = vpop.f32.mrf.mxu2  ;;  %3225 = vmatpush.bf16.msrb.mxu2 %v6906_v58  ;;  %v8720_v26 = vld [vmem:[#allocation2 + $0xac] sm:$0xf0] }
 0x411   :  { %v2886_v10 = vadd.f32 %v2885_v5, %v10473_v17  ;;  %v2919_v42 = vpop.f32.mrf.mxu3  ;;  %v7315_v5 = vld [vmem:[#allocation2 + $0x468] sm:$0xf0]  ;;  %v6842_v58 = vor.u32 %v8720_v26, %v6841_v39  ;;  %v6809_v56 = vld [vmem:[#allocation2 + $0x50] sm:$0xf] }
 0x412   :  { %v2830_v3 = vpop.f32.mrf.mxu0  ;;  %v8712_v35 = vld [vmem:[#allocation2 + $0x6c] sm:$0xf0] }
 0x413   :  { %v2831_v63 = vadd.f32 %v2830_v3, %v10425_v0  ;;  %v10494_v43 = vadd.f32 %v10458_v34, %v2886_v10  ;;  %v7318_v0 = vor.u32 %v8835_v52, %v7315_v5  ;;  %3258 = vmatpush.bf16.msra.mxu3 %v7034_v62  ;;  %v6810_v5 = vor.u32 %v8712_v35, %v6809_v56  ;;  %v6777_v26 = vld [vmem:[#allocation2 + $0x10] sm:$0xf] }
 0x414   :  { %3226 = vmatpush.bf16.msrb.mxu2 %v6874_v47  ;;  %v8827_v47 = vld [vmem:[#allocation2 + $0x40c] sm:$0xf] }
 0x415   :  { %v10497_v38 = vadd.f32 %v10455_v16, %v2831_v63  ;;  %v2866_v4 = vpop.f32.mrf.mxu1  ;;  %3061 = vmatmul.bf16.gmra.mxu0 %v10371_v21  ;;  %3119 = vmatmul.bf16.gmra.mxu2 %v10308_v13 }
 0x416   :  { %3153 = vmatmul.bf16.gmra.mxu3 %v10306_v44  ;;  %3170 = vmatpush.bf16.msra.mxu0 %v7318_v0  ;;  %v7283_v0 = vld [vmem:[#allocation2 + $0x428] sm:$0xf0] }
 0x417   :  { %v7286_v39 = vor.u32 %v8827_v47, %v7283_v0  ;;  %v7513_v47 = vld [vmem:[#allocation2 + $0x5d0] sm:$0xf] }
 0x418   :  { %v2888_v34 = vpop.f32.mrf.mxu2  ;;  %3227 = vmatpush.bf16.msrb.mxu2 %v6842_v58  ;;  %v8888_v0 = vld [vmem:[#allocation2 + $0x5ec] sm:$0xf0] }
 0x419   :  { %v2889_v16 = vadd.f32 %v2888_v34, %v10473_v17  ;;  %v2922_v10 = vpop.f32.mrf.mxu3  ;;  %v7769_v34 = vld [vmem:[#allocation2 + $0x7d0] sm:$0xf] }
 0x41a   :  { %v2832_v45 = vpop.f32.mrf.mxu0  ;;  %3171 = vmatpush.bf16.msra.mxu0 %v7286_v39 }
 0x41b   :  { %v2833_v3 = vadd.f32 %v2832_v45, %v10429_v31  ;;  %v10505_v63 = vadd.f32 %v10477_v51, %v2889_v16  ;;  %v8704_v51 = vld [vmem:[#allocation2 + $0x2c] sm:$0xf0] }
 0x41c   :  { %3228 = vmatpush.bf16.msrb.mxu2 %v6810_v5  ;;  %v6778_v45 = vor.u32 %v8704_v51, %v6777_v26 }
 0x41d   :  { %v10508_v62 = vadd.f32 %v10468_v11, %v2833_v3  ;;  %v2869_v52 = vpop.f32.mrf.mxu1 }
 0x420   :  { %3100 = vmatmul.bf16.gmra.mxu1 %v10378_v53  ;;  %v2890_v31 = vpop.f32.mrf.mxu2  ;;  %3229 = vmatpush.bf16.msrb.mxu2 %v6778_v45 }
 0x421   :  { %v2891_v16 = vadd.f32 %v2890_v31, %v10473_v17  ;;  %v2924_v58 = vpop.f32.mrf.mxu3  ;;  %v7514_v31 = vor.u32 %v8888_v0, %v7513_v47  ;;  %v7770_v47 = vor.u32 %v8952_v29, %v7769_v34  ;;  %v8820_v29 = vld [vmem:[#allocation2 + $0x3d4] sm:$0xf] }
 0x422   :  { %v2835_v11 = vpop.f32.mrf.mxu0  ;;  %v7259_v34 = vld [vmem:[#allocation2 + $0x3f0] sm:$0xf0] }
 0x423   :  { %v2836_v3 = vadd.f32 %v2835_v11, %v10435_v18  ;;  %v10515_v56 = vadd.f32 %v2919_v42, %v2891_v16  ;;  %3280 = vmatpush.bf16.msrb.mxu0 %v7514_v31  ;;  %v7481_v11 = vld [vmem:[#allocation2 + $0x590] sm:$0xf]  ;;  %3309 = vmatpush.bf16.msra.mxu1 %v7770_v47 }
 0x424   :  { %v7449_v47 = vld [vmem:[#allocation2 + $0x550] sm:$0xf] }
 0x425   :  { %v10518_v35 = vadd.f32 %v10486_v24, %v2836_v3  ;;  %v10520_v5 = vpop.f32.mrf.mxu1  ;;  %3066 = vmatmul.bf16.gmra.mxu0 %v10383_v12  ;;  %3124 = vmatmul.bf16.gmra.mxu2 %v10326_v37  ;;  %v8880_v3 = vld [vmem:[#allocation2 + $0x5ac] sm:$0xf0] }
 0x426   :  { %3158 = vmatmul.bf16.gmra.mxu3 %v10324_v6  ;;  %v7482_v14 = vor.u32 %v8880_v3, %v7481_v11 }
 0x428   :  { %v2893_v39 = vpop.f32.mrf.mxu2  ;;  %3281 = vmatpush.bf16.msrb.mxu0 %v7482_v14  ;;  %v7262_v14 = vor.u32 %v8820_v29, %v7259_v34  ;;  %v7673_v34 = vld [vmem:[#allocation2 + $0x710] sm:$0xf] }
 0x429   :  { %v2894_v18 = vadd.f32 %v2893_v39, %v10473_v17  ;;  %v2927_v26 = vpop.f32.mrf.mxu3  ;;  %v7737_v39 = vld [vmem:[#allocation2 + $0x790] sm:$0xf] }
 0x42a   :  { %v2837_v42 = vpop.f32.mrf.mxu0  ;;  %3367 = vmatpush.bf16.msrb.mxu3 %v7262_v14 }
 0x42b   :  { %v2838_v24 = vadd.f32 %v2837_v42, %v10443_v55  ;;  %v10527_v51 = vadd.f32 %v2922_v10, %v2894_v18  ;;  %v8944_v18 = vld [vmem:[#allocation2 + $0x7ac] sm:$0xf0] }
 0x42d   :  { %v10529_v16 = vadd.f32 %v2866_v4, %v2838_v24  ;;  %v10531_v45 = vpop.f32.mrf.mxu1  ;;  %v7738_v24 = vor.u32 %v8944_v18, %v7737_v39  ;;  %v7227_v18 = vld [vmem:[#allocation2 + $0x3b0] sm:$0xf0] }
 0x42f   :  { %3310 = vmatpush.bf16.msra.mxu1 %v7738_v24  ;;  %v8928_v24 = vld [vmem:[#allocation2 + $0x72c] sm:$0xf0] }
 0x430   :  { %3201 = vmatmul.bf16.vlgmr.msrb.gmra.mxu1 %v10335_v61  ;;  %v2895_v31 = vpop.f32.mrf.mxu2 }
 0x431   :  { %v2896_v55 = vadd.f32 %v2895_v31, %v10473_v17  ;;  %v10537_v10 = vpop.f32.mrf.mxu3  ;;  %v8872_v31 = vld [vmem:[#allocation2 + $0x56c] sm:$0xf0] }
 0x432   :  { %v2840_v4 = vpop.f32.mrf.mxu0 }
 0x433   :  { %v2841_v42 = vadd.f32 %v2840_v4, %v10453_v15  ;;  %v10540_v11 = vadd.f32 %v2924_v58, %v2896_v55  ;;  %v7705_v15 = vld [vmem:[#allocation2 + $0x750] sm:$0xf]  ;;  %v7450_v4 = vor.u32 %v8872_v31, %v7449_v47  ;;  %v7674_v47 = vor.u32 %v8928_v24, %v7673_v34  ;;  %v8804_v31 = vld [vmem:[#allocation2 + $0x354] sm:$0xf] }
 0x434   :  { %v8936_v58 = vld [vmem:[#allocation2 + $0x76c] sm:$0xf0] }
 0x435   :  { %v10542_v3 = vadd.f32 %v2869_v52, %v2841_v42  ;;  %v10544_v0 = vpop.f32.mrf.mxu1  ;;  %3071 = vmatmul.bf16.gmra.mxu0 %v10391_v57  ;;  %3129 = vmatmul.bf16.gmra.mxu2 %v10341_v28  ;;  %v7706_v39 = vor.u32 %v8936_v58, %v7705_v15  ;;  %v8812_v52 = vld [vmem:[#allocation2 + $0x394] sm:$0xf] }
 0x436   :  { %3259 = vmatmul.bf16.vlgmr.msra.gmra.mxu3 %v10259_v7  ;;  %3282 = vmatpush.bf16.msrb.mxu0 %v7450_v4  ;;  %v7230_v8 = vor.u32 %v8812_v52, %v7227_v18  ;;  %v7195_v15 = vld [vmem:[#allocation2 + $0x370] sm:$0xf0]  ;;  %v8864_v4 = vld [vmem:[#allocation2 + $0x52c] sm:$0xf0] }
 0x437   :  { %3311 = vmatpush.bf16.msra.mxu1 %v7706_v39  ;;  %v7198_v52 = vor.u32 %v8804_v31, %v7195_v15  ;;  %v7418_v39 = vor.u32 %v8864_v4, %v7417_v49  ;;  %v7641_v18 = vld [vmem:[#allocation2 + $0x6d0] sm:$0xf]  ;;  %v7163_v49 = vld [vmem:[#allocation2 + $0x330] sm:$0xf0] }
 0x438   :  { %v2898_v55 = vpop.f32.mrf.mxu2  ;;  %3368 = vmatpush.bf16.msrb.mxu3 %v7230_v8  ;;  %v7609_v15 = vld [vmem:[#allocation2 + $0x690] sm:$0xf]  ;;  %v7131_v8 = vld [vmem:[#allocation2 + $0x2f0] sm:$0xf0] }
 0x439   :  { %v2899_v42 = vadd.f32 %v2898_v55, %v10473_v17  ;;  %v10550_v36 = vpop.f32.mrf.mxu3  ;;  %v8912_v4 = vld [vmem:[#allocation2 + $0x6ac] sm:$0xf0] }
 0x43a   :  { %v2842_v29 = vpop.f32.mrf.mxu0  ;;  %3283 = vmatpush.bf16.msrb.mxu0 %v7418_v39 }
 0x43b   :  { %v2843_v9 = vadd.f32 %v2842_v29, %v10463_v22  ;;  %v10553_v14 = vadd.f32 %v2927_v26, %v2899_v42  ;;  %3312 = vmatpush.bf16.msra.mxu1 %v7674_v47  ;;  %v7642_v22 = vor.u32 %v8920_v1, %v7641_v18  ;;  %v8796_v42 = vld [vmem:[#allocation2 + $0x314] sm:$0xf] }
 0x43c   :  { %3369 = vmatpush.bf16.msrb.mxu3 %v7198_v52  ;;  %v7166_v31 = vor.u32 %v8796_v42, %v7163_v49  ;;  %v7610_v52 = vor.u32 %v8912_v4, %v7609_v15  ;;  %v8788_v18 = vld [vmem:[#allocation2 + $0x2d4] sm:$0xf] }
 0x43d   :  { %v10556_v58 = vadd.f32 %v10520_v5, %v2843_v9  ;;  %v10558_v55 = vpop.f32.mrf.mxu1  ;;  %v8756_v9 = vld [vmem:[#allocation2 + $0x1d4] sm:$0xf] }
 0x43e   :  { %v7003_v5 = vld [vmem:[#allocation2 + $0x1f0] sm:$0xf0] }
 0x43f   :  { %v7006_v24 = vor.u32 %v8756_v9, %v7003_v5  ;;  %3313 = vmatpush.bf16.msra.mxu1 %v7642_v22  ;;  %v10578_v22 = vperm.slane %v10404_v48, 2  ;;  %v8856_v9 = vld [vmem:[#allocation2 + $0x4ec] sm:$0xf0]  ;;  %v8748_v5 = vld [vmem:[#allocation2 + $0x194] sm:$0xf] }
 0x440   :  { %3206 = vmatmul.bf16.gmra.mxu1 %v10351_v46  ;;  %v2900_v26 = vpop.f32.mrf.mxu2  ;;  %3370 = vmatpush.bf16.msrb.mxu3 %v7166_v31  ;;  %v8780_v15 = vld [vmem:[#allocation2 + $0x294] sm:$0xf] }
 0x441   :  { %v2901_v29 = vadd.f32 %v2900_v26, %v10473_v17  ;;  %v10564_v34 = vpop.f32.mrf.mxu3  ;;  %3338 = vmatpush.bf16.msra.mxu2 %v7006_v24  ;;  %v8904_v24 = vld [vmem:[#allocation2 + $0x66c] sm:$0xf0]  ;;  %v7099_v4 = vld [vmem:[#allocation2 + $0x2b0] sm:$0xf0] }
 0x442   :  { %v2941_v47 = vpop.f32.mrf.mxu0 }
 0x443   :  { %v2942_v1 = vadd.f32 %v2941_v47, %v10481_v27  ;;  %v10568_v39 = vadd.f32 %v10537_v10, %v2901_v29  ;;  %v7134_v27 = vor.u32 %v8788_v18, %v7131_v8  ;;  %3314 = vmatpush.bf16.msra.mxu1 %v7610_v52  ;;  %v7385_v10 = vld [vmem:[#allocation2 + $0x4d0] sm:$0xf]  ;;  %v6971_v29 = vld [vmem:[#allocation2 + $0x1b0] sm:$0xf0]  ;;  %v7102_v8 = vor.u32 %v8780_v15, %v7099_v4 }
 0x444   :  { %v7386_v42 = vor.u32 %v8856_v9, %v7385_v10  ;;  %v6974_v47 = vor.u32 %v8748_v5, %v6971_v29  ;;  %v7545_v18 = vld [vmem:[#allocation2 + $0x610] sm:$0xf]  ;;  %v8740_v5 = vld [vmem:[#allocation2 + $0x154] sm:$0xf] }
 0x445   :  { %v10571_v17 = vadd.f32 %v10531_v45, %v2942_v1  ;;  %v10573_v26 = vpop.f32.mrf.mxu1  ;;  %3172 = vmatmul.bf16.vlgmr.msra.gmra.mxu0 %v10357_v23  ;;  %3230 = vmatmul.bf16.vlgmr.msrb.gmra.mxu2 %v10282_v25  ;;  %v7577_v45 = vld [vmem:[#allocation2 + $0x650] sm:$0xf]  ;;  %v6939_v29 = vld [vmem:[#allocation2 + $0x170] sm:$0xf0] }
 0x446   :  { %3264 = vmatmul.bf16.gmra.mxu3 %v10280_v54  ;;  %v7578_v31 = vor.u32 %v8904_v24, %v7577_v45  ;;  %3284 = vmatpush.bf16.msrb.mxu0 %v7386_v42  ;;  %v8896_v10 = vld [vmem:[#allocation2 + $0x62c] sm:$0xf0]  ;;  %v8772_v45 = vld [vmem:[#allocation2 + $0x254] sm:$0xf] }
 0x447   :  { %12120 = vst [vmem:[#allocation44_spill] sm:$0xff] %v10571_v17  ;;  %3371 = vmatpush.bf16.msrb.mxu3 %v7134_v27  ;;  %3339 = vmatpush.bf16.msra.mxu2 %v6974_v47  ;;  %v7546_v40 = vor.u32 %v8896_v10, %v7545_v18  ;;  %v8848_v47 = vld [vmem:[#allocation2 + $0x4ac] sm:$0xf0]  ;;  %v7067_v15 = vld [vmem:[#allocation2 + $0x270] sm:$0xf0] }
 0x448   :  { %v2999_v49 = vpop.f32.mrf.mxu2  ;;  %3315 = vmatpush.bf16.msra.mxu1 %v7578_v31  ;;  %v6942_v31 = vor.u32 %v8740_v5, %v6939_v29  ;;  %v7035_v5 = vld [vmem:[#allocation2 + $0x230] sm:$0xf0] }
 0x449   :  { %v3000_v48 = vadd.f32 %v2999_v49, %v10578_v22  ;;  %v10582_v1 = vpop.f32.mrf.mxu3  ;;  %v7353_v49 = vld [vmem:[#allocation2 + $0x490] sm:$0xf] }
 0x44a   :  { %v2943_v52 = vpop.f32.mrf.mxu0  ;;  %v7354_v4 = vor.u32 %v8848_v47, %v7353_v49  ;;  %v8724_v47 = vld [vmem:[#allocation2 + $0xd4] sm:$0xf] }
 0x44b   :  { %v2944_v9 = vadd.f32 %v2943_v52, %v10494_v43  ;;  %v10586_v27 = vadd.f32 %v10550_v36, %v3000_v48  ;;  %3372 = vmatpush.bf16.msrb.mxu3 %v7102_v8  ;;  %v7070_v43 = vor.u32 %v8772_v45, %v7067_v15  ;;  %3340 = vmatpush.bf16.msra.mxu2 %v6942_v31  ;;  %v8732_v8 = vld [vmem:[#allocation2 + $0x114] sm:$0xf] }
 0x44c   :  { %3316 = vmatpush.bf16.msra.mxu1 %v7546_v40  ;;  %3285 = vmatpush.bf16.msrb.mxu0 %v7354_v4  ;;  %v8764_v52 = vld [vmem:[#allocation2 + $0x214] sm:$0xf] }
 0x44d   :  { %v10589_v24 = vadd.f32 %v10544_v0, %v2944_v9  ;;  %v10591_v42 = vpop.f32.mrf.mxu1  ;;  %v6907_v0 = vld [vmem:[#allocation2 + $0x130] sm:$0xf0]  ;;  %v7038_v45 = vor.u32 %v8764_v52, %v7035_v5 }
 0x44e   :  { %v6910_v9 = vor.u32 %v8732_v8, %v6907_v0  ;;  %v6875_v31 = vld [vmem:[#allocation2 + $0xf0] sm:$0xf0] }
 0x44f   :  { %12121 = vst [vmem:[#allocation45_spill] sm:$0xff] %v10589_v24  ;;  %3373 = vmatpush.bf16.msrb.mxu3 %v7070_v43  ;;  %v7321_v43 = vld [vmem:[#allocation2 + $0x450] sm:$0xf]  ;;  %v6878_v8 = vor.u32 %v8724_v47, %v6875_v31  ;;  %v8716_v0 = vld [vmem:[#allocation2 + $0x94] sm:$0xf] }
 0x450   :  { %3211 = vmatmul.bf16.gmra.mxu1 %v10365_v20  ;;  %v3001_v48 = vpop.f32.mrf.mxu2  ;;  %3341 = vmatpush.bf16.msra.mxu2 %v6910_v9  ;;  %v6843_v52 = vld [vmem:[#allocation2 + $0xb0] sm:$0xf0]  ;;  %v7105_v24 = vld [vmem:[#allocation2 + $0x298] sm:$0xf] }
 0x451   :  { %v3002_v18 = vadd.f32 %v3001_v48, %v10578_v22  ;;  %v3035_v10 = vpop.f32.mrf.mxu3  ;;  %v8840_v48 = vld [vmem:[#allocation2 + $0x46c] sm:$0xf0]  ;;  %v6846_v9 = vor.u32 %v8716_v0, %v6843_v52  ;;  %v8708_v47 = vld [vmem:[#allocation2 + $0x54] sm:$0xf] }
 0x452   :  { %v2946_v40 = vpop.f32.mrf.mxu0  ;;  %v6811_v31 = vld [vmem:[#allocation2 + $0x70] sm:$0xf0] }
 0x453   :  { %v2947_v29 = vadd.f32 %v2946_v40, %v10505_v63  ;;  %v10599_v49 = vadd.f32 %v10564_v34, %v3002_v18  ;;  %v7322_v63 = vor.u32 %v8840_v48, %v7321_v43  ;;  %3374 = vmatpush.bf16.msrb.mxu3 %v7038_v45  ;;  %v6814_v48 = vor.u32 %v8708_v47, %v6811_v31  ;;  %v6779_v52 = vld [vmem:[#allocation2 + $0x30] sm:$0xf0] }
 0x454   :  { %3342 = vmatpush.bf16.msra.mxu2 %v6878_v8  ;;  %v7289_v8 = vld [vmem:[#allocation2 + $0x410] sm:$0xf] }
 0x455   :  { %v10602_v15 = vadd.f32 %v10558_v55, %v2947_v29  ;;  %v2982_v4 = vpop.f32.mrf.mxu1  ;;  %3177 = vmatmul.bf16.gmra.mxu0 %v10371_v21  ;;  %3235 = vmatmul.bf16.gmra.mxu2 %v10308_v13 }
 0x456   :  { %3269 = vmatmul.bf16.gmra.mxu3 %v10306_v44  ;;  %3286 = vmatpush.bf16.msrb.mxu0 %v7322_v63  ;;  %v8832_v63 = vld [vmem:[#allocation2 + $0x42c] sm:$0xf0] }
 0x457   :  { %12122 = vst [vmem:[#allocation46_spill] sm:$0xff] %v10602_v15  ;;  %v7290_v0 = vor.u32 %v8832_v63, %v7289_v8  ;;  %v8884_v8 = vld [vmem:[#allocation2 + $0x5d4] sm:$0xf] }
 0x458   :  { %v3004_v34 = vpop.f32.mrf.mxu2  ;;  %3343 = vmatpush.bf16.msra.mxu2 %v6846_v9  ;;  %v7515_v63 = vld [vmem:[#allocation2 + $0x5f0] sm:$0xf0] }
 0x459   :  { %v3005_v55 = vadd.f32 %v3004_v34, %v10578_v22  ;;  %v3038_v18 = vpop.f32.mrf.mxu3  ;;  %v6977_v34 = vld [vmem:[#allocation2 + $0x198] sm:$0xf] }
 0x45a   :  { %v2948_v5 = vpop.f32.mrf.mxu0  ;;  %3287 = vmatpush.bf16.msrb.mxu0 %v7290_v0  ;;  %v6978_v33 = vor.u32 %v8753_v41, %v6977_v34  ;;  %v7739_v41 = vld [vmem:[#allocation2 + $0x7b0] sm:$0xf0] }
 0x45b   :  { %v2949_v40 = vadd.f32 %v2948_v5, %v10515_v56  ;;  %v10610_v29 = vadd.f32 %v10582_v1, %v3005_v55  ;;  %v8700_v1 = vld [vmem:[#allocation2 + $0x14] sm:$0xf] }
 0x45c   :  { %3344 = vmatpush.bf16.msra.mxu2 %v6814_v48 }
 0x45d   :  { %v10613_v45 = vadd.f32 %v10573_v26, %v2949_v40  ;;  %v10615_v43 = vpop.f32.mrf.mxu1  ;;  %v6782_v26 = vor.u32 %v8700_v1, %v6779_v52 }
 0x45f   :  { %12123 = vst [vmem:[#allocation47_spill] sm:$0xff] %v10613_v45 }
 0x460   :  { %3216 = vmatmul.bf16.gmra.mxu1 %v10378_v53  ;;  %v3006_v56 = vpop.f32.mrf.mxu2  ;;  %3345 = vmatpush.bf16.msra.mxu2 %v6782_v26 }
 0x461   :  { %v3007_v55 = vadd.f32 %v3006_v56, %v10578_v22  ;;  %v3040_v9 = vpop.f32.mrf.mxu3  ;;  %v7518_v56 = vor.u32 %v8884_v8, %v7515_v63  ;;  %v8876_v8 = vld [vmem:[#allocation2 + $0x594] sm:$0xf] }
 0x462   :  { %v2951_v5 = vpop.f32.mrf.mxu0  ;;  %v7483_v63 = vld [vmem:[#allocation2 + $0x5b0] sm:$0xf0] }
 0x463   :  { %v2952_v40 = vadd.f32 %v2951_v5, %v10527_v51  ;;  %v10622_v47 = vadd.f32 %v3035_v10, %v3007_v55  ;;  %3396 = vmatpush.bf16.msra.mxu0 %v7518_v56  ;;  %v7009_v10 = vld [vmem:[#allocation2 + $0x1d8] sm:$0xf]  ;;  %v7771_v56 = vld [vmem:[#allocation2 + $0x7f0] sm:$0xf0] }
 0x464   :  { %v7774_v19 = vor.u32 %v8948_v32, %v7771_v56  ;;  %v8825_v56 = vld [vmem:[#allocation2 + $0x3f4] sm:$0xf0] }
 0x465   :  { %v10625_v31 = vadd.f32 %v10591_v42, %v2952_v40  ;;  %v10627_v48 = vpop.f32.mrf.mxu1  ;;  %3182 = vmatmul.bf16.gmra.mxu0 %v10383_v12  ;;  %3240 = vmatmul.bf16.gmra.mxu2 %v10326_v37  ;;  %v8761_v42 = vld [vmem:[#allocation2 + $0x1f4] sm:$0xf0] }
 0x466   :  { %3274 = vmatmul.bf16.gmra.mxu3 %v10324_v6  ;;  %v7010_v55 = vor.u32 %v8761_v42, %v7009_v10  ;;  %3425 = vmatpush.bf16.msrb.mxu1 %v7774_v19  ;;  %v8745_v42 = vld [vmem:[#allocation2 + $0x174] sm:$0xf0] }
 0x467   :  { %v8817_v10 = vld [vmem:[#allocation2 + $0x3b4] sm:$0xf0] }
 0x468   :  { %v3009_v0 = vpop.f32.mrf.mxu2  ;;  %3454 = vmatpush.bf16.msrb.mxu2 %v7010_v55 }
 0x469   :  { %v3010_v51 = vadd.f32 %v3009_v0, %v10578_v22  ;;  %v10633_v1 = vpop.f32.mrf.mxu3  ;;  %v7486_v0 = vor.u32 %v8876_v8, %v7483_v63  ;;  %v7265_v63 = vld [vmem:[#allocation2 + $0x3d8] sm:$0xf] }
 0x46a   :  { %v2953_v52 = vpop.f32.mrf.mxu0  ;;  %v7266_v19 = vor.u32 %v8825_v56, %v7265_v63 }
 0x46b   :  { %v2954_v26 = vadd.f32 %v2953_v52, %v10540_v11  ;;  %v10636_v5 = vadd.f32 %v3038_v18, %v3010_v51  ;;  %3397 = vmatpush.bf16.msra.mxu0 %v7486_v0  ;;  %v6945_v51 = vld [vmem:[#allocation2 + $0x158] sm:$0xf] }
 0x46c   :  { %3455 = vmatpush.bf16.msrb.mxu2 %v6978_v33  ;;  %v6946_v55 = vor.u32 %v8745_v42, %v6945_v51  ;;  %v6913_v33 = vld [vmem:[#allocation2 + $0x118] sm:$0xf]  ;;  %v8932_v42 = vld [vmem:[#allocation2 + $0x754] sm:$0xf]  ;;  %3483 = vmatpush.bf16.msra.mxu3 %v7266_v19 }
 0x46d   :  { %v10638_v40 = vadd.f32 %v2982_v4, %v2954_v26  ;;  %v10640_v36 = vpop.f32.mrf.mxu1  ;;  %v8940_v26 = vld [vmem:[#allocation2 + $0x794] sm:$0xf]  ;;  %v8737_v51 = vld [vmem:[#allocation2 + $0x134] sm:$0xf0] }
 0x46e   :  { %v7742_v34 = vor.u32 %v8940_v26, %v7739_v41 }
 0x470   :  { %3317 = vmatmul.bf16.vlgmr.msra.gmra.mxu1 %v10335_v61  ;;  %v3011_v11 = vpop.f32.mrf.mxu2  ;;  %3456 = vmatpush.bf16.msrb.mxu2 %v6946_v55  ;;  %v8729_v55 = vld [vmem:[#allocation2 + $0xf4] sm:$0xf0] }
 0x471   :  { %v3012_v4 = vadd.f32 %v3011_v11, %v10578_v22  ;;  %v10646_v18 = vpop.f32.mrf.mxu3  ;;  %3426 = vmatpush.bf16.msrb.mxu1 %v7742_v34  ;;  %v7675_v34 = vld [vmem:[#allocation2 + $0x730] sm:$0xf0] }
 0x472   :  { %v2956_v52 = vpop.f32.mrf.mxu0 }
 0x473   :  { %v2957_v32 = vadd.f32 %v2956_v52, %v10553_v14  ;;  %v10649_v8 = vadd.f32 %v3040_v9, %v3012_v4  ;;  %v8868_v14 = vld [vmem:[#allocation2 + $0x554] sm:$0xf]  ;;  %v6914_v4 = vor.u32 %v8737_v51, %v6913_v33  ;;  %v6882_v33 = vor.u32 %v8729_v55, %v6881_v59 }
 0x474   :  { %v7451_v9 = vld [vmem:[#allocation2 + $0x570] sm:$0xf0] }
 0x475   :  { %v10652_v0 = vadd.f32 %v10615_v43, %v2957_v32  ;;  %v10654_v11 = vpop.f32.mrf.mxu1  ;;  %3187 = vmatmul.bf16.gmra.mxu0 %v10391_v57  ;;  %3245 = vmatmul.bf16.gmra.mxu2 %v10341_v28  ;;  %v7454_v52 = vor.u32 %v8868_v14, %v7451_v9  ;;  %v7707_v43 = vld [vmem:[#allocation2 + $0x770] sm:$0xf0]  ;;  %v7233_v32 = vld [vmem:[#allocation2 + $0x398] sm:$0xf] }
 0x476   :  { %3375 = vmatmul.bf16.vlgmr.msrb.gmra.mxu3 %v10259_v7  ;;  %v7710_v41 = vor.u32 %v8932_v42, %v7707_v43  ;;  %v7234_v56 = vor.u32 %v8817_v10, %v7233_v32  ;;  %3457 = vmatpush.bf16.msrb.mxu2 %v6914_v4  ;;  %v8924_v51 = vld [vmem:[#allocation2 + $0x714] sm:$0xf]  ;;  %v7201_v42 = vld [vmem:[#allocation2 + $0x358] sm:$0xf] }
 0x477   :  { %3398 = vmatpush.bf16.msra.mxu0 %v7454_v52  ;;  %v7678_v14 = vor.u32 %v8924_v51, %v7675_v34  ;;  %v8809_v43 = vld [vmem:[#allocation2 + $0x374] sm:$0xf0]  ;;  %v7419_v4 = vld [vmem:[#allocation2 + $0x530] sm:$0xf0] }
 0x478   :  { %v3014_v26 = vpop.f32.mrf.mxu2  ;;  %3427 = vmatpush.bf16.msrb.mxu1 %v7710_v41  ;;  %3484 = vmatpush.bf16.msra.mxu3 %v7234_v56  ;;  %v7202_v59 = vor.u32 %v8809_v43, %v7201_v42  ;;  %v6849_v32 = vld [vmem:[#allocation2 + $0x98] sm:$0xf]  ;;  %v7643_v41 = vld [vmem:[#allocation2 + $0x6f0] sm:$0xf0] }
 0x479   :  { %v3015_v30 = vadd.f32 %v3014_v26, %v10578_v22  ;;  %v10660_v63 = vpop.f32.mrf.mxu3  ;;  %v8860_v26 = vld [vmem:[#allocation2 + $0x514] sm:$0xf]  ;;  %v7169_v51 = vld [vmem:[#allocation2 + $0x318] sm:$0xf] }
 0x47a   :  { %v2958_v60 = vpop.f32.mrf.mxu0  ;;  %3458 = vmatpush.bf16.msrb.mxu2 %v6882_v33  ;;  %v7422_v55 = vor.u32 %v8860_v26, %v7419_v4  ;;  %v8801_v34 = vld [vmem:[#allocation2 + $0x334] sm:$0xf0] }
 0x47b   :  { %v2959_v19 = vadd.f32 %v2958_v60, %v10568_v39  ;;  %v10664_v9 = vadd.f32 %v10633_v1, %v3015_v30  ;;  %v8721_v60 = vld [vmem:[#allocation2 + $0xb4] sm:$0xf0]  ;;  %v8916_v39 = vld [vmem:[#allocation2 + $0x6d4] sm:$0xf]  ;;  %v7170_v42 = vor.u32 %v8801_v34, %v7169_v51 }
 0x47c   :  { %3428 = vmatpush.bf16.msrb.mxu1 %v7678_v14  ;;  %3485 = vmatpush.bf16.msra.mxu3 %v7202_v59  ;;  %v6850_v1 = vor.u32 %v8721_v60, %v6849_v32  ;;  %v7646_v56 = vor.u32 %v8916_v39, %v7643_v41  ;;  %v6817_v43 = vld [vmem:[#allocation2 + $0x58] sm:$0xf]  ;;  %v8908_v14 = vld [vmem:[#allocation2 + $0x694] sm:$0xf] }
 0x47d   :  { %v10667_v52 = vadd.f32 %v10627_v48, %v2959_v19  ;;  %v10669_v10 = vpop.f32.mrf.mxu1  ;;  %3399 = vmatpush.bf16.msra.mxu0 %v7422_v55  ;;  %v8713_v26 = vld [vmem:[#allocation2 + $0x74] sm:$0xf0]  ;;  %v7611_v59 = vld [vmem:[#allocation2 + $0x6b0] sm:$0xf0] }
 0x47e   :  { %3459 = vmatpush.bf16.msrb.mxu2 %v6850_v1  ;;  %v6818_v30 = vor.u32 %v8713_v26, %v6817_v43  ;;  %v7614_v60 = vor.u32 %v8908_v14, %v7611_v59  ;;  %v7137_v39 = vld [vmem:[#allocation2 + $0x2d8] sm:$0xf]  ;;  %v7387_v34 = vld [vmem:[#allocation2 + $0x4f0] sm:$0xf0]  ;;  %v7011_v14 = vld [vmem:[#allocation2 + $0x1f8] sm:$0xf0] }
 0x47f   :  { %v8705_v51 = vld [vmem:[#allocation2 + $0x34] sm:$0xf0]  ;;  %v7579_v26 = vld [vmem:[#allocation2 + $0x670] sm:$0xf0] }
 0x480   :  { %3322 = vmatmul.bf16.gmra.mxu1 %v10351_v46  ;;  %v3016_v48 = vpop.f32.mrf.mxu2  ;;  %3486 = vmatpush.bf16.msra.mxu3 %v7170_v42  ;;  %v8900_v42 = vld [vmem:[#allocation2 + $0x654] sm:$0xf] }
 0x481   :  { %v3017_v19 = vadd.f32 %v3016_v48, %v10578_v22  ;;  %v10675_v33 = vpop.f32.mrf.mxu3  ;;  %3429 = vmatpush.bf16.msrb.mxu1 %v7646_v56  ;;  %v8793_v22 = vld [vmem:[#allocation2 + $0x2f4] sm:$0xf0] }
 0x482   :  { %v3057_v4 = vpop.f32.mrf.mxu0  ;;  %v6785_v56 = vld [vmem:[#allocation2 + $0x18] sm:$0xf]  ;;  %3460 = vmatpush.bf16.msrb.mxu2 %v6818_v30 }
 0x483   :  { %v3058_v32 = vadd.f32 %v3057_v4, %v10586_v27  ;;  %v10679_v55 = vadd.f32 %v10646_v18, %v3017_v19  ;;  %v10691_v27 = vld [vmem:[%s12043_s9] sm:$0xff]  ;;  %v7138_v18 = vor.u32 %v8793_v22, %v7137_v39  ;;  %v6786_v19 = vor.u32 %v8705_v51, %v6785_v56  ;;  %v8757_v4 = vld [vmem:[#allocation2 + $0x1dc] sm:$0xf]  ;;  %v8785_v39 = vld [vmem:[#allocation2 + $0x2b4] sm:$0xf0] }
 0x484   :  { %v10694_v1 = vperm.slane %v10691_v27, 3  ;;  %v7014_v17 = vor.u32 %v8757_v4, %v7011_v14  ;;  %v7106_v30 = vor.u32 %v8785_v39, %v7105_v24  ;;  %v8892_v56 = vld [vmem:[#allocation2 + $0x614] sm:$0xf]  ;;  %v8749_v51 = vld [vmem:[#allocation2 + $0x19c] sm:$0xf] }
 0x485   :  { %v10682_v41 = vadd.f32 %v10640_v36, %v3058_v32  ;;  %v10684_v48 = vpop.f32.mrf.mxu1  ;;  %3288 = vmatmul.bf16.vlgmr.msrb.gmra.mxu0 %v10357_v23  ;;  %3346 = vmatmul.bf16.vlgmr.msra.gmra.mxu2 %v10282_v25  ;;  %v8852_v36 = vld [vmem:[#allocation2 + $0x4d4] sm:$0xf]  ;;  %v7582_v32 = vor.u32 %v8900_v42, %v7579_v26  ;;  %v7073_v4 = vld [vmem:[#allocation2 + $0x258] sm:$0xf] }
 0x486   :  { %3380 = vmatmul.bf16.gmra.mxu3 %v10280_v54  ;;  %3430 = vmatpush.bf16.msrb.mxu1 %v7614_v60  ;;  %v7390_v43 = vor.u32 %v8852_v36, %v7387_v34  ;;  %v7547_v60 = vld [vmem:[#allocation2 + $0x630] sm:$0xf0]  ;;  %v6979_v34 = vld [vmem:[#allocation2 + $0x1b8] sm:$0xf0]  ;;  %v8777_v14 = vld [vmem:[#allocation2 + $0x274] sm:$0xf0] }
 0x487   :  { %12124 = vst [vmem:[#allocation48_spill] sm:$0xff] %v10682_v41  ;;  %3487 = vmatpush.bf16.msra.mxu3 %v7138_v18  ;;  %3461 = vmatpush.bf16.msrb.mxu2 %v6786_v19  ;;  %v7550_v36 = vor.u32 %v8892_v56, %v7547_v60  ;;  %v6982_v26 = vor.u32 %v8749_v51, %v6979_v34  ;;  %v6915_v34 = vld [vmem:[#allocation2 + $0x138] sm:$0xf0] }
 0x488   :  { %v3115_v59 = vpop.f32.mrf.mxu2  ;;  %3400 = vmatpush.bf16.msra.mxu0 %v7390_v43  ;;  %v8844_v43 = vld [vmem:[#allocation2 + $0x494] sm:$0xf]  ;;  %v7074_v39 = vor.u32 %v8777_v14, %v7073_v4 }
 0x489   :  { %v3116_v22 = vadd.f32 %v3115_v59, %v10694_v1  ;;  %v10698_v15 = vpop.f32.mrf.mxu3  ;;  %v7355_v59 = vld [vmem:[#allocation2 + $0x4b0] sm:$0xf0] }
 0x48a   :  { %v3059_v45 = vpop.f32.mrf.mxu0  ;;  %3431 = vmatpush.bf16.msrb.mxu1 %v7582_v32 }
 0x48b   :  { %v3060_v18 = vadd.f32 %v3059_v45, %v10599_v49  ;;  %3570 = vmatpush.bf16.msra.mxu2 %v7014_v17  ;;  %v10702_v42 = vadd.f32 %v10660_v63, %v3116_v22  ;;  %3488 = vmatpush.bf16.msra.mxu3 %v7106_v30  ;;  %v7358_v49 = vor.u32 %v8844_v43, %v7355_v59  ;;  %v8741_v45 = vld [vmem:[#allocation2 + $0x15c] sm:$0xf]  ;;  %v8769_v30 = vld [vmem:[#allocation2 + $0x234] sm:$0xf0] }
 0x48c   :  { %v6947_v17 = vld [vmem:[#allocation2 + $0x178] sm:$0xf0] }
 0x48d   :  { %v10705_v24 = vadd.f32 %v10654_v11, %v3060_v18  ;;  %v10707_v19 = vpop.f32.mrf.mxu1  ;;  %v6950_v32 = vor.u32 %v8741_v45, %v6947_v17  ;;  %3401 = vmatpush.bf16.msra.mxu0 %v7358_v49  ;;  %v7041_v11 = vld [vmem:[#allocation2 + $0x218] sm:$0xf]  ;;  %v8733_v18 = vld [vmem:[#allocation2 + $0x11c] sm:$0xf]  ;;  %v7323_v49 = vld [vmem:[#allocation2 + $0x470] sm:$0xf0] }
 0x48e   :  { %3432 = vmatpush.bf16.msrb.mxu1 %v7550_v36  ;;  %v6918_v4 = vor.u32 %v8733_v18, %v6915_v34  ;;  %v6883_v17 = vld [vmem:[#allocation2 + $0xf8] sm:$0xf0] }
 0x48f   :  { %12125 = vst [vmem:[#allocation49_spill] sm:$0xff] %v10705_v24  ;;  %3571 = vmatpush.bf16.msra.mxu2 %v6982_v26  ;;  %3489 = vmatpush.bf16.msra.mxu3 %v7074_v39  ;;  %v7042_v26 = vor.u32 %v8769_v30, %v7041_v11  ;;  %v8836_v39 = vld [vmem:[#allocation2 + $0x454] sm:$0xf]  ;;  %v8717_v30 = vld [vmem:[#allocation2 + $0x9c] sm:$0xf] }
 0x490   :  { %3327 = vmatmul.bf16.gmra.mxu1 %v10365_v20  ;;  %v3117_v22 = vpop.f32.mrf.mxu2  ;;  %v7326_v45 = vor.u32 %v8836_v39, %v7323_v49  ;;  %v6819_v39 = vld [vmem:[#allocation2 + $0x78] sm:$0xf0]  ;;  %v8828_v49 = vld [vmem:[#allocation2 + $0x414] sm:$0xf] }
 0x491   :  { %v3118_v56 = vadd.f32 %v3117_v22, %v10694_v1  ;;  %v3151_v60 = vpop.f32.mrf.mxu3 }
 0x492   :  { %v3062_v51 = vpop.f32.mrf.mxu0  ;;  %3402 = vmatpush.bf16.msra.mxu0 %v7326_v45  ;;  %v7291_v45 = vld [vmem:[#allocation2 + $0x430] sm:$0xf0] }
 0x493   :  { %v3063_v36 = vadd.f32 %v3062_v51, %v10610_v29  ;;  %3572 = vmatpush.bf16.msra.mxu2 %v6950_v32  ;;  %v10715_v14 = vadd.f32 %v10675_v33, %v3118_v56  ;;  %v8725_v29 = vld [vmem:[#allocation2 + $0xdc] sm:$0xf]  ;;  %3490 = vmatpush.bf16.msra.mxu3 %v7042_v26 }
 0x494   :  { %v6886_v32 = vor.u32 %v8725_v29, %v6883_v17  ;;  %v6851_v56 = vld [vmem:[#allocation2 + $0xb8] sm:$0xf0] }
 0x495   :  { %v10718_v43 = vadd.f32 %v10669_v10, %v3063_v36  ;;  %v3098_v59 = vpop.f32.mrf.mxu1  ;;  %3293 = vmatmul.bf16.gmra.mxu0 %v10371_v21  ;;  %3351 = vmatmul.bf16.gmra.mxu2 %v10308_v13  ;;  %v6854_v18 = vor.u32 %v8717_v30, %v6851_v56  ;;  %v8821_v17 = vld [vmem:[#allocation2 + $0x3dc] sm:$0xf] }
 0x496   :  { %3385 = vmatmul.bf16.gmra.mxu3 %v10306_v44 }
 0x497   :  { %12126 = vst [vmem:[#allocation50_spill] sm:$0xff] %v10718_v43  ;;  %3573 = vmatpush.bf16.msra.mxu2 %v6918_v4  ;;  %v8709_v4 = vld [vmem:[#allocation2 + $0x5c] sm:$0xf] }
 0x498   :  { %v3120_v33 = vpop.f32.mrf.mxu2  ;;  %v6822_v29 = vor.u32 %v8709_v4, %v6819_v39  ;;  %v7521_v39 = vld [vmem:[#allocation2 + $0x5d8] sm:$0xf] }
 0x499   :  { %v3121_v10 = vadd.f32 %v3120_v33, %v10694_v1  ;;  %v3154_v22 = vpop.f32.mrf.mxu3 }
 0x49a   :  { %v3064_v11 = vpop.f32.mrf.mxu0 }
 0x49b   :  { %v3065_v51 = vadd.f32 %v3064_v11, %v10622_v47  ;;  %3574 = vmatpush.bf16.msra.mxu2 %v6886_v32  ;;  %v10726_v34 = vadd.f32 %v10698_v15, %v3121_v10  ;;  %v7294_v32 = vor.u32 %v8828_v49, %v7291_v45  ;;  %v8701_v10 = vld [vmem:[#allocation2 + $0x1c] sm:$0xf]  ;;  %v8889_v49 = vld [vmem:[#allocation2 + $0x5f4] sm:$0xf0] }
 0x49c   :  { %v6787_v11 = vld [vmem:[#allocation2 + $0x38] sm:$0xf0]  ;;  %v7522_v45 = vor.u32 %v8889_v49, %v7521_v39  ;;  %v8953_v39 = vld [vmem:[#allocation2 + $0x7f4] sm:$0xf0] }
 0x49d   :  { %v10729_v36 = vadd.f32 %v10684_v48, %v3065_v51  ;;  %v10731_v26 = vpop.f32.mrf.mxu1  ;;  %3403 = vmatpush.bf16.msra.mxu0 %v7294_v32  ;;  %v6790_v56 = vor.u32 %v8701_v10, %v6787_v11  ;;  %v7489_v10 = vld [vmem:[#allocation2 + $0x598] sm:$0xf] }
 0x49e   :  { %v8881_v11 = vld [vmem:[#allocation2 + $0x5b4] sm:$0xf0] }
 0x49f   :  { %12127 = vst [vmem:[#allocation51_spill] sm:$0xff] %v10729_v36  ;;  %3575 = vmatpush.bf16.msra.mxu2 %v6854_v18  ;;  %v7649_v36 = vld [vmem:[#allocation2 + $0x6d8] sm:$0xf] }
 0x4a0   :  { %3332 = vmatmul.bf16.gmra.mxu1 %v10378_v53  ;;  %v3122_v47 = vpop.f32.mrf.mxu2 }
 0x4a1   :  { %v3123_v15 = vadd.f32 %v3122_v47, %v10694_v1  ;;  %v3156_v33 = vpop.f32.mrf.mxu3  ;;  %3512 = vmatpush.bf16.msrb.mxu0 %v7522_v45 }
 0x4a2   :  { %v3067_v48 = vpop.f32.mrf.mxu0 }
 0x4a3   :  { %v3068_v30 = vadd.f32 %v3067_v48, %v10636_v5  ;;  %3576 = vmatpush.bf16.msra.mxu2 %v6822_v29  ;;  %v10738_v51 = vadd.f32 %v3151_v60, %v3123_v15 }
 0x4a5   :  { %v10741_v18 = vadd.f32 %v10707_v19, %v3068_v30  ;;  %v10743_v4 = vpop.f32.mrf.mxu1  ;;  %3298 = vmatmul.bf16.gmra.mxu0 %v10383_v12  ;;  %3356 = vmatmul.bf16.gmra.mxu2 %v10326_v37  ;;  %v7490_v30 = vor.u32 %v8881_v11, %v7489_v10  ;;  %v7745_v10 = vld [vmem:[#allocation2 + $0x798] sm:$0xf] }
 0x4a6   :  { %3390 = vmatmul.bf16.gmra.mxu3 %v10324_v6  ;;  %v8945_v11 = vld [vmem:[#allocation2 + $0x7b4] sm:$0xf0] }
 0x4a7   :  { %12128 = vst [vmem:[#allocation52_spill] sm:$0xff] %v10741_v18  ;;  %3577 = vmatpush.bf16.msra.mxu2 %v6790_v56  ;;  %v7777_v56 = vld [vmem:[#allocation2 + $0x7d8] sm:$0xf]  ;;  %3513 = vmatpush.bf16.msrb.mxu0 %v7490_v30 }
 0x4a8   :  { %v3125_v5 = vpop.f32.mrf.mxu2  ;;  %v7778_v49 = vor.u32 %v8953_v39, %v7777_v56  ;;  %v7746_v39 = vor.u32 %v8945_v11, %v7745_v10  ;;  %v7235_v10 = vld [vmem:[#allocation2 + $0x3b8] sm:$0xf0] }
 0x4a9   :  { %v3126_v29 = vadd.f32 %v3125_v5, %v10694_v1  ;;  %v10749_v60 = vpop.f32.mrf.mxu3  ;;  %v7267_v5 = vld [vmem:[#allocation2 + $0x3f8] sm:$0xf0] }
 0x4aa   :  { %v3069_v19 = vpop.f32.mrf.mxu0  ;;  %3541 = vmatpush.bf16.msra.mxu1 %v7778_v49  ;;  %v7270_v49 = vor.u32 %v8821_v17, %v7267_v5  ;;  %v7393_v17 = vld [vmem:[#allocation2 + $0x4d8] sm:$0xf] }
 0x4ab   :  { %v3070_v47 = vadd.f32 %v3069_v19, %v10649_v8  ;;  %v10752_v32 = vadd.f32 %v3154_v22, %v3126_v29  ;;  %v8873_v29 = vld [vmem:[#allocation2 + $0x574] sm:$0xf0] }
 0x4ac   :  { %3599 = vmatpush.bf16.msrb.mxu3 %v7270_v49  ;;  %v8857_v5 = vld [vmem:[#allocation2 + $0x4f4] sm:$0xf0] }
 0x4ad   :  { %v10754_v15 = vadd.f32 %v3098_v59, %v3070_v47  ;;  %v10756_v48 = vpop.f32.mrf.mxu1  ;;  %v7457_v59 = vld [vmem:[#allocation2 + $0x558] sm:$0xf]  ;;  %v7394_v43 = vor.u32 %v8857_v5, %v7393_v17 }
 0x4ae   :  { %v7458_v47 = vor.u32 %v8873_v29, %v7457_v59  ;;  %v7425_v59 = vld [vmem:[#allocation2 + $0x518] sm:$0xf]  ;;  %3542 = vmatpush.bf16.msra.mxu1 %v7746_v39 }
 0x4af   :  { %12129 = vst [vmem:[#allocation53_spill] sm:$0xff] %v10754_v15  ;;  %v8865_v29 = vld [vmem:[#allocation2 + $0x534] sm:$0xf0] }
 0x4b0   :  { %3433 = vmatmul.bf16.vlgmr.msrb.gmra.mxu1 %v10335_v61  ;;  %v3127_v45 = vpop.f32.mrf.mxu2  ;;  %3514 = vmatpush.bf16.msrb.mxu0 %v7458_v47  ;;  %v7681_v39 = vld [vmem:[#allocation2 + $0x718] sm:$0xf] }
 0x4b1   :  { %v3128_v8 = vadd.f32 %v3127_v45, %v10694_v1  ;;  %v10762_v22 = vpop.f32.mrf.mxu3  ;;  %v8849_v17 = vld [vmem:[#allocation2 + $0x4b4] sm:$0xf0] }
 0x4b2   :  { %v3072_v19 = vpop.f32.mrf.mxu0 }
 0x4b3   :  { %v3073_v56 = vadd.f32 %v3072_v19, %v10664_v9  ;;  %v10765_v63 = vadd.f32 %v3156_v33, %v3128_v8  ;;  %v7426_v9 = vor.u32 %v8865_v29, %v7425_v59  ;;  %v7713_v33 = vld [vmem:[#allocation2 + $0x758] sm:$0xf] }
 0x4b4   :  { %v8937_v8 = vld [vmem:[#allocation2 + $0x774] sm:$0xf0] }
 0x4b5   :  { %v10768_v30 = vadd.f32 %v10731_v26, %v3073_v56  ;;  %v10770_v45 = vpop.f32.mrf.mxu1  ;;  %3303 = vmatmul.bf16.gmra.mxu0 %v10391_v57  ;;  %3361 = vmatmul.bf16.gmra.mxu2 %v10341_v28  ;;  %v7714_v19 = vor.u32 %v8937_v8, %v7713_v33  ;;  %v8813_v26 = vld [vmem:[#allocation2 + $0x39c] sm:$0xf]  ;;  %v8929_v59 = vld [vmem:[#allocation2 + $0x734] sm:$0xf0] }
 0x4b6   :  { %3491 = vmatmul.bf16.vlgmr.msra.gmra.mxu3 %v10259_v7  ;;  %3515 = vmatpush.bf16.msrb.mxu0 %v7426_v9  ;;  %v7238_v41 = vor.u32 %v8813_v26, %v7235_v10  ;;  %v7682_v49 = vor.u32 %v8929_v59, %v7681_v39  ;;  %v8805_v33 = vld [vmem:[#allocation2 + $0x35c] sm:$0xf] }
 0x4b7   :  { %3543 = vmatpush.bf16.msra.mxu1 %v7714_v19  ;;  %v7203_v8 = vld [vmem:[#allocation2 + $0x378] sm:$0xf0]  ;;  %v7361_v19 = vld [vmem:[#allocation2 + $0x498] sm:$0xf] }
 0x4b8   :  { %v3130_v47 = vpop.f32.mrf.mxu2  ;;  %3600 = vmatpush.bf16.msrb.mxu3 %v7238_v41  ;;  %v7206_v10 = vor.u32 %v8805_v33, %v7203_v8  ;;  %v7362_v5 = vor.u32 %v8849_v17, %v7361_v19  ;;  %v7617_v19 = vld [vmem:[#allocation2 + $0x698] sm:$0xf] }
 0x4b9   :  { %v3131_v11 = vadd.f32 %v3130_v47, %v10694_v1  ;;  %v10776_v56 = vpop.f32.mrf.mxu3  ;;  %v8913_v17 = vld [vmem:[#allocation2 + $0x6b4] sm:$0xf0] }
 0x4ba   :  { %v3074_v24 = vpop.f32.mrf.mxu0  ;;  %3516 = vmatpush.bf16.msrb.mxu0 %v7394_v43 }
 0x4bb   :  { %v3075_v29 = vadd.f32 %v3074_v24, %v10679_v55  ;;  %v10780_v9 = vadd.f32 %v10749_v60, %v3131_v11  ;;  %3544 = vmatpush.bf16.msra.mxu1 %v7682_v49  ;;  %v8921_v55 = vld [vmem:[#allocation2 + $0x6f4] sm:$0xf0]  ;;  %v7171_v60 = vld [vmem:[#allocation2 + $0x338] sm:$0xf0] }
 0x4bc   :  { %3601 = vmatpush.bf16.msrb.mxu3 %v7206_v10  ;;  %v7650_v24 = vor.u32 %v8921_v55, %v7649_v36  ;;  %v8841_v49 = vld [vmem:[#allocation2 + $0x474] sm:$0xf0]  ;;  %v7618_v10 = vor.u32 %v8913_v17, %v7617_v19  ;;  %v8789_v55 = vld [vmem:[#allocation2 + $0x2dc] sm:$0xf] }
 0x4bd   :  { %v10783_v47 = vadd.f32 %v10743_v4, %v3075_v29  ;;  %v10785_v26 = vpop.f32.mrf.mxu1  ;;  %v8797_v4 = vld [vmem:[#allocation2 + $0x31c] sm:$0xf]  ;;  %v7329_v29 = vld [vmem:[#allocation2 + $0x458] sm:$0xf] }
 0x4be   :  { %3517 = vmatpush.bf16.msrb.mxu0 %v7362_v5  ;;  %v7174_v59 = vor.u32 %v8797_v4, %v7171_v60  ;;  %v7330_v8 = vor.u32 %v8841_v49, %v7329_v29  ;;  %v7297_v60 = vld [vmem:[#allocation2 + $0x418] sm:$0xf]  ;;  %v8885_v49 = vld [vmem:[#allocation2 + $0x5dc] sm:$0xf] }
 0x4bf   :  { %3545 = vmatpush.bf16.msra.mxu1 %v7650_v24  ;;  %v10805_v24 = vperm.slane %v10691_v27, 4  ;;  %v8905_v29 = vld [vmem:[#allocation2 + $0x674] sm:$0xf0] }
 0x4c0   :  { %3438 = vmatmul.bf16.gmra.mxu1 %v10351_v46  ;;  %v3132_v43 = vpop.f32.mrf.mxu2  ;;  %3602 = vmatpush.bf16.msrb.mxu3 %v7174_v59  ;;  %v8833_v59 = vld [vmem:[#allocation2 + $0x434] sm:$0xf0] }
 0x4c1   :  { %v3133_v11 = vadd.f32 %v3132_v43, %v10694_v1  ;;  %v10791_v39 = vpop.f32.mrf.mxu3  ;;  %v7139_v1 = vld [vmem:[#allocation2 + $0x2f8] sm:$0xf0] }
 0x4c2   :  { %v3173_v33 = vpop.f32.mrf.mxu0  ;;  %3518 = vmatpush.bf16.msrb.mxu0 %v7330_v8  ;;  %v7523_v8 = vld [vmem:[#allocation2 + $0x5f8] sm:$0xf0] }
 0x4c3   :  { %v3174_v36 = vadd.f32 %v3173_v33, %v10702_v42  ;;  %v10795_v5 = vadd.f32 %v10762_v22, %v3133_v11  ;;  %v7142_v42 = vor.u32 %v8789_v55, %v7139_v1  ;;  %v12130_v22 = vpack.c.bf16 %v10556_v58, %v10542_v3  ;;  %v7585_v11 = vld [vmem:[#allocation2 + $0x658] sm:$0xf]  ;;  %3546 = vmatpush.bf16.msra.mxu1 %v7618_v10  ;;  %v7107_v55 = vld [vmem:[#allocation2 + $0x2b8] sm:$0xf0] }
 0x4c4   :  { %v7586_v33 = vor.u32 %v8905_v29, %v7585_v11  ;;  %v7526_v17 = vor.u32 %v8885_v49, %v7523_v8  ;;  %v7553_v3 = vld [vmem:[#allocation2 + $0x618] sm:$0xf]  ;;  %v8773_v11 = vld [vmem:[#allocation2 + $0x25c] sm:$0xf] }
 0x4c5   :  { %v10798_v43 = vadd.f32 %v10756_v48, %v3174_v36  ;;  %v10800_v4 = vpop.f32.mrf.mxu1  ;;  %3404 = vmatmul.bf16.vlgmr.msra.gmra.mxu0 %v10357_v23  ;;  %3462 = vmatmul.bf16.vlgmr.msrb.gmra.mxu2 %v10282_v25  ;;  %v7298_v48 = vor.u32 %v8833_v59, %v7297_v60  ;;  %v8781_v36 = vld [vmem:[#allocation2 + $0x29c] sm:$0xf]  ;;  %v8897_v58 = vld [vmem:[#allocation2 + $0x634] sm:$0xf0] }
 0x4c6   :  { %3496 = vmatmul.bf16.gmra.mxu3 %v10280_v54  ;;  %3702 = vmatpush.bf16.xpose.msrb.mxu2 %v12130_v22  ;;  %v7110_v18 = vor.u32 %v8781_v36, %v7107_v55  ;;  %v8877_v60 = vld [vmem:[#allocation2 + $0x59c] sm:$0xf]  ;;  %v7554_v10 = vor.u32 %v8897_v58, %v7553_v3 }
 0x4c7   :  { %3603 = vmatpush.bf16.msrb.mxu3 %v7142_v42  ;;  %3519 = vmatpush.bf16.msrb.mxu0 %v7298_v48  ;;  %v7491_v42 = vld [vmem:[#allocation2 + $0x5b8] sm:$0xf0] }
 0x4c8   :  { %v3231_v19 = vpop.f32.mrf.mxu2  ;;  %3547 = vmatpush.bf16.msra.mxu1 %v7586_v33  ;;  %v7494_v48 = vor.u32 %v8877_v60, %v7491_v42  ;;  %v7075_v29 = vld [vmem:[#allocation2 + $0x278] sm:$0xf0] }
 0x4c9   :  { %v3232_v1 = vadd.f32 %v3231_v19, %v10805_v24  ;;  %v3265_v41 = vpop.f32.mrf.mxu3  ;;  %v7078_v19 = vor.u32 %v8773_v11, %v7075_v29  ;;  %v7043_v36 = vld [vmem:[#allocation2 + $0x238] sm:$0xf0]  ;;  %v12132_v11 = vpack.c.bf16 %v10508_v62, %v10497_v38 }
 0x4ca   :  { %v3175_v15 = vpop.f32.mrf.mxu0  ;;  %v8861_v3 = vld [vmem:[#allocation2 + $0x51c] sm:$0xf] }
 0x4cb   :  { %3628 = vmatpush.bf16.msra.mxu0 %v7526_v17  ;;  %v3176_v59 = vadd.f32 %v3175_v15, %v10715_v14  ;;  %3604 = vmatpush.bf16.msrb.mxu3 %v7110_v18  ;;  %v10814_v22 = vadd.f32 %v10776_v56, %v3232_v1  ;;  %v12131_v17 = vpack.c.bf16 %v10529_v16, %v10518_v35  ;;  %v8869_v14 = vld [vmem:[#allocation2 + $0x55c] sm:$0xf] }
 0x4cc   :  { %v7459_v18 = vld [vmem:[#allocation2 + $0x578] sm:$0xf0]  ;;  %3548 = vmatpush.bf16.msra.mxu1 %v7554_v10 }
 0x4cd   :  { %v10817_v49 = vadd.f32 %v10770_v45, %v3176_v59  ;;  %v3212_v8 = vpop.f32.mrf.mxu1  ;;  %v7462_v15 = vor.u32 %v8869_v14, %v7459_v18  ;;  %v8765_v45 = vld [vmem:[#allocation2 + $0x21c] sm:$0xf] }
 0x4ce   :  { %3703 = vmatpush.bf16.xpose.msrb.mxu2 %v12131_v17  ;;  %v7046_v35 = vor.u32 %v8765_v45, %v7043_v36  ;;  %v7427_v58 = vld [vmem:[#allocation2 + $0x538] sm:$0xf0] }
 0x4cf   :  { %3629 = vmatpush.bf16.msra.mxu0 %v7494_v48  ;;  %3605 = vmatpush.bf16.msrb.mxu3 %v7078_v19  ;;  %v7430_v59 = vor.u32 %v8861_v3, %v7427_v58  ;;  %v7395_v29 = vld [vmem:[#allocation2 + $0x4f8] sm:$0xf0] }
 0x4d0   :  { %3443 = vmatmul.bf16.gmra.mxu1 %v10365_v20  ;;  %v3233_v33 = vpop.f32.mrf.mxu2  ;;  %v8845_v18 = vld [vmem:[#allocation2 + $0x49c] sm:$0xf] }
 0x4d1   :  { %v3234_v55 = vadd.f32 %v3233_v33, %v10805_v24  ;;  %v10826_v1 = vpop.f32.mrf.mxu3 }
 0x4d2   :  { %v3178_v16 = vpop.f32.mrf.mxu0 }
 0x4d3   :  { %3630 = vmatpush.bf16.msra.mxu0 %v7462_v15  ;;  %v3179_v60 = vadd.f32 %v3178_v16, %v10726_v34  ;;  %3606 = vmatpush.bf16.msrb.mxu3 %v7046_v35  ;;  %v10830_v10 = vadd.f32 %v10791_v39, %v3234_v55  ;;  %v8853_v34 = vld [vmem:[#allocation2 + $0x4dc] sm:$0xf]  ;;  %v12133_v55 = vpack.c.bf16 %v10484_v50, %v10466_v2 }
 0x4d4   :  { %v7398_v19 = vor.u32 %v8853_v34, %v7395_v29  ;;  %v7363_v15 = vld [vmem:[#allocation2 + $0x4b8] sm:$0xf0] }
 0x4d5   :  { %v10833_v42 = vadd.f32 %v10785_v26, %v3179_v60  ;;  %v3214_v48 = vpop.f32.mrf.mxu1  ;;  %3409 = vmatmul.bf16.gmra.mxu0 %v10371_v21  ;;  %3467 = vmatmul.bf16.gmra.mxu2 %v10308_v13  ;;  %v7366_v45 = vor.u32 %v8845_v18, %v7363_v15  ;;  %v8837_v35 = vld [vmem:[#allocation2 + $0x45c] sm:$0xf] }
 0x4d6   :  { %3501 = vmatmul.bf16.gmra.mxu3 %v10306_v44  ;;  %3704 = vmatpush.bf16.xpose.msrb.mxu2 %v12132_v11  ;;  %v7331_v16 = vld [vmem:[#allocation2 + $0x478] sm:$0xf0] }
 0x4d7   :  { %3631 = vmatpush.bf16.msra.mxu0 %v7430_v59  ;;  %v7334_v3 = vor.u32 %v8837_v35, %v7331_v16  ;;  %v8829_v60 = vld [vmem:[#allocation2 + $0x41c] sm:$0xf] }
 0x4d8   :  { %v3236_v39 = vpop.f32.mrf.mxu2  ;;  %v7299_v59 = vld [vmem:[#allocation2 + $0x438] sm:$0xf0] }
 0x4d9   :  { %v3237_v17 = vadd.f32 %v3236_v39, %v10805_v24  ;;  %v10842_v26 = vpop.f32.mrf.mxu3  ;;  %v7302_v2 = vor.u32 %v8829_v60, %v7299_v59  ;;  %v7779_v18 = vld [vmem:[#allocation2 + $0x7f8] sm:$0xf0] }
 0x4da   :  { %v3180_v14 = vpop.f32.mrf.mxu0  ;;  %v8933_v59 = vld [vmem:[#allocation2 + $0x75c] sm:$0xf] }
 0x4db   :  { %v3181_v33 = vadd.f32 %v3180_v14, %v10738_v51  ;;  %3632 = vmatpush.bf16.msra.mxu0 %v7398_v19  ;;  %v10845_v36 = vadd.f32 %v3265_v41, %v3237_v17 }
 0x4dd   :  { %v10848_v38 = vadd.f32 %v10800_v4, %v3181_v33  ;;  %v3217_v62 = vpop.f32.mrf.mxu1 }
 0x4de   :  { %3705 = vmatpush.bf16.xpose.msrb.mxu2 %v12133_v55 }
 0x4df   :  { %3633 = vmatpush.bf16.msra.mxu0 %v7366_v45  ;;  %v4238_v58 = vpack.c.bf16 %v10848_v38, %v10833_v42 }
 0x4e0   :  { %3448 = vmatmul.bf16.gmra.mxu1 %v10378_v53  ;;  %v10856_v51 = vpop.f32.mrf.mxu2 }
 0x4e1   :  { %v10858_v41 = vpop.f32.mrf.mxu3 }
 0x4e2   :  { %v3183_v4 = vpop.f32.mrf.mxu0 }
 0x4e3   :  { %v3184_v11 = vadd.f32 %v3183_v4, %v10752_v32  ;;  %3634 = vmatpush.bf16.msra.mxu0 %v7334_v3 }
 0x4e5   :  { %v10861_v50 = vadd.f32 %v3212_v8, %v3184_v11  ;;  %v3219_v34 = vpop.f32.mrf.mxu1  ;;  %3414 = vmatmul.bf16.gmra.mxu0 %v10383_v12  ;;  %3472 = vmatmul.bf16.gmra.mxu2 %v10326_v37  ;;  %v8949_v8 = vld [vmem:[#allocation2 + $0x7dc] sm:$0xf] }
 0x4e6   :  { %3506 = vmatmul.bf16.gmra.mxu3 %v10324_v6  ;;  %v7782_v45 = vor.u32 %v8949_v8, %v7779_v18  ;;  %v7715_v11 = vld [vmem:[#allocation2 + $0x778] sm:$0xf0] }
 0x4e7   :  { %3635 = vmatpush.bf16.msra.mxu0 %v7302_v2  ;;  %v7683_v18 = vld [vmem:[#allocation2 + $0x738] sm:$0xf0] }
 0x4e8   :  { %v10866_v29 = vpop.f32.mrf.mxu2  ;;  %3657 = vmatpush.bf16.msrb.mxu1 %v7782_v45 }
 0x4e9   :  { %v10868_v19 = vpop.f32.mrf.mxu3 }
 0x4ea   :  { %v3185_v39 = vpop.f32.mrf.mxu0 }
 0x4eb   :  { %v3186_v17 = vadd.f32 %v3185_v39, %v10765_v63  ;;  %v8941_v63 = vld [vmem:[#allocation2 + $0x79c] sm:$0xf]  ;;  %v7718_v39 = vor.u32 %v8933_v59, %v7715_v11 }
 0x4ed   :  { %v10871_v32 = vadd.f32 %v3214_v48, %v3186_v17  ;;  %v3318_v14 = vpop.f32.mrf.mxu1  ;;  %v7747_v48 = vld [vmem:[#allocation2 + $0x7b8] sm:$0xf0] }
 0x4ee   :  { %v7750_v3 = vor.u32 %v8941_v63, %v7747_v48  ;;  %v8917_v63 = vld [vmem:[#allocation2 + $0x6dc] sm:$0xf] }
 0x4ef   :  { %v4239_v15 = vpack.c.bf16 %v10871_v32, %v10861_v50  ;;  %v7651_v48 = vld [vmem:[#allocation2 + $0x6f8] sm:$0xf0] }
 0x4f0   :  { %3549 = vmatmul.bf16.vlgmr.msra.gmra.mxu1 %v10335_v61  ;;  %v10876_v33 = vpop.f32.mrf.mxu2  ;;  %v7654_v59 = vor.u32 %v8917_v63, %v7651_v48  ;;  %v12134_v63 = vpack.c.bf16 %v10667_v52, %v10652_v0  ;;  %v7587_v48 = vld [vmem:[#allocation2 + $0x678] sm:$0xf0] }
 0x4f1   :  { %v10878_v55 = vpop.f32.mrf.mxu3  ;;  %3658 = vmatpush.bf16.msrb.mxu1 %v7750_v3  ;;  %v7555_v0 = vld [vmem:[#allocation2 + $0x638] sm:$0xf0] }
 0x4f2   :  { %v3188_v35 = vpop.f32.mrf.mxu0  ;;  %v12156_v50 = vld [vmem:[#allocation15_spill] sm:$0xff] }
 0x4f3   :  { %v3189_v16 = vadd.f32 %v3188_v35, %v10780_v9 }
 0x4f5   :  { %v10881_v4 = vadd.f32 %v3217_v62, %v3189_v16  ;;  %v3320_v60 = vpop.f32.mrf.mxu1  ;;  %3419 = vmatmul.bf16.gmra.mxu0 %v10391_v57  ;;  %3477 = vmatmul.bf16.gmra.mxu2 %v10341_v28  ;;  %v8925_v62 = vld [vmem:[#allocation2 + $0x71c] sm:$0xf] }
 0x4f6   :  { %3607 = vmatmul.bf16.vlgmr.msrb.gmra.mxu3 %v10259_v7  ;;  %3659 = vmatpush.bf16.msrb.mxu1 %v7718_v39  ;;  %v7686_v45 = vor.u32 %v8925_v62, %v7683_v18 }
 0x4f8   :  { %v10886_v2 = vpop.f32.mrf.mxu2 }
 0x4f9   :  { %v3376_v17 = vpop.f32.mrf.mxu3 }
 0x4fa   :  { %v3190_v9 = vpop.f32.mrf.mxu0  ;;  %3660 = vmatpush.bf16.msrb.mxu1 %v7686_v45  ;;  %v10904_v45 = vperm.slane %v10691_v27, 5 }
 0x4fb   :  { %v3191_v8 = vadd.f32 %v3190_v9, %v10795_v5  ;;  %v7619_v9 = vld [vmem:[#allocation2 + $0x6b8] sm:$0xf0] }
 0x4fd   :  { %v10889_v35 = vadd.f32 %v3219_v34, %v3191_v8  ;;  %v3323_v16 = vpop.f32.mrf.mxu1  ;;  %v8909_v34 = vld [vmem:[#allocation2 + $0x69c] sm:$0xf] }
 0x4fe   :  { %3661 = vmatpush.bf16.msrb.mxu1 %v7654_v59  ;;  %v7622_v8 = vor.u32 %v8909_v34, %v7619_v9  ;;  %v8893_v9 = vld [vmem:[#allocation2 + $0x61c] sm:$0xf] }
 0x4ff   :  { %v4240_v7 = vpack.c.bf16 %v10889_v35, %v10881_v4 }
 0x500   :  { %3554 = vmatmul.bf16.gmra.mxu1 %v10351_v46  ;;  %v10894_v3 = vpop.f32.mrf.mxu2 }
 0x501   :  { %v10896_v11 = vpop.f32.mrf.mxu3 }
 0x502   :  { %v3289_v5 = vpop.f32.mrf.mxu0  ;;  %3662 = vmatpush.bf16.msrb.mxu1 %v7622_v8  ;;  %v12136_v8 = vpack.c.bf16 %v10638_v40, %v10625_v31  ;;  %v12140_v40 = vld [vmem:[#allocation47_spill] sm:$0xff] }
 0x503   :  { %v3290_v39 = vadd.f32 %v3289_v5, %v10814_v22  ;;  %v12135_v22 = vpack.c.bf16 %v10783_v47, %v10768_v30 }
 0x505   :  { %v10899_v62 = vadd.f32 %v3318_v14, %v3290_v39  ;;  %v3325_v18 = vpop.f32.mrf.mxu1  ;;  %3520 = vmatmul.bf16.vlgmr.msrb.gmra.mxu0 %v10357_v23  ;;  %3578 = vmatmul.bf16.vlgmr.msra.gmra.mxu2 %v10282_v25  ;;  %v8901_v14 = vld [vmem:[#allocation2 + $0x65c] sm:$0xf] }
 0x506   :  { %3612 = vmatmul.bf16.gmra.mxu3 %v10280_v54  ;;  %3885 = vmatpush.bf16.xpose.msrb.mxu0 %v12134_v63  ;;  %v7590_v5 = vor.u32 %v8901_v14, %v7587_v48  ;;  %v7558_v63 = vor.u32 %v8893_v9, %v7555_v0  ;;  %v12138_v14 = vld [vmem:[#allocation52_spill] sm:$0xff]  ;;  %v12144_v9 = vld [vmem:[#allocation50_spill] sm:$0xff] }
 0x507   :  { %4067 = vmatpush.bf16.xpose.msra.mxu2 %v12135_v22  ;;  %v12137_v22 = vld [vmem:[#allocation53_spill] sm:$0xff] }
 0x508   :  { %v3347_v59 = vpop.f32.mrf.mxu2  ;;  %3663 = vmatpush.bf16.msrb.mxu1 %v7590_v5  ;;  %v12139_v48 = vpack.c.bf16 %v12137_v22, %v12138_v14  ;;  %v3239_v5 = vadd.f32 %v10856_v51, %v10805_v24 }
 0x509   :  { %v3348_v25 = vadd.f32 %v3347_v59, %v10904_v45  ;;  %v10914_v39 = vpop.f32.mrf.mxu3 }
 0x50a   :  { %v3291_v34 = vpop.f32.mrf.mxu0  ;;  %v3268_v22 = vadd.f32 %v10826_v1, %v3239_v5 }
 0x50b   :  { %v3292_v54 = vadd.f32 %v3291_v34, %v10830_v10  ;;  %v10917_v52 = vadd.f32 %v3376_v17, %v3348_v25  ;;  %v12141_v25 = vld [vmem:[#allocation46_spill] sm:$0xff] }
 0x50c   :  { %3664 = vmatpush.bf16.msrb.mxu1 %v7558_v63  ;;  %v12142_v34 = vpack.c.bf16 %v12140_v40, %v12141_v25  ;;  %v12146_v25 = vld [vmem:[#allocation45_spill] sm:$0xff] }
 0x50d   :  { %v10919_v30 = vadd.f32 %v3320_v60, %v3292_v54  ;;  %v3328_v47 = vpop.f32.mrf.mxu1  ;;  %v12143_v54 = vld [vmem:[#allocation51_spill] sm:$0xff] }
 0x50e   :  { %3886 = vmatpush.bf16.xpose.msrb.mxu0 %v12136_v8  ;;  %v12145_v0 = vpack.c.bf16 %v12143_v54, %v12144_v9  ;;  %v12149_v54 = vld [vmem:[#allocation49_spill] sm:$0xff]  ;;  %v12150_v9 = vld [vmem:[#allocation48_spill] sm:$0xff] }
 0x50f   :  { %4068 = vmatpush.bf16.xpose.msra.mxu2 %v12139_v48  ;;  %v3694_v10 = vpack.c.bf16 %v10919_v30, %v10899_v62  ;;  %v12155_v30 = vld [vmem:[#allocation16_spill] sm:$0xff] }
 0x510   :  { %3559 = vmatmul.bf16.gmra.mxu1 %v10365_v20  ;;  %v10930_v17 = vpop.f32.mrf.mxu2  ;;  %v12157_v32 = vpack.c.bf16 %v12155_v30, %v12156_v50 }
 0x511   :  { %v10932_v59 = vpop.f32.mrf.mxu3 }
 0x512   :  { %v3294_v60 = vpop.f32.mrf.mxu0 }
 0x513   :  { %v3295_v8 = vadd.f32 %v3294_v60, %v10845_v36  ;;  %v3242_v60 = vadd.f32 %v10866_v29, %v10805_v24 }
 0x515   :  { %v3330_v31 = vpop.f32.mrf.mxu1  ;;  %3525 = vmatmul.bf16.gmra.mxu0 %v10371_v21  ;;  %3583 = vmatmul.bf16.gmra.mxu2 %v10308_v13  ;;  %v10951_v48 = vadd.f32 %v3323_v16, %v3295_v8  ;;  %v3271_v8 = vadd.f32 %v10842_v26, %v3242_v60 }
 0x516   :  { %3617 = vmatmul.bf16.gmra.mxu3 %v10306_v44  ;;  %3887 = vmatpush.bf16.xpose.msrb.mxu0 %v12142_v34  ;;  %v12147_v34 = vld [vmem:[#allocation44_spill] sm:$0xff] }
 0x517   :  { %4069 = vmatpush.bf16.xpose.msra.mxu2 %v12145_v0  ;;  %v12148_v56 = vpack.c.bf16 %v12146_v25, %v12147_v34  ;;  %v12151_v0 = vpack.c.bf16 %v12149_v54, %v12150_v9  ;;  %v3247_v9 = vadd.f32 %v10886_v2, %v10805_v24 }
 0x518   :  { %v10945_v63 = vpop.f32.mrf.mxu2 }
 0x519   :  { %v10948_v51 = vpop.f32.mrf.mxu3 }
 0x51a   :  { %v3296_v14 = vpop.f32.mrf.mxu0 }
 0x51b   :  { %v3297_v13 = vadd.f32 %v3296_v14, %v3268_v22 }
 0x51d   :  { %v10953_v44 = vadd.f32 %v3325_v18, %v3297_v13  ;;  %v3333_v40 = vpop.f32.mrf.mxu1 }
 0x51e   :  { %3888 = vmatpush.bf16.xpose.msrb.mxu0 %v12148_v56  ;;  %v3244_v56 = vadd.f32 %v10876_v33, %v10805_v24 }
 0x51f   :  { %4070 = vmatpush.bf16.xpose.msra.mxu2 %v12151_v0  ;;  %v3695_v36 = vpack.c.bf16 %v10953_v44, %v10951_v48  ;;  %v3249_v0 = vadd.f32 %v10894_v3, %v10805_v24 }
 0x520   :  { %3564 = vmatmul.bf16.gmra.mxu1 %v10378_v53  ;;  %v10964_v1 = vpop.f32.mrf.mxu2  ;;  %v3273_v48 = vadd.f32 %v10858_v41, %v3244_v56 }
 0x521   :  { %v10966_v16 = vpop.f32.mrf.mxu3 }
 0x522   :  { %v3299_v18 = vpop.f32.mrf.mxu0 }
 0x523   :  { %v3300_v14 = vadd.f32 %v3299_v18, %v3271_v8  ;;  %v3278_v18 = vadd.f32 %v10878_v55, %v3249_v0  ;;  %v3350_v55 = vadd.f32 %v10930_v17, %v10904_v45 }
 0x525   :  { %v3335_v5 = vpop.f32.mrf.mxu1  ;;  %3530 = vmatmul.bf16.gmra.mxu0 %v10383_v12  ;;  %3588 = vmatmul.bf16.gmra.mxu2 %v10326_v37  ;;  %v3329_v25 = vadd.f32 %v3328_v47, %v3300_v14  ;;  %v3276_v47 = vadd.f32 %v10868_v19, %v3247_v9 }
 0x526   :  { %3622 = vmatmul.bf16.gmra.mxu3 %v10324_v6 }
 0x528   :  { %v10976_v22 = vpop.f32.mrf.mxu2 }
 0x529   :  { %v10978_v13 = vpop.f32.mrf.mxu3 }
 0x52a   :  { %v3301_v29 = vpop.f32.mrf.mxu0 }
 0x52b   :  { %v3302_v44 = vadd.f32 %v3301_v29, %v3273_v48 }
 0x52d   :  { %v3331_v33 = vadd.f32 %v3330_v31, %v3302_v44  ;;  %v3434_v34 = vpop.f32.mrf.mxu1 }
 0x52f   :  { %v3696_v54 = vpack.c.bf16 %v3331_v33, %v3329_v25 }
 0x530   :  { %3665 = vmatmul.bf16.vlgmr.msrb.gmra.mxu1 %v10335_v61  ;;  %v10982_v37 = vpop.f32.mrf.mxu2 }
 0x531   :  { %v10984_v6 = vpop.f32.mrf.mxu3 }
 0x532   :  { %v3304_v26 = vpop.f32.mrf.mxu0 }
 0x533   :  { %v3305_v61 = vadd.f32 %v3304_v26, %v3276_v47 }
 0x535   :  { %v3436_v41 = vpop.f32.mrf.mxu1  ;;  %3535 = vmatmul.bf16.gmra.mxu0 %v10391_v57  ;;  %3593 = vmatmul.bf16.gmra.mxu2 %v10341_v28  ;;  %v3334_v14 = vadd.f32 %v3333_v40, %v3305_v61  ;;  %v12152_v40 = vld [vmem:[#allocation13_spill] sm:$0xff] }
 0x538   :  { %v10993_v31 = vpop.f32.mrf.mxu2 }
 0x539   :  { %v3492_v60 = vpop.f32.mrf.mxu3 }
 0x53a   :  { %v3306_v56 = vpop.f32.mrf.mxu0 }
 0x53b   :  { %v3307_v8 = vadd.f32 %v3306_v56, %v3278_v18  ;;  %v3360_v56 = vadd.f32 %v10982_v37, %v10904_v45 }
 0x53d   :  { %v3336_v2 = vadd.f32 %v3335_v5, %v3307_v8  ;;  %v3439_v48 = vpop.f32.mrf.mxu1  ;;  %v12153_v5 = vld [vmem:[#allocation12_spill] sm:$0xff] }
 0x53e   :  { %v12154_v33 = vpack.c.bf16 %v12152_v40, %v12153_v5 }
 0x53f   :  { %v3697_v29 = vpack.c.bf16 %v3336_v2, %v3334_v14 }
 0x540   :  { %3670 = vmatmul.bf16.gmra.mxu1 %v10351_v46  ;;  %v10997_v24 = vpop.f32.mrf.mxu2  ;;  %v11011_v46 = vperm.slane %v10691_v27, 6 }
 0x541   :  { %3844 = vmatpush.bf16.msra.mxu3 %v3697_v29  ;;  %v11000_v3 = vpop.f32.mrf.mxu3  ;;  %v3389_v29 = vadd.f32 %v10966_v16, %v3360_v56  ;;  %v12162_v16 = vld [vmem:[#allocation26_spill] sm:$0xff]  ;;  %v12167_v56 = vld [vmem:[#allocation31_spill] sm:$0xff] }
 0x542   :  { %v3405_v28 = vpop.f32.mrf.mxu0 }
 0x543   :  { %v3406_v19 = vadd.f32 %v3405_v28, %v10917_v52 }
 0x545   :  { %v11004_v44 = vadd.f32 %v3434_v34, %v3406_v19  ;;  %v3441_v25 = vpop.f32.mrf.mxu1  ;;  %3636 = vmatmul.bf16.vlgmr.msra.gmra.mxu0 %v10357_v23  ;;  %3706 = vmatmul.bf16.vlgmr.msrb.gmra.mxu2 %v12154_v33  ;;  %v3379_v34 = vadd.f32 %v10896_v11, %v3350_v55  ;;  %v3353_v11 = vadd.f32 %v10945_v63, %v10904_v45 }
 0x546   :  { %3845 = vmatpush.bf16.msra.mxu3 %v3696_v54  ;;  %4249 = vmatpush.bf16.xpose.msra.mxu0 %v4240_v7  ;;  %v3363_v33 = vadd.f32 %v10993_v31, %v10904_v45 }
 0x548   :  { %v3463_v52 = vpop.f32.mrf.mxu2 }
 0x549   :  { %v3464_v17 = vadd.f32 %v3463_v52, %v11011_v46  ;;  %v11022_v27 = vpop.f32.mrf.mxu3 }
 0x54a   :  { %3846 = vmatpush.bf16.msra.mxu3 %v3695_v36  ;;  %v3407_v26 = vpop.f32.mrf.mxu0  ;;  %v3355_v36 = vadd.f32 %v10964_v1, %v10904_v45 }
 0x54b   :  { %v3408_v23 = vadd.f32 %v3407_v26, %v3379_v34  ;;  %v11018_v9 = vadd.f32 %v3492_v60, %v3464_v17  ;;  %v12158_v60 = vpack.c.bf16 %v10817_v49, %v10798_v43  ;;  %v12159_v43 = vld [vmem:[#allocation20_spill] sm:$0xff]  ;;  %v12160_v49 = vld [vmem:[#allocation19_spill] sm:$0xff]  ;;  %v12163_v17 = vld [vmem:[#allocation25_spill] sm:$0xff] }
 0x54c   :  { %v3384_v1 = vadd.f32 %v10932_v59, %v3355_v36  ;;  %v3358_v59 = vadd.f32 %v10976_v22, %v10904_v45  ;;  %v12161_v14 = vpack.c.bf16 %v12159_v43, %v12160_v49  ;;  %v12164_v34 = vpack.c.bf16 %v12162_v16, %v12163_v17 }
 0x54d   :  { %v11020_v0 = vadd.f32 %v3436_v41, %v3408_v23  ;;  %v3444_v47 = vpop.f32.mrf.mxu1  ;;  %v3392_v23 = vadd.f32 %v10978_v13, %v3363_v33  ;;  %v12165_v13 = vld [vmem:[#allocation17_spill] sm:$0xff] }
 0x54e   :  { %3847 = vmatpush.bf16.msra.mxu3 %v3694_v10  ;;  %4250 = vmatpush.bf16.xpose.msra.mxu0 %v4239_v15 }
 0x54f   :  { %v3877_v4 = vpack.c.bf16 %v11020_v0, %v11004_v44  ;;  %v12172_v0 = vld [vmem:[#allocation37_spill] sm:$0xff] }
 0x550   :  { %3675 = vmatmul.bf16.gmra.mxu1 %v10365_v20  ;;  %v11033_v35 = vpop.f32.mrf.mxu2  ;;  %v3382_v20 = vadd.f32 %v10914_v39, %v3353_v11 }
 0x551   :  { %v11047_v15 = vpop.f32.mrf.mxu3 }
 0x552   :  { %v3410_v7 = vpop.f32.mrf.mxu0 }
 0x553   :  { %v3411_v63 = vadd.f32 %v3410_v7, %v3382_v20 }
 0x555   :  { %v3446_v62 = vpop.f32.mrf.mxu1  ;;  %3641 = vmatmul.bf16.gmra.mxu0 %v10371_v21  ;;  %3711 = vmatmul.bf16.gmra.mxu2 %v12157_v32  ;;  %v11052_v21 = vadd.f32 %v3439_v48, %v3411_v63  ;;  %v12166_v63 = vld [vmem:[#allocation14_spill] sm:$0xff] }
 0x556   :  { %4251 = vmatpush.bf16.xpose.msra.mxu0 %v4238_v58 }
 0x558   :  { %v11049_v10 = vpop.f32.mrf.mxu2 }
 0x559   :  { %v11061_v58 = vpop.f32.mrf.mxu3 }
 0x55a   :  { %v3412_v54 = vpop.f32.mrf.mxu0 }
 0x55b   :  { %v3413_v41 = vadd.f32 %v3412_v54, %v3384_v1 }
 0x55d   :  { %v3442_v61 = vadd.f32 %v3441_v25, %v3413_v41  ;;  %v3449_v18 = vpop.f32.mrf.mxu1 }
 0x55e   :  { %4252 = vmatpush.bf16.xpose.msra.mxu0 %v12158_v60 }
 0x55f   :  { %v3878_v42 = vpack.c.bf16 %v3442_v61, %v11052_v21  ;;  %v3466_v61 = vadd.f32 %v11033_v35, %v11011_v46 }
 0x560   :  { %3680 = vmatmul.bf16.gmra.mxu1 %v10378_v53  ;;  %v11059_v38 = vpop.f32.mrf.mxu2  ;;  %v3387_v53 = vadd.f32 %v10948_v51, %v3358_v59  ;;  %v3365_v51 = vadd.f32 %v10997_v24, %v10904_v45  ;;  %v11096_v45 = vld [vmem:[%s12038_s4] sm:$0xf] }
 0x561   :  { %v11075_v22 = vpop.f32.mrf.mxu3  ;;  %v3495_v35 = vadd.f32 %v11000_v3, %v3466_v61  ;;  %v12171_v3 = vld [vmem:[#allocation18_spill] sm:$0xff]  ;;  %v3471_v44 = vadd.f32 %v11059_v38, %v11011_v46 }
 0x562   :  { %v3415_v39 = vpop.f32.mrf.mxu0  ;;  %v3394_v11 = vadd.f32 %v10984_v6, %v3365_v51  ;;  %v3469_v51 = vadd.f32 %v11049_v10, %v11011_v46 }
 0x563   :  { %v3416_v48 = vadd.f32 %v3415_v39, %v3387_v53  ;;  %v9301_v39 = vld [vmem:[%s12043_s9] sm:$0xff] }
 0x564   :  { %v11117_v59 = vperm.slane %v9301_v39, 7  ;;  %v3498_v16 = vadd.f32 %v11022_v27, %v3469_v51 }
 0x565   :  { %v3451_v8 = vpop.f32.mrf.mxu1  ;;  %3646 = vmatmul.bf16.gmra.mxu0 %v10383_v12  ;;  %3716 = vmatmul.bf16.gmra.mxu2 %v12161_v14  ;;  %v3445_v55 = vadd.f32 %v3444_v47, %v3416_v48 }
 0x568   :  { %v11072_v2 = vpop.f32.mrf.mxu2 }
 0x569   :  { %v11087_v26 = vpop.f32.mrf.mxu3 }
 0x56a   :  { %v3417_v28 = vpop.f32.mrf.mxu0 }
 0x56b   :  { %v3418_v19 = vadd.f32 %v3417_v28, %v3389_v29 }
 0x56d   :  { %v3447_v37 = vadd.f32 %v3446_v62, %v3418_v19  ;;  %v3550_v25 = vpop.f32.mrf.mxu1 }
 0x56f   :  { %v3879_v40 = vpack.c.bf16 %v3447_v37, %v3445_v55  ;;  %v12170_v55 = vld [vmem:[#allocation22_spill] sm:$0xff] }
 0x570   :  { %v11077_v12 = vpop.f32.mrf.mxu2 }
 0x571   :  { %v11103_v20 = vpop.f32.mrf.mxu3 }
 0x572   :  { %v3420_v5 = vpop.f32.mrf.mxu0 }
 0x573   :  { %v3421_v7 = vadd.f32 %v3420_v5, %v3392_v23 }
 0x575   :  { %v3552_v52 = vpop.f32.mrf.mxu1  ;;  %3651 = vmatmul.bf16.gmra.mxu0 %v10391_v57  ;;  %3721 = vmatmul.bf16.gmra.mxu2 %v12164_v34  ;;  %v11099_v57 = vperm.slane %v11096_v45, 1  ;;  %v3450_v24 = vadd.f32 %v3449_v18, %v3421_v7  ;;  %v3500_v7 = vadd.f32 %v11047_v15, %v3471_v44  ;;  %v3476_v15 = vadd.f32 %v11077_v12, %v11011_v46 }
 0x577   :  { %v401_v50 = vadd.f32 %v12165_v13, %v11099_v57  ;;  %v399_v1 = vadd.f32 %v12166_v63, %v11099_v57  ;;  %v406_v37 = vadd.f32 %v12170_v55, %v11099_v57 }
 0x578   :  { %v11090_v47 = vpop.f32.mrf.mxu2 }
 0x579   :  { %v3869_v41 = vpack.c.bf16 %v401_v50, %v399_v1  ;;  %v3608_v14 = vpop.f32.mrf.mxu3  ;;  %v12176_v50 = vld [vmem:[#allocation24_spill] sm:$0xff] }
 0x57a   :  { %v3422_v31 = vpop.f32.mrf.mxu0 }
 0x57b   :  { %v3423_v36 = vadd.f32 %v3422_v31, %v3394_v11 }
 0x57d   :  { %v3452_v62 = vadd.f32 %v3451_v8, %v3423_v36  ;;  %v3555_v30 = vpop.f32.mrf.mxu1  ;;  %v12168_v8 = vld [vmem:[#allocation30_spill] sm:$0xff] }
 0x57e   :  { %v12169_v43 = vpack.c.bf16 %v12167_v56, %v12168_v8  ;;  %v3505_v56 = vadd.f32 %v11075_v22, %v3476_v15 }
 0x57f   :  { %v3880_v32 = vpack.c.bf16 %v3452_v62, %v3450_v24  ;;  %v12175_v24 = vld [vmem:[#allocation28_spill] sm:$0xff] }
 0x580   :  { %v11105_v6 = vpop.f32.mrf.mxu2  ;;  %v411_v38 = vadd.f32 %v12175_v24, %v11099_v57 }
 0x581   :  { %4026 = vmatpush.bf16.msra.mxu1 %v3880_v32  ;;  %v409_v32 = vadd.f32 %v12176_v50, %v11099_v57  ;;  %v3481_v22 = vadd.f32 %v11105_v6, %v11011_v46 }
 0x582   :  { %v3521_v54 = vpop.f32.mrf.mxu0 }
 0x583   :  { %v3522_v21 = vadd.f32 %v3521_v54, %v11018_v9  ;;  %v3871_v1 = vpack.c.bf16 %v411_v38, %v409_v32  ;;  %v3474_v54 = vadd.f32 %v11072_v2, %v11011_v46 }
 0x585   :  { %v11112_v18 = vadd.f32 %v3550_v25, %v3522_v21  ;;  %v3557_v60 = vpop.f32.mrf.mxu1  ;;  %3889 = vmatmul.bf16.vlgmr.msrb.gmra.mxu0 %v3869_v41  ;;  %4027 = vmatpush.bf16.msra.mxu1 %v3879_v40  ;;  %v404_v40 = vadd.f32 %v12171_v3, %v11099_v57  ;;  %v12178_v41 = vld [vmem:[#allocation40_spill] sm:$0xff]  ;;  %v3503_v61 = vadd.f32 %v11061_v58, %v3474_v54 }
 0x586   :  { %4071 = vmatmul.bf16.vlgmr.msra.gmra.mxu2 %v12169_v43  ;;  %v3479_v3 = vadd.f32 %v11090_v47, %v11011_v46  ;;  %v303_v47 = vperm.slane %v11096_v45, 3 }
 0x587   :  { %v3870_v33 = vpack.c.bf16 %v406_v37, %v404_v40  ;;  %v12182_v40 = vld [vmem:[#allocation43_spill] sm:$0xff] }
 0x588   :  { %v3579_v49 = vpop.f32.mrf.mxu2  ;;  %v3508_v51 = vadd.f32 %v11087_v26, %v3479_v3  ;;  %v12186_v26 = vld [vmem:[#allocation21_spill] sm:$0xff] }
 0x589   :  { %v3580_v9 = vadd.f32 %v3579_v49, %v11117_v59  ;;  %4028 = vmatpush.bf16.msra.mxu1 %v3878_v42 }
 0x58a   :  { %v3523_v53 = vpop.f32.mrf.mxu0 }
 0x58b   :  { %v3524_v48 = vadd.f32 %v3523_v53, %v3495_v35  ;;  %v11124_v29 = vadd.f32 %v3608_v14, %v3580_v9  ;;  %v12180_v35 = vld [vmem:[#allocation35_spill] sm:$0xff] }
 0x58c   :  { %v416_v12 = vadd.f32 %v12180_v35, %v11099_v57 }
 0x58d   :  { %v11126_v28 = vadd.f32 %v3552_v52, %v3524_v48  ;;  %4029 = vmatpush.bf16.msra.mxu1 %v3877_v4  ;;  %v3560_v19 = vpop.f32.mrf.mxu1  ;;  %v12173_v4 = vld [vmem:[#allocation36_spill] sm:$0xff] }
 0x58e   :  { %v12174_v52 = vpack.c.bf16 %v12172_v0, %v12173_v4  ;;  %v12181_v48 = vld [vmem:[#allocation32_spill] sm:$0xff] }
 0x58f   :  { %v4059_v42 = vpack.c.bf16 %v11126_v28, %v11112_v18  ;;  %v414_v55 = vadd.f32 %v12181_v48, %v11099_v57  ;;  %v3510_v57 = vadd.f32 %v11103_v20, %v3481_v22 }
 0x590   :  { %v11135_v25 = vpop.f32.mrf.mxu2 }
 0x591   :  { %v3872_v37 = vpack.c.bf16 %v416_v12, %v414_v55 }
 0x592   :  { %v3526_v5 = vpop.f32.mrf.mxu0 }
 0x593   :  { %v3527_v23 = vadd.f32 %v3526_v5, %v3498_v16  ;;  %v12183_v5 = vld [vmem:[#allocation42_spill] sm:$0xff]  ;;  %v11184_v16 = vpop.f32.mrf.mxu3 }
 0x595   :  { %3894 = vmatmul.bf16.gmra.mxu0 %v3870_v33  ;;  %v3562_v17 = vpop.f32.mrf.mxu1  ;;  %v3556_v36 = vadd.f32 %v3555_v30, %v3527_v23  ;;  %v12177_v30 = vld [vmem:[#allocation41_spill] sm:$0xff]  ;;  %v12184_v33 = vpack.c.bf16 %v12182_v40, %v12183_v5 }
 0x596   :  { %4076 = vmatmul.bf16.gmra.mxu2 %v12174_v52  ;;  %v12179_v21 = vpack.c.bf16 %v12177_v30, %v12178_v41  ;;  %v12188_v41 = vld [vmem:[#allocation27_spill] sm:$0xff] }
 0x598   :  { %v11147_v34 = vpop.f32.mrf.mxu2 }
 0x59a   :  { %v3528_v11 = vpop.f32.mrf.mxu0 }
 0x59b   :  { %v3529_v31 = vadd.f32 %v3528_v11, %v3500_v7  ;;  %v11194_v45 = vpop.f32.mrf.mxu3 }
 0x59d   :  { %v3558_v10 = vadd.f32 %v3557_v60, %v3529_v31  ;;  %v3565_v27 = vpop.f32.mrf.mxu1 }
 0x59f   :  { %v4060_v62 = vpack.c.bf16 %v3558_v10, %v3556_v36  ;;  %v457_v36 = vadd.f32 %v12186_v26, %v303_v47 }
 0x5a0   :  { %v11152_v13 = vpop.f32.mrf.mxu2 }
 0x5a2   :  { %v3531_v63 = vpop.f32.mrf.mxu0 }
 0x5a3   :  { %v3532_v39 = vadd.f32 %v3531_v63, %v3503_v61  ;;  %v3615_v15 = vpop.f32.mrf.mxu3 }
 0x5a5   :  { %3899 = vmatmul.bf16.gmra.mxu0 %v3871_v1  ;;  %v3567_v49 = vpop.f32.mrf.mxu1  ;;  %v3561_v9 = vadd.f32 %v3560_v19, %v3532_v39 }
 0x5a6   :  { %4081 = vmatmul.bf16.gmra.mxu2 %v12179_v21  ;;  %v462_v21 = vadd.f32 %v12188_v41, %v303_v47  ;;  %v3582_v41 = vadd.f32 %v11135_v25, %v11117_v59 }
 0x5a8   :  { %v11164_v60 = vpop.f32.mrf.mxu2 }
 0x5aa   :  { %v3533_v8 = vpop.f32.mrf.mxu0 }
 0x5ab   :  { %v3534_v43 = vadd.f32 %v3533_v8, %v3505_v56  ;;  %v3618_v28 = vpop.f32.mrf.mxu3 }
 0x5ad   :  { %v3563_v2 = vadd.f32 %v3562_v17, %v3534_v43  ;;  %v3666_v19 = vpop.f32.mrf.mxu1  ;;  %v12185_v17 = vld [vmem:[#allocation23_spill] sm:$0xff] }
 0x5ae   :  { %v459_v23 = vadd.f32 %v12185_v17, %v303_v47 }
 0x5af   :  { %v4061_v14 = vpack.c.bf16 %v3563_v2, %v3561_v9  ;;  %v12189_v2 = vld [vmem:[#allocation34_spill] sm:$0xff] }
 0x5b0   :  { %v11169_v53 = vpop.f32.mrf.mxu2  ;;  %v4233_v24 = vpack.c.bf16 %v459_v23, %v457_v36  ;;  %v469_v35 = vadd.f32 %v12189_v2, %v303_v47  ;;  %v3590_v36 = vadd.f32 %v11164_v60, %v11117_v59 }
 0x5b2   :  { %v3536_v58 = vpop.f32.mrf.mxu0 }
 0x5b3   :  { %v3537_v0 = vadd.f32 %v3536_v58, %v3508_v51  ;;  %v3620_v22 = vpop.f32.mrf.mxu3  ;;  %v12191_v51 = vld [vmem:[#allocation39_spill] sm:$0xff] }
 0x5b5   :  { %3904 = vmatmul.bf16.gmra.mxu0 %v3872_v37  ;;  %v3566_v46 = vadd.f32 %v3565_v27, %v3537_v0  ;;  %v11188_v11 = vpop.f32.mrf.mxu1  ;;  %v474_v0 = vadd.f32 %v12191_v51, %v303_v47 }
 0x5b6   :  { %4086 = vmatmul.bf16.gmra.mxu2 %v12184_v33 }
 0x5b8   :  { %v11181_v44 = vpop.f32.mrf.mxu2 }
 0x5b9   :  { %v3595_v23 = vadd.f32 %v11181_v44, %v11117_v59  ;;  %v3585_v44 = vadd.f32 %v11147_v34, %v11117_v59 }
 0x5ba   :  { %v3538_v4 = vpop.f32.mrf.mxu0 }
 0x5bb   :  { %v3539_v52 = vadd.f32 %v3538_v4, %v3510_v57  ;;  %v3623_v33 = vpop.f32.mrf.mxu3  ;;  %v12192_v4 = vld [vmem:[#allocation38_spill] sm:$0xff] }
 0x5bd   :  { %v3568_v6 = vadd.f32 %v3567_v49, %v3539_v52  ;;  %v11198_v27 = vpop.f32.mrf.mxu1  ;;  %v472_v52 = vadd.f32 %v12192_v4, %v303_v47 }
 0x5bf   :  { %v4062_v7 = vpack.c.bf16 %v3568_v6, %v3566_v46  ;;  %v4236_v17 = vpack.c.bf16 %v474_v0, %v472_v52 }
 0x5c0   :  { %v3596_v31 = vpop.f32.mrf.mxu2 }
 0x5c1   :  { %4208 = vmatpush.bf16.msrb.mxu3 %v4062_v7  ;;  %v3592_v7 = vadd.f32 %v11169_v53, %v11117_v59  ;;  %v3597_v26 = vadd.f32 %v3596_v31, %v11117_v59  ;;  %v3619_v53 = vadd.f32 %v3618_v28, %v3590_v36 }
 0x5c2   :  { %v3637_v10 = vpop.f32.mrf.mxu0 }
 0x5c3   :  { %v3638_v20 = vadd.f32 %v3637_v10, %v11124_v29  ;;  %v12187_v29 = vld [vmem:[#allocation29_spill] sm:$0xff]  ;;  %v3624_v10 = vadd.f32 %v3623_v33, %v3595_v23 }
 0x5c4   :  { %v464_v54 = vadd.f32 %v12187_v29, %v303_v47 }
 0x5c5   :  { %v11192_v38 = vadd.f32 %v3666_v19, %v3638_v20  ;;  %4209 = vmatpush.bf16.msrb.mxu3 %v4061_v14  ;;  %4253 = vmatmul.bf16.vlgmr.msra.gmra.mxu0 %v4233_v24  ;;  %v11213_v8 = vpop.f32.mrf.mxu1  ;;  %v12190_v14 = vld [vmem:[#allocation33_spill] sm:$0xff]  ;;  %v3625_v24 = vpop.f32.mrf.mxu3 }
 0x5c6   :  { %v4234_v39 = vpack.c.bf16 %v464_v54, %v462_v21  ;;  %v467_v48 = vadd.f32 %v12190_v14, %v303_v47  ;;  %v3587_v47 = vadd.f32 %v11152_v13, %v11117_v59  ;;  %v3626_v29 = vadd.f32 %v3625_v24, %v3597_v26 }
 0x5c7   :  { %v3614_v13 = vadd.f32 %v11194_v45, %v3585_v44 }
 0x5c8   :  { %v3707_v50 = vpop.f32.mrf.mxu2  ;;  %v4235_v37 = vpack.c.bf16 %v469_v35, %v467_v48  ;;  %v3616_v21 = vadd.f32 %v3615_v15, %v3587_v47 }
 0x5c9   :  { %v11196_v32 = vmul.f32 0.088388346, %v3707_v50  ;;  %4210 = vmatpush.bf16.msrb.mxu3 %v4060_v62  ;;  %v3621_v50 = vadd.f32 %v3620_v22, %v3592_v7 }
 0x5ca   :  { %v11200_v63 = vpop.f32.mrf.mxu0 }
 0x5cb   :  { %v3736_v1 = vsel %vm3735_vm15, %v11196_v32, -inf }
 0x5cc   :  { %3737 = vmax.xlane.f32.xlu2 %v3736_v1 }
 0x5cd   :  { %4211 = vmatpush.bf16.msrb.mxu3 %v4059_v42  ;;  %v3676_v9 = vpop.f32.mrf.mxu1 }
 0x5d0   :  { %v3709_v30 = vpop.f32.mrf.mxu2 }
 0x5d1   :  { %v11209_v61 = vmul.f32 0.088388346, %v3709_v30 }
 0x5d2   :  { %v3642_v62 = vpop.f32.mrf.mxu0 }
 0x5d3   :  { %v3739_v56 = vsel %vm3735_vm15, %v11209_v61, -inf  ;;  %v3643_v34 = vadd.f32 %v3642_v62, %v3614_v13 }
 0x5d4   :  { %3740 = vmax.xlane.f32.xlu1 %v3739_v56 }
 0x5d5   :  { %4258 = vmatmul.bf16.gmra.mxu0 %v4234_v39  ;;  %v3678_v19 = vpop.f32.mrf.mxu1 }
 0x5d8   :  { %v3712_v43 = vpop.f32.mrf.mxu2 }
 0x5d9   :  { %v11215_v18 = vmul.f32 0.088388346, %v3712_v43 }
 0x5da   :  { %v3644_v42 = vpop.f32.mrf.mxu0 }
 0x5db   :  { %v3742_v49 = vsel %vm3735_vm15, %v11215_v18, -inf }
 0x5dc   :  { %3743 = vmax.xlane.f32.xlu1 %v3742_v49  ;;  %v3645_v49 = vadd.f32 %v3644_v42, %v3616_v21 }
 0x5dd   :  { %v3681_v46 = vpop.f32.mrf.mxu1 }
 0x5de   :  { %v3674_v15 = vadd.f32 %v11213_v8, %v3645_v49 }
 0x5e0   :  { %v3714_v12 = vpop.f32.mrf.mxu2 }
 0x5e1   :  { %v11221_v55 = vmul.f32 0.088388346, %v3714_v12  ;;  %v3611_v12 = vadd.f32 %v11184_v16, %v3582_v41  ;;  %v3672_v16 = vadd.f32 %v11198_v27, %v3643_v34 }
 0x5e2   :  { %v3647_v58 = vpop.f32.mrf.mxu0 }
 0x5e3   :  { %v3745_v3 = vsel %vm3735_vm15, %v11221_v55, -inf  ;;  %v3648_v39 = vadd.f32 %v3647_v58, %v3619_v53  ;;  %v3640_v59 = vadd.f32 %v11200_v63, %v3611_v12  ;;  %v4242_v63 = vpack.c.bf16 %v3674_v15, %v3672_v16 }
 0x5e4   :  { %3746 = vmax.xlane.f32.xlu2 %v3745_v3 }
 0x5e5   :  { %4263 = vmatmul.bf16.gmra.mxu0 %v4235_v37  ;;  %v3683_v60 = vpop.f32.mrf.mxu1  ;;  %v3677_v28 = vadd.f32 %v3676_v9, %v3648_v39  ;;  %v3669_v9 = vadd.f32 %v11188_v11, %v3640_v59 }
 0x5e7   :  { %v4241_v22 = vpack.c.bf16 %v3669_v9, %v11192_v38 }
 0x5e8   :  { %v11225_v40 = vpop.f32.mrf.mxu2 }
 0x5e9   :  { %v11266_v11 = vmul.f32 0.088388346, %v11225_v40 }
 0x5ea   :  { %v3649_v5 = vpop.f32.mrf.mxu0 }
 0x5eb   :  { %v3650_v30 = vadd.f32 %v3649_v5, %v3621_v50  ;;  %v3748_v0 = vsel %vm3735_vm15, %v11266_v11, -inf }
 0x5ed   :  { %v3679_v2 = vadd.f32 %v3678_v19, %v3650_v30 }
 0x5ef   :  { %v4243_v42 = vpack.c.bf16 %v3679_v2, %v3677_v28 }
 0x5f0   :  { %v3719_v57 = vpop.f32.mrf.mxu2 }
 0x5f1   :  { %v11256_v37 = vmul.f32 0.088388346, %v3719_v57 }
 0x5f2   :  { %v3652_v6 = vpop.f32.mrf.mxu0 }
 0x5f3   :  { %v3653_v1 = vadd.f32 %v3652_v6, %v3624_v10  ;;  %v3751_v19 = vsel %vm3735_vm15, %v11256_v37, -inf }
 0x5f5   :  { %4268 = vmatmul.bf16.gmra.mxu0 %v4236_v17  ;;  %v3682_v56 = vadd.f32 %v3681_v46, %v3653_v1 }
 0x5f8   :  { %v3722_v20 = vpop.f32.mrf.mxu2 }
 0x5f9   :  { %v11268_v5 = vmul.f32 0.088388346, %v3722_v20 }
 0x5fa   :  { %v3654_v54 = vpop.f32.mrf.mxu0 }
 0x5fb   :  { %v3655_v31 = vadd.f32 %v3654_v54, %v3626_v29  ;;  %v3754_v38 = vsel %vm3735_vm15, %v11268_v5, -inf }
 0x5fd   :  { %v3684_v43 = vadd.f32 %v3683_v60, %v3655_v31 }
 0x5ff   :  { %v4244_v35 = vpack.c.bf16 %v3684_v43, %v3682_v56 }
 0x600   :  { %v3724_v14 = vpop.f32.mrf.mxu2 }
 0x601   :  { %v11244_v48 = vmul.f32 0.088388346, %v3724_v14  ;;  %4390 = vmatpush.bf16.msrb.mxu1 %v4244_v35 }
 0x602   :  { %v3890_v25 = vpop.f32.mrf.mxu0 }
 0x603   :  { %v11248_v58 = vmul.f32 0.088388346, %v3890_v25  ;;  %v3757_v45 = vsel %vm3735_vm15, %v11244_v48, -inf }
 0x604   :  { %3758 = vmax.xlane.f32.xlu1 %v3757_v45 }
 0x605   :  { %4391 = vmatpush.bf16.msrb.mxu1 %v4243_v42  ;;  %v3918_v62 = vsel %vm3735_vm15, %v11248_v58, -inf }
 0x606   :  { %3919 = vmax.xlane.f32.xlu0 %v3918_v62 }
 0x609   :  { %4392 = vmatpush.bf16.msrb.mxu1 %v4242_v63  ;;  %v4072_v51 = vpop.f32.mrf.mxu2 }
 0x60a   :  { %v3892_v8 = vpop.f32.mrf.mxu0  ;;  %v11274_v57 = vmul.f32 0.088388346, %v4072_v51 }
 0x60b   :  { %v11258_v3 = vmul.f32 0.088388346, %v3892_v8 }
 0x60c   :  { %v4100_v6 = vsel %vm3735_vm15, %v11274_v57, -inf }
 0x60d   :  { %4393 = vmatpush.bf16.msrb.mxu1 %v4241_v22  ;;  %v3921_v27 = vsel %vm3735_vm15, %v11258_v3, -inf }
 0x60e   :  { %3922 = vmax.xlane.f32.xlu2 %v3921_v27  ;;  %3752 = vmax.xlane.f32.xlu0 %v3751_v19 }
 0x611   :  { %v4074_v23 = vpop.f32.mrf.mxu2 }
 0x612   :  { %v3895_v33 = vpop.f32.mrf.mxu0  ;;  %v11286_v7 = vmul.f32 0.088388346, %v4074_v23 }
 0x613   :  { %v11276_v4 = vmul.f32 0.088388346, %v3895_v33 }
 0x614   :  { %v4103_v10 = vsel %vm3735_vm15, %v11286_v7, -inf }
 0x615   :  { %v3924_v40 = vsel %vm3735_vm15, %v11276_v4, -inf }
 0x616   :  { %3749 = vmax.xlane.f32.xlu2 %v3748_v0  ;;  %3755 = vmax.xlane.f32.xlu0 %v3754_v38 }
 0x619   :  { %v4077_v16 = vpop.f32.mrf.mxu2 }
 0x61a   :  { %v3897_v52 = vpop.f32.mrf.mxu0 }
 0x61b   :  { %v11278_v46 = vmul.f32 0.088388346, %v3897_v52 }
 0x61d   :  { %v3927_v17 = vsel %vm3735_vm15, %v11278_v46, -inf }
 0x61e   :  { %3925 = vmax.xlane.f32.xlu0 %v3924_v40  ;;  %4101 = vmax.xlane.f32.xlu2 %v4100_v6 }
 0x61f   :  { %3928 = vmax.xlane.f32.xlu1 %v3927_v17 }
 0x621   :  { %v4079_v8 = vpop.f32.mrf.mxu2 }
 0x622   :  { %v3900_v26 = vpop.f32.mrf.mxu0  ;;  %v11334_v22 = vmul.f32 0.088388346, %v4079_v8 }
 0x623   :  { %v11288_v36 = vmul.f32 0.088388346, %v3900_v26 }
 0x625   :  { %v3930_v24 = vsel %vm3735_vm15, %v11288_v36, -inf }
 0x626   :  { %4104 = vmax.xlane.f32.xlu0 %v4103_v10 }
 0x627   :  { %3931 = vmax.xlane.f32.xlu1 %v3930_v24 }
 0x62a   :  { %v3902_v20 = vpop.f32.mrf.mxu0 }
 0x62b   :  { %v11294_v47 = vmul.f32 0.088388346, %v3902_v20 }
 0x62d   :  { %v3933_v50 = vsel %vm3735_vm15, %v11294_v47, -inf }
 0x62e   :  { %3934 = vmax.xlane.f32.xlu2 %v3933_v50 }
 0x632   :  { %v3905_v1 = vpop.f32.mrf.mxu0 }
 0x633   :  { %v11298_v29 = vmul.f32 0.088388346, %v3905_v1 }
 0x635   :  { %v3936_v54 = vsel %vm3735_vm15, %v11298_v29, -inf }
 0x636   :  { %3937 = vmax.xlane.f32.xlu1 %v3936_v54 }
 0x63a   :  { %v3907_v44 = vpop.f32.mrf.mxu0 }
 0x63b   :  { %v11302_v53 = vmul.f32 0.088388346, %v3907_v44  ;;  %v11354_v44 = vmul.f32 0.088388346, %v4077_v16 }
 0x63d   :  { %v3939_v30 = vsel %vm3735_vm15, %v11302_v53, -inf }
 0x63e   :  { %3940 = vmax.xlane.f32.xlu2 %v3939_v30 }
 0x63f   :  { %v3738_v31 = vpop.xlane.xlu2 %3737 }
 0x640   :  { %v3760_v41 = vsub.f32 %v11196_v32, %v3738_v31 }
 0x642   :  { %v3768_v60 = vmul.f32 1.442695, %v3760_v41  ;;  %v4254_v21 = vpop.f32.mrf.mxu0 }
 0x643   :  { %v11307_v39 = vmul.f32 0.088388346, %v4254_v21 }
 0x644   :  { %9171 = vpow2.f32 %v3768_v60 }
 0x645   :  { %v4282_v56 = vsel %vm3735_vm15, %v11307_v39, -inf }
 0x646   :  { %4283 = vmax.xlane.f32.xlu0 %v4282_v56 }
 0x647   :  { %v3741_v43 = vpop.xlane.xlu1 %3740 }
 0x648   :  { %v3761_v13 = vsub.f32 %v11209_v61, %v3741_v43 }
 0x64a   :  { %v11312_v49 = vpop.eup %9171  ;;  %v3770_v2 = vmul.f32 1.442695, %v3761_v13  ;;  %v4256_v35 = vpop.f32.mrf.mxu0 }
 0x64b   :  { %v11314_v12 = vmul.f32 0.088388346, %v4256_v35  ;;  %v3784_v32 = vsel %vm3735_vm15, %v11312_v49, 0.0 }
 0x64c   :  { %9173 = vpow2.f32 %v3770_v2  ;;  %3785 = vadd.xlane.f32.xlu2 %v3784_v32  ;;  %v4106_v2 = vsel %vm3735_vm15, %v11354_v44, -inf }
 0x64d   :  { %v4285_v14 = vsel %vm3735_vm15, %v11314_v12, -inf }
 0x64e   :  { %4286 = vmax.xlane.f32.xlu1 %v4285_v14 }
 0x64f   :  { %v3744_v34 = vpop.xlane.xlu1 %3743 }
 0x650   :  { %v3762_v28 = vsub.f32 %v11215_v18, %v3744_v34 }
 0x652   :  { %v11321_v59 = vpop.eup %9173  ;;  %v3772_v61 = vmul.f32 1.442695, %v3762_v28  ;;  %v4259_v27 = vpop.f32.mrf.mxu0 }
 0x653   :  { %v3787_v25 = vsel %vm3735_vm15, %v11321_v59, 0.0  ;;  %v11338_v19 = vmul.f32 0.088388346, %v4259_v27 }
 0x654   :  { %9175 = vpow2.f32 %v3772_v61  ;;  %3788 = vadd.xlane.f32.xlu0 %v3787_v25 }
 0x655   :  { %v4288_v33 = vsel %vm3735_vm15, %v11338_v19, -inf }
 0x657   :  { %v3747_v15 = vpop.xlane.xlu2 %3746 }
 0x658   :  { %v3763_v45 = vsub.f32 %v11221_v55, %v3747_v15  ;;  %v4109_v55 = vsel %vm3735_vm15, %v11334_v22, -inf }
 0x65a   :  { %v11326_v42 = vpop.eup %9175  ;;  %v3774_v62 = vmul.f32 1.442695, %v3763_v45  ;;  %v4261_v35 = vpop.f32.mrf.mxu0 }
 0x65b   :  { %v3790_v9 = vsel %vm3735_vm15, %v11326_v42, 0.0 }
 0x65c   :  { %9177 = vpow2.f32 %v3774_v62  ;;  %3791 = vadd.xlane.f32.xlu1 %v3790_v9 }
 0x662   :  { %v11330_v18 = vpop.eup %9177  ;;  %v4264_v27 = vpop.f32.mrf.mxu0 }
 0x663   :  { %v3793_v63 = vsel %vm3735_vm15, %v11330_v18, 0.0 }
 0x664   :  { %3794 = vadd.xlane.f32.xlu2 %v3793_v63 }
 0x66c   :  { %4110 = vmax.xlane.f32.xlu2 %v4109_v55 }
 0x674   :  { %4289 = vmax.xlane.f32.xlu2 %v4288_v33 }
 0x677   :  { %v3759_v20 = vpop.xlane.xlu1 %3758 }
 0x678   :  { %v3767_v33 = vsub.f32 %v11244_v48, %v3759_v20 }
 0x679   :  { %v3920_v51 = vpop.xlane.xlu0 %3919 }
 0x67a   :  { %v3942_v0 = vsub.f32 %v11248_v58, %v3920_v51 }
 0x67c   :  { %v3950_v38 = vmul.f32 1.442695, %v3942_v0 }
 0x67e   :  { %9179 = vpow2.f32 %v3950_v38 }
 0x681   :  { %v3923_v52 = vpop.xlane.xlu2 %3922  ;;  %v3753_v40 = vpop.xlane.xlu0 %3752 }
 0x682   :  { %v3943_v6 = vsub.f32 %v11258_v3, %v3923_v52  ;;  %v3765_v54 = vsub.f32 %v11256_v37, %v3753_v40  ;;  %v4082_v37 = vpop.f32.mrf.mxu2  ;;  %v3782_v40 = vmul.f32 1.442695, %v3767_v33 }
 0x684   :  { %v11344_v17 = vpop.eup %9179  ;;  %v3952_v23 = vmul.f32 1.442695, %v3943_v6  ;;  %v3778_v30 = vmul.f32 1.442695, %v3765_v54 }
 0x685   :  { %v3966_v26 = vsel %vm3735_vm15, %v11344_v17, 0.0 }
 0x686   :  { %9181 = vpow2.f32 %v3952_v23  ;;  %3967 = vadd.xlane.f32.xlu0 %v3966_v26 }
 0x689   :  { %v3750_v10 = vpop.xlane.xlu2 %3749  ;;  %v3756_v24 = vpop.xlane.xlu0 %3755 }
 0x68a   :  { %v3764_v50 = vsub.f32 %v11266_v11, %v3750_v10  ;;  %v3766_v21 = vsub.f32 %v11268_v5, %v3756_v24  ;;  %v11365_v5 = vmul.f32 0.088388346, %v4261_v35  ;;  %v4084_v16 = vpop.f32.mrf.mxu2  ;;  %v4266_v24 = vpop.f32.mrf.mxu0 }
 0x68c   :  { %v11349_v58 = vpop.eup %9181  ;;  %v3776_v1 = vmul.f32 1.442695, %v3764_v50  ;;  %v4291_v25 = vsel %vm3735_vm15, %v11365_v5, -inf }
 0x68d   :  { %v3969_v3 = vsel %vm3735_vm15, %v11349_v58, 0.0 }
 0x68e   :  { %9183 = vpow2.f32 %v3776_v1  ;;  %3970 = vadd.xlane.f32.xlu1 %v3969_v3  ;;  %v11406_v1 = vmul.f32 0.088388346, %v4266_v24 }
 0x68f   :  { %9185 = vpow2.f32 %v3778_v30 }
 0x691   :  { %v3926_v31 = vpop.xlane.xlu0 %3925  ;;  %v11367_v14 = vpop.xlane.xlu2 %4101 }
 0x692   :  { %v3944_v41 = vsub.f32 %v11276_v4, %v3926_v31  ;;  %v3929_v60 = vpop.xlane.xlu1 %3928  ;;  %v3780_v4 = vmul.f32 1.442695, %v3766_v21  ;;  %v4087_v23 = vpop.f32.mrf.mxu2  ;;  %v11410_v31 = vmul.f32 0.088388346, %v4264_v27 }
 0x693   :  { %v3945_v43 = vsub.f32 %v11278_v46, %v3929_v60  ;;  %v11423_v35 = vmul.f32 0.088388346, %v4087_v23 }
 0x694   :  { %v11358_v11 = vpop.eup %9183  ;;  %v3954_v56 = vmul.f32 1.442695, %v3944_v41 }
 0x695   :  { %v3796_v13 = vsel %vm3735_vm15, %v11358_v11, 0.0  ;;  %v3956_v32 = vmul.f32 1.442695, %v3945_v43  ;;  %v11369_v46 = vpop.eup %9185  ;;  %v4124_v43 = vsub.f32 %v11274_v57, %v11367_v14 }
 0x696   :  { %9187 = vpow2.f32 %v3954_v56  ;;  %3797 = vadd.xlane.f32.xlu0 %v3796_v13  ;;  %4107 = vmax.xlane.f32.xlu1 %v4106_v2  ;;  %v3799_v45 = vsel %vm3735_vm15, %v11369_v46, 0.0 }
 0x697   :  { %9189 = vpow2.f32 %v3780_v4  ;;  %v4132_v57 = vmul.f32 1.442695, %v4124_v43 }
 0x698   :  { %9191 = vpow2.f32 %v3956_v32 }
 0x699   :  { %v4105_v50 = vpop.xlane.xlu0 %4104 }
 0x69a   :  { %v3932_v34 = vpop.xlane.xlu1 %3931  ;;  %v4125_v60 = vsub.f32 %v11286_v7, %v4105_v50  ;;  %v4089_v2 = vpop.f32.mrf.mxu2 }
 0x69b   :  { %v3946_v61 = vsub.f32 %v11288_v36, %v3932_v34  ;;  %v11384_v36 = vmul.f32 0.088388346, %v4084_v16  ;;  %v11425_v4 = vmul.f32 0.088388346, %v4089_v2 }
 0x69c   :  { %v11371_v28 = vpop.eup %9187  ;;  %v4134_v7 = vmul.f32 1.442695, %v4125_v60 }
 0x69d   :  { %v3972_v15 = vsel %vm3735_vm15, %v11371_v28, 0.0  ;;  %v11380_v62 = vpop.eup %9189  ;;  %v3958_v9 = vmul.f32 1.442695, %v3946_v61  ;;  %v4115_v52 = vsel %vm3735_vm15, %v11384_v36, -inf  ;;  %v4269_v61 = vpop.f32.mrf.mxu0 }
 0x69e   :  { %4292 = vmax.xlane.f32.xlu0 %v4291_v25  ;;  %3973 = vadd.xlane.f32.xlu2 %v3972_v15  ;;  %v11382_v8 = vpop.eup %9191  ;;  %v3802_v0 = vsel %vm3735_vm15, %v11380_v62, 0.0  ;;  %v4118_v25 = vsel %vm3735_vm15, %v11423_v35, -inf  ;;  %v4121_v15 = vsel %vm3735_vm15, %v11425_v4, -inf }
 0x69f   :  { %3800 = vadd.xlane.f32.xlu1 %v3799_v45  ;;  %9193 = vpow2.f32 %v3958_v9  ;;  %v3975_v38 = vsel %vm3735_vm15, %v11382_v8, 0.0 }
 0x6a1   :  { %v3935_v63 = vpop.xlane.xlu2 %3934 }
 0x6a2   :  { %v3947_v55 = vsub.f32 %v11294_v47, %v3935_v63  ;;  %v11394_v47 = vmul.f32 0.088388346, %v4082_v37  ;;  %v4297_v37 = vsel %vm3735_vm15, %v11406_v1, -inf }
 0x6a4   :  { %v3960_v51 = vmul.f32 1.442695, %v3947_v55  ;;  %v4112_v10 = vsel %vm3735_vm15, %v11394_v47, -inf }
 0x6a5   :  { %v11396_v6 = vpop.eup %9193 }
 0x6a6   :  { %9195 = vpow2.f32 %v3960_v51  ;;  %3803 = vadd.xlane.f32.xlu2 %v3802_v0  ;;  %3976 = vadd.xlane.f32.xlu0 %v3975_v38  ;;  %v3978_v20 = vsel %vm3735_vm15, %v11396_v6, 0.0 }
 0x6a7   :  { %4116 = vmax.xlane.f32.xlu1 %v4115_v52  ;;  %9197 = vpow2.f32 %v3782_v40  ;;  %v4271_v52 = vpop.f32.mrf.mxu0 }
 0x6a9   :  { %v3938_v54 = vpop.xlane.xlu1 %3937 }
 0x6aa   :  { %v3948_v21 = vsub.f32 %v11298_v29, %v3938_v54 }
 0x6ac   :  { %v11398_v48 = vpop.eup %9195  ;;  %v3962_v29 = vmul.f32 1.442695, %v3948_v21 }
 0x6ad   :  { %v3981_v26 = vsel %vm3735_vm15, %v11398_v48, 0.0  ;;  %v11408_v30 = vpop.eup %9197 }
 0x6ae   :  { %3982 = vadd.xlane.f32.xlu2 %v3981_v26  ;;  %4113 = vmax.xlane.f32.xlu0 %v4112_v10  ;;  %v3805_v13 = vsel %vm3735_vm15, %v11408_v30, 0.0  ;;  %v11449_v26 = vmul.f32 0.088388346, %v4269_v61  ;;  %v11453_v10 = vmul.f32 0.088388346, %v4271_v52 }
 0x6af   :  { %3979 = vadd.xlane.f32.xlu1 %v3978_v20 }
 0x6b0   :  { %v4300_v50 = vsel %vm3735_vm15, %v11449_v26, -inf }
 0x6b1   :  { %v3941_v3 = vpop.xlane.xlu2 %3940 }
 0x6b2   :  { %v3949_v41 = vsub.f32 %v11302_v53, %v3941_v3  ;;  %v4294_v53 = vsel %vm3735_vm15, %v11410_v31, -inf  ;;  %v4303_v3 = vsel %vm3735_vm15, %v11453_v10, -inf }
 0x6b4   :  { %v3964_v56 = vmul.f32 1.442695, %v3949_v41 }
 0x6b6   :  { %9199 = vpow2.f32 %v3964_v56  ;;  %4298 = vmax.xlane.f32.xlu2 %v4297_v37  ;;  %3806 = vadd.xlane.f32.xlu0 %v3805_v13 }
 0x6b7   :  { %4295 = vmax.xlane.f32.xlu1 %v4294_v53  ;;  %9201 = vpow2.f32 %v4134_v7 }
 0x6b8   :  { %9203 = vpow2.f32 %v3962_v29 }
 0x6b9   :  { %v4284_v32 = vpop.xlane.xlu0 %4283  ;;  %9205 = vpow2.f32 %v4132_v57 }
 0x6ba   :  { %v4306_v34 = vsub.f32 %v11307_v39, %v4284_v32 }
 0x6bc   :  { %v11427_v14 = vpop.eup %9199  ;;  %v4314_v16 = vmul.f32 1.442695, %v4306_v34 }
 0x6bd   :  { %v3987_v45 = vsel %vm3735_vm15, %v11427_v14, 0.0  ;;  %v11436_v9 = vpop.eup %9201 }
 0x6be   :  { %4119 = vmax.xlane.f32.xlu2 %v4118_v25  ;;  %4122 = vmax.xlane.f32.xlu0 %v4121_v15  ;;  %v11438_v55 = vpop.eup %9203  ;;  %9207 = vpow2.f32 %v4314_v16  ;;  %v4151_v51 = vsel %vm3735_vm15, %v11436_v9, 0.0 }
 0x6bf   :  { %3988 = vadd.xlane.f32.xlu1 %v3987_v45  ;;  %v11440_v39 = vpop.eup %9205  ;;  %v3786_v27 = vpop.xlane.xlu2 %3785  ;;  %v3984_v0 = vsel %vm3735_vm15, %v11438_v55, 0.0 }
 0x6c0   :  { %9209 = vrcp.f32 %v3786_v27  ;;  %v4148_v38 = vsel %vm3735_vm15, %v11440_v39, 0.0 }
 0x6c1   :  { %v4287_v63 = vpop.xlane.xlu1 %4286 }
 0x6c2   :  { %v4307_v33 = vsub.f32 %v11314_v12, %v4287_v63 }
 0x6c4   :  { %v4316_v23 = vmul.f32 1.442695, %v4307_v33  ;;  %v11451_v12 = vpop.eup %9207 }
 0x6c5   :  { %v4330_v20 = vsel %vm3735_vm15, %v11451_v12, 0.0 }
 0x6c6   :  { %4152 = vadd.xlane.f32.xlu2 %v4151_v51  ;;  %3985 = vadd.xlane.f32.xlu0 %v3984_v0  ;;  %v9210_v24 = vpop.eup %9209 }
 0x6c7   :  { %4149 = vadd.xlane.f32.xlu1 %v4148_v38  ;;  %v3789_v40 = vpop.xlane.xlu0 %3788  ;;  %v3816_v41 = vmul.f32 %v9210_v24, %v11312_v49 }
 0x6c8   :  { %9211 = vrcp.f32 %v3789_v40 }
 0x6c9   :  { %9213 = vpow2.f32 %v4316_v23 }
 0x6ce   :  { %v9212_v54 = vpop.eup %9211  ;;  %4331 = vadd.xlane.f32.xlu2 %v4330_v20  ;;  %4301 = vmax.xlane.f32.xlu0 %v4300_v50 }
 0x6cf   :  { %v3817_v60 = vmul.f32 %v9212_v54, %v11321_v59  ;;  %4304 = vmax.xlane.f32.xlu1 %v4303_v3  ;;  %v11463_v56 = vpop.eup %9213  ;;  %v3792_v43 = vpop.xlane.xlu1 %3791 }
 0x6d0   :  { %v4333_v37 = vsel %vm3735_vm15, %v11463_v56, 0.0  ;;  %9215 = vrcp.f32 %v3792_v43 }
 0x6d1   :  { %v3824_v21 = vpack.c.bf16 %v3817_v60, %v3816_v41 }
 0x6d3   :  { %7783 = vmatmul.msk.bf16.vlgmr.msra.gmra.mxu3 %vm3735_vm15, %v3824_v21 }
 0x6d6   :  { %4334 = vadd.xlane.f32.xlu0 %v4333_v37  ;;  %v9216_v2 = vpop.eup %9215 }
 0x6d7   :  { %v3795_v13 = vpop.xlane.xlu2 %3794  ;;  %v3818_v49 = vmul.f32 %v9216_v2, %v11326_v42 }
 0x6d8   :  { %9217 = vrcp.f32 %v3795_v13 }
 0x6de   :  { %v9218_v53 = vpop.eup %9217 }
 0x6df   :  { %v3819_v59 = vmul.f32 %v9218_v53, %v11330_v18  ;;  %v4111_v7 = vpop.xlane.xlu2 %4110 }
 0x6e0   :  { %v4127_v29 = vsub.f32 %v11334_v22, %v4111_v7 }
 0x6e1   :  { %v3825_v57 = vpack.c.bf16 %v3819_v59, %v3818_v49 }
 0x6e2   :  { %v4138_v32 = vmul.f32 1.442695, %v4127_v29 }
 0x6e3   :  { %7784 = vmatmul.msk.bf16.gmra.mxu3 %vm3735_vm15, %v3825_v57  ;;  %v8984_v57 = vld [vmem:[#allocation4 + $0xec] sm:$0xf0] }
 0x6e4   :  { %9219 = vpow2.f32 %v4138_v32 }
 0x6e7   :  { %v4290_v34 = vpop.xlane.xlu2 %4289 }
 0x6e8   :  { %v4308_v61 = vsub.f32 %v11338_v19, %v4290_v34 }
 0x6ea   :  { %v11473_v25 = vpop.eup %9219  ;;  %v4318_v15 = vmul.f32 1.442695, %v4308_v61 }
 0x6eb   :  { %v4157_v45 = vsel %vm3735_vm15, %v11473_v25, 0.0 }
 0x6ec   :  { %9221 = vpow2.f32 %v4318_v15  ;;  %4158 = vadd.xlane.f32.xlu2 %v4157_v45 }
 0x6f2   :  { %v11477_v42 = vpop.eup %9221 }
 0x6f3   :  { %v4336_v18 = vsel %vm3735_vm15, %v11477_v42, 0.0 }
 0x6f4   :  { %4337 = vadd.xlane.f32.xlu0 %v4336_v18 }
 0x6f9   :  { %v3968_v22 = vpop.xlane.xlu0 %3967 }
 0x6fa   :  { %9223 = vrcp.f32 %v3968_v22 }
 0x700   :  { %v9224_v63 = vpop.eup %9223 }
 0x701   :  { %v3971_v16 = vpop.xlane.xlu1 %3970  ;;  %v3998_v27 = vmul.f32 %v9224_v63, %v11344_v17  ;;  %v8980_v63 = vld [vmem:[#allocation4 + $0xcc] sm:$0xf0] }
 0x702   :  { %9225 = vrcp.f32 %v3971_v16  ;;  %v7897_v16 = vld [vmem:[#allocation4 + $0xc0] sm:$0xf] }
 0x708   :  { %v9226_v19 = vpop.eup %9225 }
 0x709   :  { %v3999_v33 = vmul.f32 %v9226_v19, %v11349_v58  ;;  %v3798_v51 = vpop.xlane.xlu0 %3797  ;;  %v4108_v0 = vpop.xlane.xlu1 %4107  ;;  %v7898_v19 = vor.u32 %v8980_v63, %v7897_v16 }
 0x70a   :  { %v4126_v38 = vsub.f32 %v11354_v44, %v4108_v0 }
 0x70b   :  { %v4006_v52 = vpack.c.bf16 %v3999_v33, %v3998_v27  ;;  %v7881_v27 = vld [vmem:[#allocation4 + $0xa0] sm:$0xf]  ;;  %v8976_v33 = vld [vmem:[#allocation4 + $0xac] sm:$0xf0] }
 0x70c   :  { %v4136_v40 = vmul.f32 1.442695, %v4126_v38  ;;  %v7882_v38 = vor.u32 %v8976_v33, %v7881_v27 }
 0x70d   :  { %7787 = vmatmul.msk.bf16.vlgmr.msra.gmra.mxu1 %vm3735_vm15, %v4006_v52 }
 0x70e   :  { %9227 = vpow2.f32 %v4136_v40 }
 0x70f   :  { %9229 = vrcp.f32 %v3798_v51 }
 0x711   :  { %v4293_v23 = vpop.xlane.xlu0 %4292  ;;  %v3974_v24 = vpop.xlane.xlu2 %3973 }
 0x712   :  { %v4309_v20 = vsub.f32 %v11365_v5, %v4293_v23  ;;  %v3801_v50 = vpop.xlane.xlu1 %3800 }
 0x713   :  { %9231 = vrcp.f32 %v3801_v50 }
 0x714   :  { %v11486_v54 = vpop.eup %9227  ;;  %v4320_v17 = vmul.f32 1.442695, %v4309_v20 }
 0x715   :  { %v4154_v58 = vsel %vm3735_vm15, %v11486_v54, 0.0  ;;  %v9230_v44 = vpop.eup %9229 }
 0x716   :  { %9233 = vpow2.f32 %v4320_v17  ;;  %4155 = vadd.xlane.f32.xlu1 %v4154_v58  ;;  %v3820_v21 = vmul.f32 %v9230_v44, %v11358_v11  ;;  %v7865_v58 = vld [vmem:[#allocation4 + $0x80] sm:$0xf] }
 0x717   :  { %9235 = vrcp.f32 %v3974_v24 }
 0x719   :  { %v9232_v3 = vpop.eup %9231  ;;  %v3804_v41 = vpop.xlane.xlu2 %3803 }
 0x71a   :  { %v3977_v60 = vpop.xlane.xlu0 %3976  ;;  %v3821_v43 = vmul.f32 %v9232_v3, %v11369_v46  ;;  %v4117_v5 = vpop.xlane.xlu1 %4116  ;;  %v7913_v46 = vld [vmem:[#allocation4 + $0xe0] sm:$0xf] }
 0x71b   :  { %9237 = vrcp.f32 %v3977_v60  ;;  %v4129_v37 = vsub.f32 %v11384_v36, %v4117_v5  ;;  %v7914_v15 = vor.u32 %v8984_v57, %v7913_v46 }
 0x71c   :  { %v11493_v13 = vpop.eup %9233  ;;  %v3826_v2 = vpack.c.bf16 %v3821_v43, %v3820_v21 }
 0x71d   :  { %v4142_v53 = vmul.f32 1.442695, %v4129_v37  ;;  %v4339_v49 = vsel %vm3735_vm15, %v11493_v13, 0.0  ;;  %v9236_v59 = vpop.eup %9235  ;;  %5209 = vmatpush.bf16.msrb.mxu2 %v7914_v15 }
 0x71e   :  { %7785 = vmatmul.msk.bf16.gmra.mxu3 %vm3735_vm15, %v3826_v2  ;;  %4340 = vadd.xlane.f32.xlu1 %v4339_v49  ;;  %v4000_v32 = vmul.f32 %v9236_v59, %v11371_v28  ;;  %v7849_v2 = vld [vmem:[#allocation4 + $0x60] sm:$0xf] }
 0x71f   :  { %9239 = vpow2.f32 %v4142_v53  ;;  %v8968_v53 = vld [vmem:[#allocation4 + $0x6c] sm:$0xf0] }
 0x721   :  { %v9238_v7 = vpop.eup %9237  ;;  %v3983_v11 = vpop.xlane.xlu2 %3982  ;;  %5210 = vmatpush.bf16.msrb.mxu2 %v7898_v19 }
 0x722   :  { %v4114_v29 = vpop.xlane.xlu0 %4113  ;;  %v4001_v36 = vmul.f32 %v9238_v7, %v11382_v8  ;;  %v3980_v61 = vpop.xlane.xlu1 %3979  ;;  %9241 = vrcp.f32 %v3983_v11  ;;  %v7850_v11 = vor.u32 %v8968_v53, %v7849_v2 }
 0x723   :  { %v4128_v34 = vsub.f32 %v11394_v47, %v4114_v29 }
 0x724   :  { %v4007_v18 = vpack.c.bf16 %v4001_v36, %v4000_v32  ;;  %v7833_v32 = vld [vmem:[#allocation4 + $0x40] sm:$0xf] }
 0x725   :  { %v4140_v45 = vmul.f32 1.442695, %v4128_v34  ;;  %v11501_v22 = vpop.eup %9239  ;;  %5211 = vmatpush.bf16.msrb.mxu2 %v7882_v38  ;;  %v7817_v34 = vld [vmem:[#allocation4 + $0x20] sm:$0xf] }
 0x726   :  { %7788 = vmatmul.msk.bf16.gmra.mxu1 %vm3735_vm15, %v4007_v18  ;;  %v4163_v28 = vsel %vm3735_vm15, %v11501_v22, 0.0 }
 0x727   :  { %9243 = vpow2.f32 %v4140_v45  ;;  %4164 = vadd.xlane.f32.xlu0 %v4163_v28 }
 0x728   :  { %9245 = vrcp.f32 %v3980_v61  ;;  %v9242_v52 = vpop.eup %9241  ;;  %v8960_v61 = vld [vmem:[#allocation4 + $0x2c] sm:$0xf0] }
 0x729   :  { %9247 = vrcp.f32 %v3804_v41  ;;  %v4299_v8 = vpop.xlane.xlu2 %4298  ;;  %v4003_v60 = vmul.f32 %v9242_v52, %v11398_v48  ;;  %v7818_v18 = vor.u32 %v8960_v61, %v7817_v34 }
 0x72a   :  { %v3807_v47 = vpop.xlane.xlu0 %3806  ;;  %v4311_v51 = vsub.f32 %v11406_v1, %v4299_v8  ;;  %v4296_v0 = vpop.xlane.xlu1 %4295  ;;  %v8972_v1 = vld [vmem:[#allocation4 + $0x8c] sm:$0xf0]  ;;  %v7801_v8 = vld [vmem:[#allocation4] sm:$0xf] }
 0x72b   :  { %9249 = vrcp.f32 %v3807_v47  ;;  %v4310_v40 = vsub.f32 %v11410_v31, %v4296_v0  ;;  %v7866_v3 = vor.u32 %v8972_v1, %v7865_v58  ;;  %v8956_v47 = vld [vmem:[#allocation4 + $0xc] sm:$0xf0] }
 0x72c   :  { %v4324_v24 = vmul.f32 1.442695, %v4311_v51  ;;  %v7802_v33 = vor.u32 %v8956_v47, %v7801_v8  ;;  %v9048_v8 = vld [vmem:[#allocation4 + $0x2ec] sm:$0xf0]  ;;  %v8982_v47 = vld [vmem:[#allocation4 + $0xe4] sm:$0xf] }
 0x72d   :  { %v11508_v23 = vpop.eup %9243  ;;  %v4322_v50 = vmul.f32 1.442695, %v4310_v40  ;;  %5212 = vmatpush.bf16.msrb.mxu2 %v7866_v3 }
 0x72e   :  { %v9246_v20 = vpop.eup %9245  ;;  %v4160_v17 = vsel %vm3735_vm15, %v11508_v23, 0.0  ;;  %9251 = vpow2.f32 %v4324_v24 }
 0x72f   :  { %v9248_v44 = vpop.eup %9247  ;;  %4161 = vadd.xlane.f32.xlu2 %v4160_v17  ;;  %9253 = vpow2.f32 %v4322_v50  ;;  %v4002_v31 = vmul.f32 %v9246_v20, %v11396_v6 }
 0x730   :  { %v3822_v21 = vmul.f32 %v9248_v44, %v11380_v62 }
 0x731   :  { %v9250_v41 = vpop.eup %9249  ;;  %v4120_v5 = vpop.xlane.xlu2 %4119  ;;  %v4008_v57 = vpack.c.bf16 %v4003_v60, %v4002_v31  ;;  %5213 = vmatpush.bf16.msrb.mxu2 %v7850_v11 }
 0x732   :  { %v3823_v43 = vmul.f32 %v9250_v41, %v11408_v30  ;;  %v4123_v37 = vpop.xlane.xlu0 %4122  ;;  %v4130_v49 = vsub.f32 %v11423_v35, %v4120_v5  ;;  %v3989_v7 = vpop.xlane.xlu1 %3988  ;;  %v8964_v35 = vld [vmem:[#allocation4 + $0x4c] sm:$0xf0] }
 0x733   :  { %v4131_v59 = vsub.f32 %v11425_v4, %v4123_v37  ;;  %v7834_v36 = vor.u32 %v8964_v35, %v7833_v32 }
 0x734   :  { %v3827_v29 = vpack.c.bf16 %v3823_v43, %v3822_v21  ;;  %v11518_v46 = vpop.eup %9251  ;;  %v4144_v48 = vmul.f32 1.442695, %v4130_v49 }
 0x735   :  { %v4146_v6 = vmul.f32 1.442695, %v4131_v59  ;;  %v11520_v62 = vpop.eup %9253  ;;  %v4345_v30 = vsel %vm3735_vm15, %v11518_v46, 0.0  ;;  %5214 = vmatpush.bf16.msrb.mxu2 %v7834_v36 }
 0x736   :  { %7786 = vmatmul.msk.bf16.gmra.mxu3 %vm3735_vm15, %v3827_v29  ;;  %9255 = vpow2.f32 %v4144_v48  ;;  %7789 = vmatmul.msk.bf16.gmra.mxu1 %vm3735_vm15, %v4008_v57  ;;  %v4342_v4 = vsel %vm3735_vm15, %v11520_v62, 0.0  ;;  %v9016_v57 = vld [vmem:[#allocation4 + $0x1ec] sm:$0xf0] }
 0x737   :  { %4346 = vadd.xlane.f32.xlu2 %v4345_v30  ;;  %9257 = vpow2.f32 %v4146_v6  ;;  %4343 = vadd.xlane.f32.xlu1 %v4342_v4  ;;  %v8041_v6 = vld [vmem:[#allocation4 + $0x1e0] sm:$0xf] }
 0x738   :  { %9259 = vrcp.f32 %v3989_v7  ;;  %v8042_v32 = vor.u32 %v9016_v57, %v8041_v6  ;;  %v7867_v6 = vld [vmem:[#allocation4 + $0x90] sm:$0xf0] }
 0x739   :  { %v4153_v15 = vpop.xlane.xlu2 %4152  ;;  %5215 = vmatpush.bf16.msrb.mxu2 %v7818_v18 }
 0x73a   :  { %v3986_v45 = vpop.xlane.xlu0 %3985  ;;  %9261 = vrcp.f32 %v4153_v15  ;;  %v4150_v16 = vpop.xlane.xlu1 %4149  ;;  %5238 = vmatpush.bf16.msra.mxu3 %v8042_v32  ;;  %v8025_v15 = vld [vmem:[#allocation4 + $0x1c0] sm:$0xf] }
 0x73b   :  { %9263 = vrcp.f32 %v3986_v45  ;;  %v9012_v45 = vld [vmem:[#allocation4 + $0x1cc] sm:$0xf0] }
 0x73c   :  { %v11528_v63 = vpop.eup %9255  ;;  %9265 = vrcp.f32 %v4150_v16  ;;  %v8026_v18 = vor.u32 %v9012_v45, %v8025_v15  ;;  %v9076_v15 = vld [vmem:[#allocation4 + $0x3cc] sm:$0xf0] }
 0x73d   :  { %v11530_v28 = vpop.eup %9257  ;;  %v4166_v19 = vsel %vm3735_vm15, %v11528_v63, 0.0  ;;  %5216 = vmatpush.bf16.msrb.mxu2 %v7802_v33  ;;  %v7915_v33 = vld [vmem:[#allocation4 + $0xf0] sm:$0xf0] }
 0x73e   :  { %4167 = vadd.xlane.f32.xlu0 %v4166_v19  ;;  %v4169_v27 = vsel %vm3735_vm15, %v11530_v28, 0.0  ;;  %v9260_v51 = vpop.eup %9259  ;;  %v8169_v19 = vld [vmem:[#allocation4 + $0x2e0] sm:$0xf]  ;;  %5239 = vmatpush.bf16.msra.mxu3 %v8026_v18 }
 0x73f   :  { %4170 = vadd.xlane.f32.xlu1 %v4169_v27  ;;  %v4005_v20 = vmul.f32 %v9260_v51, %v11427_v14  ;;  %v8170_v27 = vor.u32 %v9048_v8, %v8169_v19  ;;  %v7918_v51 = vor.u32 %v8982_v47, %v7915_v33  ;;  %v9032_v19 = vld [vmem:[#allocation4 + $0x26c] sm:$0xf0]  ;;  %v8966_v8 = vld [vmem:[#allocation4 + $0x64] sm:$0xf] }
 0x740   :  { %v9262_v0 = vpop.eup %9261 }
 0x741   :  { %v9264_v38 = vpop.eup %9263  ;;  %v4181_v52 = vmul.f32 %v9262_v0, %v11436_v9  ;;  %v4332_v31 = vpop.xlane.xlu2 %4331  ;;  %v9008_v0 = vld [vmem:[#allocation4 + $0x1ac] sm:$0xf0]  ;;  %5267 = vmatpush.bf16.msrb.mxu0 %v8170_v27  ;;  %5325 = vmatpush.bf16.msra.mxu2 %v7918_v51  ;;  %v7851_v27 = vld [vmem:[#allocation4 + $0x70] sm:$0xf0]  ;;  %v7945_v51 = vld [vmem:[#allocation4 + $0x120] sm:$0xf] }
 0x742   :  { %v4302_v40 = vpop.xlane.xlu0 %4301  ;;  %v9266_v24 = vpop.eup %9265  ;;  %v4004_v50 = vmul.f32 %v9264_v38, %v11438_v55  ;;  %v7854_v33 = vor.u32 %v8966_v8, %v7851_v27 }
 0x743   :  { %v4312_v17 = vsub.f32 %v11449_v26, %v4302_v40  ;;  %v4305_v58 = vpop.xlane.xlu1 %4304  ;;  %v4180_v44 = vmul.f32 %v9266_v24, %v11440_v39  ;;  %v9044_v40 = vld [vmem:[#allocation4 + $0x2cc] sm:$0xf0]  ;;  %v8978_v24 = vld [vmem:[#allocation4 + $0xc4] sm:$0xf] }
 0x744   :  { %v4313_v1 = vsub.f32 %v11453_v10, %v4305_v58  ;;  %v4009_v41 = vpack.c.bf16 %v4005_v20, %v4004_v50 }
 0x745   :  { %v4326_v3 = vmul.f32 1.442695, %v4312_v17  ;;  %v4188_v60 = vpack.c.bf16 %v4181_v52, %v4180_v44  ;;  %v8153_v52 = vld [vmem:[#allocation4 + $0x2c0] sm:$0xf]  ;;  %v7899_v17 = vld [vmem:[#allocation4 + $0xd0] sm:$0xf0] }
 0x746   :  { %v4328_v21 = vmul.f32 1.442695, %v4313_v1  ;;  %7790 = vmatmul.msk.bf16.gmra.mxu1 %vm3735_vm15, %v4009_v41  ;;  %v8154_v50 = vor.u32 %v9044_v40, %v8153_v52  ;;  %v7902_v1 = vor.u32 %v8978_v24, %v7899_v17  ;;  %v9004_v41 = vld [vmem:[#allocation4 + $0x18c] sm:$0xf0]  ;;  %v8089_v24 = vld [vmem:[#allocation4 + $0x240] sm:$0xf] }
 0x747   :  { %9267 = vpow2.f32 %v4326_v3  ;;  %7791 = vmatmul.msk.bf16.vlgmr.msrb.gmra.mxu3 %vm3735_vm15, %v4188_v60  ;;  %v7993_v3 = vld [vmem:[#allocation4 + $0x180] sm:$0xf]  ;;  %v9072_v52 = vld [vmem:[#allocation4 + $0x3ac] sm:$0xf0] }
 0x748   :  { %9269 = vpow2.f32 %v4328_v21  ;;  %5268 = vmatpush.bf16.msrb.mxu0 %v8154_v50  ;;  %v7994_v60 = vor.u32 %v9004_v41, %v7993_v3  ;;  %5326 = vmatpush.bf16.msra.mxu2 %v7902_v1  ;;  %v8962_v50 = vld [vmem:[#allocation4 + $0x44] sm:$0xf] }
 0x749   :  { %9271 = vrcp.f32 %v4332_v31 }
 0x74a   :  { %v4335_v14 = vpop.xlane.xlu0 %4334 }
 0x74b   :  { %9273 = vrcp.f32 %v4335_v14  ;;  %v8137_v14 = vld [vmem:[#allocation4 + $0x2a0] sm:$0xf] }
 0x74d   :  { %v11544_v9 = vpop.eup %9267 }
 0x74e   :  { %v11546_v55 = vpop.eup %9269  ;;  %v4348_v39 = vsel %vm3735_vm15, %v11544_v9, 0.0 }
 0x74f   :  { %v9272_v26 = vpop.eup %9271  ;;  %4349 = vadd.xlane.f32.xlu2 %v4348_v39  ;;  %v4351_v10 = vsel %vm3735_vm15, %v11546_v55, 0.0  ;;  %v9040_v39 = vld [vmem:[#allocation4 + $0x2ac] sm:$0xf0] }
 0x750   :  { %4352 = vadd.xlane.f32.xlu0 %v4351_v10  ;;  %v4362_v5 = vmul.f32 %v9272_v26, %v11451_v12  ;;  %v8974_v26 = vld [vmem:[#allocation4 + $0xa4] sm:$0xf]  ;;  %v8138_v10 = vor.u32 %v9040_v39, %v8137_v14  ;;  %v7929_v14 = vld [vmem:[#allocation4 + $0x100] sm:$0xf]  ;;  %v8988_v39 = vld [vmem:[#allocation4 + $0x10c] sm:$0xf0] }
 0x751   :  { %v9274_v43 = vpop.eup %9273 }
 0x752   :  { %v4363_v37 = vmul.f32 %v9274_v43, %v11463_v56  ;;  %v7883_v43 = vld [vmem:[#allocation4 + $0xb0] sm:$0xf0]  ;;  %5269 = vmatpush.bf16.msrb.mxu0 %v8138_v10 }
 0x754   :  { %v4370_v2 = vpack.c.bf16 %v4363_v37, %v4362_v5  ;;  %v9000_v37 = vld [vmem:[#allocation4 + $0x16c] sm:$0xf0] }
 0x756   :  { %7795 = vmatmul.msk.bf16.vlgmr.msrb.gmra.mxu1 %vm3735_vm15, %v4370_v2  ;;  %v3849_v53 = vpop.f32.mrf.mxu3  ;;  %v8297_v2 = vld [vmem:[#allocation4 + $0x3e0] sm:$0xf] }
 0x75e   :  { %v3851_v49 = vpop.f32.mrf.mxu3 }
 0x75f   :  { %v11555_v59 = vpack.c.bf16 %v3851_v49, %v3849_v53  ;;  %v4159_v48 = vpop.xlane.xlu2 %4158  ;;  %v9080_v49 = vld [vmem:[#allocation4 + $0x3ec] sm:$0xf0] }
 0x760   :  { %9275 = vrcp.f32 %v4159_v48  ;;  %v9036_v48 = vld [vmem:[#allocation4 + $0x28c] sm:$0xf0] }
 0x761   :  { %5217 = vmatmul.bf16.vlgmr.msrb.gmra.mxu2 %v11555_v59 }
 0x766   :  { %v3854_v7 = vpop.f32.mrf.mxu3  ;;  %v9276_v30 = vpop.eup %9275 }
 0x767   :  { %v4338_v56 = vpop.xlane.xlu0 %4337  ;;  %v4183_v4 = vmul.f32 %v9276_v30, %v11473_v25  ;;  %v8009_v25 = vld [vmem:[#allocation4 + $0x1a0] sm:$0xf] }
 0x768   :  { %v8010_v38 = vor.u32 %v9008_v0, %v8009_v25  ;;  %v8992_v25 = vld [vmem:[#allocation4 + $0x12c] sm:$0xf0]  ;;  %v8265_v0 = vld [vmem:[#allocation4 + $0x3a0] sm:$0xf] }
 0x769   :  { %v8266_v40 = vor.u32 %v9072_v52, %v8265_v0  ;;  %v9056_v0 = vld [vmem:[#allocation4 + $0x32c] sm:$0xf0] }
 0x76a   :  { %5240 = vmatpush.bf16.msra.mxu3 %v8010_v38  ;;  %v7946_v38 = vor.u32 %v8992_v25, %v7945_v51  ;;  %v8201_v25 = vld [vmem:[#allocation4 + $0x320] sm:$0xf] }
 0x76e   :  { %v3856_v11 = vpop.f32.mrf.mxu3  ;;  %5241 = vmatpush.bf16.msra.mxu3 %v7994_v60 }
 0x76f   :  { %v11558_v29 = vpack.c.bf16 %v3856_v11, %v3854_v7  ;;  %v8298_v7 = vor.u32 %v9080_v49, %v8297_v2  ;;  %v8121_v11 = vld [vmem:[#allocation4 + $0x280] sm:$0xf]  ;;  %v9024_v2 = vld [vmem:[#allocation4 + $0x22c] sm:$0xf0] }
 0x771   :  { %5222 = vmatmul.bf16.gmra.mxu2 %v11558_v29  ;;  %5296 = vmatpush.bf16.msra.mxu1 %v8298_v7  ;;  %v7819_v7 = vld [vmem:[#allocation4 + $0x30] sm:$0xf0] }
 0x789   :  { %v4156_v12 = vpop.xlane.xlu1 %4155 }
 0x78a   :  { %9277 = vrcp.f32 %v4156_v12  ;;  %v11563_v34 = vpop.f32.mrf.mxu1  ;;  %v8970_v12 = vld [vmem:[#allocation4 + $0x84] sm:$0xf] }
 0x78b   :  { %9279 = vrcp.f32 %v4338_v56  ;;  %v8122_v56 = vor.u32 %v9036_v48, %v8121_v11  ;;  %v7870_v32 = vor.u32 %v8970_v12, %v7867_v6  ;;  %v8233_v48 = vld [vmem:[#allocation4 + $0x360] sm:$0xf]  ;;  %v9064_v12 = vld [vmem:[#allocation4 + $0x36c] sm:$0xf0] }
 0x78c   :  { %v8057_v6 = vld [vmem:[#allocation4 + $0x200] sm:$0xf] }
 0x78d   :  { %5270 = vmatpush.bf16.msrb.mxu0 %v8122_v56  ;;  %v8234_v56 = vor.u32 %v9064_v12, %v8233_v48  ;;  %v8011_v48 = vld [vmem:[#allocation4 + $0x1b0] sm:$0xf0]  ;;  %v7905_v12 = vld [vmem:[#allocation4 + $0xc8] sm:$0xf] }
 0x790   :  { %v9278_v35 = vpop.eup %9277 }
 0x791   :  { %v4182_v36 = vmul.f32 %v9278_v35, %v11486_v54  ;;  %v4341_v61 = vpop.xlane.xlu1 %4340  ;;  %v9280_v54 = vpop.eup %9279  ;;  %v7961_v35 = vld [vmem:[#allocation4 + $0x140] sm:$0xf] }
 0x792   :  { %9281 = vrcp.f32 %v4341_v61  ;;  %v4364_v58 = vmul.f32 %v9280_v54, %v11477_v42  ;;  %v11568_v31 = vpop.f32.mrf.mxu1  ;;  %v7886_v42 = vor.u32 %v8974_v26, %v7883_v43  ;;  %v8249_v26 = vld [vmem:[#allocation4 + $0x380] sm:$0xf] }
 0x793   :  { %v4189_v16 = vpack.c.bf16 %v4183_v4, %v4182_v36  ;;  %v8996_v4 = vld [vmem:[#allocation4 + $0x14c] sm:$0xf0]  ;;  %v8281_v36 = vld [vmem:[#allocation4 + $0x3c0] sm:$0xf] }
 0x794   :  { %5327 = vmatpush.bf16.msra.mxu2 %v7886_v42  ;;  %v7962_v61 = vor.u32 %v8996_v4, %v7961_v35  ;;  %v8282_v18 = vor.u32 %v9076_v15, %v8281_v36  ;;  %v9068_v42 = vld [vmem:[#allocation4 + $0x38c] sm:$0xf0]  ;;  %v7803_v4 = vld [vmem:[#allocation4 + $0x10] sm:$0xf0] }
 0x795   :  { %7792 = vmatmul.msk.bf16.gmra.mxu3 %vm3735_vm15, %v4189_v16  ;;  %v8105_v16 = vld [vmem:[#allocation4 + $0x260] sm:$0xf] }
 0x796   :  { %v8106_v47 = vor.u32 %v9032_v19, %v8105_v16  ;;  %5297 = vmatpush.bf16.msra.mxu1 %v8282_v18  ;;  %v8217_v16 = vld [vmem:[#allocation4 + $0x340] sm:$0xf]  ;;  %v9060_v19 = vld [vmem:[#allocation4 + $0x34c] sm:$0xf0] }
 0x797   :  { %v8218_v27 = vor.u32 %v9060_v19, %v8217_v16  ;;  %v8998_v19 = vld [vmem:[#allocation4 + $0x164] sm:$0xf] }
 0x798   :  { %v9282_v20 = vpop.eup %9281  ;;  %5328 = vmatpush.bf16.msra.mxu2 %v7870_v32  ;;  %5271 = vmatpush.bf16.msrb.mxu0 %v8106_v47 }
 0x799   :  { %v4365_v44 = vmul.f32 %v9282_v20, %v11493_v13  ;;  %v7977_v13 = vld [vmem:[#allocation4 + $0x160] sm:$0xf]  ;;  %v9028_v20 = vld [vmem:[#allocation4 + $0x24c] sm:$0xf0] }
 0x79a   :  { %v4165_v5 = vpop.xlane.xlu0 %4164  ;;  %v7978_v53 = vor.u32 %v9000_v37, %v7977_v13  ;;  %5298 = vmatpush.bf16.msra.mxu1 %v8266_v40  ;;  %v8073_v37 = vld [vmem:[#allocation4 + $0x220] sm:$0xf] }
 0x79b   :  { %v4371_v21 = vpack.c.bf16 %v4365_v44, %v4364_v58  ;;  %9283 = vrcp.f32 %v4165_v5  ;;  %v8090_v58 = vor.u32 %v9028_v20, %v8089_v24  ;;  %v7835_v44 = vld [vmem:[#allocation4 + $0x50] sm:$0xf0]  ;;  %v7930_v5 = vor.u32 %v8988_v39, %v7929_v14  ;;  %v8185_v40 = vld [vmem:[#allocation4 + $0x300] sm:$0xf]  ;;  %v9052_v24 = vld [vmem:[#allocation4 + $0x30c] sm:$0xf0] }
 0x79c   :  { %5242 = vmatpush.bf16.msra.mxu3 %v7978_v53  ;;  %5329 = vmatpush.bf16.msra.mxu2 %v7854_v33  ;;  %v8958_v53 = vld [vmem:[#allocation4 + $0x24] sm:$0xf]  ;;  %v8074_v49 = vor.u32 %v9024_v2, %v8073_v37  ;;  %v8027_v2 = vld [vmem:[#allocation4 + $0x1d0] sm:$0xf0] }
 0x79d   :  { %7796 = vmatmul.msk.bf16.gmra.mxu1 %vm3735_vm15, %v4371_v21  ;;  %v7838_v21 = vor.u32 %v8962_v50, %v7835_v44  ;;  %5272 = vmatpush.bf16.msrb.mxu0 %v8090_v58  ;;  %v7822_v11 = vor.u32 %v8958_v53, %v7819_v7  ;;  %v8186_v50 = vor.u32 %v9052_v24, %v8185_v40  ;;  %v9010_v37 = vld [vmem:[#allocation4 + $0x1c4] sm:$0xf]  ;;  %v7841_v40 = vld [vmem:[#allocation4 + $0x48] sm:$0xf] }
 0x7a0   :  { %5243 = vmatpush.bf16.msra.mxu3 %v7962_v61  ;;  %5330 = vmatpush.bf16.msra.mxu2 %v7838_v21 }
 0x7a1   :  { %v3859_v57 = vpop.f32.mrf.mxu3  ;;  %v9284_v54 = vpop.eup %9283  ;;  %5273 = vmatpush.bf16.msrb.mxu0 %v8074_v49 }
 0x7a2   :  { %v4162_v30 = vpop.xlane.xlu2 %4161  ;;  %v4185_v1 = vmul.f32 %v9284_v54, %v11501_v22 }
 0x7a3   :  { %9285 = vrcp.f32 %v4162_v30  ;;  %v11571_v45 = vpop.f32.mrf.mxu1  ;;  %v8954_v30 = vld [vmem:[#allocation4 + $0x4] sm:$0xf] }
 0x7a4   :  { %5244 = vmatpush.bf16.msra.mxu3 %v7946_v38  ;;  %5331 = vmatpush.bf16.msra.mxu2 %v7822_v11  ;;  %v7806_v18 = vor.u32 %v8954_v30, %v7803_v4  ;;  %v9006_v11 = vld [vmem:[#allocation4 + $0x1a4] sm:$0xf]  ;;  %v7995_v30 = vld [vmem:[#allocation4 + $0x190] sm:$0xf0] }
 0x7a8   :  { %5245 = vmatpush.bf16.msra.mxu3 %v7930_v5  ;;  %5332 = vmatpush.bf16.msra.mxu2 %v7806_v18 }
 0x7a9   :  { %v9286_v17 = vpop.eup %9285  ;;  %v3861_v41 = vpop.f32.mrf.mxu3 }
 0x7aa   :  { %v4184_v3 = vmul.f32 %v9286_v17, %v11508_v23  ;;  %v4347_v60 = vpop.xlane.xlu2 %4346  ;;  %v11575_v10 = vpack.c.bf16 %v3861_v41, %v3859_v57  ;;  %v4344_v43 = vpop.xlane.xlu1 %4343  ;;  %v8250_v23 = vor.u32 %v9068_v42, %v8249_v26  ;;  %v9020_v57 = vld [vmem:[#allocation4 + $0x20c] sm:$0xf0]  ;;  %v9014_v42 = vld [vmem:[#allocation4 + $0x1e4] sm:$0xf] }
 0x7ab   :  { %9287 = vrcp.f32 %v4347_v60  ;;  %v11577_v13 = vpop.f32.mrf.mxu1  ;;  %v8058_v35 = vor.u32 %v9020_v57, %v8057_v6  ;;  %v8981_v6 = vld [vmem:[#allocation4 + $0xd4] sm:$0xf0]  ;;  %v9002_v57 = vld [vmem:[#allocation4 + $0x184] sm:$0xf] }
 0x7ac   :  { %9289 = vrcp.f32 %v4344_v43  ;;  %v4190_v22 = vpack.c.bf16 %v4185_v1, %v4184_v3  ;;  %5227 = vmatmul.bf16.gmra.mxu2 %v11575_v10  ;;  %5299 = vmatpush.bf16.msra.mxu1 %v8250_v23  ;;  %v11602_v43 = vpack.c.bf16 %v11568_v31, %v11563_v34  ;;  %v7921_v34 = vld [vmem:[#allocation4 + $0xe8] sm:$0xf]  ;;  %v8985_v31 = vld [vmem:[#allocation4 + $0xf4] sm:$0xf0] }
 0x7ad   :  { %5274 = vmatpush.bf16.msrb.mxu0 %v8058_v35  ;;  %v7922_v7 = vor.u32 %v8985_v31, %v7921_v34  ;;  %v7998_v35 = vor.u32 %v9002_v57, %v7995_v30  ;;  %v8049_v34 = vld [vmem:[#allocation4 + $0x1e8] sm:$0xf]  ;;  %v9017_v31 = vld [vmem:[#allocation4 + $0x1f4] sm:$0xf0]  ;;  %v8139_v57 = vld [vmem:[#allocation4 + $0x2b0] sm:$0xf0] }
 0x7ae   :  { %7793 = vmatmul.msk.bf16.gmra.mxu3 %vm3735_vm15, %v4190_v22  ;;  %v8043_v22 = vld [vmem:[#allocation4 + $0x1f0] sm:$0xf0]  ;;  %v8983_v30 = vld [vmem:[#allocation4 + $0xec] sm:$0xf] }
 0x7af   :  { %v8046_v23 = vor.u32 %v9014_v42, %v8043_v22  ;;  %5441 = vmatpush.bf16.msrb.mxu2 %v7922_v7  ;;  %v8050_v7 = vor.u32 %v9017_v31, %v8049_v34  ;;  %v8967_v34 = vld [vmem:[#allocation4 + $0x6c] sm:$0xf]  ;;  %v7859_v31 = vld [vmem:[#allocation4 + $0x78] sm:$0xf0] }
 0x7b0   :  { %5300 = vmatpush.bf16.msra.mxu1 %v8234_v56  ;;  %v8014_v56 = vor.u32 %v9006_v11, %v8011_v48  ;;  %v8033_v48 = vld [vmem:[#allocation4 + $0x1c8] sm:$0xf] }
 0x7b1   :  { %v9288_v32 = vpop.eup %9287  ;;  %v4168_v15 = vpop.xlane.xlu0 %4167  ;;  %5354 = vmatpush.bf16.msrb.mxu3 %v8046_v23  ;;  %v9078_v23 = vld [vmem:[#allocation4 + $0x3e4] sm:$0xf] }
 0x7b2   :  { %v9290_v36 = vpop.eup %9289  ;;  %v4367_v61 = vmul.f32 %v9288_v32, %v11518_v46  ;;  %9291 = vrcp.f32 %v4168_v15  ;;  %v4171_v47 = vpop.xlane.xlu1 %4170  ;;  %v8202_v46 = vor.u32 %v9056_v0, %v8201_v25  ;;  %v7906_v32 = vor.u32 %v8981_v6, %v7905_v12  ;;  %v8994_v25 = vld [vmem:[#allocation4 + $0x144] sm:$0xf]  ;;  %v7963_v0 = vld [vmem:[#allocation4 + $0x150] sm:$0xf0]  ;;  %v9013_v12 = vld [vmem:[#allocation4 + $0x1d4] sm:$0xf0] }
 0x7b3   :  { %v4366_v8 = vmul.f32 %v9290_v36, %v11520_v62  ;;  %9293 = vrcp.f32 %v4171_v47  ;;  %v11583_v33 = vpop.f32.mrf.mxu1  ;;  %v7889_v36 = vld [vmem:[#allocation4 + $0xa8] sm:$0xf]  ;;  %v11612_v15 = vpack.c.bf16 %v11577_v13, %v11571_v45  ;;  %v7966_v45 = vor.u32 %v8994_v25, %v7963_v0  ;;  %v9038_v6 = vld [vmem:[#allocation4 + $0x2a4] sm:$0xf] }
 0x7b4   :  { %5301 = vmatpush.bf16.msra.mxu1 %v8218_v27  ;;  %5442 = vmatpush.bf16.msrb.mxu2 %v7906_v32  ;;  %v7873_v27 = vld [vmem:[#allocation4 + $0x88] sm:$0xf]  ;;  %v8142_v32 = vor.u32 %v9038_v6, %v8139_v57  ;;  %v8963_v6 = vld [vmem:[#allocation4 + $0x4c] sm:$0xf]  ;;  %v7843_v57 = vld [vmem:[#allocation4 + $0x58] sm:$0xf0] }
 0x7b5   :  { %v4372_v51 = vpack.c.bf16 %v4367_v61, %v4366_v8  ;;  %v8977_v61 = vld [vmem:[#allocation4 + $0xb4] sm:$0xf0]  ;;  %v7979_v8 = vld [vmem:[#allocation4 + $0x170] sm:$0xf0]  ;;  %v7857_v13 = vld [vmem:[#allocation4 + $0x68] sm:$0xf] }
 0x7b6   :  { %v7890_v16 = vor.u32 %v8977_v61, %v7889_v36  ;;  %v7982_v47 = vor.u32 %v8998_v19, %v7979_v8  ;;  %v8267_v36 = vld [vmem:[#allocation4 + $0x3b0] sm:$0xf0]  ;;  %v8017_v19 = vld [vmem:[#allocation4 + $0x1a8] sm:$0xf]  ;;  %v9009_v8 = vld [vmem:[#allocation4 + $0x1b4] sm:$0xf0] }
 0x7b7   :  { %7797 = vmatmul.msk.bf16.gmra.mxu1 %vm3735_vm15, %v4372_v51  ;;  %v8973_v51 = vld [vmem:[#allocation4 + $0x94] sm:$0xf0] }
 0x7b8   :  { %v9292_v54 = vpop.eup %9291  ;;  %5302 = vmatpush.bf16.msra.mxu1 %v8202_v46  ;;  %5443 = vmatpush.bf16.msrb.mxu2 %v7890_v16  ;;  %v7874_v46 = vor.u32 %v8973_v51, %v7873_v27  ;;  %v8979_v27 = vld [vmem:[#allocation4 + $0xcc] sm:$0xf]  ;;  %v7907_v51 = vld [vmem:[#allocation4 + $0xd8] sm:$0xf0] }
 0x7b9   :  { %v3864_v38 = vpop.f32.mrf.mxu3  ;;  %v9294_v52 = vpop.eup %9293  ;;  %v4186_v62 = vmul.f32 %v9292_v54, %v11528_v63  ;;  %v8969_v54 = vld [vmem:[#allocation4 + $0x74] sm:$0xf0]  ;;  %v7910_v0 = vor.u32 %v8979_v27, %v7907_v51  ;;  %v8219_v51 = vld [vmem:[#allocation4 + $0x350] sm:$0xf0] }
 0x7ba   :  { %v4187_v20 = vmul.f32 %v9294_v52, %v11530_v28  ;;  %v7858_v52 = vor.u32 %v8969_v54, %v7857_v13 }
 0x7bb   :  { %v11588_v17 = vpop.f32.mrf.mxu1 }
 0x7bc   :  { %v4191_v58 = vpack.c.bf16 %v4187_v20, %v4186_v62  ;;  %5303 = vmatpush.bf16.msra.mxu1 %v8186_v50  ;;  %5444 = vmatpush.bf16.msrb.mxu2 %v7874_v46  ;;  %v7947_v62 = vld [vmem:[#allocation4 + $0x130] sm:$0xf0]  ;;  %v8965_v20 = vld [vmem:[#allocation4 + $0x54] sm:$0xf0]  ;;  %v8986_v50 = vld [vmem:[#allocation4 + $0x104] sm:$0xf] }
 0x7bd   :  { %v8001_v46 = vld [vmem:[#allocation4 + $0x188] sm:$0xf] }
 0x7be   :  { %7794 = vmatmul.msk.bf16.gmra.mxu3 %vm3735_vm15, %v4191_v58  ;;  %v7931_v58 = vld [vmem:[#allocation4 + $0x110] sm:$0xf0] }
 0x7c0   :  { %5445 = vmatpush.bf16.msrb.mxu2 %v7858_v52  ;;  %v7891_v52 = vld [vmem:[#allocation4 + $0xb8] sm:$0xf0] }
 0x7c1   :  { %v3866_v44 = vpop.f32.mrf.mxu3 }
 0x7c2   :  { %v11591_v1 = vpack.c.bf16 %v3866_v44, %v3864_v38  ;;  %v4350_v3 = vpop.xlane.xlu2 %4349  ;;  %v8990_v38 = vld [vmem:[#allocation4 + $0x124] sm:$0xf]  ;;  %v7842_v44 = vor.u32 %v8965_v20, %v7841_v40  ;;  %v8123_v40 = vld [vmem:[#allocation4 + $0x290] sm:$0xf0] }
 0x7c3   :  { %9295 = vrcp.f32 %v4350_v3  ;;  %v4353_v41 = vpop.xlane.xlu0 %4352  ;;  %v11593_v63 = vpop.f32.mrf.mxu1  ;;  %v7950_v24 = vor.u32 %v8990_v38, %v7947_v62  ;;  %v7934_v3 = vor.u32 %v8986_v50, %v7931_v58  ;;  %v8975_v38 = vld [vmem:[#allocation4 + $0xac] sm:$0xf]  ;;  %v9034_v62 = vld [vmem:[#allocation4 + $0x284] sm:$0xf]  ;;  %v7985_v50 = vld [vmem:[#allocation4 + $0x168] sm:$0xf] }
 0x7c4   :  { %9297 = vrcp.f32 %v4353_v41  ;;  %5232 = vmatmul.bf16.gmra.mxu2 %v11591_v1  ;;  %v7825_v41 = vld [vmem:[#allocation4 + $0x28] sm:$0xf]  ;;  %v8126_v20 = vor.u32 %v9034_v62, %v8123_v40  ;;  %v9001_v58 = vld [vmem:[#allocation4 + $0x174] sm:$0xf0]  ;;  %v9054_v40 = vld [vmem:[#allocation4 + $0x324] sm:$0xf] }
 0x7c5   :  { %5446 = vmatpush.bf16.msrb.mxu2 %v7842_v44  ;;  %v9066_v44 = vld [vmem:[#allocation4 + $0x384] sm:$0xf] }
 0x7c9   :  { %v9296_v60 = vpop.eup %9295 }
 0x7ca   :  { %v9298_v28 = vpop.eup %9297  ;;  %v4368_v21 = vmul.f32 %v9296_v60, %v11544_v9  ;;  %v4213_v39 = vpop.f32.mrf.mxu3  ;;  %v8030_v9 = vor.u32 %v9010_v37, %v8027_v2  ;;  %v8961_v60 = vld [vmem:[#allocation4 + $0x34] sm:$0xf0]  ;;  %v8299_v37 = vld [vmem:[#allocation4 + $0x3f0] sm:$0xf0]  ;;  %v9042_v2 = vld [vmem:[#allocation4 + $0x2c4] sm:$0xf] }
 0x7cb   :  { %v4369_v14 = vmul.f32 %v9298_v28, %v11546_v55  ;;  %v11598_v26 = vpop.f32.mrf.mxu1  ;;  %v11621_v28 = vpack.c.bf16 %v11588_v17, %v11583_v33  ;;  %v9046_v33 = vld [vmem:[#allocation4 + $0x2e4] sm:$0xf]  ;;  %v8171_v17 = vld [vmem:[#allocation4 + $0x2f0] sm:$0xf0] }
 0x7cc   :  { %5355 = vmatpush.bf16.msrb.mxu3 %v8030_v9  ;;  %v11627_v42 = vpack.c.bf16 %v11598_v26, %v11593_v63  ;;  %v8174_v22 = vor.u32 %v9046_v33, %v8171_v17  ;;  %v8302_v9 = vor.u32 %v9078_v23, %v8299_v37  ;;  %v9074_v63 = vld [vmem:[#allocation4 + $0x3c4] sm:$0xf]  ;;  %v8283_v26 = vld [vmem:[#allocation4 + $0x3d0] sm:$0xf0]  ;;  %v7969_v17 = vld [vmem:[#allocation4 + $0x148] sm:$0xf] }
 0x7cd   :  { %v4373_v5 = vpack.c.bf16 %v4369_v14, %v4368_v21  ;;  %v7826_v21 = vor.u32 %v8961_v60, %v7825_v41  ;;  %v7809_v14 = vld [vmem:[#allocation4 + $0x8] sm:$0xf]  ;;  %v8286_v11 = vor.u32 %v9074_v63, %v8283_v26  ;;  %v7986_v41 = vor.u32 %v9001_v58, %v7985_v50  ;;  %v9030_v23 = vld [vmem:[#allocation4 + $0x264] sm:$0xf]  ;;  %v8059_v58 = vld [vmem:[#allocation4 + $0x210] sm:$0xf0] }
 0x7ce   :  { %5246 = vmatmul.bf16.vlgmr.msra.gmra.mxu3 %v11602_v43  ;;  %5383 = vmatpush.bf16.msra.mxu0 %v8174_v22  ;;  %v8997_v22 = vld [vmem:[#allocation4 + $0x154] sm:$0xf0]  ;;  %v9062_v63 = vld [vmem:[#allocation4 + $0x364] sm:$0xf]  ;;  %v7862_v26 = vor.u32 %v8967_v34, %v7859_v31 }
 0x7cf   :  { %7798 = vmatmul.msk.bf16.gmra.mxu1 %vm3735_vm15, %v4373_v5  ;;  %5447 = vmatpush.bf16.msrb.mxu2 %v7826_v21  ;;  %v8971_v21 = vld [vmem:[#allocation4 + $0x8c] sm:$0xf]  ;;  %v9018_v50 = vld [vmem:[#allocation4 + $0x204] sm:$0xf]  ;;  %v9081_v34 = vld [vmem:[#allocation4 + $0x3f4] sm:$0xf0] }
 0x7d0   :  { %5356 = vmatpush.bf16.msrb.mxu3 %v8014_v56  ;;  %5412 = vmatpush.bf16.msrb.mxu1 %v8302_v9  ;;  %v8034_v56 = vor.u32 %v9013_v12, %v8033_v48  ;;  %v8107_v9 = vld [vmem:[#allocation4 + $0x270] sm:$0xf0]  ;;  %v7953_v48 = vld [vmem:[#allocation4 + $0x128] sm:$0xf]  ;;  %v8993_v12 = vld [vmem:[#allocation4 + $0x134] sm:$0xf0] }
 0x7d2   :  { %v4215_v55 = vpop.f32.mrf.mxu3 }
 0x7d3   :  { %v11606_v53 = vpack.c.bf16 %v4215_v55, %v4213_v39  ;;  %v4395_v49 = vpop.f32.mrf.mxu1  ;;  %v8957_v39 = vld [vmem:[#allocation4 + $0x14] sm:$0xf0]  ;;  %v8155_v55 = vld [vmem:[#allocation4 + $0x2d0] sm:$0xf0] }
 0x7d4   :  { %5333 = vmatmul.bf16.vlgmr.msra.gmra.mxu2 %v11555_v59  ;;  %5357 = vmatpush.bf16.msrb.mxu3 %v7998_v35  ;;  %v7810_v5 = vor.u32 %v8957_v39, %v7809_v14  ;;  %v7923_v35 = vld [vmem:[#allocation4 + $0xf8] sm:$0xf0] }
 0x7d5   :  { %5275 = vmatmul.bf16.vlgmr.msrb.gmra.mxu0 %v11606_v53  ;;  %5413 = vmatpush.bf16.msrb.mxu1 %v8286_v11  ;;  %v7926_v61 = vor.u32 %v8983_v30, %v7923_v35  ;;  %v7875_v14 = vld [vmem:[#allocation4 + $0x98] sm:$0xf0]  ;;  %v7846_v30 = vor.u32 %v8963_v6, %v7843_v57  ;;  %v8989_v35 = vld [vmem:[#allocation4 + $0x114] sm:$0xf0]  ;;  %v8289_v57 = vld [vmem:[#allocation4 + $0x3c8] sm:$0xf] }
 0x7d6   :  { %5448 = vmatpush.bf16.msrb.mxu2 %v7810_v5  ;;  %v7878_v5 = vor.u32 %v8971_v21, %v7875_v14  ;;  %v9050_v14 = vld [vmem:[#allocation4 + $0x304] sm:$0xf]  ;;  %v8051_v6 = vld [vmem:[#allocation4 + $0x1f8] sm:$0xf0] }
 0x7d8   :  { %5358 = vmatpush.bf16.msrb.mxu3 %v7982_v47  ;;  %v8018_v47 = vor.u32 %v9009_v8, %v8017_v19  ;;  %v8091_v19 = vld [vmem:[#allocation4 + $0x250] sm:$0xf0] }
 0x7da   :  { %5557 = vmatpush.bf16.msra.mxu2 %v7926_v61  ;;  %v7827_v61 = vld [vmem:[#allocation4 + $0x38] sm:$0xf0] }
 0x7db   :  { %v4397_v4 = vpop.f32.mrf.mxu1 }
 0x7dc   :  { %v11614_v18 = vpack.c.bf16 %v4397_v4, %v4395_v49  ;;  %5359 = vmatpush.bf16.msrb.mxu3 %v7966_v45  ;;  %v8158_v49 = vor.u32 %v9042_v2, %v8155_v55  ;;  %v9070_v4 = vld [vmem:[#allocation4 + $0x3a4] sm:$0xf]  ;;  %v9005_v45 = vld [vmem:[#allocation4 + $0x194] sm:$0xf0]  ;;  %v7970_v2 = vor.u32 %v8997_v22, %v7969_v17 }
 0x7dd   :  { %v8270_v16 = vor.u32 %v9070_v4, %v8267_v36  ;;  %v8002_v54 = vor.u32 %v9005_v45, %v8001_v46  ;;  %v8959_v36 = vld [vmem:[#allocation4 + $0x2c] sm:$0xf]  ;;  %v7811_v46 = vld [vmem:[#allocation4 + $0x18] sm:$0xf0] }
 0x7de   :  { %5251 = vmatmul.bf16.gmra.mxu3 %v11612_v15  ;;  %5384 = vmatpush.bf16.msra.mxu0 %v8158_v49  ;;  %v8110_v49 = vor.u32 %v9030_v23, %v8107_v9  ;;  %v7830_v8 = vor.u32 %v8959_v36, %v7827_v61  ;;  %v8177_v23 = vld [vmem:[#allocation4 + $0x2e8] sm:$0xf]  ;;  %v9011_v36 = vld [vmem:[#allocation4 + $0x1cc] sm:$0xf]  ;;  %v8035_v61 = vld [vmem:[#allocation4 + $0x1d8] sm:$0xf0] }
 0x7df   :  { %5304 = vmatmul.bf16.vlgmr.msra.gmra.mxu1 %v11614_v18  ;;  %5558 = vmatpush.bf16.msra.mxu2 %v7910_v0  ;;  %v8955_v0 = vld [vmem:[#allocation4 + $0xc] sm:$0xf] }
 0x7e0   :  { %5360 = vmatpush.bf16.msrb.mxu3 %v7950_v24  ;;  %5414 = vmatpush.bf16.msrb.mxu1 %v8270_v16  ;;  %v7894_v24 = vor.u32 %v8975_v38, %v7891_v52  ;;  %v9026_v16 = vld [vmem:[#allocation4 + $0x244] sm:$0xf]  ;;  %v8075_v52 = vld [vmem:[#allocation4 + $0x230] sm:$0xf0] }
 0x7e1   :  { %v8094_v27 = vor.u32 %v9026_v16, %v8091_v19  ;;  %v9022_v38 = vld [vmem:[#allocation4 + $0x224] sm:$0xf]  ;;  %v8038_v16 = vor.u32 %v9011_v36, %v8035_v61  ;;  %v8145_v19 = vld [vmem:[#allocation4 + $0x2a8] sm:$0xf]  ;;  %v8987_v36 = vld [vmem:[#allocation4 + $0x10c] sm:$0xf] }
 0x7e2   :  { %5385 = vmatpush.bf16.msra.mxu0 %v8142_v32  ;;  %v7937_v32 = vld [vmem:[#allocation4 + $0x108] sm:$0xf]  ;;  %v8078_v62 = vor.u32 %v9022_v38, %v8075_v52  ;;  %v9003_v52 = vld [vmem:[#allocation4 + $0x18c] sm:$0xf]  ;;  %v7939_v61 = vld [vmem:[#allocation4 + $0x118] sm:$0xf0] }
 0x7e3   :  { %5559 = vmatpush.bf16.msra.mxu2 %v7894_v24  ;;  %v7938_v4 = vor.u32 %v8989_v35, %v7937_v32  ;;  %v8203_v24 = vld [vmem:[#allocation4 + $0x330] sm:$0xf0] }
 0x7e4   :  { %5338 = vmatmul.bf16.gmra.mxu2 %v11558_v29  ;;  %5361 = vmatpush.bf16.msrb.mxu3 %v7934_v3  ;;  %v8251_v3 = vld [vmem:[#allocation4 + $0x390] sm:$0xf0] }
 0x7e5   :  { %v8254_v60 = vor.u32 %v9066_v44, %v8251_v3  ;;  %v8062_v3 = vor.u32 %v9018_v50, %v8059_v58  ;;  %v9037_v50 = vld [vmem:[#allocation4 + $0x294] sm:$0xf0]  ;;  %v9087_v58 = vld [vmem:[%s12046_s12 + $0x28] sm:$0xff] }
 0x7e6   :  { %5386 = vmatpush.bf16.msra.mxu0 %v8126_v20  ;;  %v8206_v20 = vor.u32 %v9054_v40, %v8203_v24 }
 0x7e7   :  { %5415 = vmatpush.bf16.msrb.mxu1 %v8254_v60  ;;  %5560 = vmatpush.bf16.msra.mxu2 %v7878_v5  ;;  %v11648_v5 = vpop.f32.mrf.mxu2 }
 0x7e8   :  { %5470 = vmatpush.bf16.msra.mxu3 %v8050_v7  ;;  %v8235_v7 = vld [vmem:[#allocation4 + $0x370] sm:$0xf0] }
 0x7e9   :  { %v8238_v11 = vor.u32 %v9062_v63, %v8235_v7 }
 0x7ea   :  { %5387 = vmatpush.bf16.msra.mxu0 %v8110_v49 }
 0x7eb   :  { %5416 = vmatpush.bf16.msrb.mxu1 %v8238_v11  ;;  %5561 = vmatpush.bf16.msra.mxu2 %v7862_v26  ;;  %v8161_v11 = vld [vmem:[#allocation4 + $0x2c8] sm:$0xf] }
 0x7ec   :  { %5471 = vmatpush.bf16.msra.mxu3 %v8034_v56  ;;  %v7954_v56 = vor.u32 %v8993_v12, %v7953_v48  ;;  %v9045_v48 = vld [vmem:[#allocation4 + $0x2d4] sm:$0xf0] }
 0x7ed   :  { %v8162_v12 = vor.u32 %v9045_v48, %v8161_v11  ;;  %v9085_v48 = vld [vmem:[%s12046_s12 + $0x18] sm:$0xff] }
 0x7ee   :  { %5256 = vmatmul.bf16.gmra.mxu3 %v11621_v28  ;;  %5388 = vmatpush.bf16.msra.mxu0 %v8094_v27 }
 0x7ef   :  { %5562 = vmatpush.bf16.msra.mxu2 %v7846_v30  ;;  %v11653_v9 = vpop.f32.mrf.mxu2  ;;  %v9077_v30 = vld [vmem:[#allocation4 + $0x3d4] sm:$0xf0] }
 0x7f0   :  { %5472 = vmatpush.bf16.msra.mxu3 %v8018_v47  ;;  %v9058_v47 = vld [vmem:[#allocation4 + $0x344] sm:$0xf]  ;;  %v8290_v35 = vor.u32 %v9077_v30, %v8289_v57  ;;  %v9065_v57 = vld [vmem:[#allocation4 + $0x374] sm:$0xf0] }
 0x7f2   :  { %5389 = vmatpush.bf16.msra.mxu0 %v8078_v62  ;;  %v8003_v62 = vld [vmem:[#allocation4 + $0x198] sm:$0xf0] }
 0x7f3   :  { %5563 = vmatpush.bf16.msra.mxu2 %v7830_v8  ;;  %v9041_v8 = vld [vmem:[#allocation4 + $0x2b4] sm:$0xf0]  ;;  %v8006_v40 = vor.u32 %v9003_v52, %v8003_v62 }
 0x7f4   :  { %5343 = vmatmul.bf16.gmra.mxu2 %v11575_v10  ;;  %5473 = vmatpush.bf16.msra.mxu3 %v8002_v54  ;;  %v8146_v27 = vor.u32 %v9041_v8, %v8145_v19  ;;  %v8097_v19 = vld [vmem:[#allocation4 + $0x248] sm:$0xf]  ;;  %v9029_v8 = vld [vmem:[#allocation4 + $0x254] sm:$0xf0] }
 0x7f6   :  { %5390 = vmatpush.bf16.msra.mxu0 %v8062_v3  ;;  %v8999_v3 = vld [vmem:[#allocation4 + $0x16c] sm:$0xf] }
 0x7f8   :  { %5474 = vmatpush.bf16.msra.mxu3 %v7986_v41 }
 0x7fc   :  { %5475 = vmatpush.bf16.msra.mxu3 %v7970_v2  ;;  %v8305_v2 = vld [vmem:[#allocation4 + $0x3e8] sm:$0xf] }
 0x7fd   :  { %v8306_v31 = vor.u32 %v9081_v34, %v8305_v2  ;;  %v8995_v2 = vld [vmem:[#allocation4 + $0x14c] sm:$0xf] }
 0x7fe   :  { %5261 = vmatmul.bf16.gmra.mxu3 %v11627_v42 }
 0x800   :  { %5476 = vmatpush.bf16.msra.mxu3 %v7954_v56  ;;  %v9015_v56 = vld [vmem:[#allocation4 + $0x1ec] sm:$0xf] }
 0x801   :  { %v8054_v32 = vor.u32 %v9015_v56, %v8051_v6  ;;  %v7955_v56 = vld [vmem:[#allocation4 + $0x138] sm:$0xf0]  ;;  %v8241_v6 = vld [vmem:[#allocation4 + $0x368] sm:$0xf] }
 0x804   :  { %5348 = vmatmul.bf16.gmra.mxu2 %v11591_v1  ;;  %5477 = vmatpush.bf16.msra.mxu3 %v7938_v4  ;;  %v11659_v4 = vpop.f32.mrf.mxu2 }
 0x80c   :  { %v11671_v24 = vpop.f32.mrf.mxu2 }
 0x80e   :  { %5362 = vmatmul.bf16.vlgmr.msrb.gmra.mxu3 %v11602_v43 }
 0x80f   :  { %5586 = vmatpush.bf16.msrb.mxu3 %v8054_v32  ;;  %v8242_v32 = vor.u32 %v9065_v57, %v8241_v6 }
 0x813   :  { %5587 = vmatpush.bf16.msrb.mxu3 %v8038_v16  ;;  %v7942_v16 = vor.u32 %v8987_v36, %v7939_v61 }
 0x814   :  { %5449 = vmatmul.bf16.vlgmr.msrb.gmra.mxu2 %v11555_v59 }
 0x818   :  { %v4218_v25 = vpop.f32.mrf.mxu3 }
 0x81a   :  { %v4400_v13 = vpop.f32.mrf.mxu1 }
 0x81e   :  { %5367 = vmatmul.bf16.gmra.mxu3 %v11612_v15 }
 0x820   :  { %v4220_v39 = vpop.f32.mrf.mxu3 }
 0x821   :  { %v11634_v33 = vpack.c.bf16 %v4220_v39, %v4218_v25  ;;  %v8222_v25 = vor.u32 %v9058_v47, %v8219_v51  ;;  %v8187_v39 = vld [vmem:[#allocation4 + $0x310] sm:$0xf0]  ;;  %v9089_v51 = vld [vmem:[%s12046_s12 + $0x38] sm:$0xff] }
 0x822   :  { %v4402_v37 = vpop.f32.mrf.mxu1  ;;  %v8190_v17 = vor.u32 %v9050_v14, %v8187_v39  ;;  %v8257_v14 = vld [vmem:[#allocation4 + $0x388] sm:$0xf]  ;;  %v9069_v39 = vld [vmem:[#allocation4 + $0x394] sm:$0xf0] }
 0x823   :  { %v11636_v55 = vpack.c.bf16 %v4402_v37, %v4400_v13  ;;  %5280 = vmatmul.bf16.gmra.mxu0 %v11634_v33  ;;  %5417 = vmatpush.bf16.msrb.mxu1 %v8222_v25  ;;  %v7814_v13 = vor.u32 %v8955_v0, %v7811_v46  ;;  %v9049_v37 = vld [vmem:[#allocation4 + $0x2f4] sm:$0xf0]  ;;  %v9007_v0 = vld [vmem:[#allocation4 + $0x1ac] sm:$0xf]  ;;  %v8019_v46 = vld [vmem:[#allocation4 + $0x1b8] sm:$0xf0] }
 0x824   :  { %5454 = vmatmul.bf16.gmra.mxu2 %v11558_v29  ;;  %v8178_v49 = vor.u32 %v9049_v37, %v8177_v23  ;;  %v8258_v23 = vor.u32 %v9069_v39, %v8257_v14  ;;  %v9086_v37 = vld [vmem:[%s12046_s12 + $0x20] sm:$0xff]  ;;  %v9053_v14 = vld [vmem:[#allocation4 + $0x314] sm:$0xf0] }
 0x825   :  { %5309 = vmatmul.bf16.gmra.mxu1 %v11636_v55  ;;  %5564 = vmatpush.bf16.msra.mxu2 %v7814_v13  ;;  %v9073_v13 = vld [vmem:[#allocation4 + $0x3b4] sm:$0xf0] }
 0x826   :  { %5499 = vmatpush.bf16.msrb.mxu0 %v8178_v49  ;;  %v7971_v49 = vld [vmem:[#allocation4 + $0x158] sm:$0xf0] }
 0x827   :  { %5418 = vmatpush.bf16.msrb.mxu1 %v8206_v20  ;;  %v8129_v20 = vld [vmem:[#allocation4 + $0x288] sm:$0xf]  ;;  %v7974_v34 = vor.u32 %v8995_v2, %v7971_v49 }
 0x829   :  { %5949 = vmatpush.bf16.msrb.mxu2 %v9089_v51  ;;  %v8098_v51 = vor.u32 %v9029_v8, %v8097_v19  ;;  %v9043_v19 = vld [vmem:[#allocation4 + $0x2cc] sm:$0xf]  ;;  %v8163_v8 = vld [vmem:[#allocation4 + $0x2d8] sm:$0xf0] }
 0x82a   :  { %5500 = vmatpush.bf16.msrb.mxu0 %v8162_v12  ;;  %v8991_v12 = vld [vmem:[#allocation4 + $0x12c] sm:$0xf] }
 0x82b   :  { %5419 = vmatpush.bf16.msrb.mxu1 %v8190_v17  ;;  %v7958_v30 = vor.u32 %v8991_v12, %v7955_v56  ;;  %v8307_v12 = vld [vmem:[#allocation4 + $0x3f8] sm:$0xf0] }
 0x82e   :  { %5372 = vmatmul.bf16.gmra.mxu3 %v11621_v28  ;;  %5501 = vmatpush.bf16.msrb.mxu0 %v8146_v27 }
 0x82f   :  { %5528 = vmatpush.bf16.msra.mxu1 %v8306_v31  ;;  %v8113_v31 = vld [vmem:[#allocation4 + $0x268] sm:$0xf] }
 0x831   :  { %v4223_v45 = vpop.f32.mrf.mxu3 }
 0x833   :  { %5529 = vmatpush.bf16.msra.mxu1 %v8290_v35 }
 0x834   :  { %v4405_v54 = vpop.f32.mrf.mxu1  ;;  %5459 = vmatmul.bf16.gmra.mxu2 %v11575_v10 }
 0x839   :  { %v4225_v44 = vpop.f32.mrf.mxu3 }
 0x83a   :  { %v11643_v41 = vpack.c.bf16 %v4225_v44, %v4223_v45  ;;  %v8273_v45 = vld [vmem:[#allocation4 + $0x3a8] sm:$0xf]  ;;  %v8130_v44 = vor.u32 %v9037_v50, %v8129_v20  ;;  %v9057_v20 = vld [vmem:[#allocation4 + $0x334] sm:$0xf0] }
 0x83b   :  { %v8274_v38 = vor.u32 %v9073_v13, %v8273_v45  ;;  %v9082_v13 = vld [vmem:[%s12046_s12] sm:$0xff] }
 0x83c   :  { %v4407_v60 = vpop.f32.mrf.mxu1  ;;  %5285 = vmatmul.bf16.gmra.mxu0 %v11643_v41 }
 0x83d   :  { %v11646_v21 = vpack.c.bf16 %v4407_v60, %v4405_v54  ;;  %v8022_v54 = vor.u32 %v9007_v0, %v8019_v46  ;;  %5530 = vmatpush.bf16.msra.mxu1 %v8274_v38  ;;  %v7987_v60 = vld [vmem:[#allocation4 + $0x178] sm:$0xf0]  ;;  %5502 = vmatpush.bf16.msrb.mxu0 %v8130_v44  ;;  %v8225_v0 = vld [vmem:[#allocation4 + $0x348] sm:$0xf]  ;;  %v9061_v46 = vld [vmem:[#allocation4 + $0x354] sm:$0xf0] }
 0x83e   :  { %5377 = vmatmul.bf16.gmra.mxu3 %v11627_v42  ;;  %v7990_v17 = vor.u32 %v8999_v3, %v7987_v60  ;;  %v8226_v45 = vor.u32 %v9061_v46, %v8225_v0  ;;  %v9025_v38 = vld [vmem:[#allocation4 + $0x234] sm:$0xf0]  ;;  %v8193_v60 = vld [vmem:[#allocation4 + $0x308] sm:$0xf] }
 0x83f   :  { %5314 = vmatmul.bf16.gmra.mxu1 %v11646_v21  ;;  %5588 = vmatpush.bf16.msrb.mxu3 %v8022_v54  ;;  %v8081_v54 = vld [vmem:[#allocation4 + $0x228] sm:$0xf]  ;;  %v9021_v44 = vld [vmem:[#allocation4 + $0x214] sm:$0xf0] }
 0x840   :  { %v8082_v52 = vor.u32 %v9025_v38, %v8081_v54 }
 0x841   :  { %v4228_v22 = vpop.f32.mrf.mxu3  ;;  %5531 = vmatpush.bf16.msra.mxu1 %v8258_v23  ;;  %v11718_v23 = vld [vmem:[%s12045_s11] sm:$0xf] }
 0x842   :  { %v11721_v49 = vperm.slane %v11718_v23, 0 }
 0x843   :  { %5589 = vmatpush.bf16.msrb.mxu3 %v8006_v40  ;;  %v8209_v40 = vld [vmem:[#allocation4 + $0x328] sm:$0xf] }
 0x844   :  { %5464 = vmatmul.bf16.gmra.mxu2 %v11591_v1  ;;  %v8210_v50 = vor.u32 %v9057_v20, %v8209_v40  ;;  %v5219_v56 = vadd.f32 %v11648_v5, %v11721_v49  ;;  %v8166_v5 = vor.u32 %v9043_v19, %v8163_v8  ;;  %v9059_v19 = vld [vmem:[#allocation4 + $0x34c] sm:$0xf] }
 0x845   :  { %5532 = vmatpush.bf16.msra.mxu1 %v8242_v32 }
 0x847   :  { %5590 = vmatpush.bf16.msrb.mxu3 %v7990_v17 }
 0x849   :  { %v4230_v63 = vpop.f32.mrf.mxu3  ;;  %5533 = vmatpush.bf16.msra.mxu1 %v8226_v45  ;;  %v9039_v45 = vld [vmem:[#allocation4 + $0x2ac] sm:$0xf] }
 0x84a   :  { %v11655_v26 = vpack.c.bf16 %v4230_v63, %v4228_v22  ;;  %v9033_v63 = vld [vmem:[#allocation4 + $0x274] sm:$0xf0] }
 0x84b   :  { %v8114_v11 = vor.u32 %v9033_v63, %v8113_v31  ;;  %5591 = vmatpush.bf16.msrb.mxu3 %v7974_v34  ;;  %v9047_v34 = vld [vmem:[#allocation4 + $0x2ec] sm:$0xf]  ;;  %v8179_v31 = vld [vmem:[#allocation4 + $0x2f8] sm:$0xf0] }
 0x84c   :  { %v4410_v7 = vpop.f32.mrf.mxu1  ;;  %5290 = vmatmul.bf16.gmra.mxu0 %v11655_v26  ;;  %v8182_v63 = vor.u32 %v9047_v34, %v8179_v31  ;;  %v5226_v34 = vadd.f32 %v11671_v24, %v11721_v49 }
 0x84d   :  { %5503 = vmatpush.bf16.msrb.mxu0 %v8114_v11  ;;  %5534 = vmatpush.bf16.msra.mxu1 %v8210_v50  ;;  %v5221_v11 = vadd.f32 %v11653_v9, %v11721_v49  ;;  %v9035_v50 = vld [vmem:[#allocation4 + $0x28c] sm:$0xf] }
 0x84e   :  { %5478 = vmatmul.bf16.vlgmr.msra.gmra.mxu3 %v11602_v43 }
 0x84f   :  { %5592 = vmatpush.bf16.msrb.mxu3 %v7958_v30 }
 0x851   :  { %v11678_v22 = vpop.f32.mrf.mxu3  ;;  %5504 = vmatpush.bf16.msrb.mxu0 %v8098_v51 }
 0x853   :  { %5593 = vmatpush.bf16.msrb.mxu3 %v7942_v16 }
 0x854   :  { %v4412_v47 = vpop.f32.mrf.mxu1  ;;  %5565 = vmatmul.bf16.vlgmr.msra.gmra.mxu2 %v11555_v59  ;;  %v9088_v59 = vld [vmem:[%s12046_s12 + $0x30] sm:$0xff] }
 0x855   :  { %v11665_v25 = vpack.c.bf16 %v4412_v47, %v4410_v7  ;;  %5950 = vmatpush.bf16.msrb.mxu2 %v9088_v59  ;;  %v11683_v7 = vpop.f32.mrf.mxu2  ;;  %v9083_v47 = vld [vmem:[%s12046_s12 + $0x8] sm:$0xff]  ;;  %5505 = vmatpush.bf16.msrb.mxu0 %v8082_v52  ;;  %v8275_v52 = vld [vmem:[#allocation4 + $0x3b8] sm:$0xf0] }
 0x857   :  { %5319 = vmatmul.bf16.gmra.mxu1 %v11665_v25 }
 0x859   :  { %5951 = vmatpush.bf16.msrb.mxu2 %v9087_v58  ;;  %v5249_v35 = vpop.f32.mrf.mxu3  ;;  %v8065_v58 = vld [vmem:[#allocation4 + $0x208] sm:$0xf] }
 0x85a   :  { %v8066_v3 = vor.u32 %v9021_v44, %v8065_v58  ;;  %v5250_v6 = vadd.f32 %v5249_v35, %v5221_v11  ;;  %v9075_v35 = vld [vmem:[#allocation4 + $0x3cc] sm:$0xf]  ;;  %v8131_v58 = vld [vmem:[#allocation4 + $0x298] sm:$0xf0] }
 0x85b   :  { %v8134_v44 = vor.u32 %v9035_v50, %v8131_v58  ;;  %v8067_v50 = vld [vmem:[#allocation4 + $0x218] sm:$0xf0] }
 0x85c   :  { %5391 = vmatmul.bf16.vlgmr.msra.gmra.mxu0 %v11606_v53  ;;  %v5305_v2 = vpop.f32.mrf.mxu1 }
 0x85d   :  { %5952 = vmatpush.bf16.msrb.mxu2 %v9086_v37  ;;  %v11697_v27 = vpop.f32.mrf.mxu2  ;;  %5506 = vmatpush.bf16.msrb.mxu0 %v8066_v3  ;;  %v5276_v37 = vpop.f32.mrf.mxu0  ;;  %v9067_v3 = vld [vmem:[#allocation4 + $0x38c] sm:$0xf] }
 0x85e   :  { %5483 = vmatmul.bf16.gmra.mxu3 %v11612_v15 }
 0x861   :  { %5953 = vmatpush.bf16.msrb.mxu2 %v9085_v48  ;;  %v11703_v59 = vpop.f32.mrf.mxu3  ;;  %5615 = vmatpush.bf16.msra.mxu0 %v8182_v63  ;;  %v9079_v48 = vld [vmem:[#allocation4 + $0x3ec] sm:$0xf] }
 0x862   :  { %v8310_v30 = vor.u32 %v9079_v48, %v8307_v12  ;;  %v8115_v48 = vld [vmem:[#allocation4 + $0x278] sm:$0xf0]  ;;  %v9063_v12 = vld [vmem:[#allocation4 + $0x36c] sm:$0xf] }
 0x864   :  { %5570 = vmatmul.bf16.gmra.mxu2 %v11558_v29  ;;  %v9084_v29 = vld [vmem:[%s12046_s12 + $0x10] sm:$0xff]  ;;  %v5307_v36 = vpop.f32.mrf.mxu1 }
 0x865   :  { %5954 = vmatpush.bf16.msrb.mxu2 %v9084_v29  ;;  %v11706_v62 = vpop.f32.mrf.mxu2  ;;  %v5278_v29 = vpop.f32.mrf.mxu0  ;;  %5616 = vmatpush.bf16.msra.mxu0 %v8166_v5 }
 0x866   :  { %v5279_v9 = vadd.f32 %v5278_v29, %v5250_v6 }
 0x867   :  { %5420 = vmatmul.bf16.vlgmr.msrb.gmra.mxu1 %v11614_v18 }
 0x868   :  { %v5308_v16 = vadd.f32 %v5307_v36, %v5279_v9 }
 0x869   :  { %5955 = vmatpush.bf16.msrb.mxu2 %v9083_v47  ;;  %v11710_v39 = vpop.f32.mrf.mxu3  ;;  %v8291_v47 = vld [vmem:[#allocation4 + $0x3d8] sm:$0xf0] }
 0x86a   :  { %v8294_v0 = vor.u32 %v9075_v35, %v8291_v47  ;;  %v8227_v35 = vld [vmem:[#allocation4 + $0x358] sm:$0xf0] }
 0x86c   :  { %5396 = vmatmul.bf16.gmra.mxu0 %v11634_v33 }
 0x86d   :  { %5956 = vmatpush.bf16.msrb.mxu2 %v9082_v13  ;;  %v11713_v17 = vpop.f32.mrf.mxu2  ;;  %v8147_v13 = vld [vmem:[#allocation4 + $0x2b8] sm:$0xf0] }
 0x86e   :  { %5488 = vmatmul.bf16.gmra.mxu3 %v11621_v28  ;;  %v8150_v38 = vor.u32 %v9039_v45, %v8147_v13  ;;  %v8083_v45 = vld [vmem:[#allocation4 + $0x238] sm:$0xf0] }
 0x870   :  { %5617 = vmatpush.bf16.msra.mxu0 %v8150_v38  ;;  %v9055_v38 = vld [vmem:[#allocation4 + $0x32c] sm:$0xf] }
 0x871   :  { %v11729_v57 = vpop.f32.mrf.mxu3 }
 0x874   :  { %5575 = vmatmul.bf16.gmra.mxu2 %v11575_v10  ;;  %v8194_v10 = vor.u32 %v9053_v14, %v8193_v60  ;;  %v8259_v60 = vld [vmem:[#allocation4 + $0x398] sm:$0xf0]  ;;  %5618 = vmatpush.bf16.msra.mxu0 %v8134_v44 }
 0x875   :  { %v11732_v32 = vpop.f32.mrf.mxu2  ;;  %v8262_v14 = vor.u32 %v9067_v3, %v8259_v60  ;;  %v9095_v3 = vld [vmem:[%s12046_s12 + $0x68] sm:$0xff] }
 0x876   :  { %5535 = vmatpush.bf16.msra.mxu1 %v8194_v10 }
 0x877   :  { %5425 = vmatmul.bf16.gmra.mxu1 %v11636_v55 }
 0x879   :  { %v11736_v46 = vpop.f32.mrf.mxu3 }
 0x87a   :  { %5644 = vmatpush.bf16.msrb.mxu1 %v8310_v30 }
 0x87c   :  { %5401 = vmatmul.bf16.gmra.mxu0 %v11643_v41 }
 0x87d   :  { %v11738_v54 = vpop.f32.mrf.mxu2 }
 0x87e   :  { %5493 = vmatmul.bf16.gmra.mxu3 %v11627_v42  ;;  %5645 = vmatpush.bf16.msrb.mxu1 %v8294_v0  ;;  %v9097_v0 = vld [vmem:[%s12046_s12 + $0x78] sm:$0xff] }
 0x87f   :  { %5978 = vmatpush.bf16.msra.mxu3 %v9097_v0 }
 0x881   :  { %v11741_v20 = vpop.f32.mrf.mxu3 }
 0x884   :  { %5580 = vmatmul.bf16.gmra.mxu2 %v11591_v1  ;;  %v5248_v1 = vadd.f32 %v11678_v22, %v5219_v56  ;;  %v5255_v56 = vadd.f32 %v11710_v39, %v5226_v34  ;;  %v8230_v39 = vor.u32 %v9059_v19, %v8227_v35 }
 0x885   :  { %v11750_v63 = vpop.f32.mrf.mxu2 }
 0x886   :  { %v5277_v61 = vadd.f32 %v5276_v37, %v5248_v1  ;;  %v8243_v1 = vld [vmem:[#allocation4 + $0x378] sm:$0xf0] }
 0x887   :  { %5430 = vmatmul.bf16.gmra.mxu1 %v11646_v21  ;;  %v8246_v29 = vor.u32 %v9063_v12, %v8243_v1 }
 0x888   :  { %v5306_v51 = vadd.f32 %v5305_v2, %v5277_v61  ;;  %v5224_v2 = vadd.f32 %v11659_v4, %v11721_v49  ;;  %v9027_v61 = vld [vmem:[#allocation4 + $0x24c] sm:$0xf] }
 0x889   :  { %v11752_v11 = vpop.f32.mrf.mxu3 }
 0x88a   :  { %v5673_v22 = vpack.c.bf16 %v5308_v16, %v5306_v51  ;;  %v5253_v31 = vadd.f32 %v11703_v59, %v5224_v2  ;;  %v8099_v16 = vld [vmem:[#allocation4 + $0x258] sm:$0xf0]  ;;  %v5231_v2 = vadd.f32 %v11697_v27, %v11721_v49 }
 0x88b   :  { %v8102_v5 = vor.u32 %v9027_v61, %v8099_v16 }
 0x88c   :  { %5406 = vmatmul.bf16.gmra.mxu0 %v11655_v26  ;;  %v5260_v12 = vadd.f32 %v11736_v46, %v5231_v2  ;;  %v9092_v46 = vld [vmem:[%s12046_s12 + $0x50] sm:$0xff] }
 0x88d   :  { %v11758_v47 = vpop.f32.mrf.mxu2 }
 0x88e   :  { %5594 = vmatmul.bf16.vlgmr.msrb.gmra.mxu3 %v11602_v43  ;;  %v9071_v43 = vld [vmem:[#allocation4 + $0x3ac] sm:$0xf] }
 0x88f   :  { %v8278_v40 = vor.u32 %v9071_v43, %v8275_v52  ;;  %v8211_v43 = vld [vmem:[#allocation4 + $0x338] sm:$0xf0] }
 0x890   :  { %v8214_v52 = vor.u32 %v9055_v38, %v8211_v43 }
 0x891   :  { %5646 = vmatpush.bf16.msrb.mxu1 %v8278_v40  ;;  %v11760_v51 = vpop.f32.mrf.mxu3  ;;  %v9019_v40 = vld [vmem:[#allocation4 + $0x20c] sm:$0xf] }
 0x892   :  { %v8070_v44 = vor.u32 %v9019_v40, %v8067_v50  ;;  %v11820_v50 = vperm.slane %v11718_v23, 1 }
 0x894   :  { %5957 = vmatmul.bf16.vlgmr.msrb.gmra.mxu2 %v5673_v22  ;;  %v9023_v22 = vld [vmem:[#allocation4 + $0x22c] sm:$0xf] }
 0x895   :  { %5647 = vmatpush.bf16.msrb.mxu1 %v8262_v14  ;;  %v8086_v13 = vor.u32 %v9023_v22, %v8083_v45 }
 0x897   :  { %5435 = vmatmul.bf16.gmra.mxu1 %v11665_v25 }
 0x899   :  { %5648 = vmatpush.bf16.msrb.mxu1 %v8246_v29  ;;  %v11772_v60 = vpop.f32.mrf.mxu3 }
 0x89c   :  { %5507 = vmatmul.bf16.vlgmr.msrb.gmra.mxu0 %v11606_v53 }
 0x89d   :  { %5649 = vmatpush.bf16.msrb.mxu1 %v8230_v39 }
 0x89e   :  { %5599 = vmatmul.bf16.gmra.mxu3 %v11612_v15  ;;  %v9031_v15 = vld [vmem:[#allocation4 + $0x26c] sm:$0xf] }
 0x89f   :  { %v8118_v30 = vor.u32 %v9031_v15, %v8115_v48  ;;  %v9051_v15 = vld [vmem:[#allocation4 + $0x30c] sm:$0xf]  ;;  %v8195_v48 = vld [vmem:[#allocation4 + $0x318] sm:$0xf0] }
 0x8a0   :  { %v5281_v10 = vpop.f32.mrf.mxu0 }
 0x8a1   :  { %v5282_v6 = vadd.f32 %v5281_v10, %v5253_v31  ;;  %5619 = vmatpush.bf16.msra.mxu0 %v8118_v30  ;;  %5650 = vmatpush.bf16.msrb.mxu1 %v8214_v52  ;;  %v5229_v10 = vadd.f32 %v11683_v7, %v11721_v49  ;;  %v11783_v31 = vpop.f32.mrf.mxu2  ;;  %v8198_v7 = vor.u32 %v9051_v15, %v8195_v48  ;;  %v9093_v30 = vld [vmem:[%s12046_s12 + $0x58] sm:$0xff]  ;;  %v11790_v27 = vpop.f32.mrf.mxu3 }
 0x8a2   :  { %v5310_v37 = vpop.f32.mrf.mxu1 }
 0x8a3   :  { %v5311_v59 = vadd.f32 %v5310_v37, %v5282_v6  ;;  %v9094_v37 = vld [vmem:[%s12046_s12 + $0x60] sm:$0xff]  ;;  %v5258_v34 = vadd.f32 %v11729_v57, %v5229_v10 }
 0x8a5   :  { %5620 = vmatpush.bf16.msra.mxu0 %v8102_v5  ;;  %5651 = vmatpush.bf16.msrb.mxu1 %v8198_v7  ;;  %v5236_v5 = vadd.f32 %v11713_v17, %v11721_v49 }
 0x8a7   :  { %5536 = vmatmul.bf16.vlgmr.msra.gmra.mxu1 %v11614_v18  ;;  %v5265_v22 = vadd.f32 %v11752_v11, %v5236_v5  ;;  %v5335_v11 = vadd.f32 %v11732_v32, %v11820_v50  ;;  %v9099_v5 = vld [vmem:[%s12046_s12 + $0x88] sm:$0xff] }
 0x8a8   :  { %v5283_v4 = vpop.f32.mrf.mxu0 }
 0x8a9   :  { %v5284_v36 = vadd.f32 %v5283_v4, %v5255_v56  ;;  %5621 = vmatpush.bf16.msra.mxu0 %v8086_v13  ;;  %v5370_v61 = vpop.f32.mrf.mxu3 }
 0x8aa   :  { %v5312_v24 = vpop.f32.mrf.mxu1 }
 0x8ab   :  { %v5313_v9 = vadd.f32 %v5312_v24, %v5284_v36  ;;  %v11796_v36 = vpop.f32.mrf.mxu2  ;;  %v9091_v24 = vld [vmem:[%s12046_s12 + $0x48] sm:$0xff] }
 0x8ac   :  { %5512 = vmatmul.bf16.gmra.mxu0 %v11634_v33 }
 0x8ad   :  { %v5677_v8 = vpack.c.bf16 %v5313_v9, %v5311_v59  ;;  %5622 = vmatpush.bf16.msra.mxu0 %v8070_v44  ;;  %v9090_v9 = vld [vmem:[%s12046_s12 + $0x40] sm:$0xff] }
 0x8ae   :  { %5604 = vmatmul.bf16.gmra.mxu3 %v11621_v28  ;;  %v9096_v28 = vld [vmem:[%s12046_s12 + $0x70] sm:$0xff] }
 0x8af   :  { %5962 = vmatmul.bf16.gmra.mxu2 %v5677_v8  ;;  %5979 = vmatpush.bf16.msra.mxu3 %v9096_v28  ;;  %v5234_v8 = vadd.f32 %v11706_v62, %v11721_v49 }
 0x8b1   :  { %v11812_v39 = vpop.f32.mrf.mxu3  ;;  %v5263_v0 = vadd.f32 %v11741_v20, %v5234_v8 }
 0x8b3   :  { %5980 = vmatpush.bf16.msra.mxu3 %v9095_v3  ;;  %v11809_v35 = vpop.f32.mrf.mxu2 }
 0x8b7   :  { %5541 = vmatmul.bf16.gmra.mxu1 %v11636_v55  ;;  %5981 = vmatpush.bf16.msra.mxu3 %v9094_v37 }
 0x8b9   :  { %v5286_v58 = vpop.f32.mrf.mxu0  ;;  %v5375_v49 = vpop.f32.mrf.mxu3 }
 0x8ba   :  { %v5287_v56 = vadd.f32 %v5286_v58, %v5258_v34  ;;  %v5337_v58 = vadd.f32 %v11738_v54, %v11820_v50 }
 0x8bb   :  { %5982 = vmatpush.bf16.msra.mxu3 %v9093_v30  ;;  %v11817_v17 = vpop.f32.mrf.mxu2 }
 0x8bc   :  { %v5315_v14 = vpop.f32.mrf.mxu1  ;;  %5517 = vmatmul.bf16.gmra.mxu0 %v11643_v41  ;;  %v5366_v44 = vadd.f32 %v11772_v60, %v5337_v58  ;;  %v9104_v60 = vld [vmem:[%s12046_s12 + $0xb0] sm:$0xff] }
 0x8bd   :  { %v5316_v4 = vadd.f32 %v5315_v14, %v5287_v56 }
 0x8be   :  { %5609 = vmatmul.bf16.gmra.mxu3 %v11627_v42 }
 0x8bf   :  { %5983 = vmatpush.bf16.msra.mxu3 %v9092_v46 }
 0x8c1   :  { %v5288_v6 = vpop.f32.mrf.mxu0  ;;  %v11829_v37 = vpop.f32.mrf.mxu3 }
 0x8c2   :  { %v5289_v1 = vadd.f32 %v5288_v6, %v5260_v12  ;;  %v5340_v12 = vadd.f32 %v11750_v63, %v11820_v50  ;;  %v9103_v6 = vld [vmem:[%s12046_s12 + $0xa8] sm:$0xff] }
 0x8c3   :  { %5984 = vmatpush.bf16.msra.mxu3 %v9091_v24 }
 0x8c4   :  { %v5317_v57 = vpop.f32.mrf.mxu1  ;;  %v5369_v7 = vadd.f32 %v11790_v27, %v5340_v12 }
 0x8c5   :  { %v5318_v42 = vadd.f32 %v5317_v57, %v5289_v1 }
 0x8c7   :  { %v5681_v29 = vpack.c.bf16 %v5318_v42, %v5316_v4  ;;  %5546 = vmatmul.bf16.gmra.mxu1 %v11646_v21  ;;  %5985 = vmatpush.bf16.msra.mxu3 %v9090_v9  ;;  %v5345_v9 = vadd.f32 %v11783_v31, %v11820_v50 }
 0x8c9   :  { %5967 = vmatmul.bf16.gmra.mxu2 %v5681_v29  ;;  %v5291_v59 = vpop.f32.mrf.mxu0  ;;  %v5380_v48 = vpop.f32.mrf.mxu3  ;;  %v9101_v29 = vld [vmem:[%s12046_s12 + $0x98] sm:$0xff] }
 0x8ca   :  { %v5292_v13 = vadd.f32 %v5291_v59, %v5263_v0 }
 0x8cc   :  { %5522 = vmatmul.bf16.gmra.mxu0 %v11655_v26 }
 0x8d1   :  { %v5293_v16 = vpop.f32.mrf.mxu0  ;;  %v5479_v46 = vpop.f32.mrf.mxu3 }
 0x8d2   :  { %v5294_v28 = vadd.f32 %v5293_v16, %v5265_v22 }
 0x8d4   :  { %v5320_v19 = vpop.f32.mrf.mxu1 }
 0x8d5   :  { %v5321_v43 = vadd.f32 %v5320_v19, %v5292_v13  ;;  %v5374_v19 = vadd.f32 %v11812_v39, %v5345_v9  ;;  %v9113_v39 = vld [vmem:[%s12046_s12 + $0xf8] sm:$0xff] }
 0x8d6   :  { %6036 = vmatpush.bf16.msra.mxu1 %v9113_v39 }
 0x8d7   :  { %5551 = vmatmul.bf16.gmra.mxu1 %v11665_v25 }
 0x8d9   :  { %v5392_v45 = vpop.f32.mrf.mxu0  ;;  %v5481_v0 = vpop.f32.mrf.mxu3 }
 0x8dc   :  { %v5322_v38 = vpop.f32.mrf.mxu1  ;;  %5623 = vmatmul.bf16.vlgmr.msra.gmra.mxu0 %v11606_v53  ;;  %v5364_v53 = vadd.f32 %v11760_v51, %v5335_v11 }
 0x8dd   :  { %v5323_v52 = vadd.f32 %v5322_v38, %v5294_v28 }
 0x8de   :  { %v5393_v14 = vadd.f32 %v5392_v45, %v5364_v53 }
 0x8df   :  { %v5685_v62 = vpack.c.bf16 %v5323_v52, %v5321_v43 }
 0x8e1   :  { %5972 = vmatmul.bf16.gmra.mxu2 %v5685_v62  ;;  %v5394_v40 = vpop.f32.mrf.mxu0  ;;  %v5484_v62 = vpop.f32.mrf.mxu3 }
 0x8e2   :  { %v5395_v10 = vadd.f32 %v5394_v40, %v5366_v44  ;;  %v5350_v40 = vadd.f32 %v11809_v35, %v11820_v50  ;;  %v9111_v35 = vld [vmem:[%s12046_s12 + $0xe8] sm:$0xff] }
 0x8e4   :  { %v5421_v20 = vpop.f32.mrf.mxu1  ;;  %v5379_v11 = vadd.f32 %v11829_v37, %v5350_v40  ;;  %v9110_v37 = vld [vmem:[%s12046_s12 + $0xe0] sm:$0xff] }
 0x8e5   :  { %v5422_v34 = vadd.f32 %v5421_v20, %v5393_v14  ;;  %v5352_v20 = vadd.f32 %v11817_v17, %v11820_v50 }
 0x8e7   :  { %5652 = vmatmul.bf16.vlgmr.msrb.gmra.mxu1 %v11614_v18  ;;  %v9105_v18 = vld [vmem:[%s12046_s12 + $0xb8] sm:$0xff]  ;;  %v5381_v58 = vadd.f32 %v5380_v48, %v5352_v20 }
 0x8e8   :  { %6007 = vmatpush.bf16.msrb.mxu0 %v9105_v18 }
 0x8e9   :  { %v5397_v3 = vpop.f32.mrf.mxu0 }
 0x8ea   :  { %v5398_v1 = vadd.f32 %v5397_v3, %v5369_v7 }
 0x8ec   :  { %v5423_v2 = vpop.f32.mrf.mxu1  ;;  %5628 = vmatmul.bf16.gmra.mxu0 %v11634_v33  ;;  %v5342_v33 = vadd.f32 %v11758_v47, %v11820_v50  ;;  %v5450_v47 = vpop.f32.mrf.mxu2 }
 0x8ed   :  { %v5424_v15 = vadd.f32 %v5423_v2, %v5395_v10  ;;  %6008 = vmatpush.bf16.msrb.mxu0 %v9104_v60 }
 0x8ee   :  { %v5371_v56 = vadd.f32 %v5370_v61, %v5342_v33  ;;  %v5347_v61 = vadd.f32 %v11796_v36, %v11820_v50 }
 0x8ef   :  { %v5674_v32 = vpack.c.bf16 %v5424_v15, %v5422_v34  ;;  %v5486_v15 = vpop.f32.mrf.mxu3 }
 0x8f0   :  { %v5376_v8 = vadd.f32 %v5375_v49, %v5347_v61 }
 0x8f1   :  { %5986 = vmatmul.bf16.vlgmr.msra.gmra.mxu3 %v5674_v32  ;;  %v5399_v54 = vpop.f32.mrf.mxu0  ;;  %6009 = vmatpush.bf16.msrb.mxu0 %v9103_v6 }
 0x8f2   :  { %v5400_v57 = vadd.f32 %v5399_v54, %v5371_v56 }
 0x8f4   :  { %v5426_v51 = vpop.f32.mrf.mxu1  ;;  %v5452_v16 = vpop.f32.mrf.mxu2 }
 0x8f5   :  { %v5427_v42 = vadd.f32 %v5426_v51, %v5398_v1 }
 0x8f7   :  { %5657 = vmatmul.bf16.gmra.mxu1 %v11636_v55  ;;  %v9102_v55 = vld [vmem:[%s12046_s12 + $0xa0] sm:$0xff]  ;;  %v5489_v60 = vpop.f32.mrf.mxu3 }
 0x8f8   :  { %6010 = vmatpush.bf16.msrb.mxu0 %v9102_v55 }
 0x8f9   :  { %v5402_v30 = vpop.f32.mrf.mxu0 }
 0x8fa   :  { %v5403_v45 = vadd.f32 %v5402_v30, %v5374_v19 }
 0x8fc   :  { %v5428_v4 = vpop.f32.mrf.mxu1  ;;  %5633 = vmatmul.bf16.gmra.mxu0 %v11643_v41  ;;  %v9100_v41 = vld [vmem:[%s12046_s12 + $0x90] sm:$0xff]  ;;  %v5455_v43 = vpop.f32.mrf.mxu2 }
 0x8fd   :  { %v5429_v63 = vadd.f32 %v5428_v4, %v5400_v57  ;;  %6011 = vmatpush.bf16.msrb.mxu0 %v9101_v29 }
 0x8ff   :  { %v5678_v27 = vpack.c.bf16 %v5429_v63, %v5427_v42  ;;  %v9109_v42 = vld [vmem:[%s12046_s12 + $0xd8] sm:$0xff]  ;;  %v5491_v63 = vpop.f32.mrf.mxu3 }
 0x901   :  { %5991 = vmatmul.bf16.gmra.mxu3 %v5678_v27  ;;  %v5404_v24 = vpop.f32.mrf.mxu0  ;;  %6012 = vmatpush.bf16.msrb.mxu0 %v9100_v41  ;;  %v9108_v27 = vld [vmem:[%s12046_s12 + $0xd0] sm:$0xff] }
 0x902   :  { %v5405_v13 = vadd.f32 %v5404_v24, %v5376_v8 }
 0x904   :  { %v5431_v59 = vpop.f32.mrf.mxu1  ;;  %v5457_v14 = vpop.f32.mrf.mxu2 }
 0x905   :  { %6013 = vmatpush.bf16.msrb.mxu0 %v9099_v5  ;;  %v5432_v28 = vadd.f32 %v5431_v59, %v5403_v45  ;;  %v9107_v45 = vld [vmem:[%s12046_s12 + $0xc8] sm:$0xff] }
 0x907   :  { %5662 = vmatmul.bf16.gmra.mxu1 %v11646_v21  ;;  %v9098_v21 = vld [vmem:[%s12046_s12 + $0x80] sm:$0xff]  ;;  %v5494_v19 = vpop.f32.mrf.mxu3 }
 0x909   :  { %v5407_v22 = vpop.f32.mrf.mxu0  ;;  %6014 = vmatpush.bf16.msrb.mxu0 %v9098_v21 }
 0x90a   :  { %v5408_v44 = vadd.f32 %v5407_v22, %v5379_v11 }
 0x90c   :  { %v5433_v31 = vpop.f32.mrf.mxu1  ;;  %5638 = vmatmul.bf16.gmra.mxu0 %v11655_v26  ;;  %v9112_v26 = vld [vmem:[%s12046_s12 + $0xf0] sm:$0xff]  ;;  %v5460_v18 = vpop.f32.mrf.mxu2 }
 0x90d   :  { %v5434_v38 = vadd.f32 %v5433_v31, %v5405_v13  ;;  %6037 = vmatpush.bf16.msra.mxu1 %v9112_v26 }
 0x90f   :  { %v5682_v36 = vpack.c.bf16 %v5434_v38, %v5432_v28  ;;  %v9106_v38 = vld [vmem:[%s12046_s12 + $0xc0] sm:$0xff]  ;;  %v5496_v21 = vpop.f32.mrf.mxu3 }
 0x911   :  { %5996 = vmatmul.bf16.gmra.mxu3 %v5682_v36  ;;  %v5409_v52 = vpop.f32.mrf.mxu0  ;;  %6038 = vmatpush.bf16.msra.mxu1 %v9111_v35 }
 0x912   :  { %v5410_v3 = vadd.f32 %v5409_v52, %v5381_v58 }
 0x914   :  { %v5436_v49 = vpop.f32.mrf.mxu1  ;;  %v5462_v4 = vpop.f32.mrf.mxu2 }
 0x915   :  { %v5437_v2 = vadd.f32 %v5436_v49, %v5408_v44  ;;  %6039 = vmatpush.bf16.msra.mxu1 %v9110_v37 }
 0x917   :  { %5667 = vmatmul.bf16.gmra.mxu1 %v11665_v25  ;;  %v11886_v25 = vperm.slane %v11718_v23, 2  ;;  %v5595_v44 = vpop.f32.mrf.mxu3 }
 0x919   :  { %v5508_v53 = vpop.f32.mrf.mxu0  ;;  %v5451_v54 = vadd.f32 %v5450_v47, %v11886_v25  ;;  %v5453_v51 = vadd.f32 %v5452_v16, %v11886_v25  ;;  %6040 = vmatpush.bf16.msra.mxu1 %v9109_v42  ;;  %v5458_v29 = vadd.f32 %v5457_v14, %v11886_v25  ;;  %v5461_v36 = vadd.f32 %v5460_v18, %v11886_v25 }
 0x91a   :  { %v5463_v39 = vadd.f32 %v5462_v4, %v11886_v25 }
 0x91b   :  { %v5480_v48 = vadd.f32 %v5479_v46, %v5451_v54  ;;  %v5482_v12 = vadd.f32 %v5481_v0, %v5453_v51  ;;  %v5456_v46 = vadd.f32 %v5455_v43, %v11886_v25  ;;  %v5487_v59 = vadd.f32 %v5486_v15, %v5458_v29 }
 0x91c   :  { %v5438_v10 = vpop.f32.mrf.mxu1  ;;  %v5465_v41 = vpop.f32.mrf.mxu2  ;;  %v5490_v43 = vadd.f32 %v5489_v60, %v5461_v36  ;;  %v5492_v52 = vadd.f32 %v5491_v63, %v5463_v39 }
 0x91d   :  { %v5439_v34 = vadd.f32 %v5438_v10, %v5410_v3  ;;  %v5509_v7 = vadd.f32 %v5508_v53, %v5480_v48  ;;  %6041 = vmatpush.bf16.msra.mxu1 %v9108_v27  ;;  %v5485_v24 = vadd.f32 %v5484_v62, %v5456_v46  ;;  %v5466_v10 = vadd.f32 %v5465_v41, %v11886_v25 }
 0x91f   :  { %v5686_v32 = vpack.c.bf16 %v5439_v34, %v5437_v2  ;;  %v5495_v15 = vadd.f32 %v5494_v19, %v5466_v10  ;;  %v5597_v35 = vpop.f32.mrf.mxu3 }
 0x921   :  { %6001 = vmatmul.bf16.gmra.mxu3 %v5686_v32  ;;  %v5510_v17 = vpop.f32.mrf.mxu0  ;;  %6042 = vmatpush.bf16.msra.mxu1 %v9107_v45 }
 0x922   :  { %v5511_v56 = vadd.f32 %v5510_v17, %v5482_v12 }
 0x924   :  { %v5537_v50 = vpop.f32.mrf.mxu1  ;;  %v5467_v31 = vpop.f32.mrf.mxu2 }
 0x925   :  { %v5538_v30 = vadd.f32 %v5537_v50, %v5509_v7  ;;  %6043 = vmatpush.bf16.msra.mxu1 %v9106_v38  ;;  %v5468_v2 = vadd.f32 %v5467_v31, %v11886_v25 }
 0x927   :  { %v5497_v32 = vadd.f32 %v5496_v21, %v5468_v2  ;;  %v5600_v7 = vpop.f32.mrf.mxu3 }
 0x929   :  { %v5513_v33 = vpop.f32.mrf.mxu0 }
 0x92a   :  { %v5514_v61 = vadd.f32 %v5513_v33, %v5485_v24  ;;  %v4564_v33 = vperm.slane %v11718_v23, 3 }
 0x92c   :  { %v5539_v6 = vpop.f32.mrf.mxu1  ;;  %v5566_v58 = vpop.f32.mrf.mxu2 }
 0x92d   :  { %v5540_v1 = vadd.f32 %v5539_v6, %v5511_v56  ;;  %v5567_v6 = vadd.f32 %v5566_v58, %v4564_v33 }
 0x92f   :  { %v5675_v57 = vpack.c.bf16 %v5540_v1, %v5538_v30  ;;  %v5596_v30 = vadd.f32 %v5595_v44, %v5567_v6  ;;  %v5602_v46 = vpop.f32.mrf.mxu3  ;;  %v9118_v6 = vld [vmem:[%s12048_s14 + $0x20] sm:$0xff] }
 0x931   :  { %6015 = vmatmul.bf16.vlgmr.msrb.gmra.mxu0 %v5675_v57  ;;  %v5515_v55 = vpop.f32.mrf.mxu0 }
 0x932   :  { %v5516_v16 = vadd.f32 %v5515_v55, %v5487_v59 }
 0x934   :  { %v5542_v47 = vpop.f32.mrf.mxu1  ;;  %v5568_v34 = vpop.f32.mrf.mxu2 }
 0x935   :  { %v5543_v5 = vadd.f32 %v5542_v47, %v5514_v61  ;;  %v5569_v25 = vadd.f32 %v5568_v34, %v4564_v33 }
 0x937   :  { %v5598_v1 = vadd.f32 %v5597_v35, %v5569_v25  ;;  %v5605_v61 = vpop.f32.mrf.mxu3  ;;  %v9127_v25 = vld [vmem:[%s12048_s14 + $0x68] sm:$0xff] }
 0x939   :  { %v5518_v9 = vpop.f32.mrf.mxu0 }
 0x93a   :  { %v5519_v49 = vadd.f32 %v5518_v9, %v5490_v43 }
 0x93c   :  { %v5544_v8 = vpop.f32.mrf.mxu1  ;;  %v5571_v48 = vpop.f32.mrf.mxu2 }
 0x93d   :  { %v5545_v0 = vadd.f32 %v5544_v8, %v5516_v16  ;;  %v5572_v23 = vadd.f32 %v5571_v48, %v4564_v33  ;;  %v9129_v48 = vld [vmem:[%s12048_s14 + $0x78] sm:$0xff] }
 0x93e   :  { %6148 = vmatpush.bf16.msra.mxu2 %v9129_v48 }
 0x93f   :  { %v5679_v22 = vpack.c.bf16 %v5545_v0, %v5543_v5  ;;  %v5601_v16 = vadd.f32 %v5600_v7, %v5572_v23  ;;  %v5607_v38 = vpop.f32.mrf.mxu3  ;;  %v9128_v7 = vld [vmem:[%s12048_s14 + $0x70] sm:$0xff] }
 0x941   :  { %6020 = vmatmul.bf16.gmra.mxu0 %v5679_v22  ;;  %v5520_v13 = vpop.f32.mrf.mxu0 }
 0x942   :  { %v5521_v26 = vadd.f32 %v5520_v13, %v5492_v52  ;;  %6149 = vmatpush.bf16.msra.mxu2 %v9128_v7 }
 0x944   :  { %v5547_v28 = vpop.f32.mrf.mxu1  ;;  %v5573_v63 = vpop.f32.mrf.mxu2 }
 0x945   :  { %v5548_v20 = vadd.f32 %v5547_v28, %v5519_v49  ;;  %v5574_v9 = vadd.f32 %v5573_v63, %v4564_v33  ;;  %v9114_v63 = vld [vmem:[%s12048_s14] sm:$0xff] }
 0x946   :  { %6150 = vmatpush.bf16.msra.mxu2 %v9127_v25 }
 0x947   :  { %v5603_v19 = vadd.f32 %v5602_v46, %v5574_v9 }
 0x949   :  { %v5523_v62 = vpop.f32.mrf.mxu0 }
 0x94a   :  { %v5524_v50 = vadd.f32 %v5523_v62, %v5495_v15 }
 0x94c   :  { %v5549_v40 = vpop.f32.mrf.mxu1  ;;  %v5576_v41 = vpop.f32.mrf.mxu2 }
 0x94d   :  { %v5550_v11 = vadd.f32 %v5549_v40, %v5521_v26  ;;  %v5577_v39 = vadd.f32 %v5576_v41, %v4564_v33  ;;  %v9123_v41 = vld [vmem:[%s12048_s14 + $0x48] sm:$0xff] }
 0x94f   :  { %v5683_v53 = vpack.c.bf16 %v5550_v11, %v5548_v20  ;;  %v5606_v52 = vadd.f32 %v5605_v61, %v5577_v39  ;;  %v5610_v20 = vpop.f32.mrf.mxu3  ;;  %v9134_v61 = vld [vmem:[%s12048_s14 + $0xa0] sm:$0xff]  ;;  %v9131_v39 = vld [vmem:[%s12048_s14 + $0x88] sm:$0xff] }
 0x951   :  { %6025 = vmatmul.bf16.gmra.mxu0 %v5683_v53  ;;  %v5525_v3 = vpop.f32.mrf.mxu0 }
 0x952   :  { %v5526_v37 = vadd.f32 %v5525_v3, %v5497_v32 }
 0x954   :  { %v5552_v14 = vpop.f32.mrf.mxu1  ;;  %v5578_v28 = vpop.f32.mrf.mxu2 }
 0x955   :  { %v5553_v54 = vadd.f32 %v5552_v14, %v5524_v50  ;;  %v5579_v43 = vadd.f32 %v5578_v28, %v4564_v33 }
 0x957   :  { %v5608_v62 = vadd.f32 %v5607_v38, %v5579_v43  ;;  %v5612_v2 = vpop.f32.mrf.mxu3  ;;  %v9143_v43 = vld [vmem:[%s12048_s14 + $0xe8] sm:$0xff] }
 0x959   :  { %v5624_v17 = vpop.f32.mrf.mxu0 }
 0x95a   :  { %v5625_v4 = vadd.f32 %v5624_v17, %v5596_v30  ;;  %v9117_v30 = vld [vmem:[%s12048_s14 + $0x18] sm:$0xff] }
 0x95c   :  { %v5554_v18 = vpop.f32.mrf.mxu1  ;;  %v5581_v49 = vpop.f32.mrf.mxu2 }
 0x95d   :  { %v5555_v51 = vadd.f32 %v5554_v18, %v5526_v37  ;;  %v5582_v34 = vadd.f32 %v5581_v49, %v4564_v33 }
 0x95f   :  { %v5687_v60 = vpack.c.bf16 %v5555_v51, %v5553_v54  ;;  %v5611_v35 = vadd.f32 %v5610_v20, %v5582_v34 }
 0x961   :  { %6030 = vmatmul.bf16.gmra.mxu0 %v5687_v60  ;;  %v5626_v12 = vpop.f32.mrf.mxu0 }
 0x962   :  { %v5627_v42 = vadd.f32 %v5626_v12, %v5598_v1  ;;  %v9121_v12 = vld [vmem:[%s12048_s14 + $0x38] sm:$0xff] }
 0x963   :  { %6210 = vmatpush.bf16.msrb.mxu3 %v9121_v12  ;;  %v9137_v1 = vld [vmem:[%s12048_s14 + $0xb8] sm:$0xff] }
 0x964   :  { %v5653_v56 = vpop.f32.mrf.mxu1  ;;  %v5583_v14 = vpop.f32.mrf.mxu2  ;;  %6290 = vmatpush.bf16.msra.mxu0 %v9137_v1 }
 0x965   :  { %v5654_v47 = vadd.f32 %v5653_v56, %v5625_v4  ;;  %v5584_v15 = vadd.f32 %v5583_v14, %v4564_v33  ;;  %v9120_v33 = vld [vmem:[%s12048_s14 + $0x30] sm:$0xff]  ;;  %v9119_v56 = vld [vmem:[%s12048_s14 + $0x28] sm:$0xff]  ;;  %v9126_v4 = vld [vmem:[%s12048_s14 + $0x60] sm:$0xff] }
 0x966   :  { %6151 = vmatpush.bf16.msra.mxu2 %v9126_v4 }
 0x967   :  { %v5613_v17 = vadd.f32 %v5612_v2, %v5584_v15  ;;  %6211 = vmatpush.bf16.msrb.mxu3 %v9120_v33  ;;  %v9141_v2 = vld [vmem:[%s12048_s14 + $0xd8] sm:$0xff]  ;;  %v9140_v15 = vld [vmem:[%s12048_s14 + $0xd0] sm:$0xff] }
 0x969   :  { %v5629_v57 = vpop.f32.mrf.mxu0 }
 0x96a   :  { %v5630_v5 = vadd.f32 %v5629_v57, %v5601_v16  ;;  %v9116_v57 = vld [vmem:[%s12048_s14 + $0x10] sm:$0xff]  ;;  %v9122_v16 = vld [vmem:[%s12048_s14 + $0x40] sm:$0xff] }
 0x96b   :  { %6212 = vmatpush.bf16.msrb.mxu3 %v9119_v56  ;;  %v9138_v56 = vld [vmem:[%s12048_s14 + $0xc0] sm:$0xff] }
 0x96c   :  { %v5655_v55 = vpop.f32.mrf.mxu1 }
 0x96d   :  { %v5656_v27 = vadd.f32 %v5655_v55, %v5627_v42  ;;  %v9115_v42 = vld [vmem:[%s12048_s14 + $0x8] sm:$0xff]  ;;  %v9136_v55 = vld [vmem:[%s12048_s14 + $0xb0] sm:$0xff] }
 0x96e   :  { %6291 = vmatpush.bf16.msra.mxu0 %v9136_v55 }
 0x96f   :  { %v5676_v29 = vpack.c.bf16 %v5656_v27, %v5654_v47  ;;  %6213 = vmatpush.bf16.msrb.mxu3 %v9118_v6  ;;  %v9125_v47 = vld [vmem:[%s12048_s14 + $0x58] sm:$0xff] }
 0x970   :  { %6152 = vmatpush.bf16.msra.mxu2 %v9125_v47 }
 0x971   :  { %6044 = vmatmul.bf16.vlgmr.msra.gmra.mxu1 %v5676_v29  ;;  %v5631_v24 = vpop.f32.mrf.mxu0  ;;  %v5958_v29 = vpop.f32.mrf.mxu2 }
 0x972   :  { %v5632_v0 = vadd.f32 %v5631_v24, %v5603_v19  ;;  %v9135_v24 = vld [vmem:[%s12048_s14 + $0xa8] sm:$0xff] }
 0x973   :  { %6214 = vmatpush.bf16.msrb.mxu3 %v9117_v30  ;;  %6292 = vmatpush.bf16.msra.mxu0 %v9135_v24 }
 0x974   :  { %v5658_v59 = vpop.f32.mrf.mxu1  ;;  %v5987_v27 = vpop.f32.mrf.mxu3 }
 0x975   :  { %v5659_v45 = vadd.f32 %v5658_v59, %v5630_v5  ;;  %v9124_v59 = vld [vmem:[%s12048_s14 + $0x50] sm:$0xff]  ;;  %v9145_v5 = vld [vmem:[%s12048_s14 + $0xf8] sm:$0xff] }
 0x976   :  { %6153 = vmatpush.bf16.msra.mxu2 %v9124_v59 }
 0x977   :  { %6215 = vmatpush.bf16.msrb.mxu3 %v9116_v57  ;;  %6293 = vmatpush.bf16.msra.mxu0 %v9134_v61 }
 0x979   :  { %v5634_v8 = vpop.f32.mrf.mxu0  ;;  %v5960_v19 = vpop.f32.mrf.mxu2 }
 0x97a   :  { %v5635_v26 = vadd.f32 %v5634_v8, %v5606_v52  ;;  %6154 = vmatpush.bf16.msra.mxu2 %v9123_v41  ;;  %v9133_v8 = vld [vmem:[%s12048_s14 + $0x98] sm:$0xff] }
 0x97b   :  { %6216 = vmatpush.bf16.msrb.mxu3 %v9115_v42  ;;  %6294 = vmatpush.bf16.msra.mxu0 %v9133_v8 }
 0x97c   :  { %v5660_v22 = vpop.f32.mrf.mxu1  ;;  %v5989_v23 = vpop.f32.mrf.mxu3 }
 0x97d   :  { %v5661_v13 = vadd.f32 %v5660_v22, %v5632_v0  ;;  %v11981_v0 = vld [vmem:[%s12047_s13] ss:$0 sm:$0xff] }
 0x97e   :  { %6155 = vmatpush.bf16.msra.mxu2 %v9122_v16 }
 0x97f   :  { %v5680_v31 = vpack.c.bf16 %v5661_v13, %v5659_v45  ;;  %6217 = vmatpush.bf16.msrb.mxu3 %v9114_v63  ;;  %v9132_v13 = vld [vmem:[%s12048_s14 + $0x90] sm:$0xff] }
 0x980   :  { %6295 = vmatpush.bf16.msra.mxu0 %v9132_v13 }
 0x981   :  { %6049 = vmatmul.bf16.gmra.mxu1 %v5680_v31  ;;  %v5636_v21 = vpop.f32.mrf.mxu0  ;;  %v9144_v31 = vld [vmem:[%s12048_s14 + $0xf0] sm:$0xff]  ;;  %v5963_v28 = vpop.f32.mrf.mxu2 }
 0x982   :  { %v5637_v40 = vadd.f32 %v5636_v21, %v5608_v62  ;;  %6372 = vmatpush.bf16.msrb.mxu2 %v9145_v5  ;;  %v5959_v21 = vadd.f32 %v11981_v0, %v5958_v29 }
 0x984   :  { %v5663_v36 = vpop.f32.mrf.mxu1  ;;  %v5992_v22 = vpop.f32.mrf.mxu3  ;;  %v5988_v52 = vadd.f32 %v5987_v27, %v5959_v21  ;;  %6296 = vmatpush.bf16.msra.mxu0 %v9131_v39 }
 0x985   :  { %v5664_v58 = vadd.f32 %v5663_v36, %v5635_v26  ;;  %v5961_v36 = vadd.f32 %v11981_v0, %v5960_v19 }
 0x986   :  { %6373 = vmatpush.bf16.msrb.mxu2 %v9144_v31 }
 0x987   :  { %v5990_v62 = vadd.f32 %v5989_v23, %v5961_v36 }
 0x989   :  { %v5639_v44 = vpop.f32.mrf.mxu0  ;;  %v5965_v14 = vpop.f32.mrf.mxu2 }
 0x98a   :  { %v5640_v50 = vadd.f32 %v5639_v44, %v5611_v35  ;;  %6374 = vmatpush.bf16.msrb.mxu2 %v9143_v43  ;;  %v5966_v35 = vadd.f32 %v11981_v0, %v5965_v14  ;;  %v12193_v14 = vld [vmem:[#allocation10_spill] sm:$0xff] }
 0x98c   :  { %v5665_v11 = vpop.f32.mrf.mxu1  ;;  %v5994_v44 = vpop.f32.mrf.mxu3 }
 0x98d   :  { %v5666_v53 = vadd.f32 %v5665_v11, %v5637_v40 }
 0x98f   :  { %v5684_v3 = vpack.c.bf16 %v5666_v53, %v5664_v58  ;;  %v9130_v58 = vld [vmem:[%s12048_s14 + $0x80] sm:$0xff] }
 0x990   :  { %v9142_v53 = vld [vmem:[%s12048_s14 + $0xe0] sm:$0xff]  ;;  %6297 = vmatpush.bf16.msra.mxu0 %v9130_v58 }
 0x991   :  { %6054 = vmatmul.bf16.gmra.mxu1 %v5684_v3  ;;  %v5641_v32 = vpop.f32.mrf.mxu0  ;;  %6375 = vmatpush.bf16.msrb.mxu2 %v9142_v53 }
 0x992   :  { %v5642_v37 = vadd.f32 %v5641_v32, %v5613_v17  ;;  %v5964_v32 = vadd.f32 %v11981_v0, %v5963_v28  ;;  %v9139_v17 = vld [vmem:[%s12048_s14 + $0xc8] sm:$0xff] }
 0x994   :  { %v5668_v10 = vpop.f32.mrf.mxu1 }
 0x995   :  { %v5669_v54 = vadd.f32 %v5668_v10, %v5640_v50  ;;  %6376 = vmatpush.bf16.msrb.mxu2 %v9141_v2  ;;  %v5968_v50 = vpop.f32.mrf.mxu2 }
 0x996   :  { %v5969_v4 = vadd.f32 %v11981_v0, %v5968_v50  ;;  %v12195_v50 = vld [vmem:[#allocation11_spill] sm:$0xff] }
 0x999   :  { %6377 = vmatpush.bf16.msrb.mxu2 %v9140_v15 }
 0x99c   :  { %v5670_v18 = vpop.f32.mrf.mxu1 }
 0x99d   :  { %v5671_v51 = vadd.f32 %v5670_v18, %v5642_v37  ;;  %v5997_v37 = vpop.f32.mrf.mxu3  ;;  %v5993_v18 = vadd.f32 %v5992_v22, %v5964_v32  ;;  %6378 = vmatpush.bf16.msrb.mxu2 %v9139_v17  ;;  %v5970_v25 = vpop.f32.mrf.mxu2 }
 0x99e   :  { %v5971_v42 = vadd.f32 %v11981_v0, %v5970_v25  ;;  %v5998_v63 = vadd.f32 %v5997_v37, %v5969_v4 }
 0x99f   :  { %v5688_v60 = vpack.c.bf16 %v5671_v51, %v5669_v54  ;;  %v5995_v54 = vadd.f32 %v5994_v44, %v5966_v35 }
 0x9a1   :  { %6059 = vmatmul.bf16.gmra.mxu1 %v5688_v60  ;;  %6379 = vmatpush.bf16.msrb.mxu2 %v9138_v56 }
 0x9a5   :  { %v5999_v30 = vpop.f32.mrf.mxu3  ;;  %v5973_v47 = vpop.f32.mrf.mxu2 }
 0x9a6   :  { %v6000_v55 = vadd.f32 %v5999_v30, %v5971_v42  ;;  %v5974_v8 = vadd.f32 %v11981_v0, %v5973_v47 }
 0x9ad   :  { %v6002_v29 = vpop.f32.mrf.mxu3  ;;  %v5975_v61 = vpop.f32.mrf.mxu2 }
 0x9ae   :  { %v6016_v46 = vpop.f32.mrf.mxu0  ;;  %v5976_v5 = vadd.f32 %v11981_v0, %v5975_v61  ;;  %v9160_v0 = vld [vmem:[%s12049_s15] ss:$0 sm:$0xff] }
 0x9af   :  { %v6017_v49 = vadd.f32 %v6016_v46, %v5988_v52 }
 0x9b5   :  { %v6004_v19 = vpop.f32.mrf.mxu3 }
 0x9b6   :  { %v6018_v9 = vpop.f32.mrf.mxu0  ;;  %v6005_v13 = vadd.f32 %v6004_v19, %v5976_v5 }
 0x9b7   :  { %v6019_v26 = vadd.f32 %v6018_v9, %v5990_v62 }
 0x9be   :  { %v6021_v38 = vpop.f32.mrf.mxu0 }
 0x9bf   :  { %v6022_v60 = vadd.f32 %v6021_v38, %v5993_v18  ;;  %v12196_v18 = vld [vmem:[#allocation9_spill] sm:$0xff] }
 0x9c6   :  { %v6023_v10 = vpop.f32.mrf.mxu0 }
 0x9c7   :  { %v6024_v48 = vadd.f32 %v6023_v10, %v5995_v54 }
 0x9ce   :  { %v6026_v51 = vpop.f32.mrf.mxu0 }
 0x9cf   :  { %v6027_v27 = vadd.f32 %v6026_v51, %v5998_v63 }
 0x9d6   :  { %v6028_v1 = vpop.f32.mrf.mxu0 }
 0x9d7   :  { %v6029_v46 = vadd.f32 %v6028_v1, %v6000_v55 }
 0x9de   :  { %v6031_v23 = vpop.f32.mrf.mxu0 }
 0x9e6   :  { %v6033_v22 = vpop.f32.mrf.mxu0 }
 0x9e7   :  { %v6034_v28 = vadd.f32 %v6033_v22, %v6005_v13 }
 0x9ee   :  { %v6045_v45 = vpop.f32.mrf.mxu1 }
 0x9ef   :  { %v6046_v20 = vadd.f32 %v6045_v45, %v6017_v49  ;;  %v6003_v45 = vadd.f32 %v6002_v29, %v5974_v8 }
 0x9f1   :  { %v6032_v31 = vadd.f32 %v6031_v23, %v6003_v45 }
 0x9f6   :  { %v6047_v40 = vpop.f32.mrf.mxu1 }
 0x9f7   :  { %v6048_v11 = vadd.f32 %v6047_v40, %v6019_v26 }
 0x9f9   :  { %v6065_v3 = vpack.c.bf16 %v6048_v11, %v6046_v20 }
 0x9fb   :  { %6218 = vmatmul.bf16.vlgmr.msrb.gmra.mxu3 %v6065_v3 }
 0x9fe   :  { %v6050_v34 = vpop.f32.mrf.mxu1 }
 0x9ff   :  { %v6051_v33 = vadd.f32 %v6050_v34, %v6022_v60  ;;  %v12194_v34 = vld [vmem:[#allocation8_spill] sm:$0xff] }
 0xa06   :  { %v6052_v12 = vpop.f32.mrf.mxu1 }
 0xa07   :  { %v6053_v7 = vadd.f32 %v6052_v12, %v6024_v48 }
 0xa09   :  { %v6082_v6 = vpack.c.bf16 %v6053_v7, %v6051_v33 }
 0xa0b   :  { %6156 = vmatmul.bf16.vlgmr.msra.gmra.mxu2 %v6082_v6 }
 0xa0e   :  { %v6055_v57 = vpop.f32.mrf.mxu1 }
 0xa0f   :  { %v6056_v59 = vadd.f32 %v6055_v57, %v6027_v27 }
 0xa16   :  { %v6057_v24 = vpop.f32.mrf.mxu1 }
 0xa17   :  { %v6058_v41 = vadd.f32 %v6057_v24, %v6029_v46 }
 0xa19   :  { %v6224_v9 = vpack.c.bf16 %v6058_v41, %v6056_v59 }
 0xa1b   :  { %6298 = vmatmul.bf16.vlgmr.msra.gmra.mxu0 %v6224_v9 }
 0xa1e   :  { %v6060_v16 = vpop.f32.mrf.mxu1 }
 0xa1f   :  { %v6061_v21 = vadd.f32 %v6060_v16, %v6032_v31 }
 0xa26   :  { %v6062_v38 = vpop.f32.mrf.mxu1 }
 0xa27   :  { %v6063_v36 = vadd.f32 %v6062_v38, %v6034_v28 }
 0xa29   :  { %v6306_v39 = vpack.c.bf16 %v6063_v36, %v6061_v21 }
 0xa2b   :  { %6380 = vmatmul.bf16.vlgmr.msrb.gmra.mxu2 %v6306_v39 }
 0xa7e   :  { %v6219_v62 = vpop.f32.mrf.mxu3 }
 0xa86   :  { %v6221_v53 = vpop.f32.mrf.mxu3 }
 0xa8e   :  { %v6157_v43 = vpop.f32.mrf.mxu2 }
 0xa8f   :  { %v6220_v26 = vadd.f32 %v6219_v62, %v6157_v43 }
 0xa96   :  { %v6159_v52 = vpop.f32.mrf.mxu2 }
 0xa97   :  { %v6222_v3 = vadd.f32 %v6221_v53, %v6159_v52 }
 0xa98   :  { %v6299_v49 = vpop.f32.mrf.mxu0 }
 0xa99   :  { %v6304_v40 = vadd.f32 %v6299_v49, %v6220_v26 }
 0xaa0   :  { %v6301_v44 = vpop.f32.mrf.mxu0 }
 0xaa1   :  { %v6305_v2 = vadd.f32 %v6301_v44, %v6222_v3 }
 0xaae   :  { %v6381_v20 = vpop.f32.mrf.mxu2 }
 0xaaf   :  { %v6386_v11 = vadd.f32 %v6381_v20, %v6304_v40 }
 0xab1   :  { %v6392_v58 = vadd.f32 %v9160_v0, %v6386_v11 }
 0xab3   :  { %v6394_v10 = vmul.f32 %v6392_v58, %v12193_v14 }
 0xab5   :  { %v6396_v15 = vadd.f32 %v6394_v10, %v12194_v34 }
 0xab6   :  { %v6383_v32 = vpop.f32.mrf.mxu2 }
 0xab7   :  { %6399 = vst.msk [vmem:[%s12050_s16] sm:$0xff] %vm6398_vm0, %v6396_v15  ;;  %v6387_v35 = vadd.f32 %v6383_v32, %v6305_v2 }
 0xab9   :  { %v6393_v17 = vadd.f32 %v9160_v0, %v6387_v35 }
 0xabb   :  { %v6395_v37 = vmul.f32 %v6393_v17, %v12195_v50 }
 0xabd   :  { %v6397_v54 = vadd.f32 %v6395_v37, %v12196_v18 }
 0xabf   :  { %6400 = vst.msk [vmem:[%s12050_s16 + $0x8] sm:$0xff] %vm6398_vm0, %v6397_v54 }
 0xac0   :  { %6405 = vsyncpa [#allocation3], 1 }
 0xac1   :  { %6406 = vsyncpa [#allocation5], 1 }

</bundles_post_ra>
